<compile_context>
chip_gen: v7x
topology: tpu7x:2x2x1
jax: 0.10.0
libtpu: 0.0.40
codegen_flags: <defaults>
</compile_context>

<pallas_src>
import functools

import jax
import jax.numpy as jnp
from jax import lax
from jax.experimental import pallas as pl
from jax.experimental.pallas import tpu as pltpu

EPS = 1e-5
LANE = 128


def _round_up(x, m):
  return (x + m - 1) // m * m


def _vmem_limit_bytes():
  """Generation-aware scoped-VMEM limit (~half of physical, capped)."""
  try:
    cap = pltpu.get_tpu_info().vmem_capacity_bytes
    return int(min(100 * 2**20, max(32 * 2**20, cap // 2)))
  except Exception:
    return 32 * 2**20            # safe on v5e / v6e / v7x


def _pick_nb(n_images, band_rows):
  """Images per conv grid step: batch small-spatial layers until the matmul
  M-dim is >= ~256 rows (must divide the batch)."""
  nb = 1
  for cand in range(1, n_images + 1):
    if n_images % cand:
      continue
    nb = cand
    if cand * band_rows >= 256:
      break
  return nb


# --------------------------- in-kernel helpers ------------------------------ #
def _valid_mask(L, W, WW):
  """(L, 1) bool: band row m maps to image column (m+1) % WW; columns 0 and
  W+1 are the halo ("junk") columns of the band."""
  col = (lax.broadcasted_iota(jnp.int32, (L, 1), 0) + 1) % WW
  return jnp.logical_and(col >= 1, col <= W)


def _conv_band(load, w_ref, *, L, WW, base):
  """3x3 conv over a band of L = H*(W+2) flattened rows.

  Every tap operand `load(off)` is a CONTIGUOUS row slab of the flattened
  halo-padded image at static offset base + (kh-1)*WW + (kw-1); no per-tap
  slice+reshape relayout.  f32 accumulation on the MXU.
  (Further option: stack the 3 kh slabs along K for 256-deep MXUs.)
  """
  Pp = w_ref.shape[-1]
  acc = jnp.zeros((L, Pp), jnp.float32)
  for kh in range(3):
    for kw in range(3):
      off = base + (kh - 1) * WW + (kw - 1)
      acc = acc + jnp.dot(load(off), w_ref[kh * 3 + kw],
                          preferred_element_type=jnp.float32)
  return acc


# ---------------- Kernel 1: conv1 + BN1 partial statistics ------------------ #
def _conv_stats_kernel(xp_ref, w_ref, y_ref, sum_ref, sq_ref, *, H, W, nb):
  """Per grid step: 3x3 conv of `nb` images + per-step BN partial sums.

  xp_ref : (nb, MM, Cp) bf16  flat halo-padded images, MM = (H+3)*(W+2)
  w_ref  : (9, Cp, Pp)  bf16  weights, index kh*3+kw
  y_ref  : (nb, L, Pp)  bf16  conv band output, L = H*(W+2) (junk halo cols)
  sum_ref, sq_ref : (1, 8, Pp) f32  per-step partial sum / sum-of-squares
  """
  WW = W + 2
  L = H * WW
  base = WW + 1                       # flat row of output pixel (0, 0)
  Pp = w_ref.shape[-1]
  valid = _valid_mask(L, W, WW)
  s = jnp.zeros((1, Pp), jnp.float32)
  q = jnp.zeros((1, Pp), jnp.float32)
  for b in range(nb):
    acc = _conv_band(lambda off: xp_ref[b, pl.ds(off, L), :], w_ref,
                     L=L, WW=WW, base=base)
    y_ref[b] = acc.astype(y_ref.dtype)
    am = jnp.where(valid, acc, 0.0)
    s = s + jnp.sum(am, axis=0, keepdims=True)
    q = q + jnp.sum(am * am, axis=0, keepdims=True)
  sum_ref[0] = jnp.broadcast_to(s, (8, Pp))
  sq_ref[0] = jnp.broadcast_to(q, (8, Pp))


# ------- Kernel 2: fused BN1-apply + ReLU + pad + conv2 + BN2 stats --------- #
def _bn_relu_conv_stats_kernel(y1_ref, sc_ref, sh_ref, w_ref,
                               y2_ref, sum_ref, sq_ref, hp_ref,
                               *, H, W, nb, pad_top):
  """y1_ref : (nb, L, Pp) bf16 ; sc/sh : (1, Pp) f32 ; w_ref : (9, Pp, Pp) bf16
  y2_ref : (nb, L, Pp) bf16 ; sum/sq : (1, 8, Pp) f32
  hp_ref : (MM2, Pp) bf16 VMEM scratch (zero-padded image of h; band stored at
           the 16-row-aligned offset pad_top + W + 3)."""
  WW = W + 2
  L = H * WW
  base = pad_top + WW + 1
  MM2 = hp_ref.shape[0]
  Pp = w_ref.shape[-1]
  valid = _valid_mask(L, W, WW)
  # Zero the halo strips every step (cheap; safe under a parallel grid).
  hp_ref[pl.ds(0, base), :] = jnp.zeros((base, Pp), hp_ref.dtype)
  hp_ref[pl.ds(base + L, MM2 - base - L), :] = jnp.zeros(
      (MM2 - base - L, Pp), hp_ref.dtype)
  s = jnp.zeros((1, Pp), jnp.float32)
  q = jnp.zeros((1, Pp), jnp.float32)
  for b in range(nb):
    h = jnp.maximum(
        y1_ref[b].astype(jnp.float32) * sc_ref[...] + sh_ref[...], 0.0)
    h = jnp.where(valid, h, 0.0)        # halo columns must stay zero
    hp_ref[pl.ds(base, L), :] = h.astype(hp_ref.dtype)
    acc = _conv_band(lambda off: hp_ref[pl.ds(off, L), :], w_ref,
                     L=L, WW=WW, base=base)
    y2_ref[b] = acc.astype(y2_ref.dtype)
    am = jnp.where(valid, acc, 0.0)
    s = s + jnp.sum(am, axis=0, keepdims=True)
    q = q + jnp.sum(am * am, axis=0, keepdims=True)
  sum_ref[0] = jnp.broadcast_to(s, (8, Pp))
  sq_ref[0] = jnp.broadcast_to(q, (8, Pp))


# -------------- Kernel 3: BN2-apply + residual + ReLU (band) ---------------- #
def _bn_res_relu_kernel(y2_ref, sc_ref, sh_ref, xp_ref, out_ref, *, H, W, nb):
  WW = W + 2
  L = H * WW
  base = WW + 1
  for b in range(nb):
    res = xp_ref[b, pl.ds(base, L), :].astype(jnp.float32)
    o = y2_ref[b].astype(jnp.float32) * sc_ref[...] + sh_ref[...] + res
    out_ref[b] = jnp.maximum(o, 0.0)


# ----------------------------- pallas_call glue ----------------------------- #
def _conv1_stats(xp, w, *, H, W, nb, vmem):
  N, MM, Cp = xp.shape
  Pp = w.shape[-1]
  L = H * (W + 2)
  G = N // nb
  return pl.pallas_call(
      functools.partial(_conv_stats_kernel, H=H, W=W, nb=nb),
      grid=(G,),
      in_specs=[
          pl.BlockSpec((nb, MM, Cp), lambda n: (n, 0, 0)),
          pl.BlockSpec((9, Cp, Pp), lambda n: (0, 0, 0)),
      ],
      out_specs=(
          pl.BlockSpec((nb, L, Pp), lambda n: (n, 0, 0)),
          pl.BlockSpec((1, 8, Pp), lambda n: (n, 0, 0)),
          pl.BlockSpec((1, 8, Pp), lambda n: (n, 0, 0)),
      ),
      out_shape=(
          jax.ShapeDtypeStruct((N, L, Pp), jnp.bfloat16),
          jax.ShapeDtypeStruct((G, 8, Pp), jnp.float32),
          jax.ShapeDtypeStruct((G, 8, Pp), jnp.float32),
      ),
      compiler_params=pltpu.CompilerParams(
          dimension_semantics=("parallel",), vmem_limit_bytes=vmem),
  )(xp, w)


def _bn1_conv2_stats(y1, sc, sh, w, *, H, W, nb, vmem):
  N, L, Pp = y1.shape
  WW = W + 2
  pad_top = (-(WW + 1)) % 16                       # align band start in scratch
  MM2 = _round_up(pad_top + WW + 1 + L + WW + 1, 16)
  G = N // nb
  return pl.pallas_call(
      functools.partial(_bn_relu_conv_stats_kernel, H=H, W=W, nb=nb,
                        pad_top=pad_top),
      grid=(G,),
      in_specs=[
          pl.BlockSpec((nb, L, Pp), lambda n: (n, 0, 0)),
          pl.BlockSpec((1, Pp), lambda n: (0, 0)),
          pl.BlockSpec((1, Pp), lambda n: (0, 0)),
          pl.BlockSpec((9, Pp, Pp), lambda n: (0, 0, 0)),
      ],
      out_specs=(
          pl.BlockSpec((nb, L, Pp), lambda n: (n, 0, 0)),
          pl.BlockSpec((1, 8, Pp), lambda n: (n, 0, 0)),
          pl.BlockSpec((1, 8, Pp), lambda n: (n, 0, 0)),
      ),
      out_shape=(
          jax.ShapeDtypeStruct((N, L, Pp), jnp.bfloat16),
          jax.ShapeDtypeStruct((G, 8, Pp), jnp.float32),
          jax.ShapeDtypeStruct((G, 8, Pp), jnp.float32),
      ),
      scratch_shapes=[pltpu.VMEM((MM2, Pp), jnp.bfloat16)],
      compiler_params=pltpu.CompilerParams(
          dimension_semantics=("parallel",), vmem_limit_bytes=vmem),
  )(y1, sc, sh, w)


def _bn2_res_relu(y2, sc, sh, xp, *, H, W, nb, vmem):
  N, L, Pp = y2.shape
  _, MM, Cp = xp.shape
  G = N // nb
  return pl.pallas_call(
      functools.partial(_bn_res_relu_kernel, H=H, W=W, nb=nb),
      grid=(G,),
      in_specs=[
          pl.BlockSpec((nb, L, Pp), lambda n: (n, 0, 0)),
          pl.BlockSpec((1, Pp), lambda n: (0, 0)),
          pl.BlockSpec((1, Pp), lambda n: (0, 0)),
          pl.BlockSpec((nb, MM, Cp), lambda n: (n, 0, 0)),
      ],
      out_specs=pl.BlockSpec((nb, L, Pp), lambda n: (n, 0, 0)),
      out_shape=jax.ShapeDtypeStruct((N, L, Pp), jnp.float32),
      compiler_params=pltpu.CompilerParams(
          dimension_semantics=("parallel",), vmem_limit_bytes=vmem),
  )(y2, sc, sh, xp)


def _prep_weight(w, cin_p, cout_p):
  """PyTorch (O, I, kh, kw) -> (kh*3+kw, I_pad, O_pad) bf16 MXU operand."""
  wt = jnp.transpose(w, (2, 3, 1, 0)).astype(jnp.float32)
  wt = jnp.pad(wt, ((0, 0), (0, 0),
                    (0, cin_p - wt.shape[2]), (0, cout_p - wt.shape[3])))
  return wt.reshape(9, cin_p, cout_p).astype(jnp.bfloat16)


def _fold_bn(s_part, q_part, gamma, beta, count, Pp):
  """Fold per-step partial sums + (gamma, beta) into scale/shift (training BN)."""
  s = jnp.sum(s_part[:, 0, :], axis=0)
  q = jnp.sum(q_part[:, 0, :], axis=0)
  mean = s / count
  # TODO(synk): E[x^2]-E[x]^2 can cancel for very large N*H*W; switch to a
  #   shifted / Welford accumulation if tolerances tighten.
  var = jnp.maximum(q / count - mean * mean, 0.0)
  inv_std = lax.rsqrt(var + EPS)
  g = jnp.pad(gamma.astype(jnp.float32), (0, Pp - gamma.shape[0]))
  b = jnp.pad(beta.astype(jnp.float32), (0, Pp - beta.shape[0]))
  scale = g * inv_std
  shift = b - mean * scale
  return scale.reshape(1, Pp), shift.reshape(1, Pp)


@jax.jit
def basic_block_forward(x_nchw, w1, g1, b1, w2, g2, b2):
  """BasicBlock forward (stride=1, inplanes == planes). NCHW f32 in/out."""
  N, C, H, W = x_nchw.shape
  P = w1.shape[0]
  assert C == P and w1.shape[1] == C and w2.shape == (P, P, 3, 3)
  Cp = _round_up(C, LANE)
  Pp = _round_up(P, LANE)
  WW = W + 2
  L = H * WW
  count = N * H * W
  vmem = _vmem_limit_bytes()
  nb = _pick_nb(N, L)

  # NCHW -> NHWC, then ONE fused pad: halo rows (1 top, 2 bottom -- the extra
  # row keeps every tap slab in bounds), halo cols (1,1), channel pad to 128.
  # Flatten spatial row-major: flat row = h*(W+2) + w.
  x_nhwc = jnp.transpose(x_nchw, (0, 2, 3, 1)).astype(jnp.float32)
  xp = jnp.pad(x_nhwc, ((0, 0), (1, 2), (1, 1), (0, Cp - C)))
  xp = xp.reshape(N, (H + 3) * WW, Cp).astype(jnp.bfloat16)

  w1p = _prep_weight(w1, Cp, Pp)
  w2p = _prep_weight(w2, Pp, Pp)

  # conv1 + BN1 stats -> fold -> fused BN1/ReLU/pad/conv2 + BN2 stats -> fold
  y1, s1, q1 = _conv1_stats(xp, w1p, H=H, W=W, nb=nb, vmem=vmem)
  sc1, sh1 = _fold_bn(s1, q1, g1, b1, count, Pp)
  y2, s2, q2 = _bn1_conv2_stats(y1, sc1, sh1, w2p, H=H, W=W, nb=nb, vmem=vmem)
  sc2, sh2 = _fold_bn(s2, q2, g2, b2, count, Pp)
  out_band = _bn2_res_relu(y2, sc2, sh2, xp, H=H, W=W, nb=nb, vmem=vmem)

  # Band layout -> NCHW (XLA fuses the halo-column slice with the transpose).
  out = out_band.reshape(N, H, WW, Pp)[:, :, :W, :P]
  return jnp.transpose(out, (0, 3, 1, 2))


# --------------------------- pure-JAX reference ------------------------------ #
def _reference(x, w1, g1, b1, w2, g2, b2):
  """Numerics-mirrored reference: bf16 conv operands, bf16-stored conv outputs
  and residual (exactly as the kernels do); stats and all elementwise BN /
  residual / ReLU math in f32.  (A pure-f32 reference matches to ~3e-2; this
  one to ~1e-4.)"""
  def conv(x_bf, w):
    return lax.conv_general_dilated(
        x_bf, w.astype(jnp.bfloat16), (1, 1), ((1, 1), (1, 1)),
        dimension_numbers=("NCHW", "OIHW", "NCHW"),
        preferred_element_type=jnp.float32)

  def bn(y_f32, g, b):
    mean = y_f32.mean(axis=(0, 2, 3))
    var = jnp.maximum((y_f32 * y_f32).mean(axis=(0, 2, 3)) - mean * mean, 0.0)
    scale = g * lax.rsqrt(var + EPS)
    shift = b - mean * scale
    y_store = y_f32.astype(jnp.bfloat16).astype(jnp.float32)  # bf16 HBM store
    return y_store * scale.reshape(1, -1, 1, 1) + shift.reshape(1, -1, 1, 1)

  x_bf = x.astype(jnp.bfloat16)
  h = jax.nn.relu(bn(conv(x_bf, w1), g1, b1))
  out = bn(conv(h.astype(jnp.bfloat16), w2), g2, b2) + x_bf.astype(jnp.float32)
  return jax.nn.relu(out)


# --------------------------------- main -------------------------------------- #
if __name__ == "__main__":
  N, C, H, W = 2, 4, 16, 16        # inplanes == planes == 4, stride == 1
  P = C

  key = jax.random.PRNGKey(0)
  kx, kw1, kw2, kg1, kb1, kg2, kb2 = jax.random.split(key, 7)

  x = jax.random.normal(kx, (N, C, H, W), jnp.float32)
  w1 = jax.random.normal(kw1, (P, C, 3, 3), jnp.float32) * 0.1
  w2 = jax.random.normal(kw2, (P, P, 3, 3), jnp.float32) * 0.1
  g1 = 1.0 + 0.1 * jax.random.normal(kg1, (P,), jnp.float32)
  b1 = 0.1 * jax.random.normal(kb1, (P,), jnp.float32)
  g2 = 1.0 + 0.1 * jax.random.normal(kg2, (P,), jnp.float32)
  b2 = 0.1 * jax.random.normal(kb2, (P,), jnp.float32)

  out = jax.block_until_ready(basic_block_forward(x, w1, g1, b1, w2, g2, b2))
  ref = jax.block_until_ready(_reference(x, w1, g1, b1, w2, g2, b2))

  assert out.shape == (N, P, H, W), out.shape
  max_err = float(jnp.max(jnp.abs(out - ref)))
  assert max_err < 5e-3, max_err

  print("KERNEL_OK")
</pallas_src>

<mosaic_0001>
module attributes {stable_mosaic.version = 11 : i64} {
  func.func @_conv_stats_kernel(%arg0: i32, %arg1: memref<1x342x128xbf16, #tpu.memory_space<vmem>>, %arg2: memref<9x128x128xbf16, #tpu.memory_space<vmem>>, %arg3: memref<1x288x128xbf16, #tpu.memory_space<vmem>>, %arg4: memref<1x8x128xf32, #tpu.memory_space<vmem>>, %arg5: memref<1x8x128xf32, #tpu.memory_space<vmem>>) attributes {dimension_semantics = [#tpu.dimension_semantics<parallel>], iteration_bounds = array<i64: 2>, scalar_prefetch = 0 : i64, scratch_operands = 0 : i64, tpu.core_type = #tpu.core_type<tc>, window_params = [{transform_indices = @transform_0, window_bounds = array<i64: 1, 342, 128>}, {pipeline_mode = #tpu.pipeline_mode<synchronous>, transform_indices = @transform_1, window_bounds = array<i64: 9, 128, 128>}, {transform_indices = @transform_2, window_bounds = array<i64: 1, 288, 128>}, {transform_indices = @transform_3, window_bounds = array<i64: 1, 8, 128>}, {transform_indices = @transform_4, window_bounds = array<i64: 1, 8, 128>}]} {
    %0 = tpu.iota {dimensions = array<i32: 0>} : vector<288x1xi32>
    %c1_i32 = arith.constant 1 : i32
    %1 = vector.broadcast %c1_i32 : i32 to vector<288x1xi32>
    %2 = arith.addi %0, %1 : vector<288x1xi32>
    %c18_i32 = arith.constant 18 : i32
    %c0_i32 = arith.constant 0 : i32
    %3 = arith.cmpi eq, %c18_i32, %c0_i32 : i32
    %c1_i32_0 = arith.constant 1 : i32
    %4 = arith.select %3, %c1_i32_0, %c18_i32 : i32
    %5 = vector.broadcast %4 : i32 to vector<288x1xi32>
    %6 = arith.remsi %2, %5 : vector<288x1xi32>
    %c0_i32_1 = arith.constant 0 : i32
    %7 = vector.broadcast %c0_i32_1 : i32 to vector<288x1xi32>
    %8 = arith.cmpi ne, %6, %7 : vector<288x1xi32>
    %c0_i32_2 = arith.constant 0 : i32
    %9 = vector.broadcast %c0_i32_2 : i32 to vector<288x1xi32>
    %10 = arith.cmpi slt, %6, %9 : vector<288x1xi32>
    %c0_i32_3 = arith.constant 0 : i32
    %11 = arith.cmpi slt, %4, %c0_i32_3 : i32
    %12 = vector.broadcast %11 : i1 to vector<288x1xi1>
    %13 = vector.broadcast %12 : vector<288x1xi1> to vector<288x1xi1>
    %14 = arith.xori %10, %13 : vector<288x1xi1>
    %15 = arith.andi %14, %8 : vector<288x1xi1>
    %16 = vector.broadcast %4 : i32 to vector<288x1xi32>
    %17 = arith.addi %6, %16 : vector<288x1xi32>
    %18 = arith.select %15, %17, %6 : vector<288x1xi1>, vector<288x1xi32>
    %c1_i32_4 = arith.constant 1 : i32
    %19 = vector.broadcast %c1_i32_4 : i32 to vector<288x1xi32>
    %20 = arith.cmpi sge, %18, %19 : vector<288x1xi32>
    %c16_i32 = arith.constant 16 : i32
    %21 = vector.broadcast %c16_i32 : i32 to vector<288x1xi32>
    %22 = arith.cmpi sle, %18, %21 : vector<288x1xi32>
    %23 = arith.andi %20, %22 : vector<288x1xi1>
    %cst = arith.constant 0.000000e+00 : f32
    %24 = vector.broadcast %cst : f32 to vector<1x128xf32>
    %cst_5 = arith.constant 0.000000e+00 : f32
    %25 = vector.broadcast %cst_5 : f32 to vector<1x128xf32>
    %cst_6 = arith.constant 0.000000e+00 : f32
    %26 = vector.broadcast %cst_6 : f32 to vector<288x128xf32>
    %c0 = arith.constant 0 : index
    %c0_7 = arith.constant 0 : index
    %c0_8 = arith.constant 0 : index
    %27 = vector.load %arg1[%c0, %c0_7, %c0_8] : memref<1x342x128xbf16, #tpu.memory_space<vmem>>, vector<1x288x128xbf16>
    %28 = vector.shape_cast %27 : vector<1x288x128xbf16> to vector<288x128xbf16>
    %c0_9 = arith.constant 0 : index
    %c0_10 = arith.constant 0 : index
    %c0_11 = arith.constant 0 : index
    %29 = vector.load %arg2[%c0_9, %c0_10, %c0_11] : memref<9x128x128xbf16, #tpu.memory_space<vmem>>, vector<1x128x128xbf16>
    %30 = vector.shape_cast %29 : vector<1x128x128xbf16> to vector<128x128xbf16>
    %cst_12 = arith.constant dense<0.000000e+00> : vector<288x128xf32>
    %31 = tpu.matmul %28, %30, %cst_12 {dimension_numbers = #tpu.dot_dimension_numbers<[1], [0], [0], [1], [0, 0, 1, 1], [], []>} : vector<288x128xbf16>, vector<128x128xbf16>, vector<288x128xf32> -> vector<288x128xf32>
    %32 = arith.addf %26, %31 : vector<288x128xf32>
    %c0_13 = arith.constant 0 : index
    %c1 = arith.constant 1 : index
    %c0_14 = arith.constant 0 : index
    %33 = vector.load %arg1[%c0_13, %c1, %c0_14] : memref<1x342x128xbf16, #tpu.memory_space<vmem>>, vector<1x288x128xbf16>
    %34 = vector.shape_cast %33 : vector<1x288x128xbf16> to vector<288x128xbf16>
    %c1_15 = arith.constant 1 : index
    %c0_16 = arith.constant 0 : index
    %c0_17 = arith.constant 0 : index
    %35 = vector.load %arg2[%c1_15, %c0_16, %c0_17] : memref<9x128x128xbf16, #tpu.memory_space<vmem>>, vector<1x128x128xbf16>
    %36 = vector.shape_cast %35 : vector<1x128x128xbf16> to vector<128x128xbf16>
    %cst_18 = arith.constant dense<0.000000e+00> : vector<288x128xf32>
    %37 = tpu.matmul %34, %36, %cst_18 {dimension_numbers = #tpu.dot_dimension_numbers<[1], [0], [0], [1], [0, 0, 1, 1], [], []>} : vector<288x128xbf16>, vector<128x128xbf16>, vector<288x128xf32> -> vector<288x128xf32>
    %38 = arith.addf %32, %37 : vector<288x128xf32>
    %c0_19 = arith.constant 0 : index
    %c2 = arith.constant 2 : index
    %c0_20 = arith.constant 0 : index
    %39 = vector.load %arg1[%c0_19, %c2, %c0_20] : memref<1x342x128xbf16, #tpu.memory_space<vmem>>, vector<1x288x128xbf16>
    %40 = vector.shape_cast %39 : vector<1x288x128xbf16> to vector<288x128xbf16>
    %c2_21 = arith.constant 2 : index
    %c0_22 = arith.constant 0 : index
    %c0_23 = arith.constant 0 : index
    %41 = vector.load %arg2[%c2_21, %c0_22, %c0_23] : memref<9x128x128xbf16, #tpu.memory_space<vmem>>, vector<1x128x128xbf16>
    %42 = vector.shape_cast %41 : vector<1x128x128xbf16> to vector<128x128xbf16>
    %cst_24 = arith.constant dense<0.000000e+00> : vector<288x128xf32>
    %43 = tpu.matmul %40, %42, %cst_24 {dimension_numbers = #tpu.dot_dimension_numbers<[1], [0], [0], [1], [0, 0, 1, 1], [], []>} : vector<288x128xbf16>, vector<128x128xbf16>, vector<288x128xf32> -> vector<288x128xf32>
    %44 = arith.addf %38, %43 : vector<288x128xf32>
    %c0_25 = arith.constant 0 : index
    %c18 = arith.constant 18 : index
    %c0_26 = arith.constant 0 : index
    %45 = vector.load %arg1[%c0_25, %c18, %c0_26] : memref<1x342x128xbf16, #tpu.memory_space<vmem>>, vector<1x288x128xbf16>
    %46 = vector.shape_cast %45 : vector<1x288x128xbf16> to vector<288x128xbf16>
    %c3 = arith.constant 3 : index
    %c0_27 = arith.constant 0 : index
    %c0_28 = arith.constant 0 : index
    %47 = vector.load %arg2[%c3, %c0_27, %c0_28] : memref<9x128x128xbf16, #tpu.memory_space<vmem>>, vector<1x128x128xbf16>
    %48 = vector.shape_cast %47 : vector<1x128x128xbf16> to vector<128x128xbf16>
    %cst_29 = arith.constant dense<0.000000e+00> : vector<288x128xf32>
    %49 = tpu.matmul %46, %48, %cst_29 {dimension_numbers = #tpu.dot_dimension_numbers<[1], [0], [0], [1], [0, 0, 1, 1], [], []>} : vector<288x128xbf16>, vector<128x128xbf16>, vector<288x128xf32> -> vector<288x128xf32>
    %50 = arith.addf %44, %49 : vector<288x128xf32>
    %c0_30 = arith.constant 0 : index
    %c19 = arith.constant 19 : index
    %c0_31 = arith.constant 0 : index
    %51 = vector.load %arg1[%c0_30, %c19, %c0_31] : memref<1x342x128xbf16, #tpu.memory_space<vmem>>, vector<1x288x128xbf16>
    %52 = vector.shape_cast %51 : vector<1x288x128xbf16> to vector<288x128xbf16>
    %c4 = arith.constant 4 : index
    %c0_32 = arith.constant 0 : index
    %c0_33 = arith.constant 0 : index
    %53 = vector.load %arg2[%c4, %c0_32, %c0_33] : memref<9x128x128xbf16, #tpu.memory_space<vmem>>, vector<1x128x128xbf16>
    %54 = vector.shape_cast %53 : vector<1x128x128xbf16> to vector<128x128xbf16>
    %cst_34 = arith.constant dense<0.000000e+00> : vector<288x128xf32>
    %55 = tpu.matmul %52, %54, %cst_34 {dimension_numbers = #tpu.dot_dimension_numbers<[1], [0], [0], [1], [0, 0, 1, 1], [], []>} : vector<288x128xbf16>, vector<128x128xbf16>, vector<288x128xf32> -> vector<288x128xf32>
    %56 = arith.addf %50, %55 : vector<288x128xf32>
    %c0_35 = arith.constant 0 : index
    %c20 = arith.constant 20 : index
    %c0_36 = arith.constant 0 : index
    %57 = vector.load %arg1[%c0_35, %c20, %c0_36] : memref<1x342x128xbf16, #tpu.memory_space<vmem>>, vector<1x288x128xbf16>
    %58 = vector.shape_cast %57 : vector<1x288x128xbf16> to vector<288x128xbf16>
    %c5 = arith.constant 5 : index
    %c0_37 = arith.constant 0 : index
    %c0_38 = arith.constant 0 : index
    %59 = vector.load %arg2[%c5, %c0_37, %c0_38] : memref<9x128x128xbf16, #tpu.memory_space<vmem>>, vector<1x128x128xbf16>
    %60 = vector.shape_cast %59 : vector<1x128x128xbf16> to vector<128x128xbf16>
    %cst_39 = arith.constant dense<0.000000e+00> : vector<288x128xf32>
    %61 = tpu.matmul %58, %60, %cst_39 {dimension_numbers = #tpu.dot_dimension_numbers<[1], [0], [0], [1], [0, 0, 1, 1], [], []>} : vector<288x128xbf16>, vector<128x128xbf16>, vector<288x128xf32> -> vector<288x128xf32>
    %62 = arith.addf %56, %61 : vector<288x128xf32>
    %c0_40 = arith.constant 0 : index
    %c36 = arith.constant 36 : index
    %c0_41 = arith.constant 0 : index
    %63 = vector.load %arg1[%c0_40, %c36, %c0_41] : memref<1x342x128xbf16, #tpu.memory_space<vmem>>, vector<1x288x128xbf16>
    %64 = vector.shape_cast %63 : vector<1x288x128xbf16> to vector<288x128xbf16>
    %c6 = arith.constant 6 : index
    %c0_42 = arith.constant 0 : index
    %c0_43 = arith.constant 0 : index
    %65 = vector.load %arg2[%c6, %c0_42, %c0_43] : memref<9x128x128xbf16, #tpu.memory_space<vmem>>, vector<1x128x128xbf16>
    %66 = vector.shape_cast %65 : vector<1x128x128xbf16> to vector<128x128xbf16>
    %cst_44 = arith.constant dense<0.000000e+00> : vector<288x128xf32>
    %67 = tpu.matmul %64, %66, %cst_44 {dimension_numbers = #tpu.dot_dimension_numbers<[1], [0], [0], [1], [0, 0, 1, 1], [], []>} : vector<288x128xbf16>, vector<128x128xbf16>, vector<288x128xf32> -> vector<288x128xf32>
    %68 = arith.addf %62, %67 : vector<288x128xf32>
    %c0_45 = arith.constant 0 : index
    %c37 = arith.constant 37 : index
    %c0_46 = arith.constant 0 : index
    %69 = vector.load %arg1[%c0_45, %c37, %c0_46] : memref<1x342x128xbf16, #tpu.memory_space<vmem>>, vector<1x288x128xbf16>
    %70 = vector.shape_cast %69 : vector<1x288x128xbf16> to vector<288x128xbf16>
    %c7 = arith.constant 7 : index
    %c0_47 = arith.constant 0 : index
    %c0_48 = arith.constant 0 : index
    %71 = vector.load %arg2[%c7, %c0_47, %c0_48] : memref<9x128x128xbf16, #tpu.memory_space<vmem>>, vector<1x128x128xbf16>
    %72 = vector.shape_cast %71 : vector<1x128x128xbf16> to vector<128x128xbf16>
    %cst_49 = arith.constant dense<0.000000e+00> : vector<288x128xf32>
    %73 = tpu.matmul %70, %72, %cst_49 {dimension_numbers = #tpu.dot_dimension_numbers<[1], [0], [0], [1], [0, 0, 1, 1], [], []>} : vector<288x128xbf16>, vector<128x128xbf16>, vector<288x128xf32> -> vector<288x128xf32>
    %74 = arith.addf %68, %73 : vector<288x128xf32>
    %c0_50 = arith.constant 0 : index
    %c38 = arith.constant 38 : index
    %c0_51 = arith.constant 0 : index
    %75 = vector.load %arg1[%c0_50, %c38, %c0_51] : memref<1x342x128xbf16, #tpu.memory_space<vmem>>, vector<1x288x128xbf16>
    %76 = vector.shape_cast %75 : vector<1x288x128xbf16> to vector<288x128xbf16>
    %c8 = arith.constant 8 : index
    %c0_52 = arith.constant 0 : index
    %c0_53 = arith.constant 0 : index
    %77 = vector.load %arg2[%c8, %c0_52, %c0_53] : memref<9x128x128xbf16, #tpu.memory_space<vmem>>, vector<1x128x128xbf16>
    %78 = vector.shape_cast %77 : vector<1x128x128xbf16> to vector<128x128xbf16>
    %cst_54 = arith.constant dense<0.000000e+00> : vector<288x128xf32>
    %79 = tpu.matmul %76, %78, %cst_54 {dimension_numbers = #tpu.dot_dimension_numbers<[1], [0], [0], [1], [0, 0, 1, 1], [], []>} : vector<288x128xbf16>, vector<128x128xbf16>, vector<288x128xf32> -> vector<288x128xf32>
    %80 = arith.addf %74, %79 : vector<288x128xf32>
    %81 = arith.truncf %80 : vector<288x128xf32> to vector<288x128xbf16>
    %c0_55 = arith.constant 0 : index
    %c0_56 = arith.constant 0 : index
    %c0_57 = arith.constant 0 : index
    %82 = vector.load %arg3[%c0_55, %c0_56, %c0_57] : memref<1x288x128xbf16, #tpu.memory_space<vmem>>, vector<1x288x128xbf16>
    %83 = vector.shape_cast %82 : vector<1x288x128xbf16> to vector<288x128xbf16>
    %84 = vector.shape_cast %81 : vector<288x128xbf16> to vector<1x288x128xbf16>
    tpu.vector_store %arg3[%c0_55, %c0_56, %c0_57], %84 {strides = array<i32>} : memref<1x288x128xbf16, #tpu.memory_space<vmem>>, vector<1x288x128xbf16>,
    %cst_58 = arith.constant 0.000000e+00 : f32
    %85 = vector.shape_cast %23 : vector<288x1xi1> to vector<288x1xi1>
    %86 = vector.broadcast %85 : vector<288x1xi1> to vector<288x128xi1>
    %87 = vector.broadcast %cst_58 : f32 to vector<288x128xf32>
    %88 = arith.select %86, %80, %87 : vector<288x128xi1>, vector<288x128xf32>
    %cst_59 = arith.constant dense<0.000000e+00> : vector<128xf32>
    %89 = vector.multi_reduction <add>, %88, %cst_59 [0] : vector<288x128xf32> to vector<128xf32>
    %90 = vector.shape_cast %89 : vector<128xf32> to vector<1x128xf32>
    %91 = arith.addf %24, %90 : vector<1x128xf32>
    %92 = arith.mulf %88, %88 : vector<288x128xf32>
    %cst_60 = arith.constant dense<0.000000e+00> : vector<128xf32>
    %93 = vector.multi_reduction <add>, %92, %cst_60 [0] : vector<288x128xf32> to vector<128xf32>
    %94 = vector.shape_cast %93 : vector<128xf32> to vector<1x128xf32>
    %95 = arith.addf %25, %94 : vector<1x128xf32>
    %96 = vector.shape_cast %91 : vector<1x128xf32> to vector<1x128xf32>
    %97 = vector.broadcast %96 : vector<1x128xf32> to vector<8x128xf32>
    %c0_61 = arith.constant 0 : index
    %c0_62 = arith.constant 0 : index
    %c0_63 = arith.constant 0 : index
    %98 = vector.load %arg4[%c0_61, %c0_62, %c0_63] : memref<1x8x128xf32, #tpu.memory_space<vmem>>, vector<1x8x128xf32>
    %99 = vector.shape_cast %98 : vector<1x8x128xf32> to vector<8x128xf32>
    %100 = vector.shape_cast %97 : vector<8x128xf32> to vector<1x8x128xf32>
    tpu.vector_store %arg4[%c0_61, %c0_62, %c0_63], %100 {strides = array<i32>} : memref<1x8x128xf32, #tpu.memory_space<vmem>>, vector<1x8x128xf32>,
    %101 = vector.shape_cast %95 : vector<1x128xf32> to vector<1x128xf32>
    %102 = vector.broadcast %101 : vector<1x128xf32> to vector<8x128xf32>
    %c0_64 = arith.constant 0 : index
    %c0_65 = arith.constant 0 : index
    %c0_66 = arith.constant 0 : index
    %103 = vector.load %arg5[%c0_64, %c0_65, %c0_66] : memref<1x8x128xf32, #tpu.memory_space<vmem>>, vector<1x8x128xf32>
    %104 = vector.shape_cast %103 : vector<1x8x128xf32> to vector<8x128xf32>
    %105 = vector.shape_cast %102 : vector<8x128xf32> to vector<1x8x128xf32>
    tpu.vector_store %arg5[%c0_64, %c0_65, %c0_66], %105 {strides = array<i32>} : memref<1x8x128xf32, #tpu.memory_space<vmem>>, vector<1x8x128xf32>,
    return
  }
  func.func @transform_0(%arg0: i32) -> (i32, i32, i32) {
    %c0_i32 = arith.constant 0 : i32
    %c0_i32_0 = arith.constant 0 : i32
    %c0_i32_1 = arith.constant 0 : i32
    return %arg0, %c0_i32, %c0_i32_0 : i32, i32, i32
  }
  func.func @transform_1(%arg0: i32) -> (i32, i32, i32) {
    %c0_i32 = arith.constant 0 : i32
    %c0_i32_0 = arith.constant 0 : i32
    %c0_i32_1 = arith.constant 0 : i32
    %c0_i32_2 = arith.constant 0 : i32
    return %c0_i32, %c0_i32_0, %c0_i32_1 : i32, i32, i32
  }
  func.func @transform_2(%arg0: i32) -> (i32, i32, i32) {
    %c0_i32 = arith.constant 0 : i32
    %c0_i32_0 = arith.constant 0 : i32
    %c0_i32_1 = arith.constant 0 : i32
    return %arg0, %c0_i32, %c0_i32_0 : i32, i32, i32
  }
  func.func @transform_3(%arg0: i32) -> (i32, i32, i32) {
    %c0_i32 = arith.constant 0 : i32
    %c0_i32_0 = arith.constant 0 : i32
    %c0_i32_1 = arith.constant 0 : i32
    return %arg0, %c0_i32, %c0_i32_0 : i32, i32, i32
  }
  func.func @transform_4(%arg0: i32) -> (i32, i32, i32) {
    %c0_i32 = arith.constant 0 : i32
    %c0_i32_0 = arith.constant 0 : i32
    %c0_i32_1 = arith.constant 0 : i32
    return %arg0, %c0_i32, %c0_i32_0 : i32, i32, i32
  }
}

module attributes {stable_mosaic.version = 11 : i64} {
  func.func @_bn_relu_conv_stats_kernel(%arg0: i32, %arg1: memref<1x288x128xbf16, #tpu.memory_space<vmem>>, %arg2: memref<1x128xf32, #tpu.memory_space<vmem>>, %arg3: memref<1x128xf32, #tpu.memory_space<vmem>>, %arg4: memref<9x128x128xbf16, #tpu.memory_space<vmem>>, %arg5: memref<1x288x128xbf16, #tpu.memory_space<vmem>>, %arg6: memref<1x8x128xf32, #tpu.memory_space<vmem>>, %arg7: memref<1x8x128xf32, #tpu.memory_space<vmem>>, %arg8: memref<352x128xbf16, #tpu.memory_space<vmem>>) attributes {dimension_semantics = [#tpu.dimension_semantics<parallel>], iteration_bounds = array<i64: 2>, scalar_prefetch = 0 : i64, scratch_operands = 1 : i64, tpu.core_type = #tpu.core_type<tc>, window_params = [{transform_indices = @transform_0, window_bounds = array<i64: 1, 288, 128>}, {pipeline_mode = #tpu.pipeline_mode<synchronous>, transform_indices = @transform_1, window_bounds = array<i64: 1, 128>}, {pipeline_mode = #tpu.pipeline_mode<synchronous>, transform_indices = @transform_2, window_bounds = array<i64: 1, 128>}, {pipeline_mode = #tpu.pipeline_mode<synchronous>, transform_indices = @transform_3, window_bounds = array<i64: 9, 128, 128>}, {transform_indices = @transform_4, window_bounds = array<i64: 1, 288, 128>}, {transform_indices = @transform_5, window_bounds = array<i64: 1, 8, 128>}, {transform_indices = @transform_6, window_bounds = array<i64: 1, 8, 128>}]} {
    %0 = tpu.iota {dimensions = array<i32: 0>} : vector<288x1xi32>
    %c1_i32 = arith.constant 1 : i32
    %1 = vector.broadcast %c1_i32 : i32 to vector<288x1xi32>
    %2 = arith.addi %0, %1 : vector<288x1xi32>
    %c18_i32 = arith.constant 18 : i32
    %c0_i32 = arith.constant 0 : i32
    %3 = arith.cmpi eq, %c18_i32, %c0_i32 : i32
    %c1_i32_0 = arith.constant 1 : i32
    %4 = arith.select %3, %c1_i32_0, %c18_i32 : i32
    %5 = vector.broadcast %4 : i32 to vector<288x1xi32>
    %6 = arith.remsi %2, %5 : vector<288x1xi32>
    %c0_i32_1 = arith.constant 0 : i32
    %7 = vector.broadcast %c0_i32_1 : i32 to vector<288x1xi32>
    %8 = arith.cmpi ne, %6, %7 : vector<288x1xi32>
    %c0_i32_2 = arith.constant 0 : i32
    %9 = vector.broadcast %c0_i32_2 : i32 to vector<288x1xi32>
    %10 = arith.cmpi slt, %6, %9 : vector<288x1xi32>
    %c0_i32_3 = arith.constant 0 : i32
    %11 = arith.cmpi slt, %4, %c0_i32_3 : i32
    %12 = vector.broadcast %11 : i1 to vector<288x1xi1>
    %13 = vector.broadcast %12 : vector<288x1xi1> to vector<288x1xi1>
    %14 = arith.xori %10, %13 : vector<288x1xi1>
    %15 = arith.andi %14, %8 : vector<288x1xi1>
    %16 = vector.broadcast %4 : i32 to vector<288x1xi32>
    %17 = arith.addi %6, %16 : vector<288x1xi32>
    %18 = arith.select %15, %17, %6 : vector<288x1xi1>, vector<288x1xi32>
    %c1_i32_4 = arith.constant 1 : i32
    %19 = vector.broadcast %c1_i32_4 : i32 to vector<288x1xi32>
    %20 = arith.cmpi sge, %18, %19 : vector<288x1xi32>
    %c16_i32 = arith.constant 16 : i32
    %21 = vector.broadcast %c16_i32 : i32 to vector<288x1xi32>
    %22 = arith.cmpi sle, %18, %21 : vector<288x1xi32>
    %23 = arith.andi %20, %22 : vector<288x1xi1>
    %cst = arith.constant 0.000000e+00 : bf16
    %24 = vector.broadcast %cst : bf16 to vector<32x128xbf16>
    %c0 = arith.constant 0 : index
    %c0_5 = arith.constant 0 : index
    %25 = vector.load %arg8[%c0, %c0_5] : memref<352x128xbf16, #tpu.memory_space<vmem>>, vector<32x128xbf16>
    tpu.vector_store %arg8[%c0, %c0_5], %24 {strides = array<i32>} : memref<352x128xbf16, #tpu.memory_space<vmem>>, vector<32x128xbf16>,
    %cst_6 = arith.constant 0.000000e+00 : bf16
    %26 = vector.broadcast %cst_6 : bf16 to vector<32x128xbf16>
    %c320 = arith.constant 320 : index
    %c0_7 = arith.constant 0 : index
    %27 = vector.load %arg8[%c320, %c0_7] : memref<352x128xbf16, #tpu.memory_space<vmem>>, vector<32x128xbf16>
    tpu.vector_store %arg8[%c320, %c0_7], %26 {strides = array<i32>} : memref<352x128xbf16, #tpu.memory_space<vmem>>, vector<32x128xbf16>,
    %cst_8 = arith.constant 0.000000e+00 : f32
    %28 = vector.broadcast %cst_8 : f32 to vector<1x128xf32>
    %cst_9 = arith.constant 0.000000e+00 : f32
    %29 = vector.broadcast %cst_9 : f32 to vector<1x128xf32>
    %c0_10 = arith.constant 0 : index
    %c0_11 = arith.constant 0 : index
    %c0_12 = arith.constant 0 : index
    %30 = vector.load %arg1[%c0_10, %c0_11, %c0_12] : memref<1x288x128xbf16, #tpu.memory_space<vmem>>, vector<1x288x128xbf16>
    %31 = vector.shape_cast %30 : vector<1x288x128xbf16> to vector<288x128xbf16>
    %32 = arith.extf %31 : vector<288x128xbf16> to vector<288x128xf32>
    %c0_13 = arith.constant 0 : index
    %c0_14 = arith.constant 0 : index
    %33 = vector.load %arg2[%c0_13, %c0_14] : memref<1x128xf32, #tpu.memory_space<vmem>>, vector<1x128xf32>
    %34 = vector.broadcast %33 : vector<1x128xf32> to vector<288x128xf32>
    %35 = arith.mulf %32, %34 : vector<288x128xf32>
    %c0_15 = arith.constant 0 : index
    %c0_16 = arith.constant 0 : index
    %36 = vector.load %arg3[%c0_15, %c0_16] : memref<1x128xf32, #tpu.memory_space<vmem>>, vector<1x128xf32>
    %37 = vector.broadcast %36 : vector<1x128xf32> to vector<288x128xf32>
    %38 = arith.addf %35, %37 : vector<288x128xf32>
    %cst_17 = arith.constant 0.000000e+00 : f32
    %39 = vector.broadcast %cst_17 : f32 to vector<288x128xf32>
    %40 = arith.maximumf %38, %39 : vector<288x128xf32>
    %cst_18 = arith.constant 0.000000e+00 : f32
    %41 = vector.shape_cast %23 : vector<288x1xi1> to vector<288x1xi1>
    %42 = vector.broadcast %41 : vector<288x1xi1> to vector<288x128xi1>
    %43 = vector.broadcast %cst_18 : f32 to vector<288x128xf32>
    %44 = arith.select %42, %40, %43 : vector<288x128xi1>, vector<288x128xf32>
    %45 = arith.truncf %44 : vector<288x128xf32> to vector<288x128xbf16>
    %c32 = arith.constant 32 : index
    %c0_19 = arith.constant 0 : index
    %46 = vector.load %arg8[%c32, %c0_19] : memref<352x128xbf16, #tpu.memory_space<vmem>>, vector<288x128xbf16>
    tpu.vector_store %arg8[%c32, %c0_19], %45 {strides = array<i32>} : memref<352x128xbf16, #tpu.memory_space<vmem>>, vector<288x128xbf16>,
    %cst_20 = arith.constant 0.000000e+00 : f32
    %47 = vector.broadcast %cst_20 : f32 to vector<288x128xf32>
    %c13 = arith.constant 13 : index
    %c0_21 = arith.constant 0 : index
    %48 = vector.load %arg8[%c13, %c0_21] : memref<352x128xbf16, #tpu.memory_space<vmem>>, vector<288x128xbf16>
    %c0_22 = arith.constant 0 : index
    %c0_23 = arith.constant 0 : index
    %c0_24 = arith.constant 0 : index
    %49 = vector.load %arg4[%c0_22, %c0_23, %c0_24] : memref<9x128x128xbf16, #tpu.memory_space<vmem>>, vector<1x128x128xbf16>
    %50 = vector.shape_cast %49 : vector<1x128x128xbf16> to vector<128x128xbf16>
    %cst_25 = arith.constant dense<0.000000e+00> : vector<288x128xf32>
    %51 = tpu.matmul %48, %50, %cst_25 {dimension_numbers = #tpu.dot_dimension_numbers<[1], [0], [0], [1], [0, 0, 1, 1], [], []>} : vector<288x128xbf16>, vector<128x128xbf16>, vector<288x128xf32> -> vector<288x128xf32>
    %52 = arith.addf %47, %51 : vector<288x128xf32>
    %c14 = arith.constant 14 : index
    %c0_26 = arith.constant 0 : index
    %53 = vector.load %arg8[%c14, %c0_26] : memref<352x128xbf16, #tpu.memory_space<vmem>>, vector<288x128xbf16>
    %c1 = arith.constant 1 : index
    %c0_27 = arith.constant 0 : index
    %c0_28 = arith.constant 0 : index
    %54 = vector.load %arg4[%c1, %c0_27, %c0_28] : memref<9x128x128xbf16, #tpu.memory_space<vmem>>, vector<1x128x128xbf16>
    %55 = vector.shape_cast %54 : vector<1x128x128xbf16> to vector<128x128xbf16>
    %cst_29 = arith.constant dense<0.000000e+00> : vector<288x128xf32>
    %56 = tpu.matmul %53, %55, %cst_29 {dimension_numbers = #tpu.dot_dimension_numbers<[1], [0], [0], [1], [0, 0, 1, 1], [], []>} : vector<288x128xbf16>, vector<128x128xbf16>, vector<288x128xf32> -> vector<288x128xf32>
    %57 = arith.addf %52, %56 : vector<288x128xf32>
    %c15 = arith.constant 15 : index
    %c0_30 = arith.constant 0 : index
    %58 = vector.load %arg8[%c15, %c0_30] : memref<352x128xbf16, #tpu.memory_space<vmem>>, vector<288x128xbf16>
    %c2 = arith.constant 2 : index
    %c0_31 = arith.constant 0 : index
    %c0_32 = arith.constant 0 : index
    %59 = vector.load %arg4[%c2, %c0_31, %c0_32] : memref<9x128x128xbf16, #tpu.memory_space<vmem>>, vector<1x128x128xbf16>
    %60 = vector.shape_cast %59 : vector<1x128x128xbf16> to vector<128x128xbf16>
    %cst_33 = arith.constant dense<0.000000e+00> : vector<288x128xf32>
    %61 = tpu.matmul %58, %60, %cst_33 {dimension_numbers = #tpu.dot_dimension_numbers<[1], [0], [0], [1], [0, 0, 1, 1], [], []>} : vector<288x128xbf16>, vector<128x128xbf16>, vector<288x128xf32> -> vector<288x128xf32>
    %62 = arith.addf %57, %61 : vector<288x128xf32>
    %c31 = arith.constant 31 : index
    %c0_34 = arith.constant 0 : index
    %63 = vector.load %arg8[%c31, %c0_34] : memref<352x128xbf16, #tpu.memory_space<vmem>>, vector<288x128xbf16>
    %c3 = arith.constant 3 : index
    %c0_35 = arith.constant 0 : index
    %c0_36 = arith.constant 0 : index
    %64 = vector.load %arg4[%c3, %c0_35, %c0_36] : memref<9x128x128xbf16, #tpu.memory_space<vmem>>, vector<1x128x128xbf16>
    %65 = vector.shape_cast %64 : vector<1x128x128xbf16> to vector<128x128xbf16>
    %cst_37 = arith.constant dense<0.000000e+00> : vector<288x128xf32>
    %66 = tpu.matmul %63, %65, %cst_37 {dimension_numbers = #tpu.dot_dimension_numbers<[1], [0], [0], [1], [0, 0, 1, 1], [], []>} : vector<288x128xbf16>, vector<128x128xbf16>, vector<288x128xf32> -> vector<288x128xf32>
    %67 = arith.addf %62, %66 : vector<288x128xf32>
    %c32_38 = arith.constant 32 : index
    %c0_39 = arith.constant 0 : index
    %68 = vector.load %arg8[%c32_38, %c0_39] : memref<352x128xbf16, #tpu.memory_space<vmem>>, vector<288x128xbf16>
    %c4 = arith.constant 4 : index
    %c0_40 = arith.constant 0 : index
    %c0_41 = arith.constant 0 : index
    %69 = vector.load %arg4[%c4, %c0_40, %c0_41] : memref<9x128x128xbf16, #tpu.memory_space<vmem>>, vector<1x128x128xbf16>
    %70 = vector.shape_cast %69 : vector<1x128x128xbf16> to vector<128x128xbf16>
    %cst_42 = arith.constant dense<0.000000e+00> : vector<288x128xf32>
    %71 = tpu.matmul %68, %70, %cst_42 {dimension_numbers = #tpu.dot_dimension_numbers<[1], [0], [0], [1], [0, 0, 1, 1], [], []>} : vector<288x128xbf16>, vector<128x128xbf16>, vector<288x128xf32> -> vector<288x128xf32>
    %72 = arith.addf %67, %71 : vector<288x128xf32>
    %c33 = arith.constant 33 : index
    %c0_43 = arith.constant 0 : index
    %73 = vector.load %arg8[%c33, %c0_43] : memref<352x128xbf16, #tpu.memory_space<vmem>>, vector<288x128xbf16>
    %c5 = arith.constant 5 : index
    %c0_44 = arith.constant 0 : index
    %c0_45 = arith.constant 0 : index
    %74 = vector.load %arg4[%c5, %c0_44, %c0_45] : memref<9x128x128xbf16, #tpu.memory_space<vmem>>, vector<1x128x128xbf16>
    %75 = vector.shape_cast %74 : vector<1x128x128xbf16> to vector<128x128xbf16>
    %cst_46 = arith.constant dense<0.000000e+00> : vector<288x128xf32>
    %76 = tpu.matmul %73, %75, %cst_46 {dimension_numbers = #tpu.dot_dimension_numbers<[1], [0], [0], [1], [0, 0, 1, 1], [], []>} : vector<288x128xbf16>, vector<128x128xbf16>, vector<288x128xf32> -> vector<288x128xf32>
    %77 = arith.addf %72, %76 : vector<288x128xf32>
    %c49 = arith.constant 49 : index
    %c0_47 = arith.constant 0 : index
    %78 = vector.load %arg8[%c49, %c0_47] : memref<352x128xbf16, #tpu.memory_space<vmem>>, vector<288x128xbf16>
    %c6 = arith.constant 6 : index
    %c0_48 = arith.constant 0 : index
    %c0_49 = arith.constant 0 : index
    %79 = vector.load %arg4[%c6, %c0_48, %c0_49] : memref<9x128x128xbf16, #tpu.memory_space<vmem>>, vector<1x128x128xbf16>
    %80 = vector.shape_cast %79 : vector<1x128x128xbf16> to vector<128x128xbf16>
    %cst_50 = arith.constant dense<0.000000e+00> : vector<288x128xf32>
    %81 = tpu.matmul %78, %80, %cst_50 {dimension_numbers = #tpu.dot_dimension_numbers<[1], [0], [0], [1], [0, 0, 1, 1], [], []>} : vector<288x128xbf16>, vector<128x128xbf16>, vector<288x128xf32> -> vector<288x128xf32>
    %82 = arith.addf %77, %81 : vector<288x128xf32>
    %c50 = arith.constant 50 : index
    %c0_51 = arith.constant 0 : index
    %83 = vector.load %arg8[%c50, %c0_51] : memref<352x128xbf16, #tpu.memory_space<vmem>>, vector<288x128xbf16>
    %c7 = arith.constant 7 : index
    %c0_52 = arith.constant 0 : index
    %c0_53 = arith.constant 0 : index
    %84 = vector.load %arg4[%c7, %c0_52, %c0_53] : memref<9x128x128xbf16, #tpu.memory_space<vmem>>, vector<1x128x128xbf16>
    %85 = vector.shape_cast %84 : vector<1x128x128xbf16> to vector<128x128xbf16>
    %cst_54 = arith.constant dense<0.000000e+00> : vector<288x128xf32>
    %86 = tpu.matmul %83, %85, %cst_54 {dimension_numbers = #tpu.dot_dimension_numbers<[1], [0], [0], [1], [0, 0, 1, 1], [], []>} : vector<288x128xbf16>, vector<128x128xbf16>, vector<288x128xf32> -> vector<288x128xf32>
    %87 = arith.addf %82, %86 : vector<288x128xf32>
    %c51 = arith.constant 51 : index
    %c0_55 = arith.constant 0 : index
    %88 = vector.load %arg8[%c51, %c0_55] : memref<352x128xbf16, #tpu.memory_space<vmem>>, vector<288x128xbf16>
    %c8 = arith.constant 8 : index
    %c0_56 = arith.constant 0 : index
    %c0_57 = arith.constant 0 : index
    %89 = vector.load %arg4[%c8, %c0_56, %c0_57] : memref<9x128x128xbf16, #tpu.memory_space<vmem>>, vector<1x128x128xbf16>
    %90 = vector.shape_cast %89 : vector<1x128x128xbf16> to vector<128x128xbf16>
    %cst_58 = arith.constant dense<0.000000e+00> : vector<288x128xf32>
    %91 = tpu.matmul %88, %90, %cst_58 {dimension_numbers = #tpu.dot_dimension_numbers<[1], [0], [0], [1], [0, 0, 1, 1], [], []>} : vector<288x128xbf16>, vector<128x128xbf16>, vector<288x128xf32> -> vector<288x128xf32>
    %92 = arith.addf %87, %91 : vector<288x128xf32>
    %93 = arith.truncf %92 : vector<288x128xf32> to vector<288x128xbf16>
    %c0_59 = arith.constant 0 : index
    %c0_60 = arith.constant 0 : index
    %c0_61 = arith.constant 0 : index
    %94 = vector.load %arg5[%c0_59, %c0_60, %c0_61] : memref<1x288x128xbf16, #tpu.memory_space<vmem>>, vector<1x288x128xbf16>
    %95 = vector.shape_cast %94 : vector<1x288x128xbf16> to vector<288x128xbf16>
    %96 = vector.shape_cast %93 : vector<288x128xbf16> to vector<1x288x128xbf16>
    tpu.vector_store %arg5[%c0_59, %c0_60, %c0_61], %96 {strides = array<i32>} : memref<1x288x128xbf16, #tpu.memory_space<vmem>>, vector<1x288x128xbf16>,
    %cst_62 = arith.constant 0.000000e+00 : f32
    %97 = vector.shape_cast %23 : vector<288x1xi1> to vector<288x1xi1>
    %98 = vector.broadcast %97 : vector<288x1xi1> to vector<288x128xi1>
    %99 = vector.broadcast %cst_62 : f32 to vector<288x128xf32>
    %100 = arith.select %98, %92, %99 : vector<288x128xi1>, vector<288x128xf32>
    %cst_63 = arith.constant dense<0.000000e+00> : vector<128xf32>
    %101 = vector.multi_reduction <add>, %100, %cst_63 [0] : vector<288x128xf32> to vector<128xf32>
    %102 = vector.shape_cast %101 : vector<128xf32> to vector<1x128xf32>
    %103 = arith.addf %28, %102 : vector<1x128xf32>
    %104 = arith.mulf %100, %100 : vector<288x128xf32>
    %cst_64 = arith.constant dense<0.000000e+00> : vector<128xf32>
    %105 = vector.multi_reduction <add>, %104, %cst_64 [0] : vector<288x128xf32> to vector<128xf32>
    %106 = vector.shape_cast %105 : vector<128xf32> to vector<1x128xf32>
    %107 = arith.addf %29, %106 : vector<1x128xf32>
    %108 = vector.shape_cast %103 : vector<1x128xf32> to vector<1x128xf32>
    %109 = vector.broadcast %108 : vector<1x128xf32> to vector<8x128xf32>
    %c0_65 = arith.constant 0 : index
    %c0_66 = arith.constant 0 : index
    %c0_67 = arith.constant 0 : index
    %110 = vector.load %arg6[%c0_65, %c0_66, %c0_67] : memref<1x8x128xf32, #tpu.memory_space<vmem>>, vector<1x8x128xf32>
    %111 = vector.shape_cast %110 : vector<1x8x128xf32> to vector<8x128xf32>
    %112 = vector.shape_cast %109 : vector<8x128xf32> to vector<1x8x128xf32>
    tpu.vector_store %arg6[%c0_65, %c0_66, %c0_67], %112 {strides = array<i32>} : memref<1x8x128xf32, #tpu.memory_space<vmem>>, vector<1x8x128xf32>,
    %113 = vector.shape_cast %107 : vector<1x128xf32> to vector<1x128xf32>
    %114 = vector.broadcast %113 : vector<1x128xf32> to vector<8x128xf32>
    %c0_68 = arith.constant 0 : index
    %c0_69 = arith.constant 0 : index
    %c0_70 = arith.constant 0 : index
    %115 = vector.load %arg7[%c0_68, %c0_69, %c0_70] : memref<1x8x128xf32, #tpu.memory_space<vmem>>, vector<1x8x128xf32>
    %116 = vector.shape_cast %115 : vector<1x8x128xf32> to vector<8x128xf32>
    %117 = vector.shape_cast %114 : vector<8x128xf32> to vector<1x8x128xf32>
    tpu.vector_store %arg7[%c0_68, %c0_69, %c0_70], %117 {strides = array<i32>} : memref<1x8x128xf32, #tpu.memory_space<vmem>>, vector<1x8x128xf32>,
    return
  }
  func.func @transform_0(%arg0: i32) -> (i32, i32, i32) {
    %c0_i32 = arith.constant 0 : i32
    %c0_i32_0 = arith.constant 0 : i32
    %c0_i32_1 = arith.constant 0 : i32
    return %arg0, %c0_i32, %c0_i32_0 : i32, i32, i32
  }
  func.func @transform_1(%arg0: i32) -> (i32, i32) {
    %c0_i32 = arith.constant 0 : i32
    %c0_i32_0 = arith.constant 0 : i32
    %c0_i32_1 = arith.constant 0 : i32
    return %c0_i32, %c0_i32_0 : i32, i32
  }
  func.func @transform_2(%arg0: i32) -> (i32, i32) {
    %c0_i32 = arith.constant 0 : i32
    %c0_i32_0 = arith.constant 0 : i32
    %c0_i32_1 = arith.constant 0 : i32
    return %c0_i32, %c0_i32_0 : i32, i32
  }
  func.func @transform_3(%arg0: i32) -> (i32, i32, i32) {
    %c0_i32 = arith.constant 0 : i32
    %c0_i32_0 = arith.constant 0 : i32
    %c0_i32_1 = arith.constant 0 : i32
    %c0_i32_2 = arith.constant 0 : i32
    return %c0_i32, %c0_i32_0, %c0_i32_1 : i32, i32, i32
  }
  func.func @transform_4(%arg0: i32) -> (i32, i32, i32) {
    %c0_i32 = arith.constant 0 : i32
    %c0_i32_0 = arith.constant 0 : i32
    %c0_i32_1 = arith.constant 0 : i32
    return %arg0, %c0_i32, %c0_i32_0 : i32, i32, i32
  }
  func.func @transform_5(%arg0: i32) -> (i32, i32, i32) {
    %c0_i32 = arith.constant 0 : i32
    %c0_i32_0 = arith.constant 0 : i32
    %c0_i32_1 = arith.constant 0 : i32
    return %arg0, %c0_i32, %c0_i32_0 : i32, i32, i32
  }
  func.func @transform_6(%arg0: i32) -> (i32, i32, i32) {
    %c0_i32 = arith.constant 0 : i32
    %c0_i32_0 = arith.constant 0 : i32
    %c0_i32_1 = arith.constant 0 : i32
    return %arg0, %c0_i32, %c0_i32_0 : i32, i32, i32
  }
}

module attributes {stable_mosaic.version = 11 : i64} {
  func.func @_bn_res_relu_kernel(%arg0: i32, %arg1: memref<1x288x128xbf16, #tpu.memory_space<vmem>>, %arg2: memref<1x128xf32, #tpu.memory_space<vmem>>, %arg3: memref<1x128xf32, #tpu.memory_space<vmem>>, %arg4: memref<1x342x128xbf16, #tpu.memory_space<vmem>>, %arg5: memref<1x288x128xf32, #tpu.memory_space<vmem>>) attributes {dimension_semantics = [#tpu.dimension_semantics<parallel>], iteration_bounds = array<i64: 2>, scalar_prefetch = 0 : i64, scratch_operands = 0 : i64, tpu.core_type = #tpu.core_type<tc>, window_params = [{transform_indices = @transform_0, window_bounds = array<i64: 1, 288, 128>}, {pipeline_mode = #tpu.pipeline_mode<synchronous>, transform_indices = @transform_1, window_bounds = array<i64: 1, 128>}, {pipeline_mode = #tpu.pipeline_mode<synchronous>, transform_indices = @transform_2, window_bounds = array<i64: 1, 128>}, {transform_indices = @transform_3, window_bounds = array<i64: 1, 342, 128>}, {transform_indices = @transform_4, window_bounds = array<i64: 1, 288, 128>}]} {
    %c0 = arith.constant 0 : index
    %c19 = arith.constant 19 : index
    %c0_0 = arith.constant 0 : index
    %0 = vector.load %arg4[%c0, %c19, %c0_0] : memref<1x342x128xbf16, #tpu.memory_space<vmem>>, vector<1x288x128xbf16>
    %1 = vector.shape_cast %0 : vector<1x288x128xbf16> to vector<288x128xbf16>
    %2 = arith.extf %1 : vector<288x128xbf16> to vector<288x128xf32>
    %c0_1 = arith.constant 0 : index
    %c0_2 = arith.constant 0 : index
    %c0_3 = arith.constant 0 : index
    %3 = vector.load %arg1[%c0_1, %c0_2, %c0_3] : memref<1x288x128xbf16, #tpu.memory_space<vmem>>, vector<1x288x128xbf16>
    %4 = vector.shape_cast %3 : vector<1x288x128xbf16> to vector<288x128xbf16>
    %5 = arith.extf %4 : vector<288x128xbf16> to vector<288x128xf32>
    %c0_4 = arith.constant 0 : index
    %c0_5 = arith.constant 0 : index
    %6 = vector.load %arg2[%c0_4, %c0_5] : memref<1x128xf32, #tpu.memory_space<vmem>>, vector<1x128xf32>
    %7 = vector.broadcast %6 : vector<1x128xf32> to vector<288x128xf32>
    %8 = arith.mulf %5, %7 : vector<288x128xf32>
    %c0_6 = arith.constant 0 : index
    %c0_7 = arith.constant 0 : index
    %9 = vector.load %arg3[%c0_6, %c0_7] : memref<1x128xf32, #tpu.memory_space<vmem>>, vector<1x128xf32>
    %10 = vector.broadcast %9 : vector<1x128xf32> to vector<288x128xf32>
    %11 = arith.addf %8, %10 : vector<288x128xf32>
    %12 = arith.addf %11, %2 : vector<288x128xf32>
    %cst = arith.constant 0.000000e+00 : f32
    %13 = vector.broadcast %cst : f32 to vector<288x128xf32>
    %14 = arith.maximumf %12, %13 : vector<288x128xf32>
    %c0_8 = arith.constant 0 : index
    %c0_9 = arith.constant 0 : index
    %c0_10 = arith.constant 0 : index
    %15 = vector.load %arg5[%c0_8, %c0_9, %c0_10] : memref<1x288x128xf32, #tpu.memory_space<vmem>>, vector<1x288x128xf32>
    %16 = vector.shape_cast %15 : vector<1x288x128xf32> to vector<288x128xf32>
    %17 = vector.shape_cast %14 : vector<288x128xf32> to vector<1x288x128xf32>
    tpu.vector_store %arg5[%c0_8, %c0_9, %c0_10], %17 {strides = array<i32>} : memref<1x288x128xf32, #tpu.memory_space<vmem>>, vector<1x288x128xf32>,
    return
  }
  func.func @transform_0(%arg0: i32) -> (i32, i32, i32) {
    %c0_i32 = arith.constant 0 : i32
    %c0_i32_0 = arith.constant 0 : i32
    %c0_i32_1 = arith.constant 0 : i32
    return %arg0, %c0_i32, %c0_i32_0 : i32, i32, i32
  }
  func.func @transform_1(%arg0: i32) -> (i32, i32) {
    %c0_i32 = arith.constant 0 : i32
    %c0_i32_0 = arith.constant 0 : i32
    %c0_i32_1 = arith.constant 0 : i32
    return %c0_i32, %c0_i32_0 : i32, i32
  }
  func.func @transform_2(%arg0: i32) -> (i32, i32) {
    %c0_i32 = arith.constant 0 : i32
    %c0_i32_0 = arith.constant 0 : i32
    %c0_i32_1 = arith.constant 0 : i32
    return %c0_i32, %c0_i32_0 : i32, i32
  }
  func.func @transform_3(%arg0: i32) -> (i32, i32, i32) {
    %c0_i32 = arith.constant 0 : i32
    %c0_i32_0 = arith.constant 0 : i32
    %c0_i32_1 = arith.constant 0 : i32
    return %arg0, %c0_i32, %c0_i32_0 : i32, i32, i32
  }
  func.func @transform_4(%arg0: i32) -> (i32, i32, i32) {
    %c0_i32 = arith.constant 0 : i32
    %c0_i32_0 = arith.constant 0 : i32
    %c0_i32_1 = arith.constant 0 : i32
    return %arg0, %c0_i32, %c0_i32_0 : i32, i32, i32
  }
}

</mosaic_0001>

<bundles_post_ra>
// kernel: basic_block_forward.5
= control target key start
LH: loop header
LB: loop body
LE: loop exit
PB: predicated region body
PF: predicated region fallthrough
CT: control target
= control target key end

     0   :  { %s1002_s15 = smov 0   ;;  %s1225_s0 = inlined_call_operand.vmem [shape: bf16[2,288,128], index: 0, kind: input, shape index: {}]   ;;  %s1226_s1 = inlined_call_operand.vmem [shape: f32[1,128], index: 1, kind: input, shape index: {}]   ;;  %s1227_s2 = inlined_call_operand.vmem [shape: f32[1,128], index: 2, kind: input, shape index: {}]   ;;  %s1228_s3 = inlined_call_operand.vmem [shape: bf16[2,342,128], index: 3, kind: input, shape index: {}]   ;;  %s1229_s4 = inlined_call_operand.vmem [shape: f32[2,288,128], index: 4, kind: output, shape index: {}]  }
   0x1 LB: > { %s772_s16 = sadd.s32 4294967295, %s975_s15   ;;  %p776_p0 = scmp.ge.s32.totalorder %s975_s15, 1  ;;  %s975_s15 = sphi %s1002_s15, %s14_s15  }
   0x2   : > { %p172_p1 = scmp.lt.s32.totalorder %s975_s15, 3 }
   0x4   : > { %p173_p2 = pnand %p776_p0, %p172_p1 }
   0x5   : > { %p203_p3 = scmp.lt.s32.totalorder (!%p173_p2), %s772_s16, 1  ;;  %v1028_v1 = vld [vmem:[%s1226_s1] ss:$0 sm:$0xff] (!%p173_p2)  ;;  %vm487_vm0 = vcmask (!%p173_p2), 1044480  }
   0x6   : > { %176 = sbr.rel (%p173_p2) target bundleno = 98 (0x62), region = 36  ;;  %v1037_v12 = vld [vmem:[%s1227_s2] ss:$0 sm:$0xff] (!%p173_p2) }
   0xd   : > { %s1231_s16 = smov (!%p203_p3, %s772_s16), 1 }
   0xe   : > { %s958_s17 = smul.u32 144, %s1231_s16 }
   0xf   : > { %s959_s18 = smul.u32 172, %s1231_s16 }
  0x10   : > { %s1017_s21 = scalar_lea.vmem %s1225_s0, %s958_s17  ;;  %s960_s29 = smul.u32 288, %s1231_s16 }
  0x11   : > { %s1022_s24 = scalar_lea.vmem %s1228_s3, %s959_s18  ;;  %v853_v0 = vld [vmem:[%s1017_s21] sm:$0xff]   ;;  %v941_v2 = vld [vmem:[%s1017_s21 + $0x8] sm:$0xff]   ;;  %v942_v28 = vld [vmem:[%s1017_s21 + $0x10] sm:$0xff]  }
  0x12   : > { %v218_v3 = vld [vmem:[%s1022_s24 + $0x8] sm:$0xe]  ;;  %v219_v4 = vld [vmem:[%s1022_s24 + $0xc] sm:$0xf]  ;;  %v854_v5 = vunpack.c.l.bf16 %v853_v0  ;;  %v924_v6 = vld [vmem:[%s1022_s24 + $0x10] sm:$0xff]   ;;  %v855_v7 = vunpack.c.h.bf16 %v853_v0  ;;  %v858_v8 = vunpack.c.l.bf16 %v941_v2  ;;  %v859_v9 = vunpack.c.h.bf16 %v941_v2  ;;  %s1057_s6 = scalar_lea.vmem %s1229_s4, %s960_s29 }
  0x13   : > { %v255_v10 = vunpack.c.l.bf16 %v218_v3  ;;  %v256_v11 = vunpack.c.l.bf16 %v219_v4  ;;  %v786_v13 = vunpack.c.l.bf16 %v924_v6  ;;  %v787_v14 = vunpack.c.h.bf16 %v924_v6  ;;  %v925_v15 = vld [vmem:[%s1022_s24 + $0x18] sm:$0xff]   ;;  %v926_v29 = vld [vmem:[%s1022_s24 + $0x20] sm:$0xff]   ;;  %v927_v43 = vld [vmem:[%s1022_s24 + $0x28] sm:$0xff]  }
  0x14   : > { %v371_v16 = vmul.f32 %v854_v5, %v1028_v1  ;;  %v372_v17 = vmul.f32 %v855_v7, %v1028_v1  ;;  %v373_v18 = vmul.f32 %v858_v8, %v1028_v1  ;;  %v790_v19 = vunpack.c.l.bf16 %v925_v15  ;;  %v943_v42 = vld [vmem:[%s1017_s21 + $0x18] sm:$0xff]   ;;  %v944_v56 = vld [vmem:[%s1017_s21 + $0x20] sm:$0xff]   ;;  %v928_v6 = vld [vmem:[%s1022_s24 + $0x30] sm:$0xff]  }
  0x15   : > { %v488_v20 = vrot.slane %v255_v10, 3  ;;  %v489_v21 = vrot.slane %v256_v11, 3  ;;  %v491_v22 = vrot.slane %v786_v13, 3  ;;  %v493_v23 = vrot.slane %v787_v14, 3 }
  0x16   : > { %v414_v24 = vadd.f32 %v1037_v12, %v371_v16  ;;  %v415_v25 = vadd.f32 %v1037_v12, %v372_v17  ;;  %v416_v26 = vadd.f32 %v1037_v12, %v373_v18  ;;  %v374_v27 = vmul.f32 %v859_v9, %v1028_v1 }
  0x17   : > { %v490_v30 = vsel %vm487_vm0, %v488_v20, %v489_v21  ;;  %v492_v31 = vsel %vm487_vm0, %v489_v21, %v491_v22  ;;  %v494_v32 = vsel %vm487_vm0, %v491_v22, %v493_v23  ;;  %v495_v33 = vrot.slane %v790_v19, 3  ;;  %v945_v20 = vld [vmem:[%s1017_s21 + $0x28] sm:$0xff]   ;;  %v929_v21 = vld [vmem:[%s1022_s24 + $0x38] sm:$0xff]  }
  0x18   : > { %v597_v34 = vadd.f32 %v490_v30, %v414_v24  ;;  %v598_v35 = vadd.f32 %v492_v31, %v415_v25  ;;  %v599_v36 = vadd.f32 %v494_v32, %v416_v26  ;;  %v417_v37 = vadd.f32 %v1037_v12, %v374_v27 }
  0x19   : > { %v496_v38 = vsel %vm487_vm0, %v493_v23, %v495_v33  ;;  %v791_v39 = vunpack.c.h.bf16 %v925_v15  ;;  %v862_v40 = vunpack.c.l.bf16 %v942_v28  ;;  %v794_v41 = vunpack.c.l.bf16 %v926_v29 }
  0x1a   : > { %v633_v44 = vmax.f32 %v597_v34, 0.0  ;;  %v634_v45 = vmax.f32 %v598_v35, 0.0  ;;  %v635_v46 = vmax.f32 %v599_v36, 0.0  ;;  %v600_v47 = vadd.f32 %v496_v38, %v417_v37  ;;  %v946_v34 = vld [vmem:[%s1017_s21 + $0x30] sm:$0xff]  }
  0x1b   : > { %v375_v48 = vmul.f32 %v862_v40, %v1028_v1  ;;  %v497_v49 = vrot.slane %v791_v39, 3  ;;  %v863_v50 = vunpack.c.h.bf16 %v942_v28  ;;  %v499_v51 = vrot.slane %v794_v41, 3  ;;  %v930_v39 = vld [vmem:[%s1022_s24 + $0x40] sm:$0xff]  }
  0x1c   : > { %669 = vst [vmem:[%s1057_s6] sm:$0xff] %v633_v44  ;;  %670 = vst [vmem:[%s1057_s6 + $0x8] sm:$0xff] %v634_v45  ;;  %v636_v52 = vmax.f32 %v600_v47, 0.0  ;;  %v795_v53 = vunpack.c.h.bf16 %v926_v29  ;;  %v866_v54 = vunpack.c.l.bf16 %v943_v42  ;;  %v798_v55 = vunpack.c.l.bf16 %v927_v43 }
  0x1d   : > { %671 = vst [vmem:[%s1057_s6 + $0x10] sm:$0xff] %v635_v46  ;;  %v418_v57 = vadd.f32 %v1037_v12, %v375_v48  ;;  %v498_v58 = vsel %vm487_vm0, %v495_v33, %v497_v49  ;;  %v376_v59 = vmul.f32 %v863_v50, %v1028_v1  ;;  %v500_v60 = vsel %vm487_vm0, %v497_v49, %v499_v51 }
  0x1e   : > { %672 = vst [vmem:[%s1057_s6 + $0x18] sm:$0xff] %v636_v52  ;;  %v377_v61 = vmul.f32 %v866_v54, %v1028_v1  ;;  %v501_v62 = vrot.slane %v795_v53, 3  ;;  %v867_v63 = vunpack.c.h.bf16 %v943_v42  ;;  %v503_v0 = vrot.slane %v798_v55, 3  ;;  %v947_v52 = vld [vmem:[%s1017_s21 + $0x38] sm:$0xff]  }
  0x1f   : > { %v601_v2 = vadd.f32 %v498_v58, %v418_v57  ;;  %v419_v3 = vadd.f32 %v1037_v12, %v376_v59  ;;  %v799_v4 = vunpack.c.h.bf16 %v927_v43  ;;  %v870_v5 = vunpack.c.l.bf16 %v944_v56 }
  0x20   : > { %v420_v7 = vadd.f32 %v1037_v12, %v377_v61  ;;  %v502_v8 = vsel %vm487_vm0, %v499_v51, %v501_v62  ;;  %v378_v9 = vmul.f32 %v867_v63, %v1028_v1  ;;  %v504_v10 = vsel %vm487_vm0, %v501_v62, %v503_v0  ;;  %v931_v61 = vld [vmem:[%s1022_s24 + $0x48] sm:$0xff]  }
  0x21   : > { %v637_v11 = vmax.f32 %v601_v2, 0.0  ;;  %v602_v13 = vadd.f32 %v500_v60, %v419_v3  ;;  %v379_v14 = vmul.f32 %v870_v5, %v1028_v1  ;;  %v505_v15 = vrot.slane %v799_v4, 3 }
  0x22   : > { %v603_v16 = vadd.f32 %v502_v8, %v420_v7  ;;  %v421_v17 = vadd.f32 %v1037_v12, %v378_v9  ;;  %v802_v18 = vunpack.c.l.bf16 %v928_v6  ;;  %v871_v19 = vunpack.c.h.bf16 %v944_v56  ;;  %v948_v7 = vld [vmem:[%s1017_s21 + $0x40] sm:$0xff]  }
  0x23   : > { %673 = vst [vmem:[%s1057_s6 + $0x20] sm:$0xff] %v637_v11  ;;  %v638_v22 = vmax.f32 %v602_v13, 0.0  ;;  %v422_v23 = vadd.f32 %v1037_v12, %v379_v14  ;;  %v506_v24 = vsel %vm487_vm0, %v503_v0, %v505_v15  ;;  %v803_v25 = vunpack.c.h.bf16 %v928_v6  ;;  %v932_v13 = vld [vmem:[%s1022_s24 + $0x50] sm:$0xff]  }
  0x24   : > { %v639_v26 = vmax.f32 %v603_v16, 0.0  ;;  %v604_v27 = vadd.f32 %v504_v10, %v421_v17  ;;  %v380_v28 = vmul.f32 %v871_v19, %v1028_v1  ;;  %v507_v29 = vrot.slane %v802_v18, 3 }
  0x25   : > { %674 = vst [vmem:[%s1057_s6 + $0x28] sm:$0xff] %v638_v22  ;;  %v605_v30 = vadd.f32 %v506_v24, %v422_v23  ;;  %v874_v31 = vunpack.c.l.bf16 %v945_v20  ;;  %v509_v32 = vrot.slane %v803_v25, 3  ;;  %v806_v33 = vunpack.c.l.bf16 %v929_v21 }
  0x26   : > { %675 = vst [vmem:[%s1057_s6 + $0x30] sm:$0xff] %v639_v26  ;;  %v640_v35 = vmax.f32 %v604_v27, 0.0  ;;  %v423_v36 = vadd.f32 %v1037_v12, %v380_v28  ;;  %v508_v37 = vsel %vm487_vm0, %v505_v15, %v507_v29  ;;  %v875_v38 = vunpack.c.h.bf16 %v945_v20  ;;  %v949_v26 = vld [vmem:[%s1017_s21 + $0x48] sm:$0xff]  }
  0x27   : > { %v641_v40 = vmax.f32 %v605_v30, 0.0  ;;  %v381_v41 = vmul.f32 %v874_v31, %v1028_v1  ;;  %v510_v42 = vsel %vm487_vm0, %v507_v29, %v509_v32  ;;  %v511_v43 = vrot.slane %v806_v33, 3  ;;  %v933_v31 = vld [vmem:[%s1022_s24 + $0x58] sm:$0xff]  }
  0x28   : > { %676 = vst [vmem:[%s1057_s6 + $0x38] sm:$0xff] %v640_v35  ;;  %v606_v44 = vadd.f32 %v508_v37, %v423_v36  ;;  %v382_v45 = vmul.f32 %v875_v38, %v1028_v1  ;;  %v807_v46 = vunpack.c.h.bf16 %v929_v21  ;;  %v878_v47 = vunpack.c.l.bf16 %v946_v34 }
  0x29   : > { %677 = vst [vmem:[%s1057_s6 + $0x40] sm:$0xff] %v641_v40  ;;  %v424_v48 = vadd.f32 %v1037_v12, %v381_v41  ;;  %v512_v49 = vsel %vm487_vm0, %v509_v32, %v511_v43  ;;  %v810_v50 = vunpack.c.l.bf16 %v930_v39  ;;  %v879_v51 = vunpack.c.h.bf16 %v946_v34 }
  0x2a   : > { %v642_v53 = vmax.f32 %v606_v44, 0.0  ;;  %v425_v54 = vadd.f32 %v1037_v12, %v382_v45  ;;  %v383_v55 = vmul.f32 %v878_v47, %v1028_v1  ;;  %v513_v56 = vrot.slane %v807_v46, 3 }
  0x2b   : > { %v607_v57 = vadd.f32 %v510_v42, %v424_v48  ;;  %v384_v58 = vmul.f32 %v879_v51, %v1028_v1  ;;  %v515_v59 = vrot.slane %v810_v50, 3  ;;  %v811_v60 = vunpack.c.h.bf16 %v930_v39  ;;  %v950_v48 = vld [vmem:[%s1017_s21 + $0x50] sm:$0xff]  }
  0x2c   : > { %678 = vst [vmem:[%s1057_s6 + $0x48] sm:$0xff] %v642_v53  ;;  %v608_v62 = vadd.f32 %v512_v49, %v425_v54  ;;  %v426_v63 = vadd.f32 %v1037_v12, %v383_v55  ;;  %v514_v0 = vsel %vm487_vm0, %v511_v43, %v513_v56  ;;  %v882_v2 = vunpack.c.l.bf16 %v947_v52  ;;  %v934_v49 = vld [vmem:[%s1022_s24 + $0x60] sm:$0xff]  }
  0x2d   : > { %v643_v3 = vmax.f32 %v607_v57, 0.0  ;;  %v427_v4 = vadd.f32 %v1037_v12, %v384_v58  ;;  %v516_v5 = vsel %vm487_vm0, %v513_v56, %v515_v59  ;;  %v517_v6 = vrot.slane %v811_v60, 3 }
  0x2e   : > { %v644_v8 = vmax.f32 %v608_v62, 0.0  ;;  %v609_v9 = vadd.f32 %v514_v0, %v426_v63  ;;  %v385_v10 = vmul.f32 %v882_v2, %v1028_v1  ;;  %v814_v11 = vunpack.c.l.bf16 %v931_v61  ;;  %v951_v62 = vld [vmem:[%s1017_s21 + $0x58] sm:$0xff]  }
  0x2f   : > { %679 = vst [vmem:[%s1057_s6 + $0x50] sm:$0xff] %v643_v3  ;;  %v610_v14 = vadd.f32 %v516_v5, %v427_v4  ;;  %v518_v15 = vsel %vm487_vm0, %v515_v59, %v517_v6  ;;  %v883_v16 = vunpack.c.h.bf16 %v947_v52  ;;  %v815_v17 = vunpack.c.h.bf16 %v931_v61  ;;  %v935_v4 = vld [vmem:[%s1022_s24 + $0x68] sm:$0xff]  }
  0x30   : > { %680 = vst [vmem:[%s1057_s6 + $0x58] sm:$0xff] %v644_v8  ;;  %v645_v18 = vmax.f32 %v609_v9, 0.0  ;;  %v428_v19 = vadd.f32 %v1037_v12, %v385_v10  ;;  %v519_v20 = vrot.slane %v814_v11, 3  ;;  %v886_v21 = vunpack.c.l.bf16 %v948_v7 }
  0x31   : > { %v646_v22 = vmax.f32 %v610_v14, 0.0  ;;  %v386_v23 = vmul.f32 %v883_v16, %v1028_v1  ;;  %v521_v24 = vrot.slane %v815_v17, 3  ;;  %v818_v25 = vunpack.c.l.bf16 %v932_v13 }
  0x32   : > { %681 = vst [vmem:[%s1057_s6 + $0x60] sm:$0xff] %v645_v18  ;;  %v611_v27 = vadd.f32 %v518_v15, %v428_v19  ;;  %v520_v28 = vsel %vm487_vm0, %v517_v6, %v519_v20  ;;  %v387_v29 = vmul.f32 %v886_v21, %v1028_v1  ;;  %v887_v30 = vunpack.c.h.bf16 %v948_v7  ;;  %v952_v18 = vld [vmem:[%s1017_s21 + $0x60] sm:$0xff]  }
  0x33   : > { %682 = vst [vmem:[%s1057_s6 + $0x68] sm:$0xff] %v646_v22  ;;  %v429_v32 = vadd.f32 %v1037_v12, %v386_v23  ;;  %v522_v33 = vsel %vm487_vm0, %v519_v20, %v521_v24  ;;  %v523_v34 = vrot.slane %v818_v25, 3  ;;  %v819_v35 = vunpack.c.h.bf16 %v932_v13  ;;  %v936_v23 = vld [vmem:[%s1022_s24 + $0x70] sm:$0xff]  }
  0x34   : > { %v647_v36 = vmax.f32 %v611_v27, 0.0  ;;  %v430_v37 = vadd.f32 %v1037_v12, %v387_v29  ;;  %v388_v38 = vmul.f32 %v887_v30, %v1028_v1  ;;  %v890_v39 = vunpack.c.l.bf16 %v949_v26 }
  0x35   : > { %v612_v40 = vadd.f32 %v520_v28, %v429_v32  ;;  %v524_v41 = vsel %vm487_vm0, %v521_v24, %v523_v34  ;;  %v525_v42 = vrot.slane %v819_v35, 3  ;;  %v822_v43 = vunpack.c.l.bf16 %v933_v31 }
  0x36   : > { %683 = vst [vmem:[%s1057_s6 + $0x70] sm:$0xff] %v647_v36  ;;  %v613_v44 = vadd.f32 %v522_v33, %v430_v37  ;;  %v431_v45 = vadd.f32 %v1037_v12, %v388_v38  ;;  %v389_v46 = vmul.f32 %v890_v39, %v1028_v1  ;;  %v891_v47 = vunpack.c.h.bf16 %v949_v26  ;;  %v953_v36 = vld [vmem:[%s1017_s21 + $0x68] sm:$0xff]  }
  0x37   : > { %v648_v50 = vmax.f32 %v612_v40, 0.0  ;;  %v526_v51 = vsel %vm487_vm0, %v523_v34, %v525_v42  ;;  %v527_v52 = vrot.slane %v822_v43, 3  ;;  %v823_v53 = vunpack.c.h.bf16 %v933_v31 }
  0x38   : > { %v649_v54 = vmax.f32 %v613_v44, 0.0  ;;  %v614_v55 = vadd.f32 %v524_v41, %v431_v45  ;;  %v432_v56 = vadd.f32 %v1037_v12, %v389_v46  ;;  %v390_v57 = vmul.f32 %v891_v47, %v1028_v1  ;;  %v937_v41 = vld [vmem:[%s1022_s24 + $0x78] sm:$0xff]  }
  0x39   : > { %684 = vst [vmem:[%s1057_s6 + $0x78] sm:$0xff] %v648_v50  ;;  %v528_v58 = vsel %vm487_vm0, %v525_v42, %v527_v52  ;;  %v894_v59 = vunpack.c.l.bf16 %v950_v48  ;;  %v529_v60 = vrot.slane %v823_v53, 3  ;;  %v826_v61 = vunpack.c.l.bf16 %v934_v49 }
  0x3a   : > { %685 = vst [vmem:[%s1057_s6 + $0x80] sm:$0xff] %v649_v54  ;;  %v650_v63 = vmax.f32 %v614_v55, 0.0  ;;  %v615_v0 = vadd.f32 %v526_v51, %v432_v56  ;;  %v433_v2 = vadd.f32 %v1037_v12, %v390_v57  ;;  %v895_v3 = vunpack.c.h.bf16 %v950_v48  ;;  %v954_v54 = vld [vmem:[%s1017_s21 + $0x70] sm:$0xff]  }
  0x3b   : > { %v391_v5 = vmul.f32 %v894_v59, %v1028_v1  ;;  %v530_v6 = vsel %vm487_vm0, %v527_v52, %v529_v60  ;;  %v531_v7 = vrot.slane %v826_v61, 3  ;;  %v827_v8 = vunpack.c.h.bf16 %v934_v49  ;;  %v938_v59 = vld [vmem:[%s1022_s24 + $0x80] sm:$0xff]  }
  0x3c   : > { %686 = vst [vmem:[%s1057_s6 + $0x88] sm:$0xff] %v650_v63  ;;  %v651_v9 = vmax.f32 %v615_v0, 0.0  ;;  %v616_v10 = vadd.f32 %v528_v58, %v433_v2  ;;  %v392_v11 = vmul.f32 %v895_v3, %v1028_v1  ;;  %v898_v13 = vunpack.c.l.bf16 %v951_v62 }
  0x3d   : > { %v434_v14 = vadd.f32 %v1037_v12, %v391_v5  ;;  %v532_v15 = vsel %vm487_vm0, %v529_v60, %v531_v7  ;;  %v533_v16 = vrot.slane %v827_v8, 3  ;;  %v830_v17 = vunpack.c.l.bf16 %v935_v4 }
  0x3e   : > { %687 = vst [vmem:[%s1057_s6 + $0x90] sm:$0xff] %v651_v9  ;;  %v652_v19 = vmax.f32 %v616_v10, 0.0  ;;  %v435_v20 = vadd.f32 %v1037_v12, %v392_v11  ;;  %v393_v21 = vmul.f32 %v898_v13, %v1028_v1  ;;  %v899_v22 = vunpack.c.h.bf16 %v951_v62 }
  0x3f   : > { %v617_v24 = vadd.f32 %v530_v6, %v434_v14  ;;  %v534_v25 = vsel %vm487_vm0, %v531_v7, %v533_v16  ;;  %v535_v26 = vrot.slane %v830_v17, 3  ;;  %v831_v27 = vunpack.c.h.bf16 %v935_v4  ;;  %v955_v14 = vld [vmem:[%s1017_s21 + $0x78] sm:$0xff]  }
  0x40   : > { %688 = vst [vmem:[%s1057_s6 + $0x98] sm:$0xff] %v652_v19  ;;  %v618_v28 = vadd.f32 %v532_v15, %v435_v20  ;;  %v436_v29 = vadd.f32 %v1037_v12, %v393_v21  ;;  %v394_v30 = vmul.f32 %v899_v22, %v1028_v1  ;;  %v902_v31 = vunpack.c.l.bf16 %v952_v18  ;;  %v939_v15 = vld [vmem:[%s1022_s24 + $0x88] sm:$0xff]  }
  0x41   : > { %v653_v32 = vmax.f32 %v617_v24, 0.0  ;;  %v536_v33 = vsel %vm487_vm0, %v533_v16, %v535_v26  ;;  %v537_v34 = vrot.slane %v831_v27, 3  ;;  %v834_v35 = vunpack.c.l.bf16 %v936_v23 }
  0x42   : > { %v654_v37 = vmax.f32 %v618_v28, 0.0  ;;  %v619_v38 = vadd.f32 %v534_v25, %v436_v29  ;;  %v437_v39 = vadd.f32 %v1037_v12, %v394_v30  ;;  %v395_v40 = vmul.f32 %v902_v31, %v1028_v1  ;;  %v956_v28 = vld [vmem:[%s1017_s21 + $0x80] sm:$0xff]  }
  0x43   : > { %689 = vst [vmem:[%s1057_s6 + $0xa0] sm:$0xff] %v653_v32  ;;  %v538_v42 = vsel %vm487_vm0, %v535_v26, %v537_v34  ;;  %v903_v43 = vunpack.c.h.bf16 %v952_v18  ;;  %v539_v44 = vrot.slane %v834_v35, 3  ;;  %v835_v45 = vunpack.c.h.bf16 %v936_v23 }
  0x44   : > { %690 = vst [vmem:[%s1057_s6 + $0xa8] sm:$0xff] %v654_v37  ;;  %v655_v46 = vmax.f32 %v619_v38, 0.0  ;;  %v620_v47 = vadd.f32 %v536_v33, %v437_v39  ;;  %v438_v48 = vadd.f32 %v1037_v12, %v395_v40  ;;  %v906_v49 = vunpack.c.l.bf16 %v953_v36  ;;  %v940_v33 = vld [vmem:[%s1022_s24 + $0x90] sm:$0xff]  }
  0x45   : > { %v396_v50 = vmul.f32 %v903_v43, %v1028_v1  ;;  %v540_v51 = vsel %vm487_vm0, %v537_v34, %v539_v44  ;;  %v541_v52 = vrot.slane %v835_v45, 3  ;;  %v838_v53 = vunpack.c.l.bf16 %v937_v41 }
  0x46   : > { %691 = vst [vmem:[%s1057_s6 + $0xb0] sm:$0xff] %v655_v46  ;;  %v656_v55 = vmax.f32 %v620_v47, 0.0  ;;  %v621_v56 = vadd.f32 %v538_v42, %v438_v48  ;;  %v397_v57 = vmul.f32 %v906_v49, %v1028_v1  ;;  %v907_v58 = vunpack.c.h.bf16 %v953_v36  ;;  %v957_v46 = vld [vmem:[%s1017_s21 + $0x88] sm:$0xff]  }
  0x47   : > { %v439_v60 = vadd.f32 %v1037_v12, %v396_v50  ;;  %v542_v61 = vsel %vm487_vm0, %v539_v44, %v541_v52  ;;  %v543_v62 = vrot.slane %v838_v53, 3  ;;  %v839_v63 = vunpack.c.h.bf16 %v937_v41 }
  0x48   : > { %692 = vst [vmem:[%s1057_s6 + $0xb8] sm:$0xff] %v656_v55  ;;  %v657_v0 = vmax.f32 %v621_v56, 0.0  ;;  %v440_v2 = vadd.f32 %v1037_v12, %v397_v57  ;;  %v398_v3 = vmul.f32 %v907_v58, %v1028_v1  ;;  %v910_v4 = vunpack.c.l.bf16 %v954_v54 }
  0x49   : > { %v622_v5 = vadd.f32 %v540_v51, %v439_v60  ;;  %v544_v6 = vsel %vm487_vm0, %v541_v52, %v543_v62  ;;  %v545_v7 = vrot.slane %v839_v63, 3  ;;  %v842_v8 = vunpack.c.l.bf16 %v938_v59  ;;  %v254_v51 = vld [vmem:[%s1022_s24 + $0x98] sm:$0x3] }
  0x4a   : > { %693 = vst [vmem:[%s1057_s6 + $0xc0] sm:$0xff] %v657_v0  ;;  %v623_v9 = vadd.f32 %v542_v61, %v440_v2  ;;  %v441_v10 = vadd.f32 %v1037_v12, %v398_v3  ;;  %v399_v11 = vmul.f32 %v910_v4, %v1028_v1  ;;  %v911_v13 = vunpack.c.h.bf16 %v954_v54 }
  0x4b   : > { %v658_v16 = vmax.f32 %v622_v5, 0.0  ;;  %v546_v17 = vsel %vm487_vm0, %v543_v62, %v545_v7  ;;  %v547_v18 = vrot.slane %v842_v8, 3  ;;  %v843_v19 = vunpack.c.h.bf16 %v938_v59 }
  0x4c   : > { %v659_v20 = vmax.f32 %v623_v9, 0.0  ;;  %v624_v21 = vadd.f32 %v544_v6, %v441_v10  ;;  %v442_v22 = vadd.f32 %v1037_v12, %v399_v11  ;;  %v400_v23 = vmul.f32 %v911_v13, %v1028_v1 }
  0x4d   : > { %694 = vst [vmem:[%s1057_s6 + $0xc8] sm:$0xff] %v658_v16  ;;  %v548_v24 = vsel %vm487_vm0, %v545_v7, %v547_v18  ;;  %v914_v25 = vunpack.c.l.bf16 %v955_v14  ;;  %v549_v26 = vrot.slane %v843_v19, 3  ;;  %v846_v27 = vunpack.c.l.bf16 %v939_v15 }
  0x4e   : > { %695 = vst [vmem:[%s1057_s6 + $0xd0] sm:$0xff] %v659_v20  ;;  %v660_v29 = vmax.f32 %v624_v21, 0.0  ;;  %v625_v30 = vadd.f32 %v546_v17, %v442_v22  ;;  %v443_v31 = vadd.f32 %v1037_v12, %v400_v23  ;;  %v915_v32 = vunpack.c.h.bf16 %v955_v14 }
  0x4f   : > { %v401_v34 = vmul.f32 %v914_v25, %v1028_v1  ;;  %v550_v35 = vsel %vm487_vm0, %v547_v18, %v549_v26  ;;  %v551_v36 = vrot.slane %v846_v27, 3  ;;  %v847_v37 = vunpack.c.h.bf16 %v939_v15 }
  0x50   : > { %696 = vst [vmem:[%s1057_s6 + $0xd8] sm:$0xff] %v660_v29  ;;  %v661_v38 = vmax.f32 %v625_v30, 0.0  ;;  %v626_v39 = vadd.f32 %v548_v24, %v443_v31  ;;  %v402_v40 = vmul.f32 %v915_v32, %v1028_v1  ;;  %v918_v41 = vunpack.c.l.bf16 %v956_v28 }
  0x51   : > { %v444_v42 = vadd.f32 %v1037_v12, %v401_v34  ;;  %v552_v43 = vsel %vm487_vm0, %v549_v26, %v551_v36  ;;  %v553_v44 = vrot.slane %v847_v37, 3  ;;  %v850_v45 = vunpack.c.l.bf16 %v940_v33 }
  0x52   : > { %697 = vst [vmem:[%s1057_s6 + $0xe0] sm:$0xff] %v661_v38  ;;  %v662_v47 = vmax.f32 %v626_v39, 0.0  ;;  %v445_v48 = vadd.f32 %v1037_v12, %v402_v40  ;;  %v403_v49 = vmul.f32 %v918_v41, %v1028_v1  ;;  %v919_v50 = vunpack.c.h.bf16 %v956_v28 }
  0x53   : > { %v627_v52 = vadd.f32 %v550_v35, %v444_v42  ;;  %v554_v53 = vsel %vm487_vm0, %v551_v36, %v553_v44  ;;  %v555_v54 = vrot.slane %v850_v45, 3  ;;  %v851_v55 = vunpack.c.h.bf16 %v940_v33 }
  0x54   : > { %698 = vst [vmem:[%s1057_s6 + $0xe8] sm:$0xff] %v662_v47  ;;  %v628_v56 = vadd.f32 %v552_v43, %v445_v48  ;;  %v446_v57 = vadd.f32 %v1037_v12, %v403_v49  ;;  %v404_v58 = vmul.f32 %v919_v50, %v1028_v1  ;;  %v922_v59 = vunpack.c.l.bf16 %v957_v46 }
  0x55   : > { %v663_v60 = vmax.f32 %v627_v52, 0.0  ;;  %v556_v61 = vsel %vm487_vm0, %v553_v44, %v555_v54  ;;  %v557_v62 = vrot.slane %v851_v55, 3  ;;  %v291_v63 = vunpack.c.l.bf16 %v254_v51 }
  0x56   : > { %v664_v0 = vmax.f32 %v628_v56, 0.0  ;;  %v629_v2 = vadd.f32 %v554_v53, %v446_v57  ;;  %v447_v3 = vadd.f32 %v1037_v12, %v404_v58  ;;  %v405_v4 = vmul.f32 %v922_v59, %v1028_v1 }
  0x57   : > { %699 = vst [vmem:[%s1057_s6 + $0xf0] sm:$0xff] %v663_v60  ;;  %v558_v5 = vsel %vm487_vm0, %v555_v54, %v557_v62  ;;  %v923_v6 = vunpack.c.h.bf16 %v957_v46  ;;  %v559_v7 = vrot.slane %v291_v63, 3 }
  0x58   : > { %700 = vst [vmem:[%s1057_s6 + $0xf8] sm:$0xff] %v664_v0  ;;  %v665_v8 = vmax.f32 %v629_v2, 0.0  ;;  %v630_v9 = vadd.f32 %v556_v61, %v447_v3  ;;  %v448_v10 = vadd.f32 %v1037_v12, %v405_v4 }
  0x59   : > { %v406_v11 = vmul.f32 %v923_v6, %v1028_v1  ;;  %v560_v15 = vsel %vm487_vm0, %v557_v62, %v559_v7 }
  0x5a   : > { %701 = vst [vmem:[%s1057_s6 + $0x100] sm:$0xff] %v665_v8  ;;  %v666_v13 = vmax.f32 %v630_v9, 0.0  ;;  %v631_v14 = vadd.f32 %v558_v5, %v448_v10 }
  0x5b   : > { %v449_v16 = vadd.f32 %v1037_v12, %v406_v11 }
  0x5c   : > { %702 = vst [vmem:[%s1057_s6 + $0x108] sm:$0xff] %v666_v13  ;;  %v667_v17 = vmax.f32 %v631_v14, 0.0 }
  0x5d   : > { %v632_v18 = vadd.f32 %v560_v15, %v449_v16 }
  0x5e   : > { %703 = vst [vmem:[%s1057_s6 + $0x110] sm:$0xff] %v667_v17 }
  0x5f   : > { %v668_v19 = vmax.f32 %v632_v18, 0.0 }
  0x61   : > { %704 = vst [vmem:[%s1057_s6 + $0x118] sm:$0xff] %v668_v19 }
  0x62 PF: > { %s14_s15 = sadd.s32 1, %s975_s15  }
  0x63   : > { %p11_p4 = scmp.ge.s32.totalorder %s14_s15, 4  }
  0x65   :  { %13 = sbr.rel (!%p11_p4) target bundleno = 1 (0x1), region = 69 }

// kernel: basic_block_forward.4
= control target key start
LH: loop header
LB: loop body
LE: loop exit
PB: predicated region body
PF: predicated region fallthrough
CT: control target
= control target key end

     0   :  { %s7095_s21 = smov 0   ;;  %s9327_s0 = inlined_call_operand.vmem [shape: bf16[2,288,128], index: 0, kind: input, shape index: {}]   ;;  %s9328_s1 = inlined_call_operand.vmem [shape: f32[1,128], index: 1, kind: input, shape index: {}]   ;;  %s9329_s2 = inlined_call_operand.vmem [shape: f32[1,128], index: 2, kind: input, shape index: {}]   ;;  %s9330_s3 = inlined_call_operand.vmem [shape: bf16[9,128,128], index: 3, kind: input, shape index: {}]   ;;  %s9331_s4 = inlined_call_operand.vmem [shape: bf16[2,288,128], index: 4, kind: output, shape index: {0}]   ;;  %s9332_s5 = inlined_call_operand.vmem [shape: f32[2,8,128], index: 5, kind: output, shape index: {1}]   ;;  %s9333_s6 = inlined_call_operand.vmem [shape: f32[2,8,128], index: 6, kind: output, shape index: {2}]  }
   0x1 LB: > { %s5361_s22 = sadd.s32 4294967295, %s7057_s21   ;;  %p5365_p0 = scmp.ge.s32.totalorder %s7057_s21, 1  ;;  %s7057_s21 = sphi %s7095_s21, %s17_s21  }
   0x2   : > { %p217_p1 = scmp.lt.s32.totalorder %s7057_s21, 3 }
   0x4   : > { %p218_p2 = pnand %p5365_p0, %p217_p1 }
   0x6   : > { %221 = sbr.rel (%p218_p2) target bundleno = 738 (0x2e2), region = 36 }
   0xd   : > { %v6930_v0 = vld [vmem:[%s9330_s3 + $0x100] sm:$0xff]   ;;  %p255_p3 = scmp.lt.s32.totalorder %s5361_s22, 1  ;;  %v274_v1 = vlaneseq  ;;  %v6932_v3 = vld [vmem:[%s9330_s3 + $0x108] sm:$0xff]   ;;  %v7059_v4 = vmov 0   ;;  %v6934_v6 = vld [vmem:[%s9330_s3 + $0x110] sm:$0xff]   ;;  %vm9334_vm0 = vcmask 1040384  }
   0xe   : > { %v6931_v2 = vld [vmem:[%s9330_s3 + $0x40] sm:$0xff]   ;;  %6284 = vmatprep.subr.bf16.mxu0 %v6930_v0  ;;  %1031 = vst [vmem:[#allocation2] sm:$0xff] %v7059_v4  ;;  %1032 = vst [vmem:[#allocation2 + $0x8] sm:$0xff] %v7059_v4  ;;  %v6933_v5 = vld [vmem:[%s9330_s3 + $0x48] sm:$0xff]   ;;  %v7187_v41 = vrot.slane %v7059_v4, 7 }
   0xf   : > { %1033 = vst [vmem:[#allocation2 + $0xa0] sm:$0xff] %v7059_v4  ;;  %1034 = vst [vmem:[#allocation2 + $0xa8] sm:$0xff] %v7059_v4  ;;  %6076 = vmatprep.subr.bf16.mxu1 %v6931_v2  ;;  %6285 = vmatpush3.bf16.msra.mxu0 %v6930_v0  ;;  %s9860_s22 = smov (!%p255_p3, %s5361_s22), 1  ;;  %v7120_v7 = vshrl.u32 %v274_v1, 7  ;;  %v6935_v8 = vld [vmem:[%s9330_s3 + $0x50] sm:$0xff]   ;;  %v6936_v9 = vld [vmem:[%s9330_s3 + $0x118] sm:$0xff]  }
  0x10   : > { %6077 = vmatpush3.bf16.msra.mxu1 %v6931_v2  ;;  %6286 = vmatprep.subr.bf16.mxu0 %v6932_v3  ;;  %s6848_s11 = smul.u32 144, %s9860_s22  ;;  %v6937_v11 = vld [vmem:[%s9330_s3 + $0x58] sm:$0xff]   ;;  %v6938_v15 = vld [vmem:[%s9330_s3 + $0x120] sm:$0xff]   ;;  %v6940_v19 = vld [vmem:[%s9330_s3 + $0x128] sm:$0xff]  }
  0x11   : > { %6078 = vmatprep.subr.bf16.mxu1 %v6933_v5  ;;  %v276_v10 = vadd.s32 8, %v7120_v7  ;;  %v277_v12 = vadd.s32 16, %v7120_v7  ;;  %v278_v13 = vadd.s32 24, %v7120_v7  ;;  %v7136_v14 = vadd.s32 1, %v7120_v7  ;;  %v6939_v17 = vld [vmem:[%s9330_s3 + $0x60] sm:$0xff]   ;;  %v6941_v21 = vld [vmem:[%s9330_s3 + $0x68] sm:$0xff]  }
  0x12   : > { %s7149_s24 = scalar_lea.vmem %s9327_s0, %s6848_s11  ;;  %v7171_v30 = vld [vmem:[%s9328_s1] ss:$0 sm:$0xff]  ;;  %v6942_v42 = vld [vmem:[%s9330_s3 + $0x130] sm:$0xff]   ;;  %v6944_v52 = vld [vmem:[%s9330_s3 + $0x138] sm:$0xff]   ;;  %v279_v61 = vadd.s32 32, %v7120_v7  ;;  %s9221_s15 = scalar_lea.vmem %s9331_s4, %s6848_s11 }
  0x13   : > { %6287 = vmatpush3.bf16.msra.mxu0 %v6932_v3  ;;  %v312_v16 = vadd.s32 1, %v276_v10  ;;  %v313_v18 = vadd.s32 1, %v277_v12  ;;  %v7154_v20 = vadd.s32 1, %v278_v13  ;;  %v5647_v26 = vld [vmem:[%s7149_s24] sm:$0xff]   ;;  %v5808_v27 = vld [vmem:[%s7149_s24 + $0x8] sm:$0xff]   ;;  %v6943_v43 = vld [vmem:[%s9330_s3 + $0x70] sm:$0xff]  }
  0x14   : > { %6079 = vmatpush3.bf16.msra.mxu1 %v6933_v5  ;;  %6288 = vmatprep.subr.bf16.mxu0 %v6934_v6  ;;  %v7160_v22 = vmul.u32.u64.low 3817748708, %v7136_v14  ;;  %v7161_v23 = vmul.u32.u64.high 3817748708, %v7136_v14, %v7160_v22  ;;  %v5648_v28 = vunpack.c.l.bf16 %v5647_v26  ;;  %v5649_v29 = vunpack.c.h.bf16 %v5647_v26  ;;  %v7176_v31 = vld [vmem:[%s9329_s2] ss:$0 sm:$0xff]  ;;  %v6945_v57 = vld [vmem:[%s9330_s3 + $0x78] sm:$0xff]   ;;  %s5368_s11 = sshll.u32 %s9860_s22, 3 }
  0x15   : > { %6080 = vmatprep.subr.bf16.mxu1 %v6935_v8  ;;  %v7163_v24 = vmul.u32.u64.low 3817748708, %v312_v16  ;;  %v7164_v25 = vmul.u32.u64.high 3817748708, %v312_v16, %v7163_v24  ;;  %v7178_v32 = vmul.u32.u64.low 3817748708, %v313_v18  ;;  %v7179_v33 = vmul.u32.u64.high 3817748708, %v313_v18, %v7178_v32  ;;  %v1408_v40 = vld [vmem:[#allocation2] sm:$0x80]  ;;  %s268_s18 = scalar_lea.vmem %s9332_s5, %s5368_s11  ;;  %s272_s23 = scalar_lea.vmem %s9333_s6, %s5368_s11 }
  0x16   : > { %v7182_v34 = vmul.u32.u64.low 3817748708, %v7154_v20  ;;  %v7183_v35 = vmul.u32.u64.high 3817748708, %v7154_v20, %v7182_v34  ;;  %v5652_v36 = vunpack.c.l.bf16 %v5808_v27  ;;  %v5653_v37 = vunpack.c.h.bf16 %v5808_v27  ;;  %v7240_v13 = vld [vmem:[%s9330_s3] sm:$0xff]  }
  0x17   : > { %6289 = vmatpush3.bf16.msra.mxu0 %v6934_v6  ;;  %v1114_v38 = vmul.f32 %v5648_v28, %v7171_v30  ;;  %v1115_v39 = vmul.f32 %v5649_v29, %v7171_v30  ;;  %v353_v44 = vshrl.u32 %v7161_v23, 4  ;;  %v364_v45 = vshrl.u32 %v7164_v25, 4 }
  0x18   : > { %6081 = vmatpush3.bf16.msra.mxu1 %v6935_v8  ;;  %6290 = vmatprep.subr.bf16.mxu0 %v6936_v9  ;;  %v1116_v46 = vmul.f32 %v5652_v36, %v7171_v30  ;;  %v1117_v47 = vmul.f32 %v5653_v37, %v7171_v30  ;;  %v375_v50 = vshrl.u32 %v7179_v33, 4  ;;  %v1446_v51 = vrot.slane %v1408_v40, 7 }
  0x19   : > { %6082 = vmatprep.subr.bf16.mxu1 %v6937_v11  ;;  %v7200_v48 = vadd.f32 %v7176_v31, %v1114_v38  ;;  %v7203_v49 = vadd.f32 %v7176_v31, %v1115_v39  ;;  %v354_v53 = vmul.u32 18, %v353_v44  ;;  %v365_v54 = vmul.u32 18, %v364_v45  ;;  %v6948_v45 = vld [vmem:[%s9330_s3 + $0x148] sm:$0xff]  }
  0x1a   : > { %v386_v55 = vshrl.u32 %v7183_v35, 4  ;;  %v7211_v56 = vadd.f32 %v7176_v31, %v1116_v46  ;;  %v376_v59 = vmul.u32 18, %v375_v50  ;;  %v7218_v60 = vadd.f32 %v7176_v31, %v1117_v47  ;;  %v6950_v50 = vld [vmem:[%s9330_s3 + $0x8] sm:$0xff]  }
  0x1b   : > { %6291 = vmatpush3.bf16.msra.mxu0 %v6936_v9  ;;  %v1193_v58 = vmax.f32 %v7200_v48, 0.0  ;;  %v355_v62 = vsub.s32 %v7136_v14, %v354_v53  ;;  %v366_v63 = vsub.s32 %v312_v16, %v365_v54  ;;  %v1194_v0 = vmax.f32 %v7203_v49, 0.0  ;;  %v5809_v16 = vld [vmem:[%s7149_s24 + $0x10] sm:$0xff]  }
  0x1c   : > { %6083 = vmatpush3.bf16.msra.mxu1 %v6937_v11  ;;  %6292 = vmatprep.subr.bf16.mxu0 %v6938_v15  ;;  %v387_v1 = vmul.u32 18, %v386_v55  ;;  %v377_v2 = vsub.s32 %v313_v18, %v376_v59  ;;  %v1195_v3 = vmax.f32 %v7211_v56, 0.0  ;;  %v1196_v4 = vmax.f32 %v7218_v60, 0.0  ;;  %v7235_v11 = vld [vmem:[%s9330_s3 + $0x140] sm:$0xff]   ;;  %v5810_v59 = vld [vmem:[%s7149_s24 + $0x18] sm:$0xff]  }
  0x1d   : > { %6084 = vmatprep.subr.bf16.mxu1 %v6939_v17  ;;  %v1448_v5 = vsel %vm9334_vm0, %v1446_v51, %v7187_v41  ;;  %vm743_vm1 = vcmp.ne.s32.totalorder %v355_v62, 0  ;;  %vm744_vm2 = vcmp.ne.s32.totalorder %v366_v63, 0  ;;  %vm779_vm3 = vcmp.lt.s32.totalorder %v355_v62, 0 }
  0x1e   : > { %vm780_vm4 = vcmp.lt.s32.totalorder %v366_v63, 0  ;;  %6092 = vmatprep.mubr.bf16.mxu1 %v1448_v5  ;;  %vm7227_vm5 = vmand %vm779_vm3, %vm743_vm1  ;;  %v851_v8 = vadd.s32 18, %v355_v62  ;;  %v852_v9 = vadd.s32 18, %v366_v63  ;;  %v388_v10 = vsub.s32 %v7154_v20, %v387_v1 }
  0x1f   : > { %6293 = vmatpush3.bf16.msra.mxu0 %v6938_v15  ;;  %vm745_vm6 = vcmp.ne.s32.totalorder %v377_v2, 0  ;;  %vm816_vm7 = vmand %vm780_vm4, %vm744_vm2  ;;  %vm781_vm8 = vcmp.lt.s32.totalorder %v377_v2, 0  ;;  %v853_v12 = vadd.s32 18, %v377_v2  ;;  %v280_v14 = vadd.s32 40, %v7120_v7 }
  0x20   : > { %6085 = vmatpush3.bf16.msra.mxu1 %v6939_v17  ;;  %6294 = vmatprep.subr.bf16.mxu0 %v6940_v19  ;;  %v7243_v15 = vadd.s32 1, %v279_v61  ;;  %v887_v17 = vsel %vm7227_vm5, %v851_v8, %v355_v62  ;;  %v888_v18 = vsel %vm816_vm7, %v852_v9, %v366_v63  ;;  %vm746_vm9 = vcmp.ne.s32.totalorder %v388_v10, 0  ;;  %vm817_vm11 = vmand %vm781_vm8, %vm745_vm6  ;;  %v6949_v61 = vld [vmem:[%s9330_s3 + $0x150] sm:$0xff]  }
  0x21   : > { %6086 = vmatprep.subr.bf16.mxu1 %v6941_v21  ;;  %vm782_vm10 = vcmp.lt.s32.totalorder %v388_v10, 0  ;;  %vm923_vm12 = vcmp.ge.s32.totalorder %v887_v17, 1  ;;  %vm924_vm13 = vcmp.ge.s32.totalorder %v888_v18, 1  ;;  %vm959_vm14 = vcmp.le.s32.totalorder %v887_v17, 16  ;;  %v6951_v17 = vld [vmem:[%s9330_s3 + $0x158] sm:$0xff]  }
  0x22   : > { %vm960_vm15 = vcmp.le.s32.totalorder %v888_v18, 16  ;;  %vm818_vm1 = vmand %vm782_vm10, %vm746_vm9  ;;  %v854_v20 = vadd.s32 18, %v388_v10  ;;  %v7253_v22 = vadd.s32 1, %v280_v14  ;;  %v5656_v23 = vunpack.c.l.bf16 %v5809_v16 }
  0x23   : > { %6295 = vmatpush3.bf16.msra.mxu0 %v6940_v19  ;;  %vm7249_vm2 = vmand %vm923_vm12, %vm959_vm14  ;;  %v9474_v19 = vmov 0  ;;  %v9477_v24 = vmov 0  ;;  %v5657_v26 = vunpack.c.h.bf16 %v5809_v16  ;;  %v9480_v29 = vmov 0 }
  0x24   : > { %6087 = vmatpush3.bf16.msra.mxu1 %v6941_v21  ;;  %6296 = vmatprep.subr.bf16.mxu0 %v6942_v42  ;;  %v9475_v19 = vsel %vm7249_vm2, 4294967295, %v9474_v19  ;;  %v889_v21 = vsel %vm817_vm11, %v853_v12, %v377_v2  ;;  %vm7255_vm3 = vmand %vm924_vm13, %vm960_vm15  ;;  %v1301_v25 = vsel %vm7249_vm2, %v1193_v58, 0.0  ;;  %v890_v28 = vsel %vm818_vm1, %v854_v20, %v388_v10 }
  0x25   : > { %6088 = vmatprep.subr.bf16.mxu1 %v6943_v43  ;;  %9476 = vst [vmem:[#allocation3_spill] sm:$0xff] %v9475_v19  ;;  %v9478_v24 = vsel %vm7255_vm3, 4294967295, %v9477_v24  ;;  %vm925_vm4 = vcmp.ge.s32.totalorder %v889_v21, 1  ;;  %vm961_vm5 = vcmp.le.s32.totalorder %v889_v21, 16  ;;  %v1302_v27 = vsel %vm7255_vm3, %v1194_v0, 0.0  ;;  %vm7027_vm10 = vmpackc.low %vm7255_vm3, %vm7249_vm2  ;;  %v6956_v21 = vld [vmem:[%s9330_s3 + $0x18] sm:$0xff]  }
  0x26   : > { %9479 = vst [vmem:[#allocation4_spill] sm:$0xff] %v9478_v24  ;;  %vm7268_vm6 = vmand %vm925_vm4, %vm961_vm5  ;;  %v7274_v32 = vmul.u32.u64.low 3817748708, %v7243_v15  ;;  %v7275_v33 = vmul.u32.u64.high 3817748708, %v7243_v15, %v7274_v32  ;;  %v7277_v34 = vpack.c.bf16 %v1302_v27, %v1301_v25  ;;  %vm926_vm7 = vcmp.ge.s32.totalorder %v890_v28, 1 }
  0x27   : > { %6297 = vmatpush3.bf16.msra.mxu0 %v6942_v42  ;;  %v9481_v29 = vsel %vm7268_vm6, 4294967295, %v9480_v29  ;;  %vm962_vm8 = vcmp.le.s32.totalorder %v890_v28, 16  ;;  %v1303_v35 = vsel %vm7268_vm6, %v1195_v3, 0.0  ;;  %v9483_v36 = vmov 0 }
  0x28   : > { %6089 = vmatpush3.bf16.msra.mxu1 %v6943_v43  ;;  %6298 = vmatprep.subr.bf16.mxu0 %v6944_v52  ;;  %9482 = vst [vmem:[#allocation5_spill] sm:$0xff] %v9481_v29  ;;  %vm7283_vm9 = vmand %vm926_vm7, %vm962_vm8  ;;  %v7288_v37 = vmul.u32.u64.low 3817748708, %v7253_v22  ;;  %v7289_v38 = vmul.u32.u64.high 3817748708, %v7253_v22, %v7288_v37  ;;  %v1118_v39 = vmul.f32 %v5656_v23, %v7171_v30  ;;  %v1119_v40 = vmul.f32 %v5657_v26, %v7171_v30 }
  0x29   : > { %6090 = vmatprep.subr.bf16.mxu1 %v6945_v57  ;;  %v9484_v36 = vsel %vm7283_vm9, 4294967295, %v9483_v36  ;;  %v7028_v42 = vpack.c.bf16 %v1194_v0, %v1193_v58  ;;  %v1304_v43 = vsel %vm7283_vm9, %v1196_v4, 0.0  ;;  %v1449_v44 = vrot.slane %v7277_v34, 7  ;;  %vm7030_vm11 = vmpackc.low %vm7283_vm9, %vm7268_vm6  ;;  %v7398_v37 = vld [vmem:[%s7149_s24 + $0x20] sm:$0xff]  }
  0x2a   : > { %9485 = vst [vmem:[#allocation6_spill] sm:$0xff] %v9484_v36  ;;  %v7309_v46 = vpack.c.bf16 %v1304_v43, %v1303_v35  ;;  %v397_v47 = vshrl.u32 %v7275_v33, 4  ;;  %v7313_v48 = vadd.f32 %v7176_v31, %v1118_v39  ;;  %v7316_v49 = vadd.f32 %v7176_v31, %v1119_v40 }
  0x2b   : > { %6299 = vmatpush3.bf16.msra.mxu0 %v6944_v52  ;;  %7029 = vmatprep.mubr.msk.bf16.mxu0 %vm7027_vm10, %v7028_v42  ;;  %v1450_v51 = vsel %vm9334_vm0, %v7187_v41, %v1449_v44  ;;  %v281_v52 = vadd.s32 48, %v7120_v7  ;;  %v282_v53 = vadd.s32 56, %v7120_v7  ;;  %v7328_v54 = vshrl.u32 %v7277_v34, 16 }
  0x2c   : > { %6091 = vmatpush3.bf16.msra.mxu1 %v6945_v57  ;;  %6336 = vmatprep.subr.bf16.mxu0 %v7235_v11  ;;  %1356 = vst [vmem:[#allocation2 + $0x18] sm:$0xff] %v7309_v46  ;;  %v2550_v55 = vshrl.u32 %v7309_v46, 16  ;;  %v7031_v41 = vpack.c.bf16 %v1196_v4, %v1195_v3  ;;  %v398_v57 = vmul.u32 18, %v397_v47  ;;  %v408_v58 = vshrl.u32 %v7289_v38, 4  ;;  %v6953_v4 = vld [vmem:[%s9330_s3 + $0x10] sm:$0xff]  }
  0x2d   : > { %6128 = vmatprep.subr.bf16.mxu1 %v7240_v13  ;;  %v2553_v62 = vshll.u32 %v7309_v46, 16  ;;  %v1197_v56 = vmax.f32 %v7313_v48, 0.0  ;;  %v1198_v60 = vmax.f32 %v7316_v49, 0.0  ;;  %v317_v63 = vadd.s32 1, %v281_v52  ;;  %v6960_v48 = vld [vmem:[%s9330_s3 + $0x28] sm:$0xff]  }
  0x2e   : > { %7032 = vmatmul.mubr.msk.bf16.vlgmr.msra.gmra.mrb[0].mxu0 %vm7030_vm11, %v7031_v41  ;;  %v7352_v0 = vrot.slane %v2550_v55, 7  ;;  %v399_v1 = vsub.s32 %v7243_v15, %v398_v57  ;;  %v409_v2 = vmul.u32 18, %v408_v58  ;;  %v318_v3 = vadd.s32 1, %v282_v53 }
  0x2f   : > { %6093 = vmatmul.mubr.bf16.vlgmr.msra.gmra.mrb[0].mxu1 %v1450_v51  ;;  %6337 = vmatpush3.bf16.msra.mxu0 %v7235_v11  ;;  %v7358_v5 = vmul.u32.u64.low 3817748708, %v317_v63  ;;  %v7359_v6 = vmul.u32.u64.high 3817748708, %v317_v63, %v7358_v5  ;;  %v5660_v8 = vunpack.c.l.bf16 %v5810_v59  ;;  %v5661_v9 = vunpack.c.h.bf16 %v5810_v59 }
  0x30   : > { %6129 = vmatpush3.bf16.msra.mxu1 %v7240_v13  ;;  %6338 = vmatprep.subr.bf16.mxu0 %v6948_v45  ;;  %v7364_v10 = vor.u32 %v2553_v62, %v7352_v0  ;;  %v410_v11 = vsub.s32 %v7253_v22, %v409_v2  ;;  %vm747_vm12 = vcmp.ne.s32.totalorder %v399_v1, 0  ;;  %vm783_vm13 = vcmp.lt.s32.totalorder %v399_v1, 0 }
  0x31   : > { %6130 = vmatprep.subr.bf16.mxu1 %v6950_v50  ;;  %vm7367_vm14 = vmand %vm783_vm13, %vm747_vm12  ;;  %v855_v13 = vadd.s32 18, %v399_v1  ;;  %v7371_v14 = vmul.u32.u64.low 3817748708, %v318_v3  ;;  %v7372_v15 = vmul.u32.u64.high 3817748708, %v318_v3, %v7371_v14  ;;  %v1120_v16 = vmul.f32 %v5660_v8, %v7171_v30 }
  0x32   : > { %vm748_vm15 = vcmp.ne.s32.totalorder %v410_v11, 0  ;;  %vm784_vm1 = vcmp.lt.s32.totalorder %v410_v11, 0  ;;  %v856_v18 = vadd.s32 18, %v410_v11  ;;  %v1121_v20 = vmul.f32 %v5661_v9, %v7171_v30  ;;  %v5812_v14 = vld [vmem:[%s7149_s24 + $0x28] sm:$0xff]  }
  0x33   : > { %6339 = vmatpush3.bf16.msra.mxu0 %v6948_v45  ;;  %vm820_vm4 = vmand %vm784_vm1, %vm748_vm15  ;;  %v891_v22 = vsel %vm7367_vm14, %v855_v13, %v399_v1  ;;  %v419_v23 = vshrl.u32 %v7359_v6, 4  ;;  %v7386_v25 = vadd.f32 %v7176_v31, %v1120_v16  ;;  %v1451_v26 = vrot.slane %v7309_v46, 7  ;;  %v6952_v45 = vld [vmem:[%s9330_s3 + $0x160] sm:$0xff]  }
  0x34   : > { %6131 = vmatpush3.bf16.msra.mxu1 %v6950_v50  ;;  %6340 = vmatprep.subr.bf16.mxu0 %v6949_v61  ;;  %v892_v27 = vsel %vm820_vm4, %v856_v18, %v410_v11  ;;  %vm927_vm5 = vcmp.ge.s32.totalorder %v891_v22, 1  ;;  %vm963_vm7 = vcmp.le.s32.totalorder %v891_v22, 16  ;;  %v7390_v28 = vadd.f32 %v7176_v31, %v1121_v20 }
  0x35   : > { %6132 = vmatprep.subr.bf16.mxu1 %v6953_v4  ;;  %vm928_vm8 = vcmp.ge.s32.totalorder %v892_v27, 1  ;;  %vm964_vm10 = vcmp.le.s32.totalorder %v892_v27, 16  ;;  %vm7392_vm11 = vmand %vm927_vm5, %vm963_vm7  ;;  %v9488_v32 = vmov 0  ;;  %v420_v33 = vmul.u32 18, %v419_v23 }
  0x36   : > { %v9489_v32 = vsel %vm7392_vm11, 4294967295, %v9488_v32  ;;  %v430_v35 = vshrl.u32 %v7372_v15, 4  ;;  %vm7400_vm12 = vmand %vm928_vm8, %vm964_vm10  ;;  %v9491_v38 = vmov 0  ;;  %v1305_v39 = vsel %vm7392_vm11, %v1197_v56, 0.0 }
  0x37   : > { %9490 = vst [vmem:[#allocation7_spill] sm:$0xff] %v9489_v32  ;;  %6341 = vmatpush3.bf16.msra.mxu0 %v6949_v61  ;;  %v9492_v38 = vsel %vm7400_vm12, 4294967295, %v9491_v38  ;;  %v1199_v40 = vmax.f32 %v7386_v25, 0.0  ;;  %v1200_v42 = vmax.f32 %v7390_v28, 0.0  ;;  %v1452_v43 = vsel %vm9334_vm0, %v1449_v44, %v1451_v26  ;;  %v6958_v44 = vld [vmem:[%s9330_s3 + $0x20] sm:$0xff]   ;;  %vm7033_vm15 = vmpackc.low %vm7400_vm12, %vm7392_vm11 }
  0x38   : > { %6133 = vmatpush3.bf16.msra.mxu1 %v6953_v4  ;;  %9493 = vst [vmem:[#allocation8_spill] sm:$0xff] %v9492_v38  ;;  %6342 = vmatprep.subr.bf16.mxu0 %v6951_v17  ;;  %v1306_v47 = vsel %vm7400_vm12, %v1198_v60, 0.0  ;;  %v421_v50 = vsub.s32 %v317_v63, %v420_v33  ;;  %v431_v51 = vmul.u32 18, %v430_v35  ;;  %v283_v52 = vadd.s32 64, %v7120_v7  ;;  %v6954_v63 = vld [vmem:[%s9330_s3 + $0x168] sm:$0xff]  }
  0x39   : > { %6134 = vmatprep.subr.bf16.mxu1 %v6956_v21  ;;  %6096 = vmatprep.mubr.bf16.mxu1 %v1452_v43  ;;  %v7424_v53 = vpack.c.bf16 %v1306_v47, %v1305_v39  ;;  %v284_v41 = vadd.s32 72, %v7120_v7  ;;  %v5664_v57 = vunpack.c.l.bf16 %v7398_v37  ;;  %v5665_v58 = vunpack.c.h.bf16 %v7398_v37  ;;  %v6957_v39 = vld [vmem:[%s9330_s3 + $0x178] sm:$0xff]   ;;  %v5824_v38 = vld [vmem:[%s7149_s24 + $0x88] sm:$0xff]  }
  0x3a   : > { %v432_v59 = vsub.s32 %v318_v3, %v431_v51  ;;  %vm749_vm13 = vcmp.ne.s32.totalorder %v421_v50, 0  ;;  %vm785_vm14 = vcmp.lt.s32.totalorder %v421_v50, 0  ;;  %v857_v61 = vadd.s32 18, %v421_v50  ;;  %v6964_v51 = vld [vmem:[%s9330_s3 + $0x38] sm:$0xff]  }
  0x3b   : > { %6343 = vmatpush3.bf16.msra.mxu0 %v6951_v17  ;;  %1357 = vst [vmem:[#allocation2 + $0x20] sm:$0xff] %v7424_v53  ;;  %v2558_v1 = vshrl.u32 %v7424_v53, 16  ;;  %v2561_v2 = vshll.u32 %v7424_v53, 16  ;;  %v7034_v3 = vpack.c.bf16 %v1198_v60, %v1197_v56  ;;  %vm821_vm1 = vmand %vm785_vm14, %vm749_vm13  ;;  %v1453_v4 = vrot.slane %v7424_v53, 7  ;;  %v6955_v17 = vld [vmem:[%s9330_s3 + $0x170] sm:$0xff]  }
  0x3c   : > { %6135 = vmatpush3.bf16.msra.mxu1 %v6956_v21  ;;  %v7444_v5 = vadd.s32 1, %v283_v52  ;;  %6344 = vmatprep.subr.bf16.mxu0 %v6952_v45  ;;  %vm750_vm4 = vcmp.ne.s32.totalorder %v432_v59, 0  ;;  %vm786_vm5 = vcmp.lt.s32.totalorder %v432_v59, 0  ;;  %v858_v6 = vadd.s32 18, %v432_v59 }
  0x3d   : > { %7035 = vmatprep.mubr.msk.bf16.mxu0 %vm7033_vm15, %v7034_v3  ;;  %v893_v8 = vsel %vm821_vm1, %v857_v61, %v421_v50  ;;  %6136 = vmatprep.subr.bf16.mxu1 %v6958_v44  ;;  %v7451_v49 = vrot.slane %v2558_v1, 7  ;;  %vm822_vm7 = vmand %vm786_vm5, %vm750_vm4  ;;  %v1454_v56 = vsel %vm9334_vm0, %v1451_v26, %v1453_v4  ;;  %v9494_v9 = vmov 0  ;;  %v6962_v26 = vld [vmem:[%s9330_s3 + $0x30] sm:$0xff]  }
  0x3e   : > { %vm929_vm8 = vcmp.ge.s32.totalorder %v893_v8, 1  ;;  %vm965_vm10 = vcmp.le.s32.totalorder %v893_v8, 16  ;;  %v894_v60 = vsel %vm822_vm7, %v858_v6, %v432_v59  ;;  %6097 = vmatmul.mubr.bf16.gmra.mrb[4].mxu1 %v1454_v56  ;;  %v320_v11 = vadd.s32 1, %v284_v41 }
  0x3f   : > { %vm7456_vm13 = vmand %vm929_vm8, %vm965_vm10  ;;  %v7461_v12 = vmul.u32.u64.low 3817748708, %v7444_v5  ;;  %v7462_v13 = vmul.u32.u64.high 3817748708, %v7444_v5, %v7461_v12  ;;  %6345 = vmatpush3.bf16.msra.mxu0 %v6952_v45  ;;  %v7468_v15 = vor.u32 %v2561_v2, %v7451_v49  ;;  %vm930_vm14 = vcmp.ge.s32.totalorder %v894_v60, 1 }
  0x40   : > { %v9495_v9 = vsel %vm7456_vm13, 4294967295, %v9494_v9  ;;  %vm966_vm15 = vcmp.le.s32.totalorder %v894_v60, 16  ;;  %v1307_v16 = vsel %vm7456_vm13, %v1199_v40, 0.0  ;;  %6346 = vmatprep.subr.bf16.mxu0 %v6954_v63  ;;  %6137 = vmatpush3.bf16.msra.mxu1 %v6958_v44  ;;  %v9497_v18 = vmov 0 }
  0x41   : > { %9496 = vst [vmem:[#allocation9_spill] sm:$0xff] %v9495_v9  ;;  %vm7477_vm1 = vmand %vm930_vm14, %vm966_vm15  ;;  %v7481_v20 = vmul.u32.u64.low 3817748708, %v320_v11  ;;  %v7482_v21 = vmul.u32.u64.high 3817748708, %v320_v11, %v7481_v20  ;;  %v1122_v22 = vmul.f32 %v5664_v57, %v7171_v30  ;;  %v1123_v23 = vmul.f32 %v5665_v58, %v7171_v30  ;;  %6138 = vmatprep.subr.bf16.mxu1 %v6960_v48 }
  0x42   : > { %v9498_v18 = vsel %vm7477_vm1, 4294967295, %v9497_v18  ;;  %v1308_v27 = vsel %vm7477_vm1, %v1200_v42, 0.0  ;;  %v285_v33 = vadd.s32 80, %v7120_v7  ;;  %v286_v35 = vadd.s32 88, %v7120_v7  ;;  %vm7036_vm4 = vmpackc.low %vm7477_vm1, %vm7456_vm13  ;;  %v8346_v32 = vld [vmem:[#allocation2 + $0x20] sm:$0xff] }
  0x43   : > { %9499 = vst [vmem:[#allocation10_spill] sm:$0xff] %v9498_v18  ;;  %v5668_v37 = vunpack.c.l.bf16 %v5812_v14  ;;  %v7498_v43 = vpack.c.bf16 %v1308_v27, %v1307_v16  ;;  %v441_v45 = vshrl.u32 %v7462_v13, 4  ;;  %v7502_v47 = vadd.f32 %v7176_v31, %v1122_v22  ;;  %6347 = vmatpush3.bf16.msra.mxu0 %v6954_v63  ;;  %v7547_v16 = vld [vmem:[%s9330_s3 + $0x180] sm:$0xff]  }
  0x44   : > { %v7505_v50 = vadd.f32 %v7176_v31, %v1123_v23  ;;  %v321_v52 = vadd.s32 1, %v285_v33  ;;  %v7510_v44 = vadd.s32 1, %v286_v35  ;;  %v5669_v41 = vunpack.c.h.bf16 %v5812_v14  ;;  %6348 = vmatprep.subr.bf16.mxu0 %v6955_v17  ;;  %6139 = vmatpush3.bf16.msra.mxu1 %v6960_v48 }
  0x45   : > { %v1124_v57 = vmul.f32 %v5668_v37, %v7171_v30  ;;  %1358 = vst [vmem:[#allocation2 + $0x28] sm:$0xff] %v7498_v43  ;;  %v2566_v58 = vshrl.u32 %v7498_v43, 16  ;;  %v2569_v59 = vshll.u32 %v7498_v43, 16  ;;  %v7037_v61 = vpack.c.bf16 %v1200_v42, %v1199_v40  ;;  %6140 = vmatprep.subr.bf16.mxu1 %v6962_v26 }
  0x46   : > { %v442_v63 = vmul.u32 18, %v441_v45  ;;  %v452_v3 = vshrl.u32 %v7482_v21, 4  ;;  %v1201_v6 = vmax.f32 %v7502_v47, 0.0  ;;  %v1202_v8 = vmax.f32 %v7505_v50, 0.0  ;;  %v5813_v45 = vld [vmem:[%s7149_s24 + $0x30] sm:$0xff]  }
  0x47   : > { %7038 = vmatmul.mubr.msk.bf16.gmra.mrb[4].mxu0 %vm7036_vm4, %v7037_v61  ;;  %v7527_v48 = vmul.u32.u64.low 3817748708, %v321_v52  ;;  %v7528_v56 = vmul.u32.u64.high 3817748708, %v321_v52, %v7527_v48  ;;  %v7532_v60 = vrot.slane %v2566_v58, 7  ;;  %v1125_v40 = vmul.f32 %v5669_v41, %v7171_v30 }
  0x48   : > { %v443_v25 = vsub.s32 %v7444_v5, %v442_v63  ;;  %v453_v28 = vmul.u32 18, %v452_v3  ;;  %6349 = vmatpush3.bf16.msra.mxu0 %v6955_v17  ;;  %v7537_v42 = vmul.u32.u64.low 3817748708, %v7510_v44  ;;  %v7538_v12 = vmul.u32.u64.high 3817748708, %v7510_v44, %v7537_v42  ;;  %6141 = vmatpush3.bf16.msra.mxu1 %v6962_v26 }
  0x49   : > { %v7541_v13 = vadd.f32 %v7176_v31, %v1124_v57  ;;  %v1455_v14 = vrot.slane %v7498_v43, 7  ;;  %6350 = vmatprep.subr.bf16.mxu0 %v6957_v39  ;;  %v7552_v5 = vor.u32 %v2569_v59, %v7532_v60  ;;  %6142 = vmatprep.subr.bf16.mxu1 %v6964_v51  ;;  %v463_v21 = vshrl.u32 %v7528_v56, 4 }
  0x4a   : > { %v454_v17 = vsub.s32 %v320_v11, %v453_v28  ;;  %vm751_vm5 = vcmp.ne.s32.totalorder %v443_v25, 0  ;;  %vm787_vm7 = vcmp.lt.s32.totalorder %v443_v25, 0  ;;  %v859_v20 = vadd.s32 18, %v443_v25 }
  0x4b   : > { %vm823_vm8 = vmand %vm787_vm7, %vm751_vm5  ;;  %v7556_v22 = vadd.f32 %v7176_v31, %v1125_v40  ;;  %v1203_v23 = vmax.f32 %v7541_v13, 0.0  ;;  %v1456_v11 = vsel %vm9334_vm0, %v1453_v4, %v1455_v14  ;;  %v464_v33 = vmul.u32 18, %v463_v21 }
  0x4c   : > { %vm752_vm10 = vcmp.ne.s32.totalorder %v454_v17, 0  ;;  %vm788_vm14 = vcmp.lt.s32.totalorder %v454_v17, 0  ;;  %v860_v26 = vadd.s32 18, %v454_v17  ;;  %6351 = vmatpush3.bf16.msra.mxu0 %v6957_v39  ;;  %v895_v27 = vsel %vm823_vm8, %v859_v20, %v443_v25  ;;  %6100 = vmatprep.mubr.bf16.mxu1 %v1456_v11  ;;  %v8354_v29 = vld [vmem:[#allocation2 + $0x28] sm:$0xff] }
  0x4d   : > { %vm824_vm15 = vmand %vm788_vm14, %vm752_vm10  ;;  %v474_v35 = vshrl.u32 %v7538_v12, 4  ;;  %v1204_v37 = vmax.f32 %v7556_v22, 0.0  ;;  %6388 = vmatprep.subr.bf16.mxu0 %v7547_v16  ;;  %vm931_vm4 = vcmp.ge.s32.totalorder %v895_v27, 1  ;;  %vm967_vm5 = vcmp.le.s32.totalorder %v895_v27, 16  ;;  %6143 = vmatpush3.bf16.msra.mxu1 %v6964_v51 }
  0x4e   : > { %v896_v41 = vsel %vm824_vm15, %v860_v26, %v454_v17  ;;  %v287_v57 = vadd.s32 96, %v7120_v7  ;;  %vm7569_vm1 = vmand %vm931_vm4, %vm967_vm5  ;;  %v9500_v4 = vmov 0  ;;  %v465_v39 = vsub.s32 %v321_v52, %v464_v33 }
  0x4f   : > { %vm932_vm7 = vcmp.ge.s32.totalorder %v896_v41, 1  ;;  %vm968_vm0 = vcmp.le.s32.totalorder %v896_v41, 16  ;;  %v9501_v4 = vsel %vm7569_vm1, 4294967295, %v9500_v4  ;;  %v475_v61 = vmul.u32 18, %v474_v35 }
  0x50   : > { %9502 = vst [vmem:[#allocation11_spill] sm:$0xff] %v9501_v4  ;;  %vm7573_vm8 = vmand %vm932_vm7, %vm968_vm0  ;;  %v9503_v63 = vmov 0  ;;  %v1309_v3 = vsel %vm7569_vm1, %v1201_v6, 0.0  ;;  %v288_v48 = vadd.s32 104, %v7120_v7  ;;  %v7582_v51 = vadd.s32 1, %v287_v57 }
  0x51   : > { %v9504_v63 = vsel %vm7573_vm8, 4294967295, %v9503_v63  ;;  %v5672_v56 = vunpack.c.l.bf16 %v5813_v45  ;;  %v1310_v52 = vsel %vm7573_vm8, %v1202_v8, 0.0  ;;  %v476_v25 = vsub.s32 %v7510_v44, %v475_v61  ;;  %vm7039_vm5 = vmpackc.low %vm7573_vm8, %vm7569_vm1 }
  0x52   : > { %9505 = vst [vmem:[#allocation12_spill] sm:$0xff] %v9504_v63  ;;  %vm753_vm0 = vcmp.ne.s32.totalorder %v465_v39, 0  ;;  %vm789_vm10 = vcmp.lt.s32.totalorder %v465_v39, 0  ;;  %v7589_v28 = vpack.c.bf16 %v1310_v52, %v1309_v3  ;;  %v861_v42 = vadd.s32 18, %v465_v39  ;;  %v5814_v3 = vld [vmem:[%s7149_s24 + $0x38] sm:$0xff]  }
  0x53   : > { %vm7591_vm14 = vmand %vm789_vm10, %vm753_vm0  ;;  %v7595_v12 = vadd.s32 1, %v288_v48  ;;  %v5673_v17 = vunpack.c.h.bf16 %v5813_v45  ;;  %vm754_vm15 = vcmp.ne.s32.totalorder %v476_v25, 0  ;;  %vm790_vm4 = vcmp.lt.s32.totalorder %v476_v25, 0 }
  0x54   : > { %v862_v20 = vadd.s32 18, %v476_v25  ;;  %v1126_v21 = vmul.f32 %v5672_v56, %v7171_v30  ;;  %1359 = vst [vmem:[#allocation2 + $0x30] sm:$0xff] %v7589_v28  ;;  %v9339_v44 = vshrl.u32 %v7589_v28, 16  ;;  %v2577_v26 = vshll.u32 %v7589_v28, 16  ;;  %vm826_vm7 = vmand %vm790_vm4, %vm754_vm15 }
  0x55   : > { %v7040_v11 = vpack.c.bf16 %v1202_v8, %v1201_v6  ;;  %v897_v27 = vsel %vm7591_vm14, %v861_v42, %v465_v39  ;;  %v1457_v33 = vrot.slane %v7589_v28, 7  ;;  %v1127_v45 = vmul.f32 %v5673_v17, %v7171_v30 }
  0x56   : > { %v898_v35 = vsel %vm826_vm7, %v862_v20, %v476_v25  ;;  %vm933_vm0 = vcmp.ge.s32.totalorder %v897_v27, 1  ;;  %vm969_vm10 = vcmp.le.s32.totalorder %v897_v27, 16  ;;  %v7615_v41 = vrot.slane %v9339_v44, 7 }
  0x57   : > { %7041 = vmatprep.mubr.msk.bf16.mxu0 %vm7039_vm5, %v7040_v11  ;;  %vm934_vm8 = vcmp.ge.s32.totalorder %v898_v35, 1  ;;  %vm970_vm1 = vcmp.le.s32.totalorder %v898_v35, 16  ;;  %vm7617_vm12 = vmand %vm933_vm0, %vm969_vm10  ;;  %v9509_v47 = vmov 0  ;;  %vm9512_vm14 = vcmask 1040384  }
  0x58   : > { %9508 = vst [vmem:[#allocation13_spill] sm:$0xff] %v7615_v41  ;;  %v9510_v47 = vsel %vm7617_vm12, 4294967295, %v9509_v47  ;;  %v1458_v50 = vsel %vm9512_vm14, %v1455_v14, %v1457_v33  ;;  %vm7624_vm15 = vmand %vm934_vm8, %vm970_vm1  ;;  %v9513_v6 = vmov 0  ;;  %v1311_v8 = vsel %vm7617_vm12, %v1203_v23, 0.0 }
  0x59   : > { %9511 = vst [vmem:[#allocation14_spill] sm:$0xff] %v9510_v47  ;;  %v9514_v6 = vsel %vm7624_vm15, 4294967295, %v9513_v6  ;;  %6101 = vmatmul.mubr.bf16.gmra.mrb[8].mxu1 %v1458_v50  ;;  %v7633_v57 = vmul.u32.u64.low 3817748708, %v7582_v51  ;;  %v7634_v39 = vmul.u32.u64.high 3817748708, %v7582_v51, %v7633_v57  ;;  %v7637_v61 = vadd.f32 %v7176_v31, %v1126_v21  ;;  %vm7042_vm1 = vmpackc.low %vm7624_vm15, %vm7617_vm12 }
  0x5a   : > { %9515 = vst [vmem:[#allocation15_spill] sm:$0xff] %v9514_v6  ;;  %v7643_v14 = vor.u32 %v2577_v26, %v7615_v41  ;;  %v1312_v48 = vsel %vm7624_vm15, %v1204_v37, 0.0  ;;  %v7650_v56 = vmul.u32.u64.low 3817748708, %v7595_v12  ;;  %v7651_v52 = vmul.u32.u64.high 3817748708, %v7595_v12, %v7650_v56  ;;  %vm9517_vm4 = vmmov %vm9512_vm14 }
  0x5b   : > { %v7654_v25 = vshll.u32 %v7277_v34, 16  ;;  %v7656_v40 = vpack.c.bf16 %v1312_v48, %v1311_v8  ;;  %v7659_v42 = vadd.f32 %v7176_v31, %v1127_v45  ;;  %v289_v17 = vadd.s32 112, %v7120_v7 }
  0x5c   : > { %v1205_v20 = vmax.f32 %v7637_v61, 0.0  ;;  %v290_v21 = vadd.s32 120, %v7120_v7  ;;  %v5676_v11 = vunpack.c.l.bf16 %v5814_v3  ;;  %v5677_v27 = vunpack.c.h.bf16 %v5814_v3 }
  0x5d   : > { %1360 = vst [vmem:[#allocation2 + $0x38] sm:$0xff] %v7656_v40  ;;  %v9340_v35 = vshrl.u32 %v7656_v40, 16  ;;  %v9344_v34 = vshll.u32 %v7656_v40, 16  ;;  %v7043_v45 = vpack.c.bf16 %v1204_v37, %v1203_v23  ;;  %v485_v50 = vshrl.u32 %v7634_v39, 4 }
  0x5e   : > { %v1206_v8 = vmax.f32 %v7659_v42, 0.0  ;;  %v496_v57 = vshrl.u32 %v7651_v52, 4  ;;  %v325_v3 = vadd.s32 1, %v289_v17  ;;  %v326_v48 = vadd.s32 1, %v290_v21 }
  0x5f   : > { %7044 = vmatmul.mubr.msk.bf16.gmra.mrb[8].mxu0 %vm7042_vm1, %v7043_v45  ;;  %v1128_v56 = vmul.f32 %v5676_v11, %v7171_v30  ;;  %v7681_v44 = vrot.slane %v9340_v35, 7  ;;  %v486_v13 = vmul.u32 18, %v485_v50  ;;  %v1129_v22 = vmul.f32 %v5677_v27, %v7171_v30 }
  0x60   : > { %v1459_v23 = vrot.slane %v7656_v40, 7  ;;  %v497_v37 = vmul.u32 18, %v496_v57  ;;  %v7685_v39 = vmul.u32.u64.low 3817748708, %v325_v3  ;;  %v7686_v45 = vmul.u32.u64.high 3817748708, %v325_v3, %v7685_v39 }
  0x61   : > { %9516 = vst [vmem:[#allocation16_spill] sm:$0xff] %v7681_v44  ;;  %v7689_v52 = vadd.f32 %v7176_v31, %v1128_v56  ;;  %v7694_v17 = vor.u32 %v9344_v34, %v7681_v44  ;;  %v487_v21 = vsub.s32 %v7582_v51, %v486_v13  ;;  %v7702_v27 = vadd.f32 %v7176_v31, %v1129_v22  ;;  %v6966_v39 = vld [vmem:[%s9330_s3 + $0x80] sm:$0xff]  }
  0x62   : > { %v7697_v11 = vmul.u32.u64.low 3817748708, %v326_v48  ;;  %v7698_v50 = vmul.u32.u64.high 3817748708, %v326_v48, %v7697_v11  ;;  %v498_v30 = vsub.s32 %v7595_v12, %v497_v37  ;;  %v1460_v56 = vsel %vm9517_vm4, %v1457_v33, %v1459_v23  ;;  %6180 = vmatprep.subr.bf16.mxu1 %v6966_v39 }
  0x63   : > { %v1207_v57 = vmax.f32 %v7689_v52, 0.0  ;;  %vm755_vm5 = vcmp.ne.s32.totalorder %v487_v21, 0  ;;  %vm791_vm7 = vcmp.lt.s32.totalorder %v487_v21, 0  ;;  %v863_v51 = vadd.s32 18, %v487_v21  ;;  %6104 = vmatprep.mubr.bf16.mxu1 %v1460_v56 }
  0x64   : > { %v3284_v13 = vrot.slane %v7654_v25, 1  ;;  %vm756_vm0 = vcmp.ne.s32.totalorder %v498_v30, 0  ;;  %vm792_vm10 = vcmp.lt.s32.totalorder %v498_v30, 0  ;;  %vm827_vm14 = vmand %vm791_vm7, %vm755_vm5  ;;  %v864_v31 = vadd.s32 18, %v498_v30  ;;  %v8392_v44 = vld [vmem:[#allocation2 + $0x38] sm:$0xff] }
  0x65   : > { %v507_v12 = vshrl.u32 %v7686_v45, 4  ;;  %vm828_vm1 = vmand %vm792_vm10, %vm756_vm0  ;;  %v899_v22 = vsel %vm827_vm14, %v863_v51, %v487_v21  ;;  %v518_v33 = vshrl.u32 %v7698_v50, 4  ;;  %v1208_v37 = vmax.f32 %v7702_v27, 0.0 }
  0x66   : > { %v3285_v11 = vor.u32 %v3284_v13, %v7328_v54  ;;  %v900_v35 = vsel %vm828_vm1, %v864_v31, %v498_v30  ;;  %vm935_vm4 = vcmp.ge.s32.totalorder %v899_v22, 1  ;;  %vm971_vm8 = vcmp.le.s32.totalorder %v899_v22, 16 }
  0x67   : > { %v508_v56 = vmul.u32 18, %v507_v12  ;;  %vm936_vm15 = vcmp.ge.s32.totalorder %v900_v35, 1  ;;  %vm972_vm12 = vcmp.le.s32.totalorder %v900_v35, 16  ;;  %vm7716_vm13 = vmand %vm935_vm4, %vm971_vm8  ;;  %v9518_v34 = vmov 0 }
  0x68   : > { %v9519_v34 = vsel %vm7716_vm13, 4294967295, %v9518_v34  ;;  %v519_v45 = vmul.u32 18, %v518_v33  ;;  %v3289_v21 = vrot.slane %v2553_v62, 1  ;;  %vm7722_vm5 = vmand %vm936_vm15, %vm972_vm12  ;;  %v9521_v50 = vmov 0 }
  0x69   : > { %9520 = vst [vmem:[#allocation17_spill] sm:$0xff] %v9519_v34  ;;  %v9522_v50 = vsel %vm7722_vm5, 4294967295, %v9521_v50  ;;  %v1313_v30 = vsel %vm7716_vm13, %v1205_v20, 0.0  ;;  %v509_v39 = vsub.s32 %v325_v3, %v508_v56  ;;  %v3297_v35 = vrot.slane %v2561_v2, 1  ;;  %vm7045_vm1 = vmpackc.low %vm7722_vm5, %vm7716_vm13 }
  0x6a   : > { %9523 = vst [vmem:[#allocation18_spill] sm:$0xff] %v9522_v50  ;;  %v291_v51 = vadd.s32 128, %v7120_v7  ;;  %v1314_v62 = vsel %vm7722_vm5, %v1206_v8, 0.0  ;;  %v520_v13 = vsub.s32 %v326_v48, %v519_v45  ;;  %vm9524_vm12 = vsmask.f32 7424  ;;  %v5815_v45 = vld [vmem:[%s7149_s24 + $0x40] sm:$0xff]  }
  0x6b   : > { %v3290_v31 = vsel %vm9524_vm12, %v3285_v11, %v3289_v21  ;;  %v3293_v12 = vor.u32 %v3289_v21, %v2550_v55  ;;  %v7740_v22 = vpack.c.bf16 %v1314_v62, %v1313_v30  ;;  %vm757_vm15 = vcmp.ne.s32.totalorder %v509_v39, 0  ;;  %vm9525_vm14 = vmmov %vm9524_vm12 }
  0x6c   : > { %vm793_vm8 = vcmp.lt.s32.totalorder %v509_v39, 0  ;;  %v865_v3 = vadd.s32 18, %v509_v39  ;;  %vm758_vm7 = vcmp.ne.s32.totalorder %v520_v13, 0  ;;  %vm794_vm0 = vcmp.lt.s32.totalorder %v520_v13, 0 }
  0x6d   : > { %vm829_vm10 = vmand %vm793_vm8, %vm757_vm15  ;;  %v866_v2 = vadd.s32 18, %v520_v13  ;;  %v7743_v33 = vsel %vm9525_vm14, %v3293_v12, %v3297_v35  ;;  %1361 = vst [vmem:[#allocation2 + $0x40] sm:$0xff] %v7740_v22  ;;  %v9346_v48 = vshrl.u32 %v7740_v22, 16  ;;  %v9347_v46 = vshll.u32 %v7740_v22, 16 }
  0x6e   : > { %v7046_v55 = vpack.c.bf16 %v1206_v8, %v1205_v20  ;;  %vm830_vm4 = vmand %vm794_vm0, %vm758_vm7  ;;  %v901_v11 = vsel %vm829_vm10, %v865_v3, %v509_v39  ;;  %v1461_v56 = vrot.slane %v7740_v22, 7  ;;  %v292_v30 = vadd.s32 136, %v7120_v7 }
  0x6f   : > { %v902_v21 = vsel %vm830_vm4, %v866_v2, %v520_v13  ;;  %vm937_vm12 = vcmp.ge.s32.totalorder %v901_v11, 1  ;;  %vm973_vm15 = vcmp.le.s32.totalorder %v901_v11, 16  ;;  %v7761_v62 = vrot.slane %v9346_v48, 7 }
  0x70   : > { %7047 = vmatprep.mubr.msk.bf16.mxu0 %vm7045_vm1, %v7046_v55  ;;  %vm938_vm8 = vcmp.ge.s32.totalorder %v902_v21, 1  ;;  %vm974_vm14 = vcmp.le.s32.totalorder %v902_v21, 16  ;;  %vm7763_vm5 = vmand %vm937_vm12, %vm973_vm15  ;;  %v9527_v61 = vmov 0  ;;  %vm9530_vm7 = vcmask 1040384  }
  0x71   : > { %9526 = vst [vmem:[#allocation19_spill] sm:$0xff] %v7761_v62  ;;  %v9528_v61 = vsel %vm7763_vm5, 4294967295, %v9527_v61  ;;  %v1462_v42 = vsel %vm9530_vm7, %v1459_v23, %v1461_v56  ;;  %vm7770_vm0 = vmand %vm938_vm8, %vm974_vm14  ;;  %v9531_v20 = vmov 0  ;;  %v1315_v8 = vsel %vm7763_vm5, %v1207_v57, 0.0 }
  0x72   : > { %9529 = vst [vmem:[#allocation20_spill] sm:$0xff] %v9528_v61  ;;  %v9532_v20 = vsel %vm7770_vm0, 4294967295, %v9531_v20  ;;  %6105 = vmatmul.mubr.bf16.gmra.mrb[12].mxu1 %v1462_v42  ;;  %v327_v39 = vadd.s32 1, %v291_v51  ;;  %v328_v13 = vadd.s32 1, %v292_v30  ;;  %v5680_v12 = vunpack.c.l.bf16 %v5815_v45  ;;  %v7797_v30 = vld [vmem:[%s9328_s1] ss:$0 sm:$0xff]  ;;  %vm7048_vm10 = vmpackc.low %vm7770_vm0, %vm7763_vm5 }
  0x73   : > { %9533 = vst [vmem:[#allocation21_spill] sm:$0xff] %v9532_v20  ;;  %v7781_v3 = vor.u32 %v9347_v46, %v7761_v62  ;;  %v1316_v23 = vsel %vm7770_vm0, %v1208_v37, 0.0  ;;  %v5681_v2 = vunpack.c.h.bf16 %v5815_v45  ;;  %v3301_v55 = vor.u32 %v3297_v35, %v2558_v1  ;;  %vm9537_vm4 = vmmov %vm9530_vm7 }
  0x74   : > { %v7789_v11 = vpack.c.bf16 %v1316_v23, %v1315_v8  ;;  %v7791_v21 = vmul.u32.u64.low 3817748708, %v327_v39  ;;  %v7792_v51 = vmul.u32.u64.high 3817748708, %v327_v39, %v7791_v21  ;;  %v1130_v42 = vmul.f32 %v7797_v30, %v5680_v12 }
  0x75   : > { %9534 = vst [vmem:[#allocation22_spill] sm:$0xff] %v7781_v3  ;;  %v7800_v48 = vmul.u32.u64.low 3817748708, %v328_v13  ;;  %v7801_v46 = vmul.u32.u64.high 3817748708, %v328_v13, %v7800_v48  ;;  %v1131_v45 = vmul.f32 %v7797_v30, %v5681_v2  ;;  %v3305_v53 = vrot.slane %v2569_v59, 1  ;;  %v7821_v59 = vld [vmem:[%s9329_s2] ss:$0 sm:$0xff] }
  0x76   : > { %1362 = vst [vmem:[#allocation2 + $0x48] sm:$0xff] %v7789_v11  ;;  %v9348_v1 = vshrl.u32 %v7789_v11, 16  ;;  %v9350_v35 = vshll.u32 %v7789_v11, 16  ;;  %v7049_v48 = vpack.c.bf16 %v1208_v37, %v1207_v57  ;;  %v9349_v8 = vrot.slane %v7789_v11, 7  ;;  %v5816_v37 = vld [vmem:[%s7149_s24 + $0x48] sm:$0xff]  }
  0x77   : > { %v7824_v12 = vadd.f32 %v7821_v59, %v1130_v42  ;;  %v7827_v23 = vadd.f32 %v7821_v59, %v1131_v45  ;;  %vm9535_vm1 = vsmask.f32 7424  ;;  %v3309_v27 = vor.u32 %v3305_v53, %v2566_v58 }
  0x78   : > { %7050 = vmatmul.mubr.msk.bf16.gmra.mrb[12].mxu0 %vm7048_vm10, %v7049_v48  ;;  %v3306_v52 = vsel %vm9535_vm1, %v3301_v55, %v3305_v53  ;;  %v7834_v57 = vrot.slane %v2577_v26, 1  ;;  %v7839_v2 = vrot.slane %v9348_v1, 7  ;;  %v529_v21 = vshrl.u32 %v7792_v51, 4  ;;  %vm9538_vm12 = vmmov %vm9535_vm1 }
  0x79   : > { %6352 = vmatprep.mubr.bf16.mxu0 %v3290_v31  ;;  %v1464_v31 = vsel %vm9537_vm4, %v1461_v56, %v9349_v8  ;;  %v1209_v55 = vmax.f32 %v7824_v12, 0.0  ;;  %v540_v43 = vshrl.u32 %v7801_v46, 4  ;;  %v1210_v58 = vmax.f32 %v7827_v23, 0.0 }
  0x7a   : > { %9536 = vst [vmem:[#allocation23_spill] sm:$0xff] %v7839_v2  ;;  %6108 = vmatprep.mubr.bf16.mxu1 %v1464_v31  ;;  %v3314_v26 = vsel %vm9538_vm12, %v3309_v27, %v7834_v57  ;;  %v293_v42 = vadd.s32 144, %v7120_v7  ;;  %v7854_v45 = vor.u32 %v9350_v35, %v7839_v2  ;;  %v530_v56 = vmul.u32 18, %v529_v21  ;;  %v6961_v21 = vld [vmem:[%s9330_s3 + $0x188] sm:$0xff]  }
  0x7b   : > { %v294_v51 = vadd.s32 152, %v7120_v7  ;;  %v5684_v53 = vunpack.c.l.bf16 %v5816_v37  ;;  %v541_v48 = vmul.u32 18, %v540_v43  ;;  %v5685_v31 = vunpack.c.h.bf16 %v5816_v37 }
  0x7c   : > { %9539 = vst [vmem:[#allocation24_spill] sm:$0xff] %v7854_v45  ;;  %v329_v12 = vadd.s32 1, %v293_v42  ;;  %v295_v46 = vadd.s32 160, %v7120_v7  ;;  %v531_v23 = vsub.s32 %v327_v39, %v530_v56  ;;  %v296_v8 = vadd.s32 168, %v7120_v7  ;;  %v5817_v56 = vld [vmem:[%s7149_s24 + $0x50] sm:$0xff]   ;;  %v7010_v45 = vld [vmem:[%s9330_s3 + $0x80] sm:$0xff]  }
  0x7d   : > { %v7858_v1 = vadd.s32 1, %v294_v51  ;;  %v1132_v27 = vmul.f32 %v7797_v30, %v5684_v53  ;;  %v542_v35 = vsub.s32 %v328_v13, %v541_v48  ;;  %v1133_v37 = vmul.f32 %v7797_v30, %v5685_v31  ;;  %v6963_v48 = vld [vmem:[%s9330_s3 + $0x190] sm:$0xff]  }
  0x7e   : > { %v7865_v20 = vmul.u32.u64.low 3817748708, %v329_v12  ;;  %v7866_v50 = vmul.u32.u64.high 3817748708, %v329_v12, %v7865_v20  ;;  %vm759_vm15 = vcmp.ne.s32.totalorder %v531_v23, 0  ;;  %vm795_vm8 = vcmp.lt.s32.totalorder %v531_v23, 0 }
  0x7f   : > { %v867_v39 = vadd.s32 18, %v531_v23  ;;  %v7871_v43 = vadd.f32 %v7821_v59, %v1132_v27  ;;  %vm760_vm14 = vcmp.ne.s32.totalorder %v542_v35, 0  ;;  %vm796_vm7 = vcmp.lt.s32.totalorder %v542_v35, 0  ;;  %vm831_vm10 = vmand %vm795_vm8, %vm759_vm15 }
  0x80   : > { %6353 = vmatmul.mubr.bf16.vlgmr.msra.gmra.mrb[0].mxu0 %v7743_v33  ;;  %v868_v42 = vadd.s32 18, %v542_v35  ;;  %v7874_v13 = vadd.f32 %v7821_v59, %v1133_v37  ;;  %vm832_vm1 = vmand %vm796_vm7, %vm760_vm14  ;;  %v7879_v33 = vmul.u32.u64.low 3817748708, %v7858_v1  ;;  %v7880_v51 = vmul.u32.u64.high 3817748708, %v7858_v1, %v7879_v33 }
  0x81   : > { %6356 = vmatprep.mubr.bf16.mxu0 %v3306_v52  ;;  %6389 = vmatpush3.bf16.msra.mxu0 %v7547_v16  ;;  %v903_v20 = vsel %vm831_vm10, %v867_v39, %v531_v23  ;;  %v551_v31 = vshrl.u32 %v7866_v50, 4  ;;  %v9540_v16 = vmov 0  ;;  %v331_v27 = vadd.s32 1, %v295_v46  ;;  %v6965_v46 = vld [vmem:[%s9330_s3 + $0x198] sm:$0xff]  }
  0x82   : > { %6390 = vmatprep.subr.bf16.mxu0 %v6961_v21  ;;  %v904_v52 = vsel %vm832_vm1, %v868_v42, %v542_v35  ;;  %vm939_vm4 = vcmp.ge.s32.totalorder %v903_v20, 1  ;;  %vm975_vm12 = vcmp.le.s32.totalorder %v903_v20, 16  ;;  %v9543_v37 = vmov 0 }
  0x83   : > { %vm940_vm15 = vcmp.ge.s32.totalorder %v904_v52, 1  ;;  %vm976_vm8 = vcmp.le.s32.totalorder %v904_v52, 16  ;;  %vm7887_vm14 = vmand %vm939_vm4, %vm975_vm12  ;;  %v552_v39 = vmul.u32 18, %v551_v31  ;;  %v332_v42 = vadd.s32 1, %v296_v8 }
  0x84   : > { %v9541_v16 = vsel %vm7887_vm14, 4294967295, %v9540_v16  ;;  %vm7892_vm7 = vmand %vm940_vm15, %vm976_vm8  ;;  %v1317_v35 = vsel %vm7887_vm14, %v1209_v55, 0.0  ;;  %v5688_v20 = vunpack.c.l.bf16 %v5817_v56  ;;  %v562_v33 = vshrl.u32 %v7880_v51, 4 }
  0x85   : > { %9542 = vst [vmem:[#allocation25_spill] sm:$0xff] %v9541_v16  ;;  %v9544_v37 = vsel %vm7892_vm7, 4294967295, %v9543_v37  ;;  %6391 = vmatpush3.bf16.msra.mxu0 %v6961_v21  ;;  %v1318_v50 = vsel %vm7892_vm7, %v1210_v58, 0.0  ;;  %v7901_v52 = vmul.u32.u64.low 3817748708, %v331_v27  ;;  %v7902_v53 = vmul.u32.u64.high 3817748708, %v331_v27, %v7901_v52 }
  0x86   : > { %9545 = vst [vmem:[#allocation26_spill] sm:$0xff] %v9544_v37  ;;  %6392 = vmatprep.subr.bf16.mxu0 %v6963_v48  ;;  %v7907_v23 = vpack.c.bf16 %v1318_v50, %v1317_v35  ;;  %v553_v55 = vsub.s32 %v329_v12, %v552_v39  ;;  %v7909_v31 = vmul.u32.u64.low 3817748708, %v332_v42  ;;  %v7910_v8 = vmul.u32.u64.high 3817748708, %v332_v42, %v7909_v31 }
  0x87   : > { %v563_v21 = vmul.u32 18, %v562_v33  ;;  %v5689_v37 = vunpack.c.h.bf16 %v5817_v56  ;;  %v1134_v58 = vmul.f32 %v7797_v30, %v5688_v20  ;;  %v9546_v51 = vshrl.u32 %v7589_v28, 16  ;;  %v6967_v28 = vld [vmem:[%s9330_s3 + $0x1a0] sm:$0xff]  }
  0x88   : > { %6357 = vmatmul.mubr.bf16.gmra.mrb[4].mxu0 %v3314_v26  ;;  %1363 = vst [vmem:[#allocation2 + $0x50] sm:$0xff] %v7907_v23  ;;  %v1465_v16 = vrot.slane %v7907_v23, 7  ;;  %vm761_vm10 = vcmp.ne.s32.totalorder %v553_v55, 0  ;;  %vm797_vm1 = vcmp.lt.s32.totalorder %v553_v55, 0  ;;  %v869_v35 = vadd.s32 18, %v553_v55 }
  0x89   : > { %v3317_v52 = vor.u32 %v7834_v57, %v9546_v51  ;;  %6393 = vmatpush3.bf16.msra.mxu0 %v6963_v48  ;;  %v564_v12 = vsub.s32 %v7858_v1, %v563_v21  ;;  %vm833_vm4 = vmand %vm797_vm1, %vm761_vm10  ;;  %v573_v26 = vshrl.u32 %v7902_v53, 4  ;;  %v1135_v56 = vmul.f32 %v7797_v30, %v5689_v37 }
  0x8a   : > { %v7922_v39 = vadd.f32 %v7821_v59, %v1134_v58  ;;  %6394 = vmatprep.subr.bf16.mxu0 %v6965_v46  ;;  %v9547_v57 = vrot.slane %v7789_v11, 7  ;;  %vm9548_vm12 = vcmask 1040384   ;;  %v905_v1 = vsel %vm833_vm4, %v869_v35, %v553_v55 }
  0x8b   : > { %v584_v20 = vshrl.u32 %v7910_v8, 4  ;;  %v9549_v53 = vshll.u32 %v7656_v40, 16  ;;  %vm762_vm15 = vcmp.ne.s32.totalorder %v564_v12, 0  ;;  %vm798_vm8 = vcmp.lt.s32.totalorder %v564_v12, 0 }
  0x8c   : > { %v1466_v48 = vsel %vm9548_vm12, %v9547_v57, %v1465_v16  ;;  %v870_v50 = vadd.s32 18, %v564_v12  ;;  %vm941_vm10 = vcmp.ge.s32.totalorder %v905_v1, 1  ;;  %vm834_vm1 = vmand %vm798_vm8, %vm762_vm15  ;;  %vm977_vm7 = vcmp.le.s32.totalorder %v905_v1, 16 }
  0x8d   : > { %v3321_v37 = vrot.slane %v9549_v53, 1  ;;  %6109 = vmatmul.mubr.bf16.gmra.mrb[16].mxu1 %v1466_v48  ;;  %v574_v33 = vmul.u32 18, %v573_v26  ;;  %v585_v31 = vmul.u32 18, %v584_v20  ;;  %v1178_v21 = vadd.f32 %v7821_v59, %v1135_v56  ;;  %6395 = vmatpush3.bf16.msra.mxu0 %v6965_v46  ;;  %vm7936_vm12 = vmand %vm941_vm10, %vm977_vm7  ;;  %v6969_v26 = vld [vmem:[%s9330_s3 + $0x1a8] sm:$0xff]  }
  0x8e   : > { %v906_v58 = vsel %vm834_vm1, %v870_v50, %v564_v12  ;;  %v9550_v55 = vmov 0  ;;  %v1213_v8 = vmax.f32 %v7922_v39, 0.0  ;;  %vm9553_vm4 = vsmask.f32 7424  ;;  %6396 = vmatprep.subr.bf16.mxu0 %v6967_v28  ;;  %v5818_v50 = vld [vmem:[%s7149_s24 + $0x58] sm:$0xff]  }
  0x8f   : > { %v9551_v55 = vsel %vm7936_vm12, 4294967295, %v9550_v55  ;;  %v3322_v51 = vsel %vm9553_vm4, %v3317_v52, %v3321_v37  ;;  %v9554_v35 = vshrl.u32 %v7656_v40, 16  ;;  %vm942_vm15 = vcmp.ge.s32.totalorder %v906_v58, 1 }
  0x90   : > { %9552 = vst [vmem:[#allocation27_spill] sm:$0xff] %v9551_v55  ;;  %vm978_vm8 = vcmp.le.s32.totalorder %v906_v58, 16  ;;  %v9555_v46 = vmax.f32 %v7871_v43, 0.0  ;;  %v575_v56 = vsub.s32 %v331_v27, %v574_v33  ;;  %6360 = vmatprep.mubr.bf16.mxu0 %v3322_v51  ;;  %v9556_v52 = vmov 0  ;;  %v6971_v33 = vld [vmem:[%s9330_s3 + $0x1b0] sm:$0xff]  }
  0x91   : > { %v3325_v57 = vor.u32 %v3321_v37, %v9554_v35  ;;  %vm7951_vm7 = vmand %vm942_vm15, %vm978_vm8  ;;  %v586_v40 = vsub.s32 %v332_v42, %v585_v31  ;;  %v1214_v39 = vmax.f32 %v1178_v21, 0.0  ;;  %v9559_v48 = vshll.u32 %v7740_v22, 16  ;;  %6397 = vmatpush3.bf16.msra.mxu0 %v6967_v28 }
  0x92   : > { %v1319_v12 = vsel %vm7936_vm12, %v9555_v46, 0.0  ;;  %v9557_v52 = vsel %vm7951_vm7, 4294967295, %v9556_v52  ;;  %v297_v20 = vadd.s32 176, %v7120_v7  ;;  %v9560_v53 = vmax.f32 %v7874_v13, 0.0  ;;  %6398 = vmatprep.subr.bf16.mxu0 %v6969_v26 }
  0x93   : > { %9558 = vst [vmem:[#allocation28_spill] sm:$0xff] %v9557_v52  ;;  %v3329_v1 = vrot.slane %v9559_v48, 1  ;;  %vm763_vm10 = vcmp.ne.s32.totalorder %v575_v56, 0  ;;  %vm799_vm1 = vcmp.lt.s32.totalorder %v575_v56, 0  ;;  %v871_v27 = vadd.s32 18, %v575_v56 }
  0x94   : > { %v1320_v43 = vsel %vm7951_vm7, %v9560_v53, 0.0  ;;  %vm764_vm4 = vcmp.ne.s32.totalorder %v586_v40, 0  ;;  %vm800_vm15 = vcmp.lt.s32.totalorder %v586_v40, 0  ;;  %vm835_vm8 = vmand %vm799_vm1, %vm763_vm10  ;;  %v872_v42 = vadd.s32 18, %v586_v40  ;;  %v5819_v53 = vld [vmem:[%s7149_s24 + $0x60] sm:$0xff]  }
  0x95   : > { %v7962_v37 = vpack.c.bf16 %v1320_v43, %v1319_v12  ;;  %vm836_vm12 = vmand %vm800_vm15, %vm764_vm4  ;;  %v907_v13 = vsel %vm835_vm8, %v871_v27, %v575_v56  ;;  %vm9561_vm14 = vsmask.f32 7424  ;;  %v298_v21 = vadd.s32 184, %v7120_v7  ;;  %6399 = vmatpush3.bf16.msra.mxu0 %v6969_v26  ;;  %v6973_v26 = vld [vmem:[%s9330_s3 + $0x1b8] sm:$0xff]  }
  0x96   : > { %v3330_v31 = vsel %vm9561_vm14, %v3325_v57, %v3329_v1  ;;  %v333_v58 = vadd.s32 1, %v297_v20  ;;  %v908_v51 = vsel %vm836_vm12, %v872_v42, %v586_v40  ;;  %vm943_vm10 = vcmp.ge.s32.totalorder %v907_v13, 1  ;;  %6400 = vmatprep.subr.bf16.mxu0 %v6971_v33 }
  0x97   : > { %1364 = vst [vmem:[#allocation2 + $0x58] sm:$0xff] %v7962_v37  ;;  %v1467_v28 = vrot.slane %v7962_v37, 7  ;;  %vm979_vm1 = vcmp.le.s32.totalorder %v907_v13, 16  ;;  %6361 = vmatmul.mubr.bf16.gmra.mrb[8].mxu0 %v3330_v31  ;;  %vm944_vm7 = vcmp.ge.s32.totalorder %v908_v51, 1  ;;  %vm980_vm0 = vcmp.le.s32.totalorder %v908_v51, 16 }
  0x98   : > { %vm7972_vm5 = vmand %vm943_vm10, %vm979_vm1  ;;  %v9562_v35 = vmov 0  ;;  %v334_v46 = vadd.s32 1, %v298_v21  ;;  %v5692_v57 = vunpack.c.l.bf16 %v5818_v50  ;;  %vm9565_vm14 = vcmask 1040384  }
  0x99   : > { %v9563_v35 = vsel %vm7972_vm5, 4294967295, %v9562_v35  ;;  %v1468_v12 = vsel %vm9565_vm14, %v1465_v16, %v1467_v28  ;;  %vm7979_vm4 = vmand %vm944_vm7, %vm980_vm0  ;;  %v9566_v56 = vmov 0  ;;  %v1321_v40 = vsel %vm7972_vm5, %v1213_v8, 0.0  ;;  %6401 = vmatpush3.bf16.msra.mxu0 %v6971_v33 }
  0x9a   : > { %9564 = vst [vmem:[#allocation29_spill] sm:$0xff] %v9563_v35  ;;  %v9567_v56 = vsel %vm7979_vm4, 4294967295, %v9566_v56  ;;  %v7985_v48 = vmul.u32.u64.low 3817748708, %v333_v58  ;;  %v7986_v20 = vmul.u32.u64.high 3817748708, %v333_v58, %v7985_v48  ;;  %6112 = vmatprep.mubr.bf16.mxu1 %v1468_v12  ;;  %v1322_v16 = vsel %vm7979_vm4, %v1214_v39, 0.0  ;;  %6402 = vmatprep.subr.bf16.mxu0 %v6973_v26  ;;  %vm9570_vm0 = vmmov %vm9565_vm14 }
  0x9b   : > { %9568 = vst [vmem:[#allocation30_spill] sm:$0xff] %v9567_v56  ;;  %v7994_v43 = vmul.u32.u64.low 3817748708, %v334_v46  ;;  %v7995_v27 = vmul.u32.u64.high 3817748708, %v334_v46, %v7994_v43  ;;  %v5693_v42 = vunpack.c.h.bf16 %v5818_v50  ;;  %v7997_v13 = vpack.c.bf16 %v1322_v16, %v1321_v40  ;;  %v6975_v16 = vld [vmem:[%s9330_s3 + $0x1c0] sm:$0xff]  }
  0x9c   : > { %v1136_v8 = vmul.f32 %v7797_v30, %v5692_v57  ;;  %v299_v31 = vadd.s32 192, %v7120_v7  ;;  %v300_v21 = vadd.s32 200, %v7120_v7  ;;  %v5696_v48 = vunpack.c.l.bf16 %v5819_v53 }
  0x9d   : > { %v1137_v51 = vmul.f32 %v7797_v30, %v5693_v42  ;;  %v5697_v35 = vunpack.c.h.bf16 %v5819_v53  ;;  %v9569_v12 = vshrl.u32 %v7740_v22, 16  ;;  %1365 = vst [vmem:[#allocation2 + $0x60] sm:$0xff] %v7997_v13  ;;  %v1469_v39 = vrot.slane %v7997_v13, 7  ;;  %6403 = vmatpush3.bf16.msra.mxu0 %v6973_v26 }
  0x9e   : > { %v595_v50 = vshrl.u32 %v7986_v20, 4  ;;  %v1179_v57 = vadd.f32 %v7821_v59, %v1136_v8  ;;  %v335_v40 = vadd.s32 1, %v299_v31  ;;  %v606_v53 = vshrl.u32 %v7995_v27, 4  ;;  %6440 = vmatprep.subr.bf16.mxu0 %v6975_v16 }
  0x9f   : > { %v3333_v56 = vor.u32 %v3329_v1, %v9569_v12  ;;  %v1180_v22 = vadd.f32 %v7821_v59, %v1137_v51  ;;  %v336_v1 = vadd.s32 1, %v300_v21  ;;  %v1138_v33 = vmul.f32 %v7797_v30, %v5696_v48 }
  0xa0   : > { %v1470_v43 = vsel %vm9570_vm0, %v1467_v28, %v1469_v39  ;;  %v596_v20 = vmul.u32 18, %v595_v50  ;;  %v1215_v42 = vmax.f32 %v1179_v57, 0.0  ;;  %v1139_v8 = vmul.f32 %v7797_v30, %v5697_v35 }
  0xa1   : > { %6113 = vmatmul.mubr.bf16.gmra.mrb[20].mxu1 %v1470_v43  ;;  %v607_v31 = vmul.u32 18, %v606_v53  ;;  %v1216_v12 = vmax.f32 %v1180_v22, 0.0  ;;  %v8019_v52 = vmul.u32.u64.low 3817748708, %v335_v40  ;;  %v8020_v55 = vmul.u32.u64.high 3817748708, %v335_v40, %v8019_v52 }
  0xa2   : > { %v597_v27 = vsub.s32 %v333_v58, %v596_v20  ;;  %v8022_v51 = vmul.u32.u64.low 3817748708, %v336_v1  ;;  %v8023_v21 = vmul.u32.u64.high 3817748708, %v336_v1, %v8022_v51  ;;  %v8026_v48 = vadd.f32 %v7821_v59, %v1138_v33 }
  0xa3   : > { %v608_v28 = vsub.s32 %v334_v46, %v607_v31  ;;  %v8029_v50 = vadd.f32 %v7821_v59, %v1139_v8  ;;  %v9571_v35 = vshll.u32 %v7789_v11, 16  ;;  %v8034_v53 = vshll.u32 %v7907_v23, 16  ;;  %v5820_v31 = vld [vmem:[%s7149_s24 + $0x68] sm:$0xff]  }
  0xa4   : > { %vm765_vm12 = vcmp.ne.s32.totalorder %v597_v27, 0  ;;  %vm801_vm7 = vcmp.lt.s32.totalorder %v597_v27, 0  ;;  %v873_v52 = vadd.s32 18, %v597_v27  ;;  %v1217_v58 = vmax.f32 %v8026_v48, 0.0 }
  0xa5   : > { %v3337_v57 = vrot.slane %v9571_v35, 1  ;;  %9572 = vst [vmem:[#allocation31_spill] sm:$0xff] %v8034_v53  ;;  %vm766_vm15 = vcmp.ne.s32.totalorder %v608_v28, 0  ;;  %vm802_vm8 = vcmp.lt.s32.totalorder %v608_v28, 0  ;;  %vm837_vm10 = vmand %vm801_vm7, %vm765_vm12  ;;  %v874_v26 = vadd.s32 18, %v608_v28 }
  0xa6   : > { %v617_v46 = vshrl.u32 %v8020_v55, 4  ;;  %vm838_vm1 = vmand %vm802_vm8, %vm766_vm15  ;;  %v909_v16 = vsel %vm837_vm10, %v873_v52, %v597_v27  ;;  %v628_v22 = vshrl.u32 %v8023_v21, 4  ;;  %v1218_v33 = vmax.f32 %v8029_v50, 0.0 }
  0xa7   : > { %vm9573_vm14 = vsmask.f32 7424  ;;  %v910_v20 = vsel %vm838_vm1, %v874_v26, %v608_v28  ;;  %vm945_vm0 = vcmp.ge.s32.totalorder %v909_v16, 1  ;;  %vm981_vm4 = vcmp.le.s32.totalorder %v909_v16, 16 }
  0xa8   : > { %v3338_v43 = vsel %vm9573_vm14, %v3333_v56, %v3337_v57  ;;  %v618_v8 = vmul.u32 18, %v617_v46  ;;  %vm946_vm5 = vcmp.ge.s32.totalorder %v910_v20, 1  ;;  %vm982_vm13 = vcmp.le.s32.totalorder %v910_v20, 16  ;;  %vm8042_vm12 = vmand %vm945_vm0, %vm981_vm4 }
  0xa9   : > { %6364 = vmatprep.mubr.bf16.mxu0 %v3338_v43  ;;  %v9574_v51 = vmov 0  ;;  %v629_v55 = vmul.u32 18, %v628_v22  ;;  %v9577_v27 = vshrl.u32 %v7789_v11, 16  ;;  %vm8048_vm7 = vmand %vm946_vm5, %vm982_vm13  ;;  %v9578_v48 = vmov 0 }
  0xaa   : > { %v9575_v51 = vsel %vm8042_vm12, 4294967295, %v9574_v51  ;;  %v9579_v48 = vsel %vm8048_vm7, 4294967295, %v9578_v48  ;;  %v1323_v56 = vsel %vm8042_vm12, %v1215_v42, 0.0  ;;  %v619_v28 = vsub.s32 %v335_v40, %v618_v8  ;;  %vm9581_vm10 = vmmov %vm9573_vm14 }
  0xab   : > { %9576 = vst [vmem:[#allocation32_spill] sm:$0xff] %v9575_v51  ;;  %v3341_v21 = vor.u32 %v3337_v57, %v9577_v27  ;;  %9580 = vst [vmem:[#allocation33_spill] sm:$0xff] %v9579_v48  ;;  %v9369_v50 = vrot.slane %v8034_v53, 1  ;;  %v301_v35 = vadd.s32 208, %v7120_v7  ;;  %v1324_v52 = vsel %vm8048_vm7, %v1216_v12, 0.0 }
  0xac   : > { %v630_v26 = vsub.s32 %v336_v1, %v629_v55  ;;  %v302_v46 = vadd.s32 216, %v7120_v7  ;;  %v5700_v11 = vunpack.c.l.bf16 %v5820_v31  ;;  %v8059_v57 = vpack.c.bf16 %v1324_v52, %v1323_v56  ;;  %v5821_v52 = vld [vmem:[%s7149_s24 + $0x70] sm:$0xff]  }
  0xad   : > { %vm767_vm13 = vcmp.ne.s32.totalorder %v619_v28, 0  ;;  %vm803_vm5 = vcmp.lt.s32.totalorder %v619_v28, 0  ;;  %v875_v16 = vadd.s32 18, %v619_v28  ;;  %v3346_v42 = vsel %vm9581_vm10, %v3341_v21, %v9369_v50 }
  0xae   : > { %vm768_vm4 = vcmp.ne.s32.totalorder %v630_v26, 0  ;;  %vm804_vm15 = vcmp.lt.s32.totalorder %v630_v26, 0  ;;  %vm839_vm8 = vmand %vm803_vm5, %vm767_vm13  ;;  %v876_v40 = vadd.s32 18, %v630_v26  ;;  %1366 = vst [vmem:[#allocation2 + $0x68] sm:$0xff] %v8059_v57  ;;  %v1471_v1 = vrot.slane %v8059_v57, 7  ;;  %6365 = vmatmul.mubr.bf16.gmra.mrb[12].mxu0 %v3346_v42 }
  0xaf   : > { %vm840_vm1 = vmand %vm804_vm15, %vm768_vm4  ;;  %v911_v12 = vsel %vm839_vm8, %v875_v16, %v619_v28  ;;  %v337_v22 = vadd.s32 1, %v301_v35  ;;  %v338_v43 = vadd.s32 1, %v302_v46  ;;  %v5701_v8 = vunpack.c.h.bf16 %v5820_v31 }
  0xb0   : > { %v912_v20 = vsel %vm840_vm1, %v876_v40, %v630_v26  ;;  %vm947_vm14 = vcmp.ge.s32.totalorder %v911_v12, 1  ;;  %vm983_vm0 = vcmp.le.s32.totalorder %v911_v12, 16  ;;  %vm9582_vm13 = vcmask 1040384  }
  0xb1   : > { %v1472_v55 = vsel %vm9582_vm13, %v1469_v39, %v1471_v1  ;;  %vm948_vm5 = vcmp.ge.s32.totalorder %v912_v20, 1  ;;  %vm984_vm10 = vcmp.le.s32.totalorder %v912_v20, 16  ;;  %vm8069_vm7 = vmand %vm947_vm14, %vm983_vm0  ;;  %v9583_v27 = vmov 0 }
  0xb2   : > { %v9584_v27 = vsel %vm8069_vm7, 4294967295, %v9583_v27  ;;  %v1140_v21 = vmul.f32 %v7797_v30, %v5700_v11  ;;  %6116 = vmatprep.mubr.bf16.mxu1 %v1472_v55  ;;  %vm8074_vm4 = vmand %vm948_vm5, %vm984_vm10  ;;  %v9586_v56 = vmov 0  ;;  %v1325_v31 = vsel %vm8069_vm7, %v1217_v58, 0.0 }
  0xb3   : > { %9585 = vst [vmem:[#allocation34_spill] sm:$0xff] %v9584_v27  ;;  %v9587_v56 = vsel %vm8074_vm4, 4294967295, %v9586_v56  ;;  %v8080_v28 = vmul.u32.u64.low 3817748708, %v337_v22  ;;  %v8081_v35 = vmul.u32.u64.high 3817748708, %v337_v22, %v8080_v28  ;;  %v1141_v39 = vmul.f32 %v7797_v30, %v5701_v8  ;;  %vm9590_vm15 = vmmov %vm9582_vm13 }
  0xb4   : > { %9588 = vst [vmem:[#allocation35_spill] sm:$0xff] %v9587_v56  ;;  %v1326_v26 = vsel %vm8074_vm4, %v1218_v33, 0.0  ;;  %v8087_v46 = vmul.u32.u64.low 3817748708, %v338_v43  ;;  %v8088_v16 = vmul.u32.u64.high 3817748708, %v338_v43, %v8087_v46  ;;  %v1183_v11 = vadd.f32 %v7821_v59, %v1140_v21 }
  0xb5   : > { %v8091_v40 = vpack.c.bf16 %v1326_v26, %v1325_v31  ;;  %v8094_v42 = vadd.f32 %v7821_v59, %v1141_v39  ;;  %v303_v58 = vadd.s32 224, %v7120_v7  ;;  %v304_v12 = vadd.s32 232, %v7120_v7 }
  0xb6   : > { %v1219_v20 = vmax.f32 %v1183_v11, 0.0  ;;  %v5704_v8 = vunpack.c.l.bf16 %v5821_v52  ;;  %v5705_v55 = vunpack.c.h.bf16 %v5821_v52  ;;  %v8099_v28 = vshrl.u32 %v7907_v23, 16 }
  0xb7   : > { %1367 = vst [vmem:[#allocation2 + $0x70] sm:$0xff] %v8091_v40  ;;  %v9376_v33 = vrot.slane %v8091_v40, 7  ;;  %v639_v21 = vshrl.u32 %v8081_v35, 4  ;;  %v1220_v31 = vmax.f32 %v8094_v42, 0.0  ;;  %v339_v39 = vadd.s32 1, %v303_v58 }
  0xb8   : > { %9589 = vst [vmem:[#allocation36_spill] sm:$0xff] %v8099_v28  ;;  %v650_v26 = vshrl.u32 %v8088_v16, 4  ;;  %v340_v46 = vadd.s32 1, %v304_v12  ;;  %v1142_v50 = vmul.f32 %v7797_v30, %v5704_v8  ;;  %v1143_v11 = vmul.f32 %v7797_v30, %v5705_v55 }
  0xb9   : > { %v1474_v23 = vsel %vm9590_vm15, %v1471_v1, %v9376_v33  ;;  %v640_v52 = vmul.u32 18, %v639_v21  ;;  %v8111_v56 = vmul.u32.u64.low 3817748708, %v339_v39  ;;  %v8112_v27 = vmul.u32.u64.high 3817748708, %v339_v39, %v8111_v56 }
  0xba   : > { %6117 = vmatmul.mubr.bf16.gmra.mrb[24].mxu1 %v1474_v23  ;;  %v651_v35 = vmul.u32 18, %v650_v26  ;;  %v8114_v48 = vmul.u32.u64.low 3817748708, %v340_v46  ;;  %v8115_v42 = vmul.u32.u64.high 3817748708, %v340_v46, %v8114_v48  ;;  %v8118_v16 = vadd.f32 %v7821_v59, %v1142_v50 }
  0xbb   : > { %v641_v58 = vsub.s32 %v337_v22, %v640_v52  ;;  %v8121_v12 = vadd.f32 %v7821_v59, %v1143_v11  ;;  %v9591_v8 = vrot.slane %v8034_v53, 1  ;;  %v8127_v55 = vshll.u32 %v7962_v37, 16 }
  0xbc   : > { %v652_v56 = vsub.s32 %v338_v43, %v651_v35  ;;  %v1221_v21 = vmax.f32 %v8118_v16, 0.0  ;;  %v8131_v26 = vshrl.u32 %v7962_v37, 16  ;;  %v8134_v48 = vshll.u32 %v7997_v13, 16 }
  0xbd   : > { %v3349_v1 = vor.u32 %v8099_v28, %v9591_v8  ;;  %9592 = vst [vmem:[#allocation37_spill] sm:$0xff] %v8127_v55  ;;  %vm769_vm8 = vcmp.ne.s32.totalorder %v641_v58, 0  ;;  %vm805_vm1 = vcmp.lt.s32.totalorder %v641_v58, 0  ;;  %v877_v50 = vadd.s32 18, %v641_v58 }
  0xbe   : > { %9593 = vst [vmem:[#allocation38_spill] sm:$0xff] %v8131_v26  ;;  %9594 = vst [vmem:[#allocation39_spill] sm:$0xff] %v8134_v48  ;;  %v661_v22 = vshrl.u32 %v8112_v27, 4  ;;  %vm770_vm14 = vcmp.ne.s32.totalorder %v652_v56, 0  ;;  %vm806_vm0 = vcmp.lt.s32.totalorder %v652_v56, 0  ;;  %v878_v11 = vadd.s32 18, %v652_v56 }
  0xbf   : > { %vm841_vm13 = vmand %vm805_vm1, %vm769_vm8  ;;  %v672_v23 = vshrl.u32 %v8115_v42, 4  ;;  %v1222_v37 = vmax.f32 %v8121_v12, 0.0  ;;  %v3353_v35 = vrot.slane %v8127_v55, 1  ;;  %v9595_v27 = vmov 0 }
  0xc0   : > { %vm842_vm5 = vmand %vm806_vm0, %vm770_vm14  ;;  %v913_v43 = vsel %vm841_vm13, %v877_v50, %v641_v58  ;;  %v662_v52 = vmul.u32 18, %v661_v22  ;;  %vm9598_vm8 = vsmask.f32 7424  ;;  %v9599_v58 = vmov 0 }
  0xc1   : > { %v914_v16 = vsel %vm842_vm5, %v878_v11, %v652_v56  ;;  %vm949_vm10 = vcmp.ge.s32.totalorder %v913_v43, 1  ;;  %vm985_vm15 = vcmp.le.s32.totalorder %v913_v43, 16  ;;  %v673_v8 = vmul.u32 18, %v672_v23 }
  0xc2   : > { %vm950_vm4 = vcmp.ge.s32.totalorder %v914_v16, 1  ;;  %vm986_vm7 = vcmp.le.s32.totalorder %v914_v16, 16  ;;  %vm8140_vm12 = vmand %vm949_vm10, %vm985_vm15  ;;  %v663_v33 = vsub.s32 %v339_v39, %v662_v52  ;;  %v3354_v42 = vsel %vm9598_vm8, %v3349_v1, %v3353_v35 }
  0xc3   : > { %v9596_v27 = vsel %vm8140_vm12, 4294967295, %v9595_v27  ;;  %vm8145_vm1 = vmand %vm950_vm4, %vm986_vm7  ;;  %v1327_v12 = vsel %vm8140_vm12, %v1219_v20, 0.0  ;;  %v674_v56 = vsub.s32 %v340_v46, %v673_v8  ;;  %6368 = vmatprep.mubr.bf16.mxu0 %v3354_v42  ;;  %v3357_v50 = vor.u32 %v8131_v26, %v3353_v35 }
  0xc4   : > { %9597 = vst [vmem:[#allocation40_spill] sm:$0xff] %v9596_v27  ;;  %v9600_v58 = vsel %vm8145_vm1, 4294967295, %v9599_v58  ;;  %v9377_v22 = vrot.slane %v8134_v48, 1  ;;  %v1328_v11 = vsel %vm8145_vm1, %v1220_v31, 0.0  ;;  %vm771_vm14 = vcmp.ne.s32.totalorder %v663_v33, 0  ;;  %vm9602_vm10 = vmmov %vm9598_vm8  ;;  %v5822_v31 = vld [vmem:[%s7149_s24 + $0x78] sm:$0xff]  }
  0xc5   : > { %9601 = vst [vmem:[#allocation41_spill] sm:$0xff] %v9600_v58  ;;  %vm807_vm0 = vcmp.lt.s32.totalorder %v663_v33, 0  ;;  %v879_v39 = vadd.s32 18, %v663_v33  ;;  %v8155_v1 = vpack.c.bf16 %v1328_v11, %v1327_v12  ;;  %vm772_vm7 = vcmp.ne.s32.totalorder %v674_v56, 0 }
  0xc6   : > { %vm808_vm4 = vcmp.lt.s32.totalorder %v674_v56, 0  ;;  %vm843_vm13 = vmand %vm807_vm0, %vm771_vm14  ;;  %v880_v23 = vadd.s32 18, %v674_v56  ;;  %v3362_v46 = vsel %vm9602_vm10, %v3357_v50, %v9377_v22  ;;  %v305_v43 = vadd.s32 240, %v7120_v7 }
  0xc7   : > { %vm844_vm5 = vmand %vm808_vm4, %vm772_vm7  ;;  %v915_v20 = vsel %vm843_vm13, %v879_v39, %v663_v33  ;;  %v306_v52 = vadd.s32 248, %v7120_v7  ;;  %1368 = vst [vmem:[#allocation2 + $0x78] sm:$0xff] %v8155_v1  ;;  %v1475_v35 = vrot.slane %v8155_v1, 7  ;;  %6369 = vmatmul.mubr.bf16.gmra.mrb[16].mxu0 %v3362_v46  ;;  %v9603_v33 = vmov 0 }
  0xc8   : > { %v916_v16 = vsel %vm844_vm5, %v880_v23, %v674_v56  ;;  %vm951_vm15 = vcmp.ge.s32.totalorder %v915_v20, 1  ;;  %vm987_vm8 = vcmp.le.s32.totalorder %v915_v20, 16  ;;  %v341_v8 = vadd.s32 1, %v305_v43  ;;  %v5823_v20 = vld [vmem:[%s7149_s24 + $0x80] sm:$0xff]  }
  0xc9   : > { %vm952_vm14 = vcmp.ge.s32.totalorder %v916_v16, 1  ;;  %vm988_vm0 = vcmp.le.s32.totalorder %v916_v16, 16  ;;  %vm8165_vm7 = vmand %vm951_vm15, %vm987_vm8  ;;  %v342_v42 = vadd.s32 1, %v306_v52  ;;  %v9606_v12 = vrot.slane %v8091_v40, 7 }
  0xca   : > { %v9604_v33 = vsel %vm8165_vm7, 4294967295, %v9603_v33  ;;  %vm9607_vm4 = vcmask 1040384   ;;  %vm8172_vm13 = vmand %vm952_vm14, %vm988_vm0  ;;  %v9608_v11 = vmov 0  ;;  %v1329_v56 = vsel %vm8165_vm7, %v1221_v21, 0.0 }
  0xcb   : > { %9605 = vst [vmem:[#allocation42_spill] sm:$0xff] %v9604_v33  ;;  %v1476_v50 = vsel %vm9607_vm4, %v9606_v12, %v1475_v35  ;;  %v9609_v11 = vsel %vm8172_vm13, 4294967295, %v9608_v11  ;;  %v5708_v39 = vunpack.c.l.bf16 %v5822_v31  ;;  %v5709_v23 = vunpack.c.h.bf16 %v5822_v31  ;;  %vm9611_vm5 = vmmov %vm9607_vm4 }
  0xcc   : > { %9610 = vst [vmem:[#allocation43_spill] sm:$0xff] %v9609_v11  ;;  %6120 = vmatprep.mubr.bf16.mxu1 %v1476_v50  ;;  %v1330_v46 = vsel %vm8172_vm13, %v1222_v37, 0.0  ;;  %v8181_v43 = vmul.u32.u64.low 3817748708, %v341_v8  ;;  %v8182_v52 = vmul.u32.u64.high 3817748708, %v341_v8, %v8181_v43  ;;  %v307_v16 = vadd.s32 256, %v7120_v7 }
  0xcd   : > { %v8185_v12 = vpack.c.bf16 %v1330_v46, %v1329_v56  ;;  %v8187_v22 = vmul.u32.u64.low 3817748708, %v342_v42  ;;  %v8188_v58 = vmul.u32.u64.high 3817748708, %v342_v42, %v8187_v22  ;;  %v1144_v33 = vmul.f32 %v7797_v30, %v5708_v39 }
  0xce   : > { %v1145_v21 = vmul.f32 %v7797_v30, %v5709_v23  ;;  %v308_v31 = vadd.s32 264, %v7120_v7  ;;  %v343_v50 = vadd.s32 1, %v307_v16  ;;  %v5712_v27 = vunpack.c.l.bf16 %v5823_v20 }
  0xcf   : > { %1369 = vst [vmem:[#allocation2 + $0x80] sm:$0xff] %v8185_v12  ;;  %v1477_v37 = vrot.slane %v8185_v12, 7  ;;  %v1187_v43 = vadd.f32 %v7821_v59, %v1144_v33  ;;  %v5713_v11 = vunpack.c.h.bf16 %v5823_v20  ;;  %v683_v56 = vshrl.u32 %v8182_v52, 4 }
  0xd0   : > { %v1188_v46 = vadd.f32 %v7821_v59, %v1145_v21  ;;  %v344_v22 = vadd.s32 1, %v308_v31  ;;  %v1146_v39 = vmul.f32 %v7797_v30, %v5712_v27  ;;  %v694_v16 = vshrl.u32 %v8188_v58, 4 }
  0xd1   : > { %v1478_v23 = vsel %vm9611_vm5, %v1475_v35, %v1477_v37  ;;  %v1147_v51 = vmul.f32 %v7797_v30, %v5713_v11  ;;  %v8205_v61 = vshrl.u32 %v7997_v13, 16  ;;  %v684_v33 = vmul.u32 18, %v683_v56 }
  0xd2   : > { %6121 = vmatmul.mubr.bf16.gmra.mrb[28].mxu1 %v1478_v23  ;;  %v1223_v20 = vmax.f32 %v1187_v43, 0.0  ;;  %v8207_v52 = vmul.u32.u64.low 3817748708, %v343_v50  ;;  %v8208_v34 = vmul.u32.u64.high 3817748708, %v343_v50, %v8207_v52  ;;  %v695_v21 = vmul.u32 18, %v694_v16 }
  0xd3   : > { %9612 = vst [vmem:[#allocation44_spill] sm:$0xff] %v8205_v61  ;;  %v1224_v31 = vmax.f32 %v1188_v46, 0.0  ;;  %v8210_v27 = vmul.u32.u64.low 3817748708, %v344_v22  ;;  %v8211_v6 = vmul.u32.u64.high 3817748708, %v344_v22, %v8210_v27  ;;  %v685_v63 = vsub.s32 %v341_v8, %v684_v33 }
  0xd4   : > { %v8214_v35 = vadd.f32 %v7821_v59, %v1146_v39  ;;  %v8217_v30 = vadd.f32 %v7821_v59, %v1147_v51  ;;  %v8220_v13 = vshll.u32 %v8059_v57, 16  ;;  %v696_v58 = vsub.s32 %v342_v42, %v695_v21 }
  0xd5   : > { %v9614_v11 = vrot.slane %v8134_v48, 1  ;;  %v8226_v56 = vshrl.u32 %v8059_v57, 16  ;;  %v8229_v46 = vshll.u32 %v8091_v40, 16  ;;  %vm773_vm10 = vcmp.ne.s32.totalorder %v685_v63, 0 }
  0xd6   : > { %9613 = vst [vmem:[#allocation45_spill] sm:$0xff] %v8220_v13  ;;  %vm809_vm15 = vcmp.lt.s32.totalorder %v685_v63, 0  ;;  %v881_v8 = vadd.s32 18, %v685_v63  ;;  %v705_v59 = vshrl.u32 %v8208_v34, 4  ;;  %vm774_vm8 = vcmp.ne.s32.totalorder %v696_v58, 0 }
  0xd7   : > { %v3365_v43 = vor.u32 %v8205_v61, %v9614_v11  ;;  %9615 = vst [vmem:[#allocation46_spill] sm:$0xff] %v8226_v56  ;;  %9616 = vst [vmem:[#allocation47_spill] sm:$0xff] %v8229_v46  ;;  %vm810_vm14 = vcmp.lt.s32.totalorder %v696_v58, 0  ;;  %v882_v51 = vadd.s32 18, %v696_v58  ;;  %v716_v42 = vshrl.u32 %v8211_v6, 4 }
  0xd8   : > { %vm845_vm0 = vmand %vm809_vm15, %vm773_vm10  ;;  %v706_v23 = vmul.u32 18, %v705_v59  ;;  %v1225_v57 = vmax.f32 %v8214_v35, 0.0  ;;  %v3369_v16 = vrot.slane %v8220_v13, 1  ;;  %v9617_v34 = vmov 0 }
  0xd9   : > { %vm846_vm4 = vmand %vm810_vm14, %vm774_vm8  ;;  %v917_v39 = vsel %vm845_vm0, %v881_v8, %v685_v63  ;;  %v717_v52 = vmul.u32 18, %v716_v42  ;;  %vm9620_vm10 = vsmask.f32 7424  ;;  %v9621_v63 = vmov 0  ;;  %v1373_v42 = vld [vmem:[#allocation2] sm:$0xc0] }
  0xda   : > { %v918_v33 = vsel %vm846_vm4, %v882_v51, %v696_v58  ;;  %vm953_vm5 = vcmp.ge.s32.totalorder %v917_v39, 1  ;;  %vm989_vm13 = vcmp.le.s32.totalorder %v917_v39, 16  ;;  %v707_v21 = vsub.s32 %v343_v50, %v706_v23  ;;  %vm9624_vm4 = vmmov %vm9620_vm10 }
  0xdb   : > { %vm954_vm7 = vcmp.ge.s32.totalorder %v918_v33, 1  ;;  %vm990_vm1 = vcmp.le.s32.totalorder %v918_v33, 16  ;;  %vm8235_vm12 = vmand %vm953_vm5, %vm989_vm13  ;;  %v3370_v6 = vsel %vm9620_vm10, %v3365_v43, %v3369_v16  ;;  %v718_v35 = vsub.s32 %v344_v22, %v717_v52 }
  0xdc   : > { %v9618_v34 = vsel %vm8235_vm12, 4294967295, %v9617_v34  ;;  %vm8240_vm15 = vmand %vm954_vm7, %vm990_vm1  ;;  %v1331_v27 = vsel %vm8235_vm12, %v1223_v20, 0.0  ;;  %6372 = vmatprep.mubr.bf16.mxu0 %v3370_v6  ;;  %v3373_v58 = vor.u32 %v8226_v56, %v3369_v16  ;;  %v3377_v11 = vrot.slane %v8229_v46, 1 }
  0xdd   : > { %9619 = vst [vmem:[#allocation48_spill] sm:$0xff] %v9618_v34  ;;  %v9622_v63 = vsel %vm8240_vm15, 4294967295, %v9621_v63  ;;  %v1332_v8 = vsel %vm8240_vm15, %v1224_v31, 0.0  ;;  %vm775_vm13 = vcmp.ne.s32.totalorder %v707_v21, 0  ;;  %vm811_vm8 = vcmp.lt.s32.totalorder %v707_v21, 0 }
  0xde   : > { %9623 = vst [vmem:[#allocation49_spill] sm:$0xff] %v9622_v63  ;;  %v883_v50 = vadd.s32 18, %v707_v21  ;;  %v8250_v43 = vpack.c.bf16 %v1332_v8, %v1331_v27  ;;  %vm776_vm1 = vcmp.ne.s32.totalorder %v718_v35, 0  ;;  %vm812_vm7 = vcmp.lt.s32.totalorder %v718_v35, 0  ;;  %vm847_vm14 = vmand %vm811_vm8, %vm775_vm13 }
  0xdf   : > { %v884_v59 = vadd.s32 18, %v718_v35  ;;  %vm848_vm0 = vmand %vm812_vm7, %vm776_vm1  ;;  %v1226_v22 = vmax.f32 %v8217_v30, 0.0  ;;  %v3378_v51 = vsel %vm9624_vm4, %v3373_v58, %v3377_v11  ;;  %v9625_v23 = vmov 0 }
  0xe0   : > { %v919_v20 = vsel %vm847_vm14, %v883_v50, %v707_v21  ;;  %1370 = vst [vmem:[#allocation2 + $0x88] sm:$0xff] %v8250_v43  ;;  %v9394_v31 = vrot.slane %v8250_v43, 7  ;;  %6373 = vmatmul.mubr.bf16.gmra.mrb[20].mxu0 %v3378_v51  ;;  %vm9628_vm13 = vcmask 1040384   ;;  %v9629_v16 = vmov 0  ;;  %v8271_v21 = vld [vmem:[#allocation2] sm:$0xff]  ;;  %vm9643_vm7 = vmmov %vm9624_vm4 }
  0xe1   : > { %v920_v39 = vsel %vm848_vm0, %v884_v59, %v718_v35  ;;  %vm955_vm5 = vcmp.ge.s32.totalorder %v919_v20, 1  ;;  %vm991_vm10 = vcmp.le.s32.totalorder %v919_v20, 16  ;;  %v1728_v52 = vshrl.u32 %v1373_v42, 16  ;;  %9632 = vst [vmem:[#allocation52_spill] sm:$0xff] %v8271_v21  ;;  %vm9647_vm14 = vmmov %vm9628_vm13 }
  0xe2   : > { %vm956_vm15 = vcmp.ge.s32.totalorder %v920_v39, 1  ;;  %vm992_vm12 = vcmp.le.s32.totalorder %v920_v39, 16  ;;  %vm8256_vm11 = vmand %vm955_vm5, %vm991_vm10  ;;  %v1480_v30 = vsel %vm9628_vm13, %v1477_v37, %v9394_v31  ;;  %v8274_v6 = vshrl.u32 %v8271_v21, 16 }
  0xe3   : > { %v9626_v23 = vsel %vm8256_vm11, 4294967295, %v9625_v23  ;;  %vm8265_vm8 = vmand %vm956_vm15, %vm992_vm12  ;;  %v1333_v33 = vsel %vm8256_vm11, %v1225_v57, 0.0  ;;  %v8277_v27 = vshll.u32 %v8271_v21, 16  ;;  %6124 = vmatprep.mubr.bf16.mxu1 %v1480_v30  ;;  %v1731_v35 = vshll.u32 %v1373_v42, 16 }
  0xe4   : > { %9627 = vst [vmem:[#allocation50_spill] sm:$0xff] %v9626_v23  ;;  %v9630_v16 = vsel %vm8265_vm8, 4294967295, %v9629_v16  ;;  %v1334_v37 = vsel %vm8265_vm8, %v1226_v22, 0.0  ;;  %v8284_v8 = vshrl.u32 %v8091_v40, 16  ;;  %v8287_v57 = vshll.u32 %v8155_v1, 16  ;;  %vm9638_vm12 = vmmov %vm9624_vm4 }
  0xe5   : > { %9631 = vst [vmem:[#allocation51_spill] sm:$0xff] %v9630_v16  ;;  %v8281_v58 = vpack.c.bf16 %v1334_v37, %v1333_v33  ;;  %v8290_v50 = vshrl.u32 %v8155_v1, 16  ;;  %v8293_v59 = vshll.u32 %v8185_v12, 16  ;;  %v1730_v20 = vrot.slane %v1728_v52, 6  ;;  %v8303_v37 = vld [vmem:[#allocation2 + $0x18] sm:$0xff]  ;;  %vm9641_vm15 = vmmov %vm9624_vm4 }
  0xe6   : > { %9634 = vst [vmem:[#allocation54_spill] sm:$0xff] %v8284_v8  ;;  %9635 = vst [vmem:[#allocation55_spill] sm:$0xff] %v8287_v57  ;;  %v3381_v22 = vor.u32 %v8284_v8, %v3377_v11  ;;  %v3385_v51 = vrot.slane %v8287_v57, 1  ;;  %v1733_v42 = vrot.slane %v1731_v35, 7  ;;  %v1738_v40 = vrot.slane %v8274_v6, 6 }
  0xe7   : > { %9633 = vst [vmem:[#allocation53_spill] sm:$0xff] %v8281_v58  ;;  %9636 = vst [vmem:[#allocation56_spill] sm:$0xff] %v8290_v50  ;;  %v1741_v39 = vrot.slane %v8277_v27, 7  ;;  %v3393_v30 = vrot.slane %v8293_v59, 1  ;;  %v8307_v11 = vshrl.u32 %v8185_v12, 16  ;;  %v8310_v35 = vshll.u32 %v8250_v43, 16 }
  0xe8   : > { %9637 = vst [vmem:[#allocation57_spill] sm:$0xff] %v8293_v59  ;;  %1371 = vst [vmem:[#allocation2 + $0x90] sm:$0xff] %v8281_v58  ;;  %v3386_v1 = vsel %vm9638_vm12, %v3381_v22, %v3385_v51  ;;  %v3389_v33 = vor.u32 %v8290_v50, %v3385_v51  ;;  %v8315_v23 = vshrl.u32 %v8250_v43, 16  ;;  %v9399_v22 = vshll.u32 %v8281_v58, 16 }
  0xe9   : > { %6376 = vmatprep.mubr.bf16.mxu0 %v3386_v1  ;;  %9639 = vst [vmem:[#allocation58_spill] sm:$0xff] %v8307_v11  ;;  %9640 = vst [vmem:[#allocation59_spill] sm:$0xff] %v8310_v35  ;;  %v1734_v51 = vor.u32 %v1733_v42, %v1730_v20  ;;  %v1742_v1 = vor.u32 %v1741_v39, %v1738_v40  ;;  %v3397_v52 = vor.u32 %v8307_v11, %v3393_v30  ;;  %vm1726_vm1 = vsmask.f32 1280 }
  0xea   : > { %v3394_v31 = vsel %vm9641_vm15, %v3389_v33, %v3393_v30  ;;  %9642 = vst [vmem:[#allocation60_spill] sm:$0xff] %v8315_v23  ;;  %v8320_v12 = vrot.slane %v8310_v35, 1  ;;  %v8324_v33 = vrot.slane %v9399_v22, 1  ;;  %v1747_v63 = vrot.slane %v7328_v54, 6  ;;  %vm9648_vm0 = vmmov %vm9624_vm4 }
  0xeb   : > { %6377 = vmatmul.mubr.bf16.gmra.mrb[24].mxu0 %v3394_v31  ;;  %v1750_v34 = vrot.slane %v7654_v25, 7  ;;  %v9644_v40 = vshrl.u32 %v8303_v37, 16  ;;  %v9645_v30 = vshll.u32 %v8303_v37, 16  ;;  %v1743_v47 = vsel %vm1726_vm1, %v1734_v51, %v1742_v1 }
  0xec   : > { %v3402_v31 = vsel %vm9643_vm7, %v3397_v52, %v8320_v12  ;;  %v3405_v20 = vor.u32 %v8315_v23, %v8320_v12  ;;  %v309_v4 = vadd.s32 272, %v7120_v7  ;;  %v310_v18 = vadd.s32 280, %v7120_v7 }
  0xed   : > { %v1756_v39 = vrot.slane %v9644_v40, 6  ;;  %v1759_v22 = vrot.slane %v9645_v30, 7  ;;  %6380 = vmatprep.mubr.bf16.mxu0 %v3402_v31  ;;  %v9646_v52 = vrot.slane %v8250_v43, 7  ;;  %v1751_v51 = vor.u32 %v1750_v34, %v1747_v63 }
  0xee   : > { %v8352_v31 = vsel %vm9648_vm0, %v3405_v20, %v8324_v33  ;;  %v345_v30 = vadd.s32 1, %v309_v4  ;;  %v346_v24 = vadd.s32 1, %v310_v18  ;;  %v9411_v43 = vshrl.u32 %v8354_v29, 16 }
  0xef   : > { %v8326_v16 = vld [vmem:[#allocation2 + $0x90] sm:$0x7f]  ;;  %9649 = vst [vmem:[#allocation61_spill] sm:$0xff] %v8352_v31  ;;  %v1760_v7 = vor.u32 %v1759_v22, %v1756_v39  ;;  %v9651_v4 = vshll.u32 %v8346_v32, 16  ;;  %v5717_v34 = vunpack.c.h.bf16 %v5824_v38  ;;  %v1752_v63 = vsel %vm1726_vm1, %v1742_v1, %v1751_v51 }
  0xf0   : > { %v1481_v42 = vrot.slane %v8326_v16, 7  ;;  %v8359_v40 = vmul.u32.u64.low 3817748708, %v345_v30  ;;  %v8360_v36 = vmul.u32.u64.high 3817748708, %v345_v30, %v8359_v40  ;;  %v1774_v39 = vrot.slane %v9411_v43, 6 }
  0xf1   : > { %v8362_v20 = vmul.u32.u64.low 3817748708, %v346_v24  ;;  %v8363_v19 = vmul.u32.u64.high 3817748708, %v346_v24, %v8362_v20  ;;  %v1761_v22 = vsel %vm1726_vm1, %v1751_v51, %v1760_v7  ;;  %v9417_v3 = vshrl.u32 %v8392_v44, 16 }
  0xf2   : > { %v1482_v9 = vsel %vm9647_vm14, %v9646_v52, %v1481_v42  ;;  %v9412_v42 = vshll.u32 %v8354_v29, 16  ;;  %v5716_v52 = vunpack.c.l.bf16 %v5824_v38  ;;  %v727_v1 = vshrl.u32 %v8360_v36, 4 }
  0xf3   : > { %6125 = vmatmul.mubr.bf16.gmra.mrb[32].mxu1 %v1482_v9  ;;  %6381 = vmatmul.mubr.bf16.gmra.mrb[28].mxu0 %v8352_v31  ;;  %v9650_v9 = vshrl.u32 %v8346_v32, 16  ;;  %v8375_v31 = vld [vmem:[#allocation2 + $0x30] sm:$0xff]  ;;  %v738_v51 = vshrl.u32 %v8363_v19, 4 }
  0xf4   : > { %6144 = vmatprep.mubr.bf16.mxu1 %v1743_v47  ;;  %v1768_v47 = vrot.slane %v9651_v4, 7  ;;  %v1777_v40 = vrot.slane %v9412_v42, 7  ;;  %v7009_v4 = vld [vmem:[%s9328_s1] ss:$0 sm:$0xff]  ;;  %v728_v62 = vmul.u32 18, %v727_v1  ;;  %v9652_v36 = vshrl.u32 %v8375_v31, 16 }
  0xf5   : > { %v1765_v18 = vrot.slane %v9650_v9, 6  ;;  %v6968_v9 = vld [vmem:[%s9330_s3 + $0x88] sm:$0xff]   ;;  %v1148_v43 = vmul.f32 %v7009_v4, %v5716_v52  ;;  %v1149_v2 = vmul.f32 %v7009_v4, %v5717_v34  ;;  %v739_v20 = vmul.u32 18, %v738_v51  ;;  %v6970_v34 = vld [vmem:[%s9330_s3 + $0x90] sm:$0xff]   ;;  %v3706_v51 = vld [vmem:[#allocation2 + $0x18] sm:$0xff] }
  0xf6   : > { %v1778_v38 = vor.u32 %v1777_v40, %v1774_v39  ;;  %v1783_v19 = vrot.slane %v9652_v36, 6  ;;  %v9416_v52 = vshll.u32 %v8392_v44, 16 }
  0xf7   : > { %v1769_v42 = vor.u32 %v1768_v47, %v1765_v18  ;;  %v9653_v18 = vshll.u32 %v8375_v31, 16 }
  0xf9   : > { %v1786_v47 = vrot.slane %v9653_v18, 7  ;;  %v1770_v40 = vsel %vm1726_vm1, %v1760_v7, %v1769_v42  ;;  %v6972_v7 = vld [vmem:[%s9330_s3 + $0x98] sm:$0xff]  }
  0xfb   : > { %6145 = vmatmul.mubr.bf16.vlgmr.msra.gmra.mrb[0].mxu1 %v1752_v63  ;;  %v740_v63 = vsub.s32 %v346_v24, %v739_v20  ;;  %v1792_v24 = vrot.slane %v9417_v3, 6 }
  0xfc   : > { %6181 = vmatpush3.bf16.msra.mxu1 %v7010_v45  ;;  %6148 = vmatprep.mubr.bf16.mxu1 %v1761_v22  ;;  %v729_v45 = vsub.s32 %v345_v30, %v728_v62  ;;  %v7012_v22 = vld [vmem:[%s9329_s2] ss:$0 sm:$0xff]  ;;  %v1795_v62 = vrot.slane %v9416_v52, 7  ;;  %v1779_v30 = vsel %vm1726_vm1, %v1769_v42, %v1778_v38  ;;  %v9654_v42 = vmov 0 }
  0xfd   : > { %6182 = vmatprep.subr.bf16.mxu1 %v6968_v9  ;;  %v1191_v39 = vadd.f32 %v7012_v22, %v1148_v43  ;;  %v1192_v1 = vadd.f32 %v7012_v22, %v1149_v2  ;;  %vm778_vm5 = vcmp.ne.s32.totalorder %v740_v63, 0  ;;  %vm814_vm13 = vcmp.lt.s32.totalorder %v740_v63, 0  ;;  %v8413_v52 = vld [vmem:[#allocation2 + $0x20] sm:$0xff] }
  0xfe   : > { %vm777_vm4 = vcmp.ne.s32.totalorder %v729_v45, 0  ;;  %vm813_vm10 = vcmp.lt.s32.totalorder %v729_v45, 0  ;;  %v885_v4 = vadd.s32 18, %v729_v45  ;;  %v886_v36 = vadd.s32 18, %v740_v63  ;;  %vm850_vm15 = vmand %vm814_vm13, %vm778_vm5 }
  0xff   : > { %vm849_vm12 = vmand %vm813_vm10, %vm777_vm4  ;;  %v1787_v43 = vor.u32 %v1786_v47, %v1783_v19  ;;  %v1227_v2 = vmax.f32 %v1191_v39, 0.0  ;;  %v1228_v18 = vmax.f32 %v1192_v1, 0.0  ;;  %v3745_v22 = vshll.u32 %v3706_v51, 16  ;;  %v3260_v47 = vld [vmem:[#allocation2 + $0xa0] sm:$0x1] }
 0x100   : > { %6183 = vmatpush3.bf16.msra.mxu1 %v6968_v9  ;;  %v921_v20 = vsel %vm849_vm12, %v885_v4, %v729_v45  ;;  %v922_v9 = vsel %vm850_vm15, %v886_v36, %v740_v63  ;;  %v9420_v19 = vshrl.u32 %v8281_v58, 16  ;;  %v1796_v45 = vor.u32 %v1795_v62, %v1792_v24  ;;  %v8420_v63 = vld [vmem:[#allocation2 + $0x40] sm:$0xff]  ;;  %v8430_v4 = vld [vmem:[#allocation2 + $0x48] sm:$0xff] }
 0x101   : > { %6184 = vmatprep.subr.bf16.mxu1 %v6970_v34  ;;  %vm957_vm7 = vcmp.ge.s32.totalorder %v921_v20, 1  ;;  %vm958_vm14 = vcmp.ge.s32.totalorder %v922_v9, 1  ;;  %vm993_vm0 = vcmp.le.s32.totalorder %v921_v20, 16  ;;  %vm994_vm4 = vcmp.le.s32.totalorder %v922_v9, 16  ;;  %v6974_v62 = vld [vmem:[%s9330_s3 + $0xa0] sm:$0xff]  }
 0x102   : > { %vm8415_vm10 = vmand %vm957_vm7, %vm993_vm0  ;;  %v9657_v1 = vmov 0  ;;  %v3743_v20 = vshrl.u32 %v3706_v51, 16  ;;  %v3747_v9 = vrot.slane %v3745_v22, 1  ;;  %v9426_v3 = vshll.u32 %v8413_v52, 16  ;;  %v8451_v22 = vld [vmem:[#allocation2 + $0x28] sm:$0xff] }
 0x103   : > { %6149 = vmatmul.mubr.bf16.gmra.mrb[4].mxu1 %v1770_v40  ;;  %v9655_v42 = vsel %vm8415_vm10, 4294967295, %v9654_v42  ;;  %vm8424_vm5 = vmand %vm958_vm14, %vm994_vm4  ;;  %v3423_v39 = vshll.u32 %v3260_v47, 16  ;;  %v3413_v24 = vor.u32 %v9420_v19, %v8324_v33  ;;  %v1797_v36 = vsel %vm1726_vm1, %v1787_v43, %v1796_v45 }
 0x104   : > { %6152 = vmatprep.mubr.bf16.mxu1 %v1779_v30  ;;  %6185 = vmatpush3.bf16.msra.mxu1 %v6970_v34  ;;  %9656 = vst [vmem:[#allocation62_spill] sm:$0xff] %v9655_v42  ;;  %v9658_v1 = vsel %vm8424_vm5, 4294967295, %v9657_v1  ;;  %v1335_v34 = vsel %vm8415_vm10, %v1227_v2, 0.0  ;;  %v1336_v30 = vsel %vm8424_vm5, %v1228_v18, 0.0  ;;  %v1788_v2 = vsel %vm1726_vm1, %v1778_v38, %v1787_v43 }
 0x105   : > { %9659 = vst [vmem:[#allocation63_spill] sm:$0xff] %v9658_v1  ;;  %6186 = vmatprep.subr.bf16.mxu1 %v6972_v7  ;;  %v8441_v40 = vpack.c.bf16 %v1336_v30, %v1335_v34  ;;  %v9660_v42 = vshrl.u32 %v8420_v63, 16  ;;  %v9661_v18 = vshll.u32 %v8420_v63, 16  ;;  %v9662_v34 = vshrl.u32 %v8430_v4, 16 }
 0x106   : > { %v9663_v43 = vshll.u32 %v8430_v4, 16  ;;  %v3425_v47 = vrot.slane %v3423_v39, 1  ;;  %v9427_v1 = vshll.u32 %v8451_v22, 16  ;;  %v9429_v58 = vshrl.u32 %v8413_v52, 16  ;;  %v6978_v39 = vld [vmem:[%s9330_s3 + $0xb0] sm:$0xff]  }
 0x107   : > { %v1801_v21 = vrot.slane %v9660_v42, 6  ;;  %v1804_v51 = vrot.slane %v9661_v18, 7  ;;  %1372 = vst [vmem:[#allocation2 + $0x98] sm:$0xff] %v8441_v40  ;;  %v9425_v38 = vshll.u32 %v8441_v40, 16  ;;  %v1810_v33 = vrot.slane %v9662_v34, 6  ;;  %v6976_v42 = vld [vmem:[%s9330_s3 + $0xa8] sm:$0xff]  }
 0x108   : > { %6187 = vmatpush3.bf16.msra.mxu1 %v6972_v7  ;;  %v1813_v30 = vrot.slane %v9663_v43, 7  ;;  %v3748_v7 = vor.u32 %v3747_v9, %v3743_v20  ;;  %v3752_v18 = vrot.slane %v9426_v3, 1  ;;  %v8468_v34 = vld [vmem:[#allocation2 + $0x30] sm:$0xff]  ;;  %vm9664_vm13 = vsmask.f32 7424 }
 0x109   : > { %6188 = vmatprep.subr.bf16.mxu1 %v6974_v62  ;;  %v3417_v19 = vrot.slane %v9425_v38, 1  ;;  %v1805_v43 = vor.u32 %v1804_v51, %v1801_v21  ;;  %v9666_v20 = vshrl.u32 %v8441_v40, 16  ;;  %v9430_v38 = vshrl.u32 %v8451_v22, 16  ;;  %vm9668_vm12 = vmmov %vm9664_vm13 }
 0x10a   : > { %v3753_v21 = vsel %vm9668_vm12, %v3748_v7, %v3752_v18  ;;  %vm9669_vm15 = vmmov %vm9668_vm12  ;;  %v1819_v51 = vrot.slane %v8099_v28, 6  ;;  %v3756_v7 = vor.u32 %v9429_v58, %v3752_v18  ;;  %v1831_v3 = vrot.slane %v8127_v55, 7  ;;  %v7015_v58 = vld [vmem:[#allocation2] sm:$0x80] }
 0x10b   : > { %6153 = vmatmul.mubr.bf16.gmra.mrb[8].mxu1 %v1788_v2  ;;  %v8472_v41 = vsel %vm9664_vm13, %v3413_v24, %v3417_v19  ;;  %v8476_v9 = vor.u32 %v9666_v20, %v3417_v19  ;;  %v1814_v2 = vor.u32 %v1813_v30, %v1810_v33  ;;  %v8485_v24 = vld [vmem:[#allocation2 + $0x38] sm:$0xff]  ;;  %v1822_v33 = vrot.slane %v8034_v53, 7  ;;  %v8502_v53 = vld [vmem:[#allocation2 + $0x40] sm:$0xff]  ;;  %vm9671_vm7 = vmmov %vm9668_vm12 }
 0x10c   : > { %6156 = vmatprep.mubr.bf16.mxu1 %v1797_v36  ;;  %6189 = vmatpush3.bf16.msra.mxu1 %v6974_v62  ;;  %9665 = vst [vmem:[#allocation64_spill] sm:$0xff] %v8472_v41  ;;  %v3760_v62 = vrot.slane %v9427_v1, 1  ;;  %v1806_v30 = vsel %vm1726_vm1, %v1796_v45, %v1805_v43  ;;  %v1828_v20 = vrot.slane %v8131_v26, 6  ;;  %v6980_v45 = vld [vmem:[%s9330_s3 + $0xb8] sm:$0xff]   ;;  %v9670_v18 = vshll.u32 %v8468_v34, 16  ;;  %vm9673_vm14 = vmmov %vm9671_vm7 }
 0x10d   : > { %9667 = vst [vmem:[#allocation65_spill] sm:$0xff] %v8476_v9  ;;  %6190 = vmatprep.subr.bf16.mxu1 %v6976_v42  ;;  %6384 = vmatprep.mubr.bf16.mxu0 %v8472_v41  ;;  %v3426_v19 = vsel %vm9669_vm15, %v8476_v9, %v3425_v47  ;;  %v1815_v47 = vsel %vm1726_vm1, %v1805_v43, %v1814_v2  ;;  %v1840_v43 = vrot.slane %v8134_v48, 7  ;;  %v9441_v28 = vshrl.u32 %v8485_v24, 16  ;;  %v8515_v9 = vld [vmem:[#allocation2 + $0x48] sm:$0xff]  ;;  %vm9675_vm0 = vmmov %vm9671_vm7 }
 0x10e   : > { %6385 = vmatmul.mubr.bf16.gmra.mrb[32].mxu0 %v3426_v19  ;;  %v3764_v1 = vor.u32 %v9430_v38, %v3760_v62  ;;  %v3768_v19 = vrot.slane %v9670_v18, 1  ;;  %v2160_v38 = vshrl.u32 %v7015_v58, 16  ;;  %v1823_v36 = vor.u32 %v1822_v33, %v1819_v51  ;;  %vm9679_vm4 = vmmov %vm9675_vm0 }
 0x10f   : > { %6404 = vmatprep.mubr.bf16.mxu0 %v3753_v21  ;;  %v1837_v21 = vrot.slane %v8205_v61, 6  ;;  %v3761_v55 = vsel %vm9671_vm7, %v3756_v7, %v3760_v62  ;;  %v1832_v26 = vor.u32 %v1831_v3, %v1828_v20  ;;  %v9442_v41 = vshll.u32 %v8502_v53, 16  ;;  %v8532_v20 = vld [vmem:[%s9330_s3 + $0xc0] sm:$0xff]   ;;  %vm9687_vm12 = vmmov %vm9675_vm0 }
 0x110   : > { %6191 = vmatpush3.bf16.msra.mxu1 %v6976_v42  ;;  %v9672_v18 = vshll.u32 %v8485_v24, 16  ;;  %v1846_v48 = vrot.slane %v8226_v56, 6  ;;  %v1849_v58 = vrot.slane %v8220_v13, 7  ;;  %v1882_v51 = vrot.slane %v8315_v23, 6  ;;  %v8614_v56 = vld [vmem:[#allocation2 + $0x60] sm:$0xff]  ;;  %vm9693_vm15 = vmmov %vm9675_vm0 }
 0x111   : > { %6192 = vmatprep.subr.bf16.mxu1 %v6978_v39  ;;  %v3769_v62 = vsel %vm9673_vm14, %v3764_v1, %v3768_v19  ;;  %v9674_v3 = vshrl.u32 %v8468_v34, 16  ;;  %v1885_v7 = vrot.slane %v8310_v35, 7  ;;  %v1889_v1 = vshrl.u32 %v8326_v16, 16  ;;  %9688 = vst [vmem:[#allocation68_spill] sm:$0xff] %v8614_v56  ;;  %vm9710_vm14 = vmmov %vm9675_vm0 }
 0x112   : > { %v3776_v42 = vrot.slane %v9672_v18, 1  ;;  %v1850_v18 = vor.u32 %v1849_v58, %v1846_v48  ;;  %v1858_v35 = vrot.slane %v8229_v46, 7  ;;  %v9677_v48 = vshll.u32 %v8515_v9, 16 }
 0x113   : > { %6157 = vmatmul.mubr.bf16.gmra.mrb[12].mxu1 %v1806_v30  ;;  %v3772_v33 = vor.u32 %v9674_v3, %v3768_v19  ;;  %v1841_v30 = vor.u32 %v1840_v43, %v1837_v21  ;;  %v1892_v19 = vshll.u32 %v8326_v16, 16  ;;  %v1833_v21 = vsel %vm1726_vm1, %v1823_v36, %v1832_v26 }
 0x114   : > { %6160 = vmatprep.mubr.bf16.mxu1 %v1815_v47  ;;  %6193 = vmatpush3.bf16.msra.mxu1 %v6978_v39  ;;  %v6977_v39 = vld [vmem:[%s9330_s3 + $0x1c8] sm:$0xff]   ;;  %v1824_v47 = vsel %vm1726_vm1, %v1814_v2, %v1823_v36  ;;  %v3780_v43 = vor.u32 %v9441_v28, %v3776_v42  ;;  %v3784_v3 = vrot.slane %v9442_v41, 1  ;;  %v7016_v2 = vld [vmem:[%s9330_s3 + $0x1c0] sm:$0xff]   ;;  %v8547_v16 = vor.u32 %v1885_v7, %v1882_v51 }
 0x115   : > { %6194 = vmatprep.subr.bf16.mxu1 %v6980_v45  ;;  %v1894_v36 = vrot.slane %v1892_v19, 7  ;;  %v3777_v23 = vsel %vm9675_vm0, %v3772_v33, %v3776_v42  ;;  %v1842_v28 = vsel %vm1726_vm1, %v1832_v26, %v1841_v30  ;;  %v1855_v41 = vrot.slane %v8284_v8, 6  ;;  %v8561_v42 = vld [vmem:[#allocation2 + $0x58] sm:$0xff] }
 0x116   : > { %6405 = vmatmul.mubr.bf16.vlgmr.msra.gmra.mrb[0].mxu0 %v3761_v55  ;;  %v1891_v55 = vrot.slane %v1889_v1, 6  ;;  %v3792_v58 = vrot.slane %v9677_v48, 1  ;;  %9678 = vst [vmem:[#allocation67_spill] sm:$0xff] %v8561_v42  ;;  %v2162_v51 = vrot.slane %v2160_v38, 7  ;;  %v9443_v33 = vrot.slane %v8274_v6, 7 }
 0x117   : > { %6408 = vmatprep.mubr.bf16.mxu0 %v3769_v62  ;;  %6441 = vmatpush3.bf16.msra.mxu0 %v7016_v2  ;;  %v6979_v62 = vld [vmem:[%s9330_s3 + $0x1d0] sm:$0xff]   ;;  %v3785_v7 = vsel %vm9679_vm4, %v3780_v43, %v3784_v3  ;;  %v9680_v1 = vshrl.u32 %v8502_v53, 16  ;;  %v9451_v2 = vshrl.u32 %v8515_v9, 16  ;;  %vm2158_vm13 = vsmask.f32 256  ;;  %vm9716_vm4 = vmmov %vm9675_vm0 }
 0x118   : > { %6195 = vmatpush3.bf16.msra.mxu1 %v6980_v45  ;;  %6442 = vmatprep.subr.bf16.mxu0 %v6977_v39  ;;  %v8553_v45 = vld [vmem:[#allocation2 + $0x50] sm:$0xff]  ;;  %v1895_v26 = vor.u32 %v1894_v36, %v1891_v55  ;;  %v1859_v43 = vor.u32 %v1858_v35, %v1855_v41  ;;  %v8583_v55 = vshll.u32 %v8561_v42, 16  ;;  %v9682_v35 = vshrl.u32 %v8346_v32, 16 }
 0x119   : > { %9676 = vst [vmem:[#allocation66_spill] sm:$0xff] %v8553_v45  ;;  %6232 = vmatprep.subr.bf16.mxu1 %v8532_v20  ;;  %v3788_v19 = vor.u32 %v9680_v1, %v3784_v3  ;;  %v8570_v48 = vshll.u32 %v8553_v45, 16  ;;  %v8580_v3 = vshrl.u32 %v8553_v45, 16  ;;  %v1867_v1 = vrot.slane %v8287_v57, 7 }
 0x11a   : > { %v8574_v38 = vsel %vm1726_vm1, %v8547_v16, %v1895_v26  ;;  %v1864_v26 = vrot.slane %v8290_v50, 6  ;;  %v3796_v46 = vor.u32 %v9451_v2, %v3792_v58  ;;  %v9683_v45 = vshll.u32 %v8303_v37, 16 }
 0x11b   : > { %6161 = vmatmul.mubr.bf16.gmra.mrb[16].mxu1 %v1824_v47  ;;  %v1851_v47 = vsel %vm1726_vm1, %v1841_v30, %v1850_v18  ;;  %6443 = vmatpush3.bf16.msra.mxu0 %v6977_v39  ;;  %v6981_v30 = vld [vmem:[%s9330_s3 + $0x1d8] sm:$0xff]   ;;  %v9681_v39 = vshrl.u32 %v8303_v37, 16  ;;  %v9685_v50 = vshrl.u32 %v8375_v31, 16  ;;  %v3793_v37 = vsel %vm9687_vm12, %v3788_v19, %v3792_v58  ;;  %vm9717_vm12 = vmmov %vm9675_vm0 }
 0x11c   : > { %6164 = vmatprep.mubr.bf16.mxu1 %v1833_v21  ;;  %v2164_v21 = vor.u32 %v9443_v33, %v8277_v27  ;;  %6444 = vmatprep.subr.bf16.mxu0 %v6979_v62  ;;  %v2172_v33 = vrot.slane %v9682_v35, 7  ;;  %v9686_v35 = vshll.u32 %v8346_v32, 16  ;;  %v1860_v32 = vsel %vm1726_vm1, %v1850_v18, %v1859_v43 }
 0x11d   : > { %v2169_v36 = vrot.slane %v9681_v39, 7  ;;  %v9684_v39 = vshrl.u32 %v8354_v29, 16  ;;  %v2178_v57 = vrot.slane %v9685_v50, 7  ;;  %v6983_v50 = vld [vmem:[%s9330_s3 + $0x1e0] sm:$0xff]   ;;  %v8627_v58 = vshrl.u32 %v8561_v42, 16 }
 0x11e   : > { %v8593_v41 = vsel %vm2158_vm13, %v2162_v51, %v2164_v21  ;;  %6409 = vmatmul.mubr.bf16.gmra.mrb[4].mxu0 %v3777_v23  ;;  %v3800_v51 = vrot.slane %v8570_v48, 1  ;;  %v1873_v21 = vrot.slane %v8307_v11, 6  ;;  %v1876_v23 = vrot.slane %v8293_v59, 7 }
 0x11f   : > { %v8601_v8 = vor.u32 %v2169_v36, %v9683_v45  ;;  %v2175_v13 = vrot.slane %v9684_v39, 7  ;;  %6412 = vmatprep.mubr.bf16.mxu0 %v3785_v7  ;;  %6445 = vmatpush3.bf16.msra.mxu0 %v6979_v62  ;;  %v2173_v2 = vor.u32 %v2172_v33, %v9686_v35  ;;  %v3808_v45 = vrot.slane %v8583_v55, 1 }
 0x120   : > { %6446 = vmatprep.subr.bf16.mxu0 %v6981_v30  ;;  %v9689_v7 = vshll.u32 %v8354_v29, 16  ;;  %v9690_v59 = vshll.u32 %v8375_v31, 16  ;;  %v8624_v35 = vor.u32 %v1867_v1, %v1864_v26  ;;  %v9692_v31 = vshrl.u32 %v8420_v63, 16 }
 0x121   : > { %v8630_v19 = vsel %vm2158_vm13, %v2169_v36, %v2173_v2  ;;  %v3801_v26 = vsel %vm9693_vm15, %v3796_v46, %v3800_v51  ;;  %v3804_v1 = vor.u32 %v8580_v3, %v3800_v51  ;;  %v8647_v2 = vshll.u32 %v8614_v56, 16  ;;  %vm9719_vm15 = vmmov %vm9675_vm0 }
 0x122   : > { %v2176_v39 = vor.u32 %v2175_v13, %v9689_v7  ;;  %v2179_v62 = vor.u32 %v2178_v57, %v9690_v59  ;;  %v9691_v59 = vshrl.u32 %v8392_v44, 16  ;;  %v2184_v18 = vrot.slane %v9692_v31, 7 }
 0x123   : > { %6165 = vmatmul.mubr.bf16.gmra.mrb[20].mxu1 %v1842_v28  ;;  %v8644_v7 = vor.u32 %v1876_v23, %v1873_v21  ;;  %6447 = vmatpush3.bf16.msra.mxu0 %v6981_v30  ;;  %v9696_v46 = vshll.u32 %v8420_v63, 16  ;;  %vm4206_vm7 = vcmask 1046528   ;;  %v3812_v21 = vor.u32 %v8627_v58, %v3808_v45  ;;  %v8660_v23 = vld [vmem:[#allocation2 + $0x68] sm:$0xff]  ;;  %v8672_v63 = vld [vmem:[#allocation2 + $0x80] sm:$0xff] }
 0x124   : > { %6168 = vmatprep.mubr.bf16.mxu1 %v1851_v47  ;;  %v8633_v11 = vsel %vm2158_vm13, %v2172_v33, %v2176_v39  ;;  %v8636_v29 = vsel %vm2158_vm13, %v2175_v13, %v2179_v62  ;;  %v2181_v28 = vrot.slane %v9691_v59, 7  ;;  %v8649_v33 = vld [vmem:[#allocation2 + $0x70] sm:$0xff]  ;;  %6448 = vmatprep.subr.bf16.mxu0 %v6983_v50  ;;  %v6985_v13 = vld [vmem:[%s9330_s3 + $0x1e8] sm:$0xff]   ;;  %v9695_v47 = vshll.u32 %v8392_v44, 16  ;;  %9697 = vst [vmem:[#allocation70_spill] sm:$0xff] %v8660_v23 }
 0x125   : > { %9694 = vst [vmem:[#allocation69_spill] sm:$0xff] %v8649_v33  ;;  %v2185_v39 = vor.u32 %v2184_v18, %v9696_v46  ;;  %v8663_v30 = vshrl.u32 %v8614_v56, 16  ;;  %v4210_v62 = vrot.slane %v8451_v22, 1  ;;  %v9698_v59 = vshrl.u32 %v8430_v4, 16  ;;  %9700 = vst [vmem:[#allocation72_spill] sm:$0xff] %v8672_v63 }
 0x126   : > { %v2182_v36 = vor.u32 %v2181_v28, %v9695_v47  ;;  %6413 = vmatmul.mubr.bf16.gmra.mrb[8].mxu0 %v3793_v37  ;;  %v1869_v44 = vsel %vm1726_vm1, %v1859_v43, %v8624_v35  ;;  %v4212_v51 = vrot.slane %v8468_v34, 1  ;;  %v8682_v56 = vshll.u32 %v8649_v33, 16 }
 0x127   : > { %v8668_v31 = vrot.slane %v9698_v59, 7  ;;  %v8678_v46 = vsel %vm2158_vm13, %v2181_v28, %v2185_v39  ;;  %6416 = vmatprep.mubr.bf16.mxu0 %v3801_v26  ;;  %v8684_v59 = vld [vmem:[#allocation2 + $0x78] sm:$0xff]  ;;  %6449 = vmatpush3.bf16.msra.mxu0 %v6983_v50  ;;  %v9704_v37 = vrot.slane %v8413_v52, 1  ;;  %v4214_v28 = vrot.slane %v8485_v24, 1  ;;  %v6987_v50 = vld [vmem:[%s9330_s3 + $0x1f0] sm:$0xff]  }
 0x128   : > { %v8675_v47 = vsel %vm2158_vm13, %v2178_v57, %v2182_v36  ;;  %9702 = vst [vmem:[#allocation74_spill] sm:$0xff] %v8678_v46  ;;  %9703 = vst [vmem:[#allocation75_spill] sm:$0xff] %v8684_v59  ;;  %v9706_v57 = vshll.u32 %v8430_v4, 16  ;;  %v3816_v39 = vrot.slane %v8647_v2, 1  ;;  %v8697_v26 = vshll.u32 %v8660_v23, 16  ;;  %6450 = vmatprep.subr.bf16.mxu0 %v6985_v13 }
 0x129   : > { %9699 = vst [vmem:[#allocation71_spill] sm:$0xff] %v8668_v31  ;;  %9701 = vst [vmem:[#allocation73_spill] sm:$0xff] %v8675_v47  ;;  %v8689_v43 = vsel %vm4206_vm7, %v9704_v37, %v4210_v62  ;;  %v8703_v42 = vsel %vm4206_vm7, %v4210_v62, %v4212_v51  ;;  %v4216_v37 = vrot.slane %v8502_v53, 1  ;;  %v8707_v4 = vshll.u32 %v8672_v63, 16  ;;  %v8784_v47 = vld [vmem:[#allocation2 + $0xa8] sm:$0x1] }
 0x12a   : > { %9705 = vst [vmem:[#allocation76_spill] sm:$0xff] %v8689_v43  ;;  %v2188_v36 = vor.u32 %v8668_v31, %v9706_v57  ;;  %9707 = vst [vmem:[#allocation77_spill] sm:$0xff] %v8703_v42  ;;  %v8713_v61 = vsel %vm4206_vm7, %v4212_v51, %v4214_v28  ;;  %v9465_v31 = vrot.slane %v8515_v9, 1  ;;  %v3809_v43 = vsel %vm9710_vm14, %v3804_v1, %v3808_v45 }
 0x12b   : > { %6169 = vmatmul.mubr.bf16.gmra.mrb[24].mxu1 %v1860_v32  ;;  %9709 = vst [vmem:[#allocation79_spill] sm:$0xff] %v8713_v61  ;;  %v8718_v62 = vshrl.u32 %v8660_v23, 16  ;;  %v8721_v42 = vshll.u32 %v8684_v59, 16  ;;  %v8724_v32 = vsel %vm4206_vm7, %v4214_v28, %v4216_v37  ;;  %v2166_v51 = vrot.slane %v7328_v54, 7  ;;  %6451 = vmatpush3.bf16.msra.mxu0 %v6985_v13  ;;  %v8748_v23 = vld [vmem:[#allocation2 + $0x90] sm:$0xff]  ;;  %vm9720_vm14 = vmmov %vm9675_vm0 }
 0x12c   : > { %v8710_v57 = vsel %vm2158_vm13, %v2184_v18, %v2188_v36  ;;  %6172 = vmatprep.mubr.bf16.mxu1 %v1869_v44  ;;  %9711 = vst [vmem:[#allocation80_spill] sm:$0xff] %v8724_v32  ;;  %v3832_v18 = vrot.slane %v8682_v56, 1  ;;  %v8728_v36 = vshrl.u32 %v8649_v33, 16  ;;  %v8734_v45 = vsel %vm4206_vm7, %v4216_v37, %v9465_v31  ;;  %6452 = vmatprep.subr.bf16.mxu0 %v6987_v50  ;;  %v6989_v33 = vld [vmem:[%s9330_s3 + $0x1f8] sm:$0xff]  }
 0x12d   : > { %9708 = vst [vmem:[#allocation78_spill] sm:$0xff] %v8710_v57  ;;  %9712 = vst [vmem:[#allocation81_spill] sm:$0xff] %v8734_v45  ;;  %v3817_v1 = vsel %vm9675_vm0, %v3812_v21, %v3816_v39  ;;  %v3824_v44 = vrot.slane %v8697_v26, 1  ;;  %v8739_v28 = vshrl.u32 %v8684_v59, 16  ;;  %v3848_v54 = vrot.slane %v8707_v4, 1 }
 0x12e   : > { %v8746_v13 = vshrl.u32 %v8672_v63, 16  ;;  %9713 = vst [vmem:[#allocation82_spill] sm:$0xff] %v8748_v23  ;;  %6417 = vmatmul.mubr.bf16.gmra.mrb[12].mxu0 %v3809_v43  ;;  %v1878_v21 = vsel %vm1726_vm1, %v8624_v35, %v8644_v7  ;;  %v3820_v37 = vor.u32 %v8663_v30, %v3816_v39  ;;  %v3840_v59 = vrot.slane %v8721_v42, 1  ;;  %v8767_v35 = vld [vmem:[%s9330_s3 + $0x200] sm:$0xff]  }
 0x12f   : > { %v3828_v31 = vor.u32 %v8718_v62, %v3824_v44  ;;  %6420 = vmatprep.mubr.bf16.mxu0 %v3817_v1  ;;  %v1887_v45 = vsel %vm1726_vm1, %v8644_v7, %v8547_v16  ;;  %v3836_v63 = vor.u32 %v8728_v36, %v3832_v18  ;;  %v8761_v32 = vor.u32 %v7654_v25, %v2166_v51  ;;  %vm9715_vm1 = vmmov %vm9675_vm0 }
 0x130   : > { %6453 = vmatpush3.bf16.msra.mxu0 %v6987_v50  ;;  %v3844_v43 = vor.u32 %v8739_v28, %v3840_v59  ;;  %v2215_v39 = vshrl.u32 %v8748_v23, 16  ;;  %v3852_v1 = vor.u32 %v8746_v13, %v3848_v54  ;;  %v9714_v16 = vshrl.u32 %v8451_v22, 16 }
 0x131   : > { %6454 = vmatprep.subr.bf16.mxu0 %v6989_v33  ;;  %v8775_v25 = vsel %vm2158_vm13, %v2166_v51, %v7364_v10  ;;  %v3825_v50 = vsel %vm9715_vm1, %v3820_v37, %v3824_v44  ;;  %v3833_v61 = vsel %vm9716_vm4, %v3828_v31, %v3832_v18  ;;  %v3841_v57 = vsel %vm9717_vm12, %v3836_v63, %v3840_v59  ;;  %v9724_v37 = vld [vmem:[#allocation22_spill] sm:$0xff]  ;;  %vm9750_vm4 = vmmov %vm9715_vm1 }
 0x132   : > { %v4554_v7 = vrot.slane %v9714_v16, 1  ;;  %v9718_v46 = vrot.slane %v8274_v6, 7  ;;  %v8788_v10 = vrot.slane %v2215_v39, 7  ;;  %v2218_v44 = vshll.u32 %v8748_v23, 16 }
 0x133   : > { %6173 = vmatmul.mubr.bf16.gmra.mrb[28].mxu1 %v1878_v21  ;;  %v8794_v31 = vsel %vm2158_vm13, %v7352_v0, %v7468_v15  ;;  %v8798_v63 = vsel %vm9720_vm14, %v3852_v1, %v8320_v12  ;;  %v8812_v0 = vsel %vm2158_vm13, %v7532_v60, %v7643_v14  ;;  %v9721_v15 = vld [vmem:[#allocation13_spill] sm:$0xff]  ;;  %v9727_v14 = vld [vmem:[#allocation24_spill] sm:$0xff]  ;;  %vm4541_vm0 = vsmask.f32 6400 }
 0x134   : > { %6176 = vmatprep.mubr.bf16.mxu1 %v1887_v45  ;;  %v2168_v21 = vsel %vm2158_vm13, %v9718_v46, %v8761_v32  ;;  %6455 = vmatpush3.bf16.msra.mxu0 %v6989_v33  ;;  %v3849_v45 = vsel %vm9719_vm15, %v3844_v43, %v3848_v54  ;;  %v2171_v33 = vsel %vm2158_vm13, %v2166_v51, %v8601_v8  ;;  %v8819_v8 = vld [vmem:[#allocation2 + $0x18] sm:$0xfe]  ;;  %v4242_v54 = vrot.slane %v8784_v47, 1 }
 0x135   : > { %6492 = vmatprep.subr.bf16.mxu0 %v8767_v35  ;;  %v8805_v46 = vsel %vm2158_vm13, %v7451_v49, %v7552_v5  ;;  %v8817_v12 = vsel %vm2158_vm13, %v9721_v15, %v7694_v17  ;;  %v9470_v49 = vrot.slane %v8441_v40, 1  ;;  %v9723_v5 = vld [vmem:[#allocation52_spill] sm:$0xff]  ;;  %v8830_v60 = vor.u32 %v2218_v44, %v8788_v10  ;;  %v9728_v17 = vld [vmem:[#allocation19_spill] sm:$0xff] }
 0x136   : > { %6421 = vmatmul.mubr.bf16.gmra.mrb[16].mxu0 %v3825_v50  ;;  %9722 = vst [vmem:[#allocation13_spill] sm:$0xff] %v8817_v12  ;;  %v4240_v51 = vrot.slane %v9723_v5, 1  ;;  %v9725_v43 = vld [vmem:[#allocation16_spill] sm:$0xff]  ;;  %v4543_v1 = vshrl.u32 %v8819_v8, 16  ;;  %v4546_v44 = vshll.u32 %v8819_v8, 16  ;;  %v9731_v15 = vshrl.u32 %v8413_v52, 16 }
 0x137   : > { %6424 = vmatprep.mubr.bf16.mxu0 %v3833_v61  ;;  %v8827_v39 = vsel %vm2158_vm13, %v9725_v43, %v9724_v37  ;;  %v8835_v61 = vsel %vm2158_vm13, %v9728_v17, %v9727_v14  ;;  %v9732_v43 = vshll.u32 %v8413_v52, 16  ;;  %v9735_v23 = vshll.u32 %v8468_v34, 16 }
 0x138   : > { %9726 = vst [vmem:[#allocation52_spill] sm:$0xff] %v8827_v39  ;;  %9729 = vst [vmem:[#allocation22_spill] sm:$0xff] %v8835_v61  ;;  %v8842_v16 = vsel %vm4206_vm7, %v9470_v49, %v4240_v51  ;;  %v8845_v50 = vsel %vm4206_vm7, %v4240_v51, %v4242_v54  ;;  %v4550_v5 = vrot.slane %v9731_v15, 1  ;;  %v4545_v37 = vrot.slane %v4543_v1, 1 }
 0x139   : > { %9730 = vst [vmem:[#allocation16_spill] sm:$0xff] %v8845_v50  ;;  %v4551_v14 = vrot.slane %v9732_v43, 2  ;;  %v2608_v49 = vrot.slane %v8580_v3, 7  ;;  %v4548_v18 = vrot.slane %v4546_v44, 2  ;;  %v2616_v51 = vrot.slane %v8627_v58, 7 }
 0x13a   : > { %v9734_v54 = vshrl.u32 %v8468_v34, 16  ;;  %v4559_v15 = vrot.slane %v9735_v23, 2  ;;  %v9736_v43 = vshrl.u32 %v8485_v24, 16  ;;  %v9737_v44 = vshll.u32 %v8485_v24, 16  ;;  %v9738_v34 = vld [vmem:[#allocation23_spill] sm:$0xff] }
 0x13b   : > { %6177 = vmatmul.mubr.bf16.gmra.mrb[32].mxu1 %v8574_v38  ;;  %v9733_v38 = vshll.u32 %v8451_v22, 16  ;;  %v4552_v61 = vor.u32 %v4551_v14, %v4550_v5  ;;  %v2611_v1 = vor.u32 %v8570_v48, %v2608_v49  ;;  %v4549_v22 = vor.u32 %v4548_v18, %v4545_v37 }
 0x13c   : > { %6196 = vmatprep.mubr.bf16.mxu1 %v8593_v41  ;;  %v4558_v59 = vrot.slane %v9734_v54, 1  ;;  %v4562_v50 = vrot.slane %v9736_v43, 1  ;;  %v4563_v12 = vrot.slane %v9737_v44, 2  ;;  %v2632_v5 = vrot.slane %v8718_v62, 7  ;;  %v6986_v44 = vld [vmem:[%s9330_s3 + $0xd0] sm:$0xff]  }
 0x13d   : > { %v4555_v17 = vrot.slane %v9733_v38, 2  ;;  %v2619_v38 = vor.u32 %v8583_v55, %v2616_v51  ;;  %v8872_v23 = vsel %vm2158_vm13, %v9738_v34, %v2611_v1  ;;  %v8880_v24 = vsel %vm4541_vm0, %v4549_v22, %v4552_v61 }
 0x13e   : > { %v4560_v39 = vor.u32 %v4559_v15, %v4558_v59  ;;  %6425 = vmatmul.mubr.bf16.gmra.mrb[20].mxu0 %v3841_v57  ;;  %v6984_v59 = vld [vmem:[%s9330_s3 + $0xc8] sm:$0xff]   ;;  %v4564_v37 = vor.u32 %v4563_v12, %v4562_v50  ;;  %v9740_v1 = vshll.u32 %v8502_v53, 16  ;;  %v2640_v50 = vrot.slane %v8728_v36, 7 }
 0x13f   : > { %v4556_v41 = vor.u32 %v4555_v17, %v4554_v7  ;;  %v2624_v7 = vrot.slane %v8663_v30, 7  ;;  %6428 = vmatprep.mubr.bf16.mxu0 %v3849_v45  ;;  %v8883_v57 = vsel %vm2158_vm13, %v2608_v49, %v2619_v38  ;;  %v2635_v17 = vor.u32 %v8697_v26, %v2632_v5 }
 0x140   : > { %v9739_v45 = vshrl.u32 %v8502_v53, 16  ;;  %v4567_v43 = vrot.slane %v9740_v1, 2  ;;  %v9741_v49 = vshrl.u32 %v8515_v9, 16 }
 0x141   : > { %v8868_v54 = vsel %vm4541_vm0, %v4552_v61, %v4556_v41  ;;  %v8886_v18 = vsel %vm4541_vm0, %v4556_v41, %v4560_v39  ;;  %v2627_v14 = vor.u32 %v8647_v2, %v2624_v7  ;;  %v8895_v61 = vsel %vm4541_vm0, %v4560_v39, %v4564_v37 }
 0x142   : > { %v4566_v15 = vrot.slane %v9739_v45, 1  ;;  %v4570_v22 = vrot.slane %v9741_v49, 1  ;;  %v9742_v41 = vshll.u32 %v8515_v9, 16  ;;  %v8907_v53 = vsel %vm2158_vm13, %v2624_v7, %v2635_v17 }
 0x143   : > { %6197 = vmatmul.mubr.bf16.vlgmr.msra.gmra.mrb[0].mxu1 %v2168_v21  ;;  %v8904_v38 = vsel %vm2158_vm13, %v2616_v51, %v2627_v14  ;;  %v2648_v39 = vrot.slane %v8739_v28, 7  ;;  %v2643_v45 = vor.u32 %v8682_v56, %v2640_v50  ;;  %v8916_v51 = vld [vmem:[#allocation2 + $0x88] sm:$0xff]  ;;  %v4578_v17 = vrot.slane %v8627_v58, 1 }
 0x144   : > { %v4571_v12 = vrot.slane %v9742_v41, 2  ;;  %6233 = vmatpush3.bf16.msra.mxu1 %v8532_v20  ;;  %6200 = vmatprep.mubr.bf16.mxu1 %v2171_v33  ;;  %v4568_v21 = vor.u32 %v4567_v43, %v4566_v15  ;;  %v4574_v20 = vrot.slane %v8580_v3, 1  ;;  %v4575_v33 = vrot.slane %v8570_v48, 2  ;;  %v9743_v41 = vld [vmem:[#allocation61_spill] sm:$0xff] }
 0x145   : > { %6234 = vmatprep.subr.bf16.mxu1 %v6984_v59  ;;  %v2651_v14 = vor.u32 %v8721_v42, %v2648_v39  ;;  %v4579_v15 = vrot.slane %v8583_v55, 2  ;;  %v8928_v43 = vsel %vm2158_vm13, %v2632_v5, %v2643_v45  ;;  %v2656_v48 = vrot.slane %v8746_v13, 7  ;;  %v6988_v5 = vld [vmem:[%s9330_s3 + $0xd8] sm:$0xff]  }
 0x146   : > { %v4572_v34 = vor.u32 %v4571_v12, %v4570_v22  ;;  %v8919_v7 = vsel %vm4541_vm0, %v4564_v37, %v4568_v21  ;;  %v4576_v3 = vor.u32 %v4575_v33, %v4574_v20  ;;  %6429 = vmatmul.mubr.bf16.gmra.mrb[24].mxu0 %v8798_v63  ;;  %v2662_v58 = vshrl.u32 %v8916_v51, 16  ;;  %v8937_v22 = vld [vmem:[#allocation2 + $0x98] sm:$0xff] }
 0x147   : > { %v8933_v37 = vsel %vm2158_vm13, %v2640_v50, %v2651_v14  ;;  %v4580_v49 = vor.u32 %v4579_v15, %v4578_v17  ;;  %v2665_v55 = vshll.u32 %v8916_v51, 16  ;;  %6432 = vmatprep.mubr.bf16.mxu0 %v9743_v41  ;;  %v4582_v12 = vrot.slane %v8663_v30, 1 }
 0x148   : > { %v8925_v1 = vsel %vm4541_vm0, %v4568_v21, %v4572_v34  ;;  %6235 = vmatpush3.bf16.msra.mxu1 %v6984_v59  ;;  %v8944_v63 = vsel %vm4541_vm0, %v4572_v34, %v4576_v3  ;;  %v2659_v59 = vor.u32 %v8707_v4, %v2656_v48  ;;  %v4583_v50 = vrot.slane %v8647_v2, 2 }
 0x149   : > { %6236 = vmatprep.subr.bf16.mxu1 %v6986_v44  ;;  %v8950_v21 = vsel %vm4541_vm0, %v4576_v3, %v4580_v49  ;;  %v2664_v45 = vrot.slane %v2662_v58, 7  ;;  %v4586_v20 = vrot.slane %v8718_v62, 1  ;;  %v4587_v33 = vrot.slane %v8697_v26, 2 }
 0x14a   : > { %v8956_v14 = vsel %vm2158_vm13, %v2648_v39, %v2659_v59  ;;  %v4584_v34 = vor.u32 %v4583_v50, %v4582_v12  ;;  %v2678_v17 = vshrl.u32 %v8937_v22, 16  ;;  %v2681_v30 = vshll.u32 %v8937_v22, 16 }
 0x14b   : > { %6201 = vmatmul.mubr.bf16.gmra.mrb[4].mxu1 %v8630_v19  ;;  %v2667_v2 = vor.u32 %v2665_v55, %v2664_v45  ;;  %v4588_v15 = vor.u32 %v4587_v33, %v4586_v20  ;;  %v8963_v62 = vsel %vm2158_vm13, %v2664_v45, %v8830_v60  ;;  %v4590_v26 = vrot.slane %v8728_v36, 1  ;;  %v6990_v19 = vld [vmem:[%s9330_s3 + $0xe0] sm:$0xff]   ;;  %v9746_v45 = vld [vmem:[#allocation64_spill] sm:$0xff] }
 0x14c   : > { %6204 = vmatprep.mubr.bf16.mxu1 %v8633_v11  ;;  %6237 = vmatpush3.bf16.msra.mxu1 %v6986_v44  ;;  %v8970_v39 = vsel %vm4541_vm0, %v4580_v49, %v4584_v34  ;;  %v2680_v3 = vrot.slane %v2678_v17, 7  ;;  %v4591_v11 = vrot.slane %v8682_v56, 2  ;;  %v4594_v44 = vrot.slane %v8739_v28, 1  ;;  %v9745_v55 = vld [vmem:[#allocation65_spill] sm:$0xff] }
 0x14d   : > { %6238 = vmatprep.subr.bf16.mxu1 %v6988_v5  ;;  %v9744_v58 = vrot.slane %v8277_v27, 1  ;;  %v8979_v36 = vsel %vm2158_vm13, %v2656_v48, %v2667_v2  ;;  %v8982_v59 = vsel %vm4541_vm0, %v4584_v34, %v4588_v15  ;;  %v4595_v12 = vrot.slane %v8721_v42, 2  ;;  %v6992_v34 = vld [vmem:[%s9330_s3 + $0xe8] sm:$0xff]  }
 0x14e   : > { %v2683_v49 = vor.u32 %v2681_v30, %v2680_v3  ;;  %v4592_v50 = vor.u32 %v4591_v11, %v4590_v26  ;;  %6433 = vmatmul.mubr.bf16.gmra.mrb[28].mxu0 %v9746_v45  ;;  %v9748_v33 = vshll.u32 %v8784_v47, 16  ;;  %v4207_v17 = vrot.slane %v8819_v8, 1  ;;  %v9749_v26 = vld [vmem:[#allocation73_spill] sm:$0xff]  ;;  %v9753_v11 = vld [vmem:[#allocation38_spill] sm:$0xff] }
 0x14f   : > { %v3881_v41 = vsel %vm9715_vm1, %v9745_v55, %v9744_v58  ;;  %v4596_v56 = vor.u32 %v4595_v12, %v4594_v44  ;;  %v9747_v28 = vmov %v9744_v58  ;;  %v4598_v47 = vrot.slane %v8746_v13, 1  ;;  %v6996_v58 = vld [vmem:[%s9330_s3 + $0xf8] sm:$0xff]   ;;  %v9754_v55 = vld [vmem:[#allocation74_spill] sm:$0xff] }
 0x150   : > { %6239 = vmatpush3.bf16.msra.mxu1 %v6988_v5  ;;  %6436 = vmatprep.mubr.bf16.mxu0 %v3881_v41  ;;  %v3884_v20 = vor.u32 %v9747_v28, %v8274_v6  ;;  %v3888_v48 = vrot.slane %v9748_v33, 1  ;;  %v8996_v42 = vsel %vm2158_vm13, %v8788_v10, %v2683_v49  ;;  %v8999_v5 = vsel %vm4541_vm0, %v4588_v15, %v4592_v50  ;;  %v6994_v15 = vld [vmem:[%s9330_s3 + $0xf0] sm:$0xff]   ;;  %v9757_v49 = vld [vmem:[#allocation37_spill] sm:$0xff]  ;;  %v6993_v45 = vld [vmem:[%s9330_s3 + $0x208] sm:$0xff]  }
 0x151   : > { %6240 = vmatprep.subr.bf16.mxu1 %v6990_v19  ;;  %v9003_v30 = vsel %vm4541_vm0, %v4592_v50, %v4596_v56  ;;  %v4599_v2 = vrot.slane %v8707_v4, 2  ;;  %v9751_v3 = vrot.slane %v8413_v52, 1  ;;  %v9752_v4 = vld [vmem:[#allocation36_spill] sm:$0xff]  ;;  %v2193_v44 = vrot.slane %v9753_v11, 7  ;;  %v9755_v52 = vld [vmem:[#allocation78_spill] sm:$0xff]  ;;  %v9756_v41 = vld [vmem:[#allocation31_spill] sm:$0xff] }
 0x152   : > { %v3889_v10 = vsel %vm9750_vm4, %v3884_v20, %v3888_v48  ;;  %v9759_v28 = vld [vmem:[#allocation71_spill] sm:$0xff]  ;;  %v9760_v33 = vld [vmem:[#allocation44_spill] sm:$0xff]  ;;  %v4523_v11 = vld [vmem:[#allocation2 + $0xa8] sm:$0x3] }
 0x153   : > { %6205 = vmatmul.mubr.bf16.gmra.mrb[8].mxu1 %v8636_v29  ;;  %v9013_v8 = vor.u32 %v4599_v2, %v4598_v47  ;;  %v4209_v29 = vsel %vm4206_vm7, %v4207_v17, %v9751_v3  ;;  %v2194_v50 = vor.u32 %v9757_v49, %v2193_v44  ;;  %v2196_v48 = vrot.slane %v9760_v33, 7  ;;  %v9762_v47 = vld [vmem:[#allocation46_spill] sm:$0xff]  ;;  %v9767_v33 = vld [vmem:[#allocation79_spill] sm:$0xff] }
 0x154   : > { %6208 = vmatprep.mubr.bf16.mxu1 %v9749_v26  ;;  %6241 = vmatpush3.bf16.msra.mxu1 %v6990_v19  ;;  %v2190_v19 = vrot.slane %v9752_v4, 7  ;;  %v2199_v2 = vrot.slane %v9762_v47, 7  ;;  %v9763_v26 = vshrl.u32 %v8441_v40, 16  ;;  %v9052_v4 = vld [vmem:[%s9330_s3 + $0x100] sm:$0xff]  }
 0x155   : > { %6242 = vmatprep.subr.bf16.mxu1 %v6992_v34  ;;  %v9020_v13 = vsel %vm4541_vm0, %v4596_v56, %v9013_v8  ;;  %v9758_v56 = vld [vmem:[#allocation76_spill] sm:$0xff] }
 0x156   : > { %6437 = vmatmul.mubr.bf16.gmra.mrb[32].mxu0 %v3889_v10  ;;  %v2191_v12 = vor.u32 %v9756_v41, %v2190_v19  ;;  %v2195_v17 = vsel %vm2158_vm13, %v2190_v19, %v2194_v50  ;;  %v4610_v10 = vrot.slane %v9763_v26, 1  ;;  %v4615_v19 = vrot.slane %v8277_v27, 2  ;;  %v9769_v26 = vld [vmem:[#allocation80_spill] sm:$0xff] }
 0x157   : > { %6456 = vmatprep.mubr.bf16.mxu0 %v4209_v29  ;;  %v6995_v29 = vld [vmem:[%s9330_s3 + $0x210] sm:$0xff]   ;;  %v4622_v41 = vshll.u32 %v4523_v11, 16 }
 0x158   : > { %6243 = vmatpush3.bf16.msra.mxu1 %v6992_v34  ;;  %v2192_v20 = vsel %vm2158_vm13, %v9759_v28, %v2191_v12  ;;  %v9761_v34 = vld [vmem:[#allocation77_spill] sm:$0xff]  ;;  %v6997_v28 = vld [vmem:[%s9330_s3 + $0x218] sm:$0xff]  }
 0x159   : > { %6244 = vmatprep.subr.bf16.mxu1 %v6994_v15  ;;  %v9766_v12 = vld [vmem:[#allocation45_spill] sm:$0xff] }
 0x15a   : > { %v2200_v49 = vor.u32 %v9766_v12, %v2199_v2  ;;  %v6999_v12 = vld [vmem:[%s9330_s3 + $0x228] sm:$0xff]  }
 0x15b   : > { %6209 = vmatmul.mubr.bf16.gmra.mrb[12].mxu1 %v9754_v55 }
 0x15c   : > { %6212 = vmatprep.mubr.bf16.mxu1 %v9755_v52  ;;  %6245 = vmatpush3.bf16.msra.mxu1 %v6994_v15  ;;  %v9764_v15 = vshll.u32 %v8441_v40, 16  ;;  %v4619_v52 = vshrl.u32 %v4523_v11, 16  ;;  %v6998_v11 = vld [vmem:[%s9330_s3 + $0x220] sm:$0xff]  }
 0x15d   : > { %6246 = vmatprep.subr.bf16.mxu1 %v6996_v58 }
 0x15e   : > { %6457 = vmatmul.mubr.bf16.vlgmr.msra.gmra.mrb[0].mxu0 %v9758_v56  ;;  %v4611_v3 = vrot.slane %v9764_v15, 2  ;;  %v9770_v15 = vld [vmem:[#allocation56_spill] sm:$0xff] }
 0x15f   : > { %6460 = vmatprep.mubr.bf16.mxu0 %v9761_v34  ;;  %6493 = vmatpush3.bf16.msra.mxu0 %v8767_v35  ;;  %v4614_v35 = vrot.slane %v8274_v6, 1  ;;  %v4621_v6 = vrot.slane %v4619_v52, 1  ;;  %v9773_v52 = vld [vmem:[#allocation55_spill] sm:$0xff] }
 0x160   : > { %6247 = vmatpush3.bf16.msra.mxu1 %v6996_v58  ;;  %6494 = vmatprep.subr.bf16.mxu0 %v6993_v45  ;;  %v9765_v58 = vld [vmem:[#allocation39_spill] sm:$0xff]  ;;  %v9059_v50 = vor.u32 %v4611_v3, %v4610_v10  ;;  %v2201_v10 = vsel %vm2158_vm13, %v2196_v48, %v2200_v49  ;;  %v2205_v3 = vrot.slane %v9770_v15, 7  ;;  %v9775_v49 = vld [vmem:[#allocation81_spill] sm:$0xff] }
 0x161   : > { %6544 = vmatprep.subr.bf16.mxu1 %v9052_v4  ;;  %v2197_v55 = vor.u32 %v9765_v58, %v2196_v48  ;;  %v4616_v56 = vor.u32 %v4615_v19, %v4614_v35  ;;  %v9771_v35 = vld [vmem:[#allocation66_spill] sm:$0xff]  ;;  %v9774_v48 = vrot.slane %v8515_v9, 1 }
 0x162   : > { %v4220_v19 = vrot.slane %v9771_v35, 1 }
 0x163   : > { %6213 = vmatmul.mubr.bf16.gmra.mrb[16].mxu1 %v2192_v20  ;;  %6495 = vmatpush3.bf16.msra.mxu0 %v6993_v45  ;;  %v4624_v20 = vrot.slane %v4622_v41, 2  ;;  %v9066_v27 = vsel %vm4541_vm0, %v9059_v50, %v4616_v56  ;;  %v2198_v34 = vsel %vm2158_vm13, %v2193_v44, %v2197_v55  ;;  %v9772_v44 = vld [vmem:[#allocation47_spill] sm:$0xff]  ;;  %v2206_v41 = vor.u32 %v9773_v52, %v2205_v3 }
 0x164   : > { %6216 = vmatprep.mubr.bf16.mxu1 %v2195_v17  ;;  %6496 = vmatprep.subr.bf16.mxu0 %v6995_v29  ;;  %v9768_v17 = vld [vmem:[#allocation54_spill] sm:$0xff] }
 0x165   : > { %v2202_v45 = vrot.slane %v9768_v17, 7  ;;  %v4625_v47 = vor.u32 %v4624_v20, %v4621_v6  ;;  %v9776_v6 = vld [vmem:[#allocation58_spill] sm:$0xff]  ;;  %v9778_v17 = vld [vmem:[#allocation60_spill] sm:$0xff] }
 0x166   : > { %6461 = vmatmul.mubr.bf16.gmra.mrb[4].mxu0 %v9767_v33  ;;  %v2208_v20 = vrot.slane %v9776_v6, 7  ;;  %v9777_v33 = vld [vmem:[#allocation67_spill] sm:$0xff]  ;;  %v2211_v9 = vrot.slane %v9778_v17, 7  ;;  %v9783_v6 = vld [vmem:[#allocation69_spill] sm:$0xff] }
 0x167   : > { %6464 = vmatprep.mubr.bf16.mxu0 %v9769_v26  ;;  %6497 = vmatpush3.bf16.msra.mxu0 %v6995_v29  ;;  %v9079_v58 = vsel %vm4541_vm0, %v4616_v56, %v4625_v47  ;;  %v2203_v55 = vor.u32 %v9772_v44, %v2202_v45  ;;  %v4221_v29 = vsel %vm4206_vm7, %v9774_v48, %v4220_v19  ;;  %v9779_v47 = vld [vmem:[#allocation68_spill] sm:$0xff] }
 0x168   : > { %6498 = vmatprep.subr.bf16.mxu0 %v6997_v28  ;;  %v4224_v26 = vrot.slane %v9779_v47, 1 }
 0x169   : > { %v2204_v56 = vsel %vm2158_vm13, %v2199_v2, %v2203_v55  ;;  %v9780_v2 = vld [vmem:[#allocation57_spill] sm:$0xff]  ;;  %v9781_v55 = vld [vmem:[#allocation59_spill] sm:$0xff] }
 0x16a   : > { %v2209_v15 = vor.u32 %v9780_v2, %v2208_v20  ;;  %v2212_v52 = vor.u32 %v9781_v55, %v2211_v9 }
 0x16b   : > { %6217 = vmatmul.mubr.bf16.gmra.mrb[20].mxu1 %v2198_v34  ;;  %6499 = vmatpush3.bf16.msra.mxu0 %v6997_v28  ;;  %v4222_v34 = vrot.slane %v9777_v33, 1  ;;  %v2207_v28 = vsel %vm2158_vm13, %v2202_v45, %v2206_v41  ;;  %v2501_v41 = vld [vmem:[#allocation2 + $0x8] sm:$0x80] }
 0x16c   : > { %6220 = vmatprep.mubr.bf16.mxu1 %v2201_v10  ;;  %6500 = vmatprep.subr.bf16.mxu0 %v6998_v11  ;;  %v7000_v10 = vld [vmem:[%s9330_s3 + $0x230] sm:$0xff]   ;;  %v2210_v48 = vsel %vm2158_vm13, %v2205_v3, %v2209_v15  ;;  %v2221_v3 = vsel %vm2158_vm13, %v2211_v9, %v8830_v60  ;;  %v7020_v9 = vld [vmem:[%s9330_s3 + $0x108] sm:$0xff]  }
 0x16d   : > { %v4223_v44 = vsel %vm4206_vm7, %v4220_v19, %v4222_v34  ;;  %v4225_v45 = vsel %vm4206_vm7, %v4222_v34, %v4224_v26  ;;  %v2538_v19 = vshrl.u32 %v2501_v41, 16  ;;  %v9784_v15 = vld [vmem:[#allocation75_spill] sm:$0xff]  ;;  %v7018_v41 = vld [vmem:[#allocation2 + $0x88] sm:$0xff] }
 0x16e   : > { %6465 = vmatmul.mubr.bf16.gmra.mrb[8].mxu0 %v9775_v49 }
 0x16f   : > { %6468 = vmatprep.mubr.bf16.mxu0 %v4221_v29  ;;  %6501 = vmatpush3.bf16.msra.mxu0 %v6998_v11  ;;  %v7001_v11 = vld [vmem:[%s9330_s3 + $0x238] sm:$0xff]   ;;  %v9782_v29 = vld [vmem:[#allocation70_spill] sm:$0xff] }
 0x170   : > { %6502 = vmatprep.subr.bf16.mxu0 %v6999_v12  ;;  %v4226_v49 = vrot.slane %v9782_v29, 1 }
 0x172   : > { %v4227_v34 = vsel %vm4206_vm7, %v4224_v26, %v4226_v49 }
 0x173   : > { %6221 = vmatmul.mubr.bf16.gmra.mrb[24].mxu1 %v2204_v56  ;;  %6503 = vmatpush3.bf16.msra.mxu0 %v6999_v12  ;;  %v2213_v56 = vsel %vm2158_vm13, %v2208_v20, %v2212_v52  ;;  %v4228_v12 = vrot.slane %v9783_v6, 1  ;;  %v4230_v20 = vrot.slane %v9784_v15, 1 }
 0x174   : > { %6224 = vmatprep.mubr.bf16.mxu1 %v2207_v28  ;;  %6504 = vmatprep.subr.bf16.mxu0 %v7000_v10  ;;  %v2540_v28 = vrot.slane %v2538_v19, 7  ;;  %v9788_v19 = vld [vmem:[#allocation52_spill] sm:$0xff] }
 0x175   : > { %v4229_v2 = vsel %vm4206_vm7, %v4226_v49, %v4228_v12  ;;  %v4231_v26 = vsel %vm4206_vm7, %v4228_v12, %v4230_v20  ;;  %v9789_v12 = vld [vmem:[#allocation16_spill] sm:$0xff] }
 0x176   : > { %6469 = vmatmul.mubr.bf16.gmra.mrb[12].mxu0 %v4223_v44  ;;  %v9785_v44 = vld [vmem:[#allocation72_spill] sm:$0xff] }
 0x177   : > { %6472 = vmatprep.mubr.bf16.mxu0 %v4225_v45  ;;  %6505 = vmatpush3.bf16.msra.mxu0 %v7000_v10  ;;  %v2548_v10 = vsel %vm2158_vm13, %v2540_v28, %v8761_v32  ;;  %v4232_v52 = vrot.slane %v9785_v44, 1  ;;  %v7026_v28 = vld [vmem:[%s9330_s3 + $0x138] sm:$0xff]  }
 0x178   : > { %6506 = vmatprep.subr.bf16.mxu0 %v7001_v11 }
 0x179   : > { %v4233_v45 = vsel %vm4206_vm7, %v4230_v20, %v4232_v52 }
 0x17b   : > { %6225 = vmatmul.mubr.bf16.gmra.mrb[28].mxu1 %v2210_v48  ;;  %6507 = vmatpush3.bf16.msra.mxu0 %v7001_v11  ;;  %v4234_v11 = vrot.slane %v7018_v41, 1  ;;  %v7019_v48 = vld [vmem:[#allocation2 + $0x90] sm:$0xff] }
 0x17c   : > { %6228 = vmatprep.mubr.bf16.mxu1 %v2213_v56  ;;  %v4236_v60 = vrot.slane %v7019_v48, 1  ;;  %v7022_v56 = vld [vmem:[%s9330_s3 + $0x118] sm:$0xff]  }
 0x17d   : > { %v4235_v32 = vsel %vm4206_vm7, %v4232_v52, %v4234_v11 }
 0x17e   : > { %6473 = vmatmul.mubr.bf16.gmra.mrb[16].mxu0 %v4227_v34  ;;  %v4237_v49 = vsel %vm4206_vm7, %v4234_v11, %v4236_v60  ;;  %v9790_v34 = vld [vmem:[#allocation22_spill] sm:$0xff] }
 0x17f   : > { %6476 = vmatprep.mubr.bf16.mxu0 %v4229_v2 }
 0x183   : > { %6229 = vmatmul.mubr.bf16.gmra.mrb[32].mxu1 %v2221_v3 }
 0x184   : > { %6248 = vmatprep.mubr.bf16.mxu1 %v2548_v10 }
 0x186   : > { %6477 = vmatmul.mubr.bf16.gmra.mrb[20].mxu0 %v4231_v26  ;;  %v9809_v26 = vld [vmem:[#allocation14_spill] sm:$0xff] }
 0x187   : > { %6480 = vmatprep.mubr.bf16.mxu0 %v4233_v45 }
 0x18b   : > { %6249 = vmatmul.mubr.bf16.vlgmr.msra.gmra.mrb[0].mxu1 %v8775_v25  ;;  %v7021_v25 = vld [vmem:[%s9330_s3 + $0x110] sm:$0xff]  }
 0x18c   : > { %6552 = vmatpush3.bf16.msra.mxu1 %v9052_v4  ;;  %6252 = vmatprep.mubr.bf16.mxu1 %v8794_v31  ;;  %v9786_v31 = vrot.slane %v8441_v40, 1  ;;  %v7024_v40 = vld [vmem:[%s9330_s3 + $0x128] sm:$0xff]  }
 0x18d   : > { %6545 = vmatprep.subr.bf16.mxu1 %v7020_v9 }
 0x18e   : > { %6481 = vmatmul.mubr.bf16.gmra.mrb[24].mxu0 %v4235_v32  ;;  %v4239_v4 = vsel %vm4206_vm7, %v4236_v60, %v9786_v31  ;;  %vm9810_vm7 = vnez %v9809_v26 }
 0x18f   : > { %6484 = vmatprep.mubr.bf16.mxu0 %v4237_v49 }
 0x190   : > { %6553 = vmatpush3.bf16.msra.mxu1 %v7020_v9 }
 0x191   : > { %6546 = vmatprep.subr.bf16.mxu1 %v7021_v25 }
 0x193   : > { %6253 = vmatmul.mubr.bf16.gmra.mrb[4].mxu1 %v8805_v46  ;;  %v7023_v46 = vld [vmem:[%s9330_s3 + $0x120] sm:$0xff]  }
 0x194   : > { %6256 = vmatprep.mubr.bf16.mxu1 %v8812_v0  ;;  %6554 = vmatpush3.bf16.msra.mxu1 %v7021_v25  ;;  %v9787_v0 = vld [vmem:[#allocation13_spill] sm:$0xff] }
 0x195   : > { %6547 = vmatprep.subr.bf16.mxu1 %v7022_v56 }
 0x196   : > { %6485 = vmatmul.mubr.bf16.gmra.mrb[28].mxu0 %v4239_v4 }
 0x197   : > { %6488 = vmatprep.mubr.bf16.mxu0 %v8842_v16  ;;  %v7025_v16 = vld [vmem:[%s9330_s3 + $0x130] sm:$0xff]  }
 0x198   : > { %6555 = vmatpush3.bf16.msra.mxu1 %v7022_v56 }
 0x199   : > { %6548 = vmatprep.subr.bf16.mxu1 %v7023_v46 }
 0x19b   : > { %6257 = vmatmul.mubr.bf16.gmra.mrb[8].mxu1 %v9787_v0 }
 0x19c   : > { %6260 = vmatprep.mubr.bf16.mxu1 %v9788_v19  ;;  %6556 = vmatpush3.bf16.msra.mxu1 %v7023_v46 }
 0x19d   : > { %6549 = vmatprep.subr.bf16.mxu1 %v7024_v40 }
 0x19e   : > { %6489 = vmatmul.mubr.bf16.gmra.mrb[32].mxu0 %v9789_v12 }
 0x19f   : > { %6508 = vmatprep.mubr.bf16.mxu0 %v8880_v24  ;;  %v9791_v24 = vld [vmem:[#allocation53_spill] sm:$0xff] }
 0x1a0   : > { %6557 = vmatpush3.bf16.msra.mxu1 %v7024_v40 }
 0x1a1   : > { %6550 = vmatprep.subr.bf16.mxu1 %v7025_v16 }
 0x1a3   : > { %6261 = vmatmul.mubr.bf16.gmra.mrb[12].mxu1 %v9790_v34 }
 0x1a4   : > { %6264 = vmatprep.mubr.bf16.mxu1 %v8872_v23  ;;  %6558 = vmatpush3.bf16.msra.mxu1 %v7025_v16  ;;  %v4603_v23 = vrot.slane %v9781_v55, 2 }
 0x1a5   : > { %6551 = vmatprep.subr.bf16.mxu1 %v7026_v28 }
 0x1a6   : > { %6509 = vmatmul.mubr.bf16.vlgmr.msra.gmra.mrb[0].mxu0 %v8868_v54  ;;  %v4602_v54 = vrot.slane %v9778_v17, 1 }
 0x1a7   : > { %6512 = vmatprep.mubr.bf16.mxu0 %v8886_v18 }
 0x1a8   : > { %6559 = vmatpush3.bf16.msra.mxu1 %v7026_v28  ;;  %v9799_v28 = vld [vmem:[#allocation7_spill] sm:$0xff] }
 0x1ab   : > { %6265 = vmatmul.mubr.bf16.gmra.mrb[16].mxu1 %v8883_v57  ;;  %v9792_v57 = vshrl.u32 %v9791_v24, 16 }
 0x1ac   : > { %6268 = vmatprep.mubr.bf16.mxu1 %v8904_v38 }
 0x1ad   : > { %v4606_v18 = vrot.slane %v9792_v57, 1 }
 0x1ae   : > { %6513 = vmatmul.mubr.bf16.gmra.mrb[4].mxu0 %v8895_v61  ;;  %v9793_v61 = vshll.u32 %v9791_v24, 16 }
 0x1af   : > { %6516 = vmatprep.mubr.bf16.mxu0 %v8919_v7 }
 0x1b0   : > { %v4607_v38 = vrot.slane %v9793_v61, 2 }
 0x1b2   : > { %v4608_v7 = vor.u32 %v4607_v38, %v4606_v18  ;;  %v9801_v38 = vld [vmem:[#allocation9_spill] sm:$0xff] }
 0x1b3   : > { %6269 = vmatmul.mubr.bf16.gmra.mrb[20].mxu1 %v8907_v53  ;;  %v4604_v53 = vor.u32 %v4603_v23, %v4602_v54 }
 0x1b4   : > { %6272 = vmatprep.mubr.bf16.mxu1 %v8928_v43 }
 0x1b5   : > { %v4609_v43 = vsel %vm4541_vm0, %v4604_v53, %v4608_v7 }
 0x1b6   : > { %6517 = vmatmul.mubr.bf16.gmra.mrb[8].mxu0 %v8925_v1  ;;  %v4605_v1 = vsel %vm4541_vm0, %v9013_v8, %v4604_v53 }
 0x1b7   : > { %6520 = vmatprep.mubr.bf16.mxu0 %v8944_v63  ;;  %v9794_v63 = vld [vmem:[#allocation82_spill] sm:$0xff] }
 0x1bb   : > { %6273 = vmatmul.mubr.bf16.gmra.mrb[24].mxu1 %v8933_v37  ;;  %v4613_v37 = vsel %vm4541_vm0, %v4608_v7, %v9059_v50 }
 0x1bc   : > { %6276 = vmatprep.mubr.bf16.mxu1 %v8956_v14 }
 0x1be   : > { %6521 = vmatmul.mubr.bf16.gmra.mrb[12].mxu0 %v8950_v21 }
 0x1bf   : > { %6524 = vmatprep.mubr.bf16.mxu0 %v8970_v39 }
 0x1c3   : > { %6277 = vmatmul.mubr.bf16.gmra.mrb[28].mxu1 %v8979_v36 }
 0x1c4   : > { %6280 = vmatprep.mubr.bf16.mxu1 %v8963_v62 }
 0x1c6   : > { %6525 = vmatmul.mubr.bf16.gmra.mrb[16].mxu0 %v8982_v59 }
 0x1c7   : > { %6528 = vmatprep.mubr.bf16.mxu0 %v8999_v5 }
 0x1cb   : > { %6281 = vmatmul.mubr.bf16.gmra.mrb[32].mxu1 %v8996_v42 }
 0x1cc   : > { %6316 = vmatprep.mubr.bf16.mxu1 %v9771_v35 }
 0x1ce   : > { %6529 = vmatmul.mubr.bf16.gmra.mrb[20].mxu0 %v9003_v30 }
 0x1cf   : > { %6532 = vmatprep.mubr.bf16.mxu0 %v9020_v13 }
 0x1d3   : > { %6317 = vmatmul.mubr.bf16.vlgmr.msra.gmra.mrb[16].mxu1 %v9777_v33 }
 0x1d4   : > { %6320 = vmatprep.mubr.bf16.mxu1 %v9779_v47 }
 0x1d6   : > { %6533 = vmatmul.mubr.bf16.gmra.mrb[24].mxu0 %v4605_v1  ;;  %v9803_v1 = vld [vmem:[#allocation8_spill] sm:$0xff] }
 0x1d7   : > { %6536 = vmatprep.mubr.bf16.mxu0 %v4609_v43 }
 0x1db   : > { %6321 = vmatmul.mubr.bf16.gmra.mrb[20].mxu1 %v9782_v29 }
 0x1dc   : > { %6324 = vmatprep.mubr.bf16.mxu1 %v9783_v6 }
 0x1de   : > { %6537 = vmatmul.mubr.bf16.gmra.mrb[28].mxu0 %v4613_v37 }
 0x1df   : > { %6540 = vmatprep.mubr.bf16.mxu0 %v9066_v27 }
 0x1e3   : > { %6325 = vmatmul.mubr.bf16.gmra.mrb[24].mxu1 %v9784_v15 }
 0x1e4   : > { %6328 = vmatprep.mubr.bf16.mxu1 %v9785_v44 }
 0x1e6   : > { %6541 = vmatmul.mubr.bf16.gmra.mrb[32].mxu0 %v9079_v58 }
 0x1eb   : > { %6329 = vmatmul.mubr.bf16.gmra.mrb[28].mxu1 %v8916_v51 }
 0x1ec   : > { %6332 = vmatprep.mubr.bf16.mxu1 %v9794_v63 }
 0x1f3   : > { %6333 = vmatmul.mubr.bf16.gmra.mrb[32].mxu1 %v8937_v22 }
 0x25e   : > { %v6250_v21 = vpop.f32.mrb[0].mxu1 }
 0x25f   : > { %v2785_v14 = vpop.f32.mrb[1].mxu1 }
 0x260   : > { %v6251_v62 = vpop.f32.mrb[2].mxu1 }
 0x261   : > { %v2788_v39 = vpop.f32.mrb[3].mxu1 }
 0x266   : > { %v6254_v36 = vpop.f32.mrb[4].mxu1 }
 0x267   : > { %v2801_v59 = vpop.f32.mrb[5].mxu1 }
 0x268   : > { %v6255_v42 = vpop.f32.mrb[6].mxu1 }
 0x269   : > { %v2804_v5 = vpop.f32.mrb[7].mxu1 }
 0x26e   : > { %v6258_v30 = vpop.f32.mrb[8].mxu1 }
 0x26f   : > { %v2817_v8 = vpop.f32.mrb[9].mxu1 }
 0x270   : > { %v9202_v13 = vpop.f32.mrb[10].mxu1 }
 0x271   : > { %v9204_v50 = vpop.f32.mrb[11].mxu1 }
 0x276   : > { %v9206_v51 = vpop.f32.mrb[12].mxu1 }
 0x277   : > { %v9208_v27 = vpop.f32.mrb[13].mxu1 }
 0x278   : > { %v9210_v22 = vpop.f32.mrb[14].mxu1 }
 0x279   : > { %v9212_v35 = vpop.f32.mrb[15].mxu1  ;;  %v6510_v58 = vpop.f32.mrb[0].mxu0 }
 0x27a   : > { %v6560_v33 = vadd.f32 %v6510_v58, %v6250_v21  ;;  %v4727_v17 = vpop.f32.mrb[1].mxu0 }
 0x27b   : > { %v6561_v47 = vadd.f32 %v4727_v17, %v2785_v14  ;;  %v6511_v55 = vpop.f32.mrb[2].mxu0  ;;  %v9805_v14 = vld [vmem:[#allocation10_spill] sm:$0xff] }
 0x27c   : > { %v6562_v29 = vadd.f32 %v6511_v55, %v6251_v62  ;;  %v4730_v6 = vpop.f32.mrb[3].mxu0  ;;  %v5088_v44 = vsel %vm7268_vm6, %v6560_v33, 0.0  ;;  %vm9804_vm6 = vnez %v9803_v1 }
 0x27d   : > { %v5086_v3 = vsel %vm7249_vm2, %v6561_v47, 0.0  ;;  %v6563_v15 = vadd.f32 %v4730_v6, %v2788_v39  ;;  %v5166_v49 = vmul.f32 %v5088_v44, %v5088_v44  ;;  %vm9800_vm2 = vnez %v9799_v28  ;;  %v9815_v28 = vld [vmem:[#allocation17_spill] sm:$0xff] }
 0x27e   : > { %v5726_v20 = vpack.c.bf16 %v6562_v29, %v6560_v33  ;;  %v5164_v41 = vmul.f32 %v5086_v3, %v5086_v3  ;;  %v5089_v32 = vsel %vm7283_vm9, %v6562_v29, 0.0  ;;  %vm9806_vm9 = vnez %v9805_v14 }
 0x27f   : > { %v5721_v52 = vpack.c.bf16 %v6563_v15, %v6561_v47  ;;  %v5087_v45 = vsel %vm7255_vm3, %v6563_v15, 0.0  ;;  %v5167_v19 = vmul.f32 %v5089_v32, %v5089_v32  ;;  %vm9802_vm3 = vnez %v9801_v38 }
 0x280   : > { %5825 = vst [vmem:[%s9221_s15 + $0x8] sm:$0xff] %v5726_v20   ;;  %v5122_v11 = vadd.f32 %v5087_v45, %v5086_v3  ;;  %v5165_v48 = vmul.f32 %v5087_v45, %v5087_v45  ;;  %v9807_v3 = vld [vmem:[#allocation11_spill] sm:$0xff]  ;;  %vm9816_vm14 = vnez %v9815_v28 }
 0x281   : > { %5722 = vst [vmem:[%s9221_s15] sm:$0xff] %v5721_v52   ;;  %v6514_v9 = vpop.f32.mrb[4].mxu0  ;;  %vm9808_vm13 = vnez %v9807_v3 }
 0x282   : > { %v5123_v25 = vadd.f32 %v5122_v11, %v5088_v44  ;;  %v5200_v31 = vadd.f32 %v5165_v48, %v5164_v41  ;;  %v6564_v4 = vadd.f32 %v6514_v9, %v6254_v36  ;;  %v4743_v56 = vpop.f32.mrb[5].mxu0  ;;  %v9811_v41 = vld [vmem:[#allocation12_spill] sm:$0xff] }
 0x283   : > { %v6565_v46 = vadd.f32 %v4743_v56, %v2801_v59  ;;  %v6515_v0 = vpop.f32.mrb[6].mxu0  ;;  %vm9812_vm12 = vnez %v9811_v41 }
 0x284   : > { %v5201_v40 = vadd.f32 %v5200_v31, %v5166_v49  ;;  %v5124_v12 = vadd.f32 %v5123_v25, %v5089_v32  ;;  %v6566_v16 = vadd.f32 %v6515_v0, %v6255_v42  ;;  %v4746_v34 = vpop.f32.mrb[7].mxu0  ;;  %v5092_v53 = vsel %vm9802_vm3, %v6564_v4, 0.0  ;;  %v9813_v32 = vld [vmem:[#allocation15_spill] sm:$0xff] }
 0x285   : > { %v5090_v54 = vsel %vm9800_vm2, %v6565_v46, 0.0  ;;  %v6567_v23 = vadd.f32 %v4746_v34, %v2804_v5  ;;  %v5170_v36 = vmul.f32 %v5092_v53, %v5092_v53  ;;  %vm9814_vm15 = vnez %v9813_v32  ;;  %v9827_v32 = vld [vmem:[#allocation26_spill] sm:$0xff] }
 0x286   : > { %v5125_v24 = vadd.f32 %v5124_v12, %v5090_v54  ;;  %v5168_v57 = vmul.f32 %v5090_v54, %v5090_v54  ;;  %v5202_v18 = vadd.f32 %v5201_v40, %v5167_v19  ;;  %v5736_v61 = vpack.c.bf16 %v6566_v16, %v6564_v4 }
 0x287   : > { %v5731_v7 = vpack.c.bf16 %v6567_v23, %v6565_v46  ;;  %v5091_v43 = vsel %vm9804_vm6, %v6567_v23, 0.0  ;;  %v5093_v62 = vsel %vm9806_vm9, %v6566_v16, 0.0  ;;  %vm9828_vm6 = vnez %v9827_v32 }
 0x288   : > { %v5203_v37 = vadd.f32 %v5202_v18, %v5168_v57  ;;  %5827 = vst [vmem:[%s9221_s15 + $0x18] sm:$0xff] %v5736_v61   ;;  %v5126_v63 = vadd.f32 %v5125_v24, %v5091_v43  ;;  %v5169_v21 = vmul.f32 %v5091_v43, %v5091_v43  ;;  %v5171_v47 = vmul.f32 %v5093_v62, %v5093_v62  ;;  %v9817_v61 = vld [vmem:[#allocation20_spill] sm:$0xff] }
 0x289   : > { %5826 = vst [vmem:[%s9221_s15 + $0x10] sm:$0xff] %v5731_v7   ;;  %v6518_v39 = vpop.f32.mrb[8].mxu0  ;;  %vm9818_vm0 = vnez %v9817_v61 }
 0x28a   : > { %v5127_v59 = vadd.f32 %v5126_v63, %v5092_v53  ;;  %v5204_v42 = vadd.f32 %v5203_v37, %v5169_v21  ;;  %v6568_v5 = vadd.f32 %v6518_v39, %v6258_v30  ;;  %v4759_v58 = vpop.f32.mrb[9].mxu0  ;;  %v9819_v53 = vld [vmem:[#allocation18_spill] sm:$0xff]  ;;  %v9821_v37 = vld [vmem:[#allocation21_spill] sm:$0xff] }
 0x28b   : > { %v6569_v33 = vadd.f32 %v4759_v58, %v2817_v8  ;;  %v6519_v17 = vpop.f32.mrb[10].mxu0  ;;  %vm9820_vm1 = vnez %v9819_v53  ;;  %vm9822_vm4 = vnez %v9821_v37 }
 0x28c   : > { %v5205_v55 = vadd.f32 %v5204_v42, %v5170_v36  ;;  %v5128_v29 = vadd.f32 %v5127_v59, %v5093_v62  ;;  %v6570_v6 = vadd.f32 %v6519_v17, %v9202_v13  ;;  %v4762_v2 = vpop.f32.mrb[11].mxu0  ;;  %v5096_v8 = vsel %vm9810_vm7, %v6568_v5, 0.0 }
 0x28d   : > { %v5094_v15 = vsel %vm9808_vm13, %v6569_v33, 0.0  ;;  %v6571_v20 = vadd.f32 %v4762_v2, %v9204_v50  ;;  %v5174_v49 = vmul.f32 %v5096_v8, %v5096_v8 }
 0x28e   : > { %v5129_v10 = vadd.f32 %v5128_v29, %v5094_v15  ;;  %v5172_v44 = vmul.f32 %v5094_v15, %v5094_v15  ;;  %v5206_v52 = vadd.f32 %v5205_v55, %v5171_v47  ;;  %v5746_v30 = vpack.c.bf16 %v6570_v6, %v6568_v5 }
 0x28f   : > { %v5741_v45 = vpack.c.bf16 %v6571_v20, %v6569_v33  ;;  %v5095_v11 = vsel %vm9812_vm12, %v6571_v20, 0.0  ;;  %v5097_v9 = vsel %vm9814_vm15, %v6570_v6, 0.0 }
 0x290   : > { %v5207_v48 = vadd.f32 %v5206_v52, %v5172_v44  ;;  %5829 = vst [vmem:[%s9221_s15 + $0x28] sm:$0xff] %v5746_v30   ;;  %v5130_v13 = vadd.f32 %v5129_v10, %v5095_v11  ;;  %v5173_v60 = vmul.f32 %v5095_v11, %v5095_v11  ;;  %v5175_v19 = vmul.f32 %v5097_v9, %v5097_v9  ;;  %v9823_v52 = vld [vmem:[#allocation25_spill] sm:$0xff] }
 0x291   : > { %5828 = vst [vmem:[%s9221_s15 + $0x20] sm:$0xff] %v5741_v45   ;;  %v6522_v50 = vpop.f32.mrb[12].mxu0  ;;  %vm9824_vm2 = vnez %v9823_v52 }
 0x292   : > { %v5131_v25 = vadd.f32 %v5130_v13, %v5096_v8  ;;  %v5208_v31 = vadd.f32 %v5207_v48, %v5173_v60  ;;  %v6572_v4 = vadd.f32 %v6522_v50, %v9206_v51  ;;  %v4775_v56 = vpop.f32.mrb[13].mxu0  ;;  %v9825_v48 = vld [vmem:[#allocation27_spill] sm:$0xff] }
 0x293   : > { %v6573_v46 = vadd.f32 %v4775_v56, %v9208_v27  ;;  %v6523_v0 = vpop.f32.mrb[14].mxu0  ;;  %vm9826_vm3 = vnez %v9825_v48  ;;  %v9829_v56 = vld [vmem:[#allocation28_spill] sm:$0xff] }
 0x294   : > { %v5209_v40 = vadd.f32 %v5208_v31, %v5174_v49  ;;  %v5132_v12 = vadd.f32 %v5131_v25, %v5097_v9  ;;  %v6574_v16 = vadd.f32 %v6523_v0, %v9210_v22  ;;  %v4778_v34 = vpop.f32.mrb[15].mxu0  ;;  %v5100_v27 = vsel %vm9818_vm0, %v6572_v4, 0.0 }
 0x295   : > { %v5098_v54 = vsel %vm9816_vm14, %v6573_v46, 0.0  ;;  %v6575_v23 = vadd.f32 %v4778_v34, %v9212_v35  ;;  %v5178_v21 = vmul.f32 %v5100_v27, %v5100_v27  ;;  %vm9830_vm9 = vnez %v9829_v56 }
 0x296   : > { %v5133_v24 = vadd.f32 %v5132_v12, %v5098_v54  ;;  %v5176_v57 = vmul.f32 %v5098_v54, %v5098_v54  ;;  %v5210_v51 = vadd.f32 %v5209_v40, %v5175_v19  ;;  %v5756_v18 = vpack.c.bf16 %v6574_v16, %v6572_v4 }
 0x297   : > { %v5751_v38 = vpack.c.bf16 %v6575_v23, %v6573_v46  ;;  %v5099_v7 = vsel %vm9820_vm1, %v6575_v23, 0.0  ;;  %v5101_v63 = vsel %vm9822_vm4, %v6574_v16, 0.0 }
 0x298   : > { %v5211_v1 = vadd.f32 %v5210_v51, %v5176_v57  ;;  %5831 = vst [vmem:[%s9221_s15 + $0x38] sm:$0xff] %v5756_v18   ;;  %v5134_v22 = vadd.f32 %v5133_v24, %v5099_v7  ;;  %v5177_v43 = vmul.f32 %v5099_v7, %v5099_v7  ;;  %v5179_v59 = vmul.f32 %v5101_v63, %v5101_v63 }
 0x299   : > { %5830 = vst [vmem:[%s9221_s15 + $0x30] sm:$0xff] %v5751_v38   ;;  %v6526_v35 = vpop.f32.mrb[16].mxu0 }
 0x29a   : > { %v5135_v14 = vadd.f32 %v5134_v22, %v5100_v27  ;;  %v5212_v62 = vadd.f32 %v5211_v1, %v5177_v43  ;;  %v4791_v39 = vpop.f32.mrb[17].mxu0  ;;  %v9831_v27 = vld [vmem:[#allocation29_spill] sm:$0xff] }
 0x29b   : > { %v6527_v36 = vpop.f32.mrb[18].mxu0  ;;  %vm9832_vm13 = vnez %v9831_v27 }
 0x29c   : > { %v5213_v42 = vadd.f32 %v5212_v62, %v5178_v21  ;;  %v4794_v5 = vpop.f32.mrb[19].mxu0  ;;  %v5136_v58 = vadd.f32 %v5135_v14, %v5101_v63  ;;  %v9833_v63 = vld [vmem:[#allocation32_spill] sm:$0xff]  ;;  %v9835_v14 = vld [vmem:[#allocation30_spill] sm:$0xff] }
 0x29d   : > { %vm9834_vm7 = vnez %v9833_v63  ;;  %vm9836_vm12 = vnez %v9835_v14 }
 0x29e   : > { %v5214_v33 = vadd.f32 %v5213_v42, %v5179_v59 }
 0x2a1   : > { %v6530_v17 = vpop.f32.mrb[20].mxu0 }
 0x2a2   : > { %v4807_v47 = vpop.f32.mrb[21].mxu0 }
 0x2a3   : > { %v6531_v55 = vpop.f32.mrb[22].mxu0 }
 0x2a4   : > { %v4810_v6 = vpop.f32.mrb[23].mxu0 }
 0x2a6   : > { %v6318_v29 = vpop.f32.mrb[16].mxu1 }
 0x2a7   : > { %v6576_v2 = vadd.f32 %v6526_v35, %v6318_v29  ;;  %v3127_v3 = vpop.f32.mrb[17].mxu1 }
 0x2a8   : > { %v6577_v15 = vadd.f32 %v4791_v39, %v3127_v3  ;;  %v6319_v20 = vpop.f32.mrb[18].mxu1 }
 0x2a9   : > { %v6578_v10 = vadd.f32 %v6527_v36, %v6319_v20  ;;  %v3130_v44 = vpop.f32.mrb[19].mxu1  ;;  %v6534_v11 = vpop.f32.mrb[24].mxu0  ;;  %v5104_v13 = vsel %vm9826_vm3, %v6576_v2, 0.0 }
 0x2aa   : > { %v5102_v30 = vsel %vm9824_vm2, %v6577_v15, 0.0  ;;  %v6579_v26 = vadd.f32 %v4794_v5, %v3130_v44  ;;  %v4823_v50 = vpop.f32.mrb[25].mxu0  ;;  %v5182_v40 = vmul.f32 %v5104_v13, %v5104_v13 }
 0x2ab   : > { %v5137_v8 = vadd.f32 %v5136_v58, %v5102_v30  ;;  %v5180_v45 = vmul.f32 %v5102_v30, %v5102_v30  ;;  %v5766_v41 = vpack.c.bf16 %v6578_v10, %v6576_v2  ;;  %v6535_v4 = vpop.f32.mrb[26].mxu0  ;;  %v5105_v46 = vsel %vm9830_vm9, %v6578_v10, 0.0  ;;  %v9837_v58 = vld [vmem:[#allocation33_spill] sm:$0xff] }
 0x2ac   : > { %v5761_v60 = vpack.c.bf16 %v6579_v26, %v6577_v15  ;;  %v5103_v9 = vsel %vm9828_vm6, %v6579_v26, 0.0  ;;  %v4826_v19 = vpop.f32.mrb[27].mxu0  ;;  %v5183_v24 = vmul.f32 %v5105_v46, %v5105_v46  ;;  %vm9838_vm15 = vnez %v9837_v58 }
 0x2ad   : > { %v5215_v49 = vadd.f32 %v5214_v33, %v5180_v45  ;;  %5833 = vst [vmem:[%s9221_s15 + $0x48] sm:$0xff] %v5766_v41   ;;  %v5138_v25 = vadd.f32 %v5137_v8, %v5103_v9  ;;  %v5181_v31 = vmul.f32 %v5103_v9, %v5103_v9  ;;  %v9839_v8 = vld [vmem:[#allocation34_spill] sm:$0xff] }
 0x2ae   : > { %5832 = vst [vmem:[%s9221_s15 + $0x40] sm:$0xff] %v5761_v60   ;;  %v6322_v0 = vpop.f32.mrb[20].mxu1  ;;  %vm9840_vm14 = vnez %v9839_v8 }
 0x2af   : > { %v5139_v12 = vadd.f32 %v5138_v25, %v5104_v13  ;;  %v5216_v16 = vadd.f32 %v5215_v49, %v5181_v31  ;;  %v6580_v34 = vadd.f32 %v6530_v17, %v6322_v0  ;;  %v3143_v28 = vpop.f32.mrb[21].mxu1  ;;  %v9843_v25 = vld [vmem:[#allocation35_spill] sm:$0xff] }
 0x2b0   : > { %v6581_v54 = vadd.f32 %v4807_v47, %v3143_v28  ;;  %v6323_v23 = vpop.f32.mrb[22].mxu1  ;;  %vm9844_vm1 = vnez %v9843_v25 }
 0x2b1   : > { %v5217_v57 = vadd.f32 %v5216_v16, %v5182_v40  ;;  %v5140_v51 = vadd.f32 %v5139_v12, %v5105_v46  ;;  %v6582_v18 = vadd.f32 %v6531_v55, %v6323_v23  ;;  %v3146_v61 = vpop.f32.mrb[23].mxu1  ;;  %v6538_v37 = vpop.f32.mrb[28].mxu0  ;;  %v5108_v35 = vsel %vm9834_vm7, %v6580_v34, 0.0 }
 0x2b2   : > { %v5106_v38 = vsel %vm9832_vm13, %v6581_v54, 0.0  ;;  %v6583_v53 = vadd.f32 %v4810_v6, %v3146_v61  ;;  %v4839_v39 = vpop.f32.mrb[29].mxu0  ;;  %v5186_v55 = vmul.f32 %v5108_v35, %v5108_v35 }
 0x2b3   : > { %v5141_v7 = vadd.f32 %v5140_v51, %v5106_v38  ;;  %v5184_v1 = vmul.f32 %v5106_v38, %v5106_v38  ;;  %v5218_v22 = vadd.f32 %v5217_v57, %v5183_v24  ;;  %v5776_v43 = vpack.c.bf16 %v6582_v18, %v6580_v34  ;;  %v6539_v5 = vpop.f32.mrb[30].mxu0 }
 0x2b4   : > { %v5771_v21 = vpack.c.bf16 %v6583_v53, %v6581_v54  ;;  %v5107_v62 = vsel %vm9836_vm12, %v6583_v53, 0.0  ;;  %v5109_v33 = vsel %vm9838_vm15, %v6582_v18, 0.0  ;;  %v4842_v47 = vpop.f32.mrb[31].mxu0 }
 0x2b5   : > { %v5219_v36 = vadd.f32 %v5218_v22, %v5184_v1  ;;  %5835 = vst [vmem:[%s9221_s15 + $0x58] sm:$0xff] %v5776_v43   ;;  %v5142_v59 = vadd.f32 %v5141_v7, %v5107_v62  ;;  %v5185_v42 = vmul.f32 %v5107_v62, %v5107_v62  ;;  %v5187_v10 = vmul.f32 %v5109_v33, %v5109_v33  ;;  %v9847_v1 = vld [vmem:[#allocation42_spill] sm:$0xff]  ;;  %v9849_v62 = vld [vmem:[#allocation48_spill] sm:$0xff] }
 0x2b6   : > { %5834 = vst [vmem:[%s9221_s15 + $0x50] sm:$0xff] %v5771_v21   ;;  %v6326_v17 = vpop.f32.mrb[24].mxu1  ;;  %vm9848_vm2 = vnez %v9847_v1  ;;  %vm9850_vm3 = vnez %v9849_v62 }
 0x2b7   : > { %v5143_v29 = vadd.f32 %v5142_v59, %v5108_v35  ;;  %v5220_v6 = vadd.f32 %v5219_v36, %v5185_v42  ;;  %v6584_v2 = vadd.f32 %v6534_v11, %v6326_v17  ;;  %v3159_v3 = vpop.f32.mrb[25].mxu1  ;;  %v9841_v11 = vld [vmem:[#allocation40_spill] sm:$0xff]  ;;  %v9851_v36 = vld [vmem:[#allocation43_spill] sm:$0xff] }
 0x2b8   : > { %v6585_v15 = vadd.f32 %v4823_v50, %v3159_v3  ;;  %v6327_v20 = vpop.f32.mrb[26].mxu1  ;;  %vm9842_vm0 = vnez %v9841_v11  ;;  %vm9852_vm6 = vnez %v9851_v36 }
 0x2b9   : > { %v5221_v44 = vadd.f32 %v5220_v6, %v5186_v55  ;;  %v5144_v52 = vadd.f32 %v5143_v29, %v5109_v33  ;;  %v6586_v30 = vadd.f32 %v6535_v4, %v6327_v20  ;;  %v3162_v26 = vpop.f32.mrb[27].mxu1  ;;  %v6542_v9 = vpop.f32.mrb[32].mxu0  ;;  %v5112_v50 = vsel %vm9842_vm0, %v6584_v2, 0.0  ;;  %v9853_v33 = vld [vmem:[#allocation49_spill] sm:$0xff] }
 0x2ba   : > { %v5110_v45 = vsel %vm9840_vm14, %v6585_v15, 0.0  ;;  %v6587_v41 = vadd.f32 %v4826_v19, %v3162_v26  ;;  %v4855_v56 = vpop.f32.mrb[33].mxu0  ;;  %v9845_v19 = vld [vmem:[#allocation41_spill] sm:$0xff]  ;;  %v5190_v28 = vmul.f32 %v5112_v50, %v5112_v50  ;;  %vm9854_vm9 = vnez %v9853_v33 }
 0x2bb   : > { %v5145_v48 = vadd.f32 %v5144_v52, %v5110_v45  ;;  %v5188_v13 = vmul.f32 %v5110_v45, %v5110_v45  ;;  %v5222_v60 = vadd.f32 %v5221_v44, %v5187_v10  ;;  %v5786_v32 = vpack.c.bf16 %v6586_v30, %v6584_v2  ;;  %v6543_v40 = vpop.f32.mrb[34].mxu0 }
 0x2bc   : > { %v5781_v49 = vpack.c.bf16 %v6587_v41, %v6585_v15  ;;  %v5111_v31 = vsel %vm9844_vm1, %v6587_v41, 0.0  ;;  %vm9846_vm4 = vnez %v9845_v19  ;;  %v4858_v34 = vpop.f32.mrb[35].mxu0 }
 0x2bd   : > { %v5223_v4 = vadd.f32 %v5222_v60, %v5188_v13  ;;  %5837 = vst [vmem:[%s9221_s15 + $0x68] sm:$0xff] %v5786_v32   ;;  %v5146_v46 = vadd.f32 %v5145_v48, %v5111_v31  ;;  %v5189_v0 = vmul.f32 %v5111_v31, %v5111_v31  ;;  %v5113_v12 = vsel %vm9846_vm4, %v6586_v30, 0.0 }
 0x2be   : > { %5836 = vst [vmem:[%s9221_s15 + $0x60] sm:$0xff] %v5781_v49   ;;  %v6330_v16 = vpop.f32.mrb[28].mxu1  ;;  %v5191_v61 = vmul.f32 %v5113_v12, %v5113_v12 }
 0x2bf   : > { %v5147_v54 = vadd.f32 %v5146_v46, %v5112_v50  ;;  %v5224_v23 = vadd.f32 %v5223_v4, %v5189_v0  ;;  %v6588_v24 = vadd.f32 %v6538_v37, %v6330_v16  ;;  %v3175_v57 = vpop.f32.mrb[29].mxu1 }
 0x2c0   : > { %v6589_v51 = vadd.f32 %v4839_v39, %v3175_v57  ;;  %v6331_v18 = vpop.f32.mrb[30].mxu1 }
 0x2c1   : > { %v5225_v27 = vadd.f32 %v5224_v23, %v5190_v28  ;;  %v5148_v38 = vadd.f32 %v5147_v54, %v5113_v12  ;;  %v6590_v53 = vadd.f32 %v6539_v5, %v6331_v18  ;;  %v3178_v7 = vpop.f32.mrb[31].mxu1  ;;  %v5116_v37 = vsel %vm9850_vm3, %v6588_v24, 0.0 }
 0x2c2   : > { %v5114_v22 = vsel %vm9848_vm2, %v6589_v51, 0.0  ;;  %v6591_v43 = vadd.f32 %v4842_v47, %v3178_v7  ;;  %v5194_v55 = vmul.f32 %v5116_v37, %v5116_v37 }
 0x2c3   : > { %v5149_v63 = vadd.f32 %v5148_v38, %v5114_v22  ;;  %v5192_v35 = vmul.f32 %v5114_v22, %v5114_v22  ;;  %v5226_v21 = vadd.f32 %v5225_v27, %v5191_v61  ;;  %v5796_v14 = vpack.c.bf16 %v6590_v53, %v6588_v24 }
 0x2c4   : > { %v5791_v39 = vpack.c.bf16 %v6591_v43, %v6589_v51  ;;  %v5115_v59 = vsel %vm9852_vm6, %v6591_v43, 0.0  ;;  %v5117_v17 = vsel %vm9854_vm9, %v6590_v53, 0.0 }
 0x2c5   : > { %v5227_v42 = vadd.f32 %v5226_v21, %v5192_v35  ;;  %5839 = vst [vmem:[%s9221_s15 + $0x78] sm:$0xff] %v5796_v14   ;;  %v5150_v5 = vadd.f32 %v5149_v63, %v5115_v59  ;;  %v5193_v58 = vmul.f32 %v5115_v59, %v5115_v59  ;;  %v5195_v10 = vmul.f32 %v5117_v17, %v5117_v17 }
 0x2c6   : > { %5838 = vst [vmem:[%s9221_s15 + $0x70] sm:$0xff] %v5791_v39   ;;  %v6334_v47 = vpop.f32.mrb[32].mxu1 }
 0x2c7   : > { %v5151_v29 = vadd.f32 %v5150_v5, %v5116_v37  ;;  %v5228_v6 = vadd.f32 %v5227_v42, %v5193_v58  ;;  %v6592_v2 = vadd.f32 %v6542_v9, %v6334_v47  ;;  %v3191_v3 = vpop.f32.mrb[33].mxu1 }
 0x2c8   : > { %v6593_v15 = vadd.f32 %v4855_v56, %v3191_v3  ;;  %v6335_v20 = vpop.f32.mrb[34].mxu1 }
 0x2c9   : > { %v5229_v44 = vadd.f32 %v5228_v6, %v5194_v55  ;;  %v5152_v52 = vadd.f32 %v5151_v29, %v5117_v17  ;;  %v6594_v30 = vadd.f32 %v6543_v40, %v6335_v20  ;;  %v3194_v26 = vpop.f32.mrb[35].mxu1  ;;  %v5120_v9 = vsel %vm8415_vm10, %v6592_v2, 0.0 }
 0x2ca   : > { %v5118_v45 = vsel %vm8256_vm11, %v6593_v15, 0.0  ;;  %v6595_v41 = vadd.f32 %v4858_v34, %v3194_v26  ;;  %v5198_v40 = vmul.f32 %v5120_v9, %v5120_v9 }
 0x2cb   : > { %v5153_v48 = vadd.f32 %v5152_v52, %v5118_v45  ;;  %v5196_v13 = vmul.f32 %v5118_v45, %v5118_v45  ;;  %v5230_v60 = vadd.f32 %v5229_v44, %v5195_v10  ;;  %v5806_v32 = vpack.c.bf16 %v6594_v30, %v6592_v2 }
 0x2cc   : > { %v5801_v50 = vpack.c.bf16 %v6595_v41, %v6593_v15  ;;  %v5119_v25 = vsel %vm8265_vm8, %v6595_v41, 0.0  ;;  %v5121_v0 = vsel %vm8424_vm5, %v6594_v30, 0.0 }
 0x2cd   : > { %v5231_v31 = vadd.f32 %v5230_v60, %v5196_v13  ;;  %5841 = vst [vmem:[%s9221_s15 + $0x88] sm:$0xff] %v5806_v32   ;;  %v5154_v56 = vadd.f32 %v5153_v48, %v5119_v25  ;;  %v5197_v4 = vmul.f32 %v5119_v25, %v5119_v25  ;;  %v5199_v16 = vmul.f32 %v5121_v0, %v5121_v0 }
 0x2ce   : > { %5840 = vst [vmem:[%s9221_s15 + $0x80] sm:$0xff] %v5801_v50  }
 0x2cf   : > { %v5155_v19 = vadd.f32 %v5154_v56, %v5120_v9  ;;  %v5232_v12 = vadd.f32 %v5231_v31, %v5197_v4 }
 0x2d1   : > { %v5156_v34 = vadd.f32 %v5155_v19, %v5121_v0  ;;  %v5233_v28 = vadd.f32 %v5232_v12, %v5198_v40 }
 0x2d3   : > { %v5157_v54 = vrot.slane %v5156_v34, 4  ;;  %v5234_v23 = vadd.f32 %v5233_v28, %v5199_v16 }
 0x2d5   : > { %v5158_v24 = vadd.f32 %v5157_v54, %v5156_v34  ;;  %v5235_v57 = vrot.slane %v5234_v23, 4 }
 0x2d7   : > { %v5159_v51 = vrot.slane %v5158_v24, 2  ;;  %v5236_v18 = vadd.f32 %v5235_v57, %v5234_v23 }
 0x2d9   : > { %v5160_v61 = vadd.f32 %v5159_v51, %v5158_v24  ;;  %v5237_v27 = vrot.slane %v5236_v18, 2 }
 0x2db   : > { %v5161_v38 = vrot.slane %v5160_v61, 1  ;;  %v5238_v53 = vadd.f32 %v5237_v27, %v5236_v18 }
 0x2dd   : > { %v5162_v7 = vadd.f32 %v5161_v38, %v5160_v61  ;;  %v5239_v1 = vrot.slane %v5238_v53, 1 }
 0x2df   : > { %v5240_v22 = vadd.f32 %v5239_v1, %v5238_v53  ;;  %5242 = vst [vmem:[%s268_s18] sm:$0xff] %v5162_v7 }
 0x2e1   : > { %5243 = vst [vmem:[%s272_s23] sm:$0xff] %v5240_v22 }
 0x2e2 PF: > { %s17_s21 = sadd.s32 1, %s7057_s21  }
 0x2e3   : > { %p14_p4 = scmp.ge.s32.totalorder %s17_s21, 4  }
 0x2e5   :  { %16 = sbr.rel (!%p14_p4) target bundleno = 1 (0x1), region = 98 }

// kernel: basic_block_forward.3
= control target key start
LH: loop header
LB: loop body
LE: loop exit
PB: predicated region body
PF: predicated region fallthrough
CT: control target
= control target key end

     0   :  { %s6934_s15 = smov 0   ;;  %s9012_s0 = inlined_call_operand.vmem [shape: bf16[2,342,128], index: 0, kind: input, shape index: {}]   ;;  %s9013_s1 = inlined_call_operand.vmem [shape: bf16[9,128,128], index: 1, kind: input, shape index: {}]   ;;  %s9014_s2 = inlined_call_operand.vmem [shape: bf16[2,288,128], index: 2, kind: output, shape index: {0}]   ;;  %s9015_s3 = inlined_call_operand.vmem [shape: f32[2,8,128], index: 3, kind: output, shape index: {1}]   ;;  %s9016_s4 = inlined_call_operand.vmem [shape: f32[2,8,128], index: 4, kind: output, shape index: {2}]  }
   0x1 LB: > { %s5184_s16 = sadd.s32 4294967295, %s6907_s15   ;;  %p5188_p0 = scmp.ge.s32.totalorder %s6907_s15, 1  ;;  %s6907_s15 = sphi %s6934_s15, %s15_s15  }
   0x2   : > { %p167_p1 = scmp.lt.s32.totalorder %s6907_s15, 3 }
   0x4   : > { %p168_p2 = pnand %p5188_p0, %p167_p1 }
   0x6   : > { %171 = sbr.rel (%p168_p2) target bundleno = 615 (0x267), region = 28 }
   0xd   : > { %v6724_v0 = vld [vmem:[%s9013_s1 + $0x40] sm:$0xff]   ;;  %p201_p3 = scmp.lt.s32.totalorder %s5184_s16, 1  ;;  %v6726_v2 = vld [vmem:[%s9013_s1 + $0x48] sm:$0xff]   ;;  %v6728_v4 = vld [vmem:[%s9013_s1 + $0x50] sm:$0xff]   ;;  %vm1140_vm0 = vsmask.f32 7424 }
   0xe   : > { %v6725_v1 = vld [vmem:[%s9013_s1 + $0x100] sm:$0xff]   ;;  %5870 = vmatprep.subr.bf16.mxu1 %v6724_v0  ;;  %v6727_v3 = vld [vmem:[%s9013_s1 + $0x108] sm:$0xff]   ;;  %v6729_v5 = vld [vmem:[%s9013_s1 + $0x110] sm:$0xff]   ;;  %vm2597_vm1 = vsmask.f32 6400  ;;  %vm3068_vm2 = vcmask 1045504  }
   0xf   : > { %6078 = vmatprep.subr.bf16.mxu0 %v6725_v1  ;;  %5871 = vmatpush3.bf16.msra.mxu1 %v6724_v0  ;;  %s9156_s16 = smov (!%p201_p3, %s5184_s16), 1  ;;  %v6730_v6 = vld [vmem:[%s9013_s1 + $0x58] sm:$0xff]   ;;  %v6732_v8 = vld [vmem:[%s9013_s1 + $0x60] sm:$0xff]   ;;  %v6734_v10 = vld [vmem:[%s9013_s1 + $0x68] sm:$0xff]   ;;  %vm1796_vm3 = vcmask 1046528   ;;  %vm4340_vm5 = vcmask 1044480  }
  0x10   : > { %6079 = vmatpush3.bf16.msra.mxu0 %v6725_v1  ;;  %5872 = vmatprep.subr.bf16.mxu1 %v6726_v2  ;;  %v6731_v7 = vld [vmem:[%s9013_s1 + $0x118] sm:$0xff]   ;;  %s6642_s7 = smul.u32 172, %s9156_s16  ;;  %v6733_v9 = vld [vmem:[%s9013_s1 + $0x120] sm:$0xff]   ;;  %v6735_v11 = vld [vmem:[%s9013_s1 + $0x128] sm:$0xff]   ;;  %vm3869_vm4 = vsmask.f32 5376 }
  0x11   : > { %6080 = vmatprep.subr.bf16.mxu0 %v6727_v3  ;;  %v6736_v17 = vld [vmem:[%s9013_s1 + $0x70] sm:$0xff]   ;;  %v6738_v32 = vld [vmem:[%s9013_s1 + $0x78] sm:$0xff]   ;;  %v6745_v48 = vld [vmem:[%s9013_s1] sm:$0xff]   ;;  %s5191_s22 = sshll.u32 %s9156_s16, 3 }
  0x12   : > { %s6978_s14 = scalar_lea.vmem %s9012_s0, %s6642_s7  ;;  %v6737_v20 = vld [vmem:[%s9013_s1 + $0x130] sm:$0xff]   ;;  %v6739_v36 = vld [vmem:[%s9013_s1 + $0x138] sm:$0xff]   ;;  %v6747_v54 = vld [vmem:[%s9013_s1 + $0x140] sm:$0xff]   ;;  %s214_s25 = scalar_lea.vmem %s9015_s3, %s5191_s22 }
  0x13   : > { %5873 = vmatpush3.bf16.msra.mxu1 %v6726_v2  ;;  %v977_v12 = vld [vmem:[%s6978_s14] sm:$0xf]  ;;  %v978_v13 = vld [vmem:[%s6978_s14 + $0x4] sm:$0xf]  ;;  %v6991_v15 = vld [vmem:[%s6978_s14 + $0x8] sm:$0xff]   ;;  %s218_s28 = scalar_lea.vmem %s9016_s4, %s5191_s22 }
  0x14   : > { %6081 = vmatpush3.bf16.msra.mxu0 %v6727_v3  ;;  %5874 = vmatprep.subr.bf16.mxu1 %v6728_v4  ;;  %v6988_v14 = vcombine.low %v977_v12, %v978_v13  ;;  %v6994_v16 = vld [vmem:[%s6978_s14 + $0x10] sm:$0xff]   ;;  %v2113_v18 = vld [vmem:[%s6978_s14 + $0x8] sm:$0xe]  ;;  %v7001_v19 = vld [vmem:[%s6978_s14 + $0xc] sm:$0xf]  ;;  %v1149_v23 = vshll.u32 %v6991_v15, 16 }
  0x15   : > { %6082 = vmatprep.subr.bf16.mxu0 %v6729_v5  ;;  %v7010_v24 = vcombine.low %v2113_v18, %v7001_v19  ;;  %v7013_v25 = vld [vmem:[%s6978_s14 + $0x10] sm:$0xff]   ;;  %v2607_v26 = vshrl.u32 %v6994_v16, 16  ;;  %v2610_v27 = vshll.u32 %v6994_v16, 16  ;;  %v1153_v40 = vshrl.u32 %v6991_v15, 16  ;;  %v7028_v41 = vld [vmem:[%s6978_s14 + $0x18] sm:$0xff]   ;;  %v7045_v57 = vld [vmem:[%s6978_s14 + $0x20] sm:$0xff]  }
  0x16   : > { %v1142_v21 = vshrl.u32 %v6988_v14, 16  ;;  %v1144_v22 = vshll.u32 %v6988_v14, 16  ;;  %v1151_v29 = vrot.slane %v1149_v23, 1  ;;  %v1157_v35 = vshll.u32 %v7013_v25, 16  ;;  %v7042_v55 = vld [vmem:[%s6978_s14 + $0x18] sm:$0xff]   ;;  %v7049_v60 = vld [vmem:[%s6978_s14 + $0x20] sm:$0xff]  }
  0x17   : > { %5875 = vmatpush3.bf16.msra.mxu1 %v6728_v4  ;;  %v2599_v30 = vshrl.u32 %v7010_v24, 16  ;;  %v2602_v31 = vshll.u32 %v7010_v24, 16  ;;  %v2609_v33 = vrot.slane %v2607_v26, 1  ;;  %v2612_v34 = vrot.slane %v2610_v27, 2  ;;  %v7053_v62 = vld [vmem:[%s6978_s14 + $0x28] sm:$0xff]  }
  0x18   : > { %6083 = vmatpush3.bf16.msra.mxu0 %v6729_v5  ;;  %5876 = vmatprep.subr.bf16.mxu1 %v6730_v6  ;;  %v1146_v28 = vrot.slane %v1144_v22, 1  ;;  %v2616_v45 = vshrl.u32 %v7028_v41, 16  ;;  %v2619_v46 = vshll.u32 %v7028_v41, 16  ;;  %v1159_v47 = vrot.slane %v1157_v35, 1  ;;  %v7073_v22 = vld [vmem:[%s6978_s14 + $0x28] sm:$0xff]  }
  0x19   : > { %6084 = vmatprep.subr.bf16.mxu0 %v6731_v7  ;;  %v2601_v38 = vrot.slane %v2599_v30, 1  ;;  %v2604_v39 = vrot.slane %v2602_v31, 2  ;;  %v2613_v42 = vor.u32 %v2612_v34, %v2609_v33  ;;  %v1161_v49 = vshrl.u32 %v7013_v25, 16  ;;  %v7082_v31 = vld [vmem:[%s6978_s14 + $0x30] sm:$0xff]   ;;  %v7086_v33 = vld [vmem:[%s6978_s14 + $0x38] sm:$0xff]  }
  0x1a   : > { %v1147_v37 = vor.u32 %v1146_v28, %v1142_v21  ;;  %v1155_v51 = vor.u32 %v1153_v40, %v1151_v29  ;;  %v2618_v52 = vrot.slane %v2616_v45, 1  ;;  %v2621_v53 = vrot.slane %v2619_v46, 2  ;;  %v6753_v21 = vld [vmem:[%s9013_s1 + $0x150] sm:$0xff]  }
  0x1b   : > { %5877 = vmatpush3.bf16.msra.mxu1 %v6730_v6  ;;  %v2605_v44 = vor.u32 %v2604_v39, %v2601_v38  ;;  %v1163_v58 = vor.u32 %v1161_v49, %v1159_v47  ;;  %v1165_v59 = vshll.u32 %v7042_v55, 16  ;;  %v1169_v61 = vshrl.u32 %v7042_v55, 16  ;;  %v7078_v28 = vld [vmem:[%s6978_s14 + $0x30] sm:$0xff]  }
  0x1c   : > { %6085 = vmatpush3.bf16.msra.mxu0 %v6731_v7  ;;  %5878 = vmatprep.subr.bf16.mxu1 %v6732_v8  ;;  %v1152_v43 = vsel %vm1140_vm0, %v1147_v37, %v1151_v29  ;;  %v2622_v56 = vor.u32 %v2621_v53, %v2618_v52  ;;  %v1160_v63 = vsel %vm1140_vm0, %v1155_v51, %v1159_v47  ;;  %v2625_v1 = vshrl.u32 %v7045_v57, 16  ;;  %v6748_v7 = vld [vmem:[%s9013_s1 + $0x148] sm:$0xff]   ;;  %v6761_v46 = vld [vmem:[%s9013_s1 + $0x10] sm:$0xff]   ;;  %v6760_v53 = vld [vmem:[%s9013_s1 + $0x160] sm:$0xff]  }
  0x1d   : > { %6086 = vmatprep.subr.bf16.mxu0 %v6733_v9  ;;  %5886 = vmatprep.mubr.bf16.mxu1 %v1152_v43  ;;  %v2614_v50 = vsel %vm2597_vm1, %v2605_v44, %v2613_v42  ;;  %v2628_v2 = vshll.u32 %v7045_v57, 16  ;;  %v1167_v3 = vrot.slane %v1165_v59, 1  ;;  %v1173_v4 = vshll.u32 %v7049_v60, 16  ;;  %v6755_v43 = vld [vmem:[%s9013_s1 + $0x158] sm:$0xff]  }
  0x1e   : > { %6094 = vmatprep.mubr.bf16.mxu0 %v2614_v50  ;;  %v2623_v0 = vsel %vm2597_vm1, %v2613_v42, %v2622_v56  ;;  %v2634_v5 = vshrl.u32 %v7053_v62, 16  ;;  %v2637_v6 = vshll.u32 %v7053_v62, 16  ;;  %v1177_v23 = vshrl.u32 %v7049_v60, 16 }
  0x1f   : > { %5879 = vmatpush3.bf16.msra.mxu1 %v6732_v8  ;;  %v2627_v8 = vrot.slane %v2625_v1, 1  ;;  %v1175_v18 = vrot.slane %v1173_v4, 1  ;;  %v1181_v30 = vshll.u32 %v7073_v22, 16  ;;  %v2646_v37 = vshll.u32 %v7078_v28, 16  ;;  %v7115_v1 = vld [vmem:[%s6978_s14 + $0x40] sm:$0xff]  }
  0x20   : > { %6087 = vmatpush3.bf16.msra.mxu0 %v6733_v9  ;;  %5880 = vmatprep.subr.bf16.mxu1 %v6734_v10  ;;  %v2630_v9 = vrot.slane %v2628_v2, 2  ;;  %v2636_v12 = vrot.slane %v2634_v5, 1  ;;  %v1189_v39 = vshll.u32 %v7082_v31, 16  ;;  %v2652_v40 = vshrl.u32 %v7086_v33, 16 }
  0x21   : > { %6088 = vmatprep.subr.bf16.mxu0 %v6735_v11  ;;  %v1179_v29 = vor.u32 %v1177_v23, %v1175_v18  ;;  %v1183_v38 = vrot.slane %v1181_v30, 1  ;;  %v2655_v42 = vshll.u32 %v7086_v33, 16  ;;  %v2648_v45 = vrot.slane %v2646_v37, 2  ;;  %v6768_v30 = vld [vmem:[%s9013_s1 + $0x18] sm:$0xff]   ;;  %v3047_v37 = vld [vmem:[%s6978_s14 + $0x8] sm:$0xc] }
  0x22   : > { %v2631_v13 = vor.u32 %v2630_v9, %v2627_v8  ;;  %v1191_v51 = vrot.slane %v1189_v39, 1  ;;  %v3070_v39 = vrot.slane %v6994_v16, 2 }
  0x23   : > { %5881 = vmatpush3.bf16.msra.mxu1 %v6734_v10  ;;  %v6754_v10 = vld [vmem:[%s9013_s1 + $0x8] sm:$0xff]   ;;  %v1184_v47 = vsel %vm1140_vm0, %v1179_v29, %v1183_v38  ;;  %v2657_v52 = vrot.slane %v2655_v42, 2  ;;  %v6767_v29 = vld [vmem:[%s9013_s1 + $0x170] sm:$0xff]  }
  0x24   : > { %6089 = vmatpush3.bf16.msra.mxu0 %v6735_v11  ;;  %5882 = vmatprep.subr.bf16.mxu1 %v6736_v17  ;;  %v1168_v11 = vsel %vm1140_vm0, %v1163_v58, %v1167_v3  ;;  %v2632_v26 = vsel %vm2597_vm1, %v2622_v56, %v2631_v13  ;;  %v1193_v56 = vshrl.u32 %v7082_v31, 16 }
  0x25   : > { %6090 = vmatprep.subr.bf16.mxu0 %v6737_v20 }
  0x27   : > { %5883 = vmatpush3.bf16.msra.mxu1 %v6736_v17  ;;  %v1171_v17 = vor.u32 %v1169_v61, %v1167_v3  ;;  %v7111_v61 = vld [vmem:[%s6978_s14 + $0x40] sm:$0xff]   ;;  %v6762_v3 = vld [vmem:[%s9013_s1 + $0x168] sm:$0xff]  }
  0x28   : > { %6091 = vmatpush3.bf16.msra.mxu0 %v6737_v20  ;;  %5884 = vmatprep.subr.bf16.mxu1 %v6738_v32  ;;  %v2639_v20 = vrot.slane %v2637_v6, 2  ;;  %v2661_v4 = vshrl.u32 %v7111_v61, 16  ;;  %v2664_v5 = vshll.u32 %v7111_v61, 16 }
  0x29   : > { %6092 = vmatprep.subr.bf16.mxu0 %v6739_v36  ;;  %v1176_v34 = vsel %vm1140_vm0, %v1171_v17, %v1175_v18 }
  0x2a   : > { %v2640_v27 = vor.u32 %v2639_v20, %v2636_v12  ;;  %v2666_v12 = vrot.slane %v2664_v5, 2  ;;  %v3074_v5 = vrot.slane %v7045_v57, 2 }
  0x2b   : > { %5885 = vmatpush3.bf16.msra.mxu1 %v6738_v32  ;;  %v1185_v32 = vshrl.u32 %v7073_v22, 16 }
  0x2c   : > { %6093 = vmatpush3.bf16.msra.mxu0 %v6739_v36  ;;  %5922 = vmatprep.subr.bf16.mxu1 %v6745_v48  ;;  %v2641_v35 = vsel %vm2597_vm1, %v2631_v13, %v2640_v27  ;;  %v2643_v36 = vshrl.u32 %v7078_v28, 16 }
  0x2d   : > { %6130 = vmatprep.subr.bf16.mxu0 %v6747_v54  ;;  %v1187_v50 = vor.u32 %v1185_v32, %v1183_v38  ;;  %v5353_v38 = vcombine.low %v3047_v37, %v7001_v19  ;;  %v6784_v37 = vld [vmem:[%s9013_s1 + $0x190] sm:$0xff]  }
  0x2e   : > { %5887 = vmatmul.mubr.bf16.vlgmr.msra.gmra.mrb[0].mxu1 %v1160_v63  ;;  %v2645_v44 = vrot.slane %v2643_v36, 1  ;;  %v1195_v63 = vor.u32 %v1193_v56, %v1191_v51  ;;  %v1209_v36 = vshrl.u32 %v7115_v1, 16 }
  0x2f   : > { %6095 = vmatmul.mubr.bf16.vlgmr.msra.gmra.mrb[0].mxu0 %v2623_v0  ;;  %5923 = vmatpush3.bf16.msra.mxu1 %v6745_v48  ;;  %v2654_v48 = vrot.slane %v2652_v40, 1  ;;  %v1192_v2 = vsel %vm1140_vm0, %v1187_v50, %v1191_v51  ;;  %v7149_v40 = vld [vmem:[%s6978_s14 + $0x50] sm:$0xff]   ;;  %v3069_v19 = vrot.slane %v5353_v38, 2 }
  0x30   : > { %6131 = vmatpush3.bf16.msra.mxu0 %v6747_v54  ;;  %5890 = vmatprep.mubr.bf16.mxu1 %v1168_v11  ;;  %v2649_v49 = vor.u32 %v2648_v45, %v2645_v44  ;;  %v7106_v54 = vld [vmem:[%s6978_s14 + $0x38] sm:$0xff]   ;;  %v2663_v11 = vrot.slane %v2661_v4, 1  ;;  %v1225_v51 = vshrl.u32 %v7149_v40, 16 }
  0x31   : > { %6132 = vmatprep.subr.bf16.mxu0 %v6748_v7  ;;  %5924 = vmatprep.subr.bf16.mxu1 %v6754_v10  ;;  %v2658_v59 = vor.u32 %v2657_v52, %v2654_v48  ;;  %v1197_v0 = vshll.u32 %v7106_v54, 16  ;;  %v1201_v6 = vshrl.u32 %v7106_v54, 16  ;;  %v1221_v48 = vshll.u32 %v7149_v40, 16 }
  0x32   : > { %6098 = vmatprep.mubr.bf16.mxu0 %v2632_v26  ;;  %v2650_v58 = vsel %vm2597_vm1, %v2640_v27, %v2649_v49 }
  0x33   : > { %5925 = vmatpush3.bf16.msra.mxu1 %v6754_v10  ;;  %v2659_v8 = vsel %vm2597_vm1, %v2649_v49, %v2658_v59  ;;  %v1199_v9 = vrot.slane %v1197_v0, 1  ;;  %v1205_v10 = vshll.u32 %v7115_v1, 16  ;;  %v6769_v49 = vld [vmem:[%s9013_s1 + $0x178] sm:$0xff]   ;;  %v1223_v56 = vrot.slane %v1221_v48, 1 }
  0x34   : > { %6133 = vmatpush3.bf16.msra.mxu0 %v6748_v7  ;;  %5926 = vmatprep.subr.bf16.mxu1 %v6761_v46  ;;  %v7125_v7 = vld [vmem:[%s6978_s14 + $0x48] sm:$0xff]   ;;  %v3072_v0 = vrot.slane %v7028_v41, 2  ;;  %v6790_v48 = vld [vmem:[%s9013_s1 + $0x198] sm:$0xff]  }
  0x35   : > { %6134 = vmatprep.subr.bf16.mxu0 %v6753_v21  ;;  %v2670_v13 = vshrl.u32 %v7125_v7, 16  ;;  %v2673_v17 = vshll.u32 %v7125_v7, 16  ;;  %v1200_v18 = vsel %vm1140_vm0, %v1195_v63, %v1199_v9  ;;  %v1207_v20 = vrot.slane %v1205_v10, 1 }
  0x36   : > { %5891 = vmatmul.mubr.bf16.gmra.mrb[4].mxu1 %v1176_v34  ;;  %v1203_v23 = vor.u32 %v1201_v6, %v1199_v9  ;;  %v1227_v4 = vor.u32 %v1225_v51, %v1223_v56  ;;  %v6776_v6 = vld [vmem:[%s9013_s1 + $0x180] sm:$0xff]   ;;  %v3073_v57 = vsel %vm3068_vm2, %v3070_v39, %v3072_v0 }
  0x37   : > { %6099 = vmatmul.mubr.bf16.gmra.mrb[4].mxu0 %v2641_v35  ;;  %5894 = vmatprep.mubr.bf16.mxu1 %v1184_v47  ;;  %v2672_v26 = vrot.slane %v2670_v13, 1  ;;  %v2675_v27 = vrot.slane %v2673_v17, 2  ;;  %v7142_v35 = vld [vmem:[%s6978_s14 + $0x48] sm:$0xff]   ;;  %v7158_v47 = vld [vmem:[%s6978_s14 + $0x58] sm:$0xff]   ;;  %v6781_v17 = vld [vmem:[%s9013_s1 + $0x30] sm:$0xff]  }
  0x38   : > { %6135 = vmatpush3.bf16.msra.mxu0 %v6753_v21  ;;  %5927 = vmatpush3.bf16.msra.mxu1 %v6761_v46  ;;  %v2667_v21 = vor.u32 %v2666_v12, %v2663_v11  ;;  %v1208_v42 = vsel %vm1140_vm0, %v1203_v23, %v1207_v20  ;;  %v1213_v44 = vshll.u32 %v7142_v35, 16  ;;  %v1217_v45 = vshrl.u32 %v7142_v35, 16  ;;  %v6773_v46 = vld [vmem:[%s9013_s1 + $0x20] sm:$0xff]   ;;  %v7199_v23 = vld [vmem:[%s6978_s14 + $0x70] sm:$0xff]  }
  0x39   : > { %6136 = vmatprep.subr.bf16.mxu0 %v6755_v43  ;;  %6102 = vmatprep.mubr.bf16.mxu0 %v2650_v58  ;;  %v7139_v34 = vor.u32 %v2675_v27, %v2672_v26  ;;  %v1229_v52 = vshll.u32 %v7158_v47, 16  ;;  %v7170_v58 = vld [vmem:[%s6978_s14 + $0x60] sm:$0xff]   ;;  %v1233_v10 = vshrl.u32 %v7158_v47, 16  ;;  %v3076_v27 = vrot.slane %v7053_v62, 2 }
  0x3a   : > { %v2668_v32 = vsel %vm2597_vm1, %v2658_v59, %v2667_v21  ;;  %5928 = vmatprep.subr.bf16.mxu1 %v6768_v30  ;;  %v1215_v50 = vrot.slane %v1213_v44, 1  ;;  %v1237_v41 = vshll.u32 %v7170_v58, 16  ;;  %v1241_v11 = vshrl.u32 %v7170_v58, 16 }
  0x3b   : > { %v2677_v16 = vsel %vm2597_vm1, %v2667_v21, %v7139_v34  ;;  %v1253_v38 = vshll.u32 %v7199_v23, 16  ;;  %v1257_v44 = vshrl.u32 %v7199_v23, 16 }
  0x3c   : > { %6137 = vmatpush3.bf16.msra.mxu0 %v6755_v43  ;;  %5929 = vmatpush3.bf16.msra.mxu1 %v6768_v30  ;;  %v1211_v43 = vor.u32 %v1209_v36, %v1207_v20  ;;  %v1219_v63 = vor.u32 %v1217_v45, %v1215_v50  ;;  %v6780_v20 = vld [vmem:[%s9013_s1 + $0x188] sm:$0xff]   ;;  %v1239_v21 = vrot.slane %v1237_v41, 1  ;;  %v3078_v36 = vrot.slane %v7078_v28, 2  ;;  %v6787_v41 = vld [vmem:[%s6978_s14 + $0x50] sm:$0xff]  }
  0x3d   : > { %6138 = vmatprep.subr.bf16.mxu0 %v6760_v53  ;;  %5930 = vmatprep.subr.bf16.mxu1 %v6773_v46 }
  0x3e   : > { %5895 = vmatmul.mubr.bf16.gmra.mrb[8].mxu1 %v1192_v2  ;;  %v1216_v59 = vsel %vm1140_vm0, %v1211_v43, %v1215_v50  ;;  %v1231_v2 = vrot.slane %v1229_v52, 1  ;;  %v1224_v9 = vsel %vm1140_vm0, %v1219_v63, %v1223_v56  ;;  %v3077_v43 = vsel %vm3068_vm2, %v3074_v5, %v3076_v27 }
  0x3f   : > { %6103 = vmatmul.mubr.bf16.gmra.mrb[8].mxu0 %v2659_v8  ;;  %5898 = vmatprep.mubr.bf16.mxu1 %v1200_v18  ;;  %v7182_v8 = vld [vmem:[%s6978_s14 + $0x68] sm:$0xff]   ;;  %v3075_v18 = vsel %vm3068_vm2, %v3072_v0, %v3074_v5  ;;  %v3080_v50 = vrot.slane %v7086_v33, 2  ;;  %v3082_v56 = vrot.slane %v7111_v61, 2  ;;  %v6794_v61 = vld [vmem:[%s9013_s1 + $0x1a0] sm:$0xff]  }
  0x40   : > { %6139 = vmatpush3.bf16.msra.mxu0 %v6760_v53  ;;  %6106 = vmatprep.mubr.bf16.mxu0 %v2668_v32  ;;  %v3071_v53 = vsel %vm3068_vm2, %v3069_v19, %v3070_v39  ;;  %v1232_v12 = vsel %vm1140_vm0, %v1227_v4, %v1231_v2  ;;  %v1245_v13 = vshll.u32 %v7182_v8, 16  ;;  %v1235_v26 = vor.u32 %v1233_v10, %v1231_v2  ;;  %v7203_v32 = vld [vmem:[%s6978_s14 + $0x78] sm:$0xff]  }
  0x41   : > { %6140 = vmatprep.subr.bf16.mxu0 %v6762_v3  ;;  %5931 = vmatpush3.bf16.msra.mxu1 %v6773_v46  ;;  %v1249_v62 = vshrl.u32 %v7182_v8, 16  ;;  %v1261_v45 = vshll.u32 %v7203_v32, 16  ;;  %v3079_v46 = vsel %vm3068_vm2, %v3076_v27, %v3078_v36  ;;  %v1255_v19 = vrot.slane %v1253_v38, 1  ;;  %v6802_v27 = vld [vmem:[%s9013_s1 + $0x1b0] sm:$0xff]  }
  0x42   : > { %v1247_v30 = vrot.slane %v1245_v13, 1  ;;  %v1240_v39 = vsel %vm1140_vm0, %v1235_v26, %v1239_v21  ;;  %v1265_v0 = vshrl.u32 %v7203_v32, 16  ;;  %v3081_v2 = vsel %vm3068_vm2, %v3078_v36, %v3080_v50 }
  0x43   : > { %v1259_v51 = vor.u32 %v1257_v44, %v1255_v19  ;;  %v1263_v52 = vrot.slane %v1261_v45, 1  ;;  %v6793_v45 = vld [vmem:[%s6978_s14 + $0x68] sm:$0xff]  }
  0x44   : > { %6141 = vmatpush3.bf16.msra.mxu0 %v6762_v3  ;;  %v6777_v3 = vld [vmem:[%s9013_s1 + $0x28] sm:$0xff]  }
  0x45   : > { %6142 = vmatprep.subr.bf16.mxu0 %v6767_v29  ;;  %5932 = vmatprep.subr.bf16.mxu1 %v6777_v3 }
  0x46   : > { %5899 = vmatmul.mubr.bf16.gmra.mrb[12].mxu1 %v1208_v42  ;;  %v6786_v42 = vld [vmem:[%s9013_s1 + $0x38] sm:$0xff]  }
  0x47   : > { %6107 = vmatmul.mubr.bf16.gmra.mrb[12].mxu0 %v2677_v16  ;;  %5902 = vmatprep.mubr.bf16.mxu1 %v1216_v59  ;;  %v7221_v16 = vld [vmem:[%s6978_s14 + $0x80] sm:$0xff]  }
  0x48   : > { %6143 = vmatpush3.bf16.msra.mxu0 %v6767_v29  ;;  %6146 = vmatprep.mubr.bf16.mxu0 %v3071_v53  ;;  %v1243_v29 = vor.u32 %v1241_v11, %v1239_v21  ;;  %v7228_v53 = vld [vmem:[%s6978_s14 + $0x88] sm:$0xff]   ;;  %v7234_v59 = vld [vmem:[%s9013_s1 + $0x80] sm:$0xff]   ;;  %v1269_v63 = vshll.u32 %v7221_v16, 16  ;;  %v1273_v4 = vshrl.u32 %v7221_v16, 16  ;;  %v1267_v11 = vor.u32 %v1265_v0, %v1263_v52  ;;  %v6801_v0 = vld [vmem:[%s9013_s1 + $0x90] sm:$0xff]  }
  0x49   : > { %6144 = vmatprep.subr.bf16.mxu0 %v6769_v49  ;;  %5933 = vmatpush3.bf16.msra.mxu1 %v6777_v3  ;;  %v1264_v3 = vsel %vm1140_vm0, %v1259_v51, %v1263_v52  ;;  %v1277_v5 = vshll.u32 %v7228_v53, 16  ;;  %v6796_v51 = vld [vmem:[%s6978_s14 + $0x78] sm:$0xff]  }
  0x4a   : > { %5934 = vmatprep.subr.bf16.mxu1 %v6781_v17  ;;  %v1248_v28 = vsel %vm1140_vm0, %v1243_v29, %v1247_v30  ;;  %v1271_v10 = vrot.slane %v1269_v63, 1 }
  0x4c   : > { %6145 = vmatpush3.bf16.msra.mxu0 %v6769_v49  ;;  %v1251_v49 = vor.u32 %v1249_v62, %v1247_v30  ;;  %v1275_v13 = vor.u32 %v1273_v4, %v1271_v10  ;;  %v1272_v21 = vsel %vm1140_vm0, %v1267_v11, %v1271_v10  ;;  %v6806_v62 = vld [vmem:[%s9013_s1 + $0x1b8] sm:$0xff]   ;;  %v6810_v10 = vld [vmem:[%s9013_s1 + $0xa0] sm:$0xff]  }
  0x4d   : > { %6182 = vmatprep.subr.bf16.mxu0 %v6776_v6  ;;  %5935 = vmatpush3.bf16.msra.mxu1 %v6781_v17  ;;  %v1279_v17 = vrot.slane %v1277_v5, 1  ;;  %v6805_v4 = vld [vmem:[%s9013_s1 + $0x98] sm:$0xff]   ;;  %v3385_v5 = vld [vmem:[%s6978_s14 + $0x10] sm:$0xc] }
  0x4e   : > { %5903 = vmatmul.mubr.bf16.gmra.mrb[16].mxu1 %v1224_v9  ;;  %5936 = vmatprep.subr.bf16.mxu1 %v6786_v42  ;;  %v1256_v33 = vsel %vm1140_vm0, %v1251_v49, %v1255_v19  ;;  %v7250_v9 = vld [vmem:[%s6978_s14 + $0x90] ss:$0 sps:$4 sm:$0x11]   ;;  %v3092_v49 = vrot.slane %v6793_v45, 2  ;;  %v6825_v45 = vld [vmem:[%s9013_s1 + $0x1d8] sm:$0xff]  }
  0x4f   : > { %6147 = vmatmul.mubr.bf16.vlgmr.msra.gmra.mrb[0].mxu0 %v3073_v57  ;;  %5906 = vmatprep.mubr.bf16.mxu1 %v1232_v12  ;;  %v6798_v57 = vld [vmem:[%s9013_s1 + $0x1a8] sm:$0xff]   ;;  %v3084_v12 = vrot.slane %v7125_v7, 2  ;;  %v1285_v26 = vshll.u32 %v7250_v9, 16  ;;  %v1280_v30 = vsel %vm1140_vm0, %v1275_v13, %v1279_v17  ;;  %v6789_v7 = vld [vmem:[%s6978_s14 + $0x58] sm:$0xff]   ;;  %v6795_v19 = vld [vmem:[%s6978_s14 + $0x70] sm:$0xff]  }
  0x50   : > { %6150 = vmatprep.mubr.bf16.mxu0 %v3075_v18  ;;  %6183 = vmatpush3.bf16.msra.mxu0 %v6776_v6  ;;  %v3083_v6 = vsel %vm3068_vm2, %v3080_v50, %v3082_v56  ;;  %v3086_v18 = vrot.slane %v6787_v41, 2  ;;  %v3094_v50 = vrot.slane %v6795_v19, 2  ;;  %v6804_v11 = vld [vmem:[%s6978_s14 + $0x98] ss:$0 sps:$4 sm:$0x33]   ;;  %v6814_v13 = vld [vmem:[%s9013_s1 + $0xa8] sm:$0xff]  }
  0x51   : > { %6184 = vmatprep.subr.bf16.mxu0 %v6780_v20  ;;  %5937 = vmatpush3.bf16.msra.mxu1 %v6786_v42  ;;  %v3085_v29 = vsel %vm3068_vm2, %v3082_v56, %v3084_v12  ;;  %v3088_v42 = vrot.slane %v6789_v7, 2  ;;  %v6797_v56 = vld [vmem:[%s9013_s1 + $0x88] sm:$0xff]  }
  0x52   : > { %5974 = vmatprep.subr.bf16.mxu1 %v7234_v59  ;;  %v3087_v36 = vsel %vm3068_vm2, %v3084_v12, %v3086_v18  ;;  %v3095_v63 = vsel %vm3068_vm2, %v3092_v49, %v3094_v50 }
  0x53   : > { %v3089_v44 = vsel %vm3068_vm2, %v3086_v18, %v3088_v42 }
  0x54   : > { %6185 = vmatpush3.bf16.msra.mxu0 %v6780_v20  ;;  %v1281_v20 = vshrl.u32 %v7228_v53, 16 }
  0x55   : > { %6186 = vmatprep.subr.bf16.mxu0 %v6784_v37 }
  0x56   : > { %5907 = vmatmul.mubr.bf16.gmra.mrb[20].mxu1 %v1240_v39  ;;  %v1283_v38 = vor.u32 %v1281_v20, %v1279_v17  ;;  %v1287_v39 = vrot.slane %v1285_v26, 1  ;;  %v3104_v17 = vrot.slane %v6804_v11, 2 }
  0x57   : > { %6151 = vmatmul.mubr.bf16.gmra.mrb[4].mxu0 %v3077_v43  ;;  %5910 = vmatprep.mubr.bf16.mxu1 %v1248_v28 }
  0x58   : > { %6154 = vmatprep.mubr.bf16.mxu0 %v3079_v46  ;;  %6187 = vmatpush3.bf16.msra.mxu0 %v6784_v37  ;;  %v6791_v37 = vld [vmem:[%s6978_s14 + $0x60] sm:$0xff]   ;;  %v1288_v28 = vsel %vm1140_vm0, %v1283_v38, %v1287_v39  ;;  %v7352_v38 = vld [vmem:[%s6978_s14 + $0x30] sm:$0xff]   ;;  %v6817_v39 = vld [vmem:[%s9013_s1 + $0x1c8] sm:$0xff]  }
  0x59   : > { %6188 = vmatprep.subr.bf16.mxu0 %v6790_v48  ;;  %v3090_v43 = vrot.slane %v6791_v37, 2 }
  0x5b   : > { %v3091_v46 = vsel %vm3068_vm2, %v3088_v42, %v3090_v43  ;;  %v3093_v52 = vsel %vm3068_vm2, %v3090_v43, %v3092_v49  ;;  %v6821_v43 = vld [vmem:[%s9013_s1 + $0x1d0] sm:$0xff]  }
  0x5c   : > { %6189 = vmatpush3.bf16.msra.mxu0 %v6790_v48  ;;  %v7278_v48 = vld [vmem:[%s9013_s1 + $0x1c0] sm:$0xff]  }
  0x5d   : > { %6190 = vmatprep.subr.bf16.mxu0 %v6794_v61 }
  0x5e   : > { %5911 = vmatmul.mubr.bf16.gmra.mrb[24].mxu1 %v1256_v33  ;;  %v6799_v33 = vld [vmem:[%s6978_s14 + $0x80] sm:$0xff]  }
  0x5f   : > { %6155 = vmatmul.mubr.bf16.gmra.mrb[8].mxu0 %v3081_v2  ;;  %5914 = vmatprep.mubr.bf16.mxu1 %v1264_v3  ;;  %v6800_v2 = vld [vmem:[%s6978_s14 + $0x88] sm:$0xff]  }
  0x60   : > { %6158 = vmatprep.mubr.bf16.mxu0 %v3083_v6  ;;  %6191 = vmatpush3.bf16.msra.mxu0 %v6794_v61  ;;  %v3098_v61 = vrot.slane %v6799_v33, 2  ;;  %v7306_v6 = vld [vmem:[%s6978_s14 + $0x14] sm:$0xf] }
  0x61   : > { %6192 = vmatprep.subr.bf16.mxu0 %v6798_v57  ;;  %v6838_v33 = vld [vmem:[%s9013_s1 + $0x1f0] sm:$0xff]  }
  0x64   : > { %6193 = vmatpush3.bf16.msra.mxu0 %v6798_v57 }
  0x65   : > { %6194 = vmatprep.subr.bf16.mxu0 %v6802_v27 }
  0x66   : > { %5915 = vmatmul.mubr.bf16.gmra.mrb[28].mxu1 %v1272_v21  ;;  %v6818_v21 = vld [vmem:[%s9013_s1 + $0xb0] sm:$0xff]  }
  0x67   : > { %6159 = vmatmul.mubr.bf16.gmra.mrb[12].mxu0 %v3085_v29  ;;  %5918 = vmatprep.mubr.bf16.mxu1 %v1280_v30  ;;  %v6822_v29 = vld [vmem:[%s9013_s1 + $0xb8] sm:$0xff]  }
  0x68   : > { %6162 = vmatprep.mubr.bf16.mxu0 %v3087_v36  ;;  %6195 = vmatpush3.bf16.msra.mxu0 %v6802_v27  ;;  %v7332_v27 = vld [vmem:[%s6978_s14 + $0x20] sm:$0xff]  }
  0x69   : > { %6196 = vmatprep.subr.bf16.mxu0 %v6806_v62  ;;  %v3535_v30 = vrot.slane %v7332_v27, 2  ;;  %v7348_v36 = vld [vmem:[%s9013_s1 + $0xc0] sm:$0xff]  }
  0x6c   : > { %6197 = vmatpush3.bf16.msra.mxu0 %v6806_v62  ;;  %v3539_v62 = vrot.slane %v7352_v38, 2 }
  0x6d   : > { %6234 = vmatprep.subr.bf16.mxu0 %v7278_v48 }
  0x6e   : > { %5919 = vmatmul.mubr.bf16.gmra.mrb[32].mxu1 %v1288_v28 }
  0x6f   : > { %6163 = vmatmul.mubr.bf16.gmra.mrb[16].mxu0 %v3089_v44  ;;  %5938 = vmatprep.mubr.bf16.mxu1 %v6988_v14  ;;  %v3096_v14 = vrot.slane %v6796_v51, 2  ;;  %v7372_v44 = vld [vmem:[%s6978_s14 + $0x40] sm:$0xff]   ;;  %v6834_v51 = vld [vmem:[%s9013_s1 + $0x1e8] sm:$0xff]  }
  0x70   : > { %6166 = vmatprep.mubr.bf16.mxu0 %v3091_v46  ;;  %v3543_v46 = vrot.slane %v7372_v44, 2 }
  0x71   : > { %v3097_v3 = vsel %vm3068_vm2, %v3094_v50, %v3096_v14  ;;  %v7390_v50 = vld [vmem:[%s6978_s14 + $0x50] sm:$0xff]  }
  0x76   : > { %5939 = vmatmul.mubr.bf16.vlgmr.msra.gmra.mrb[0].mxu1 %v6991_v15  ;;  %v3099_v15 = vsel %vm3068_vm2, %v3096_v14, %v3098_v61 }
  0x77   : > { %6167 = vmatmul.mubr.bf16.gmra.mrb[20].mxu0 %v3093_v52  ;;  %5975 = vmatpush3.bf16.msra.mxu1 %v7234_v59  ;;  %v3100_v59 = vrot.slane %v6800_v2, 2  ;;  %v3547_v52 = vrot.slane %v7390_v50, 2  ;;  %v7414_v2 = vld [vmem:[%s6978_s14 + $0x68] sm:$0xff]  }
  0x78   : > { %5942 = vmatprep.mubr.bf16.mxu1 %v7013_v25  ;;  %6170 = vmatprep.mubr.bf16.mxu0 %v3095_v63  ;;  %v6803_v25 = vld [vmem:[%s6978_s14 + $0x90] sm:$0xff]   ;;  %v1775_v63 = vld [vmem:[%s6978_s14] sm:$0xe] }
  0x79   : > { %5976 = vmatprep.subr.bf16.mxu1 %v6797_v56  ;;  %v3102_v41 = vrot.slane %v6803_v25, 2  ;;  %v3101_v57 = vsel %vm3068_vm2, %v3098_v61, %v3100_v59  ;;  %v6859_v25 = vld [vmem:[%s6978_s14 + $0x8] sm:$0xff]  }
  0x7b   : > { %5977 = vmatpush3.bf16.msra.mxu1 %v6797_v56  ;;  %v3103_v12 = vsel %vm3068_vm2, %v3100_v59, %v3102_v41  ;;  %v3105_v26 = vsel %vm3068_vm2, %v3102_v41, %v3104_v17 }
  0x7c   : > { %5978 = vmatprep.subr.bf16.mxu1 %v6801_v0 }
  0x7e   : > { %5943 = vmatmul.mubr.bf16.gmra.mrb[4].mxu1 %v7042_v55  ;;  %v7314_v55 = vcombine.low %v3385_v5, %v7306_v6  ;;  %v3553_v5 = vrot.slane %v7414_v2, 2 }
  0x7f   : > { %6171 = vmatmul.mubr.bf16.gmra.mrb[24].mxu0 %v3097_v3  ;;  %5946 = vmatprep.mubr.bf16.mxu1 %v7049_v60  ;;  %v7317_v60 = vld [vmem:[%s6978_s14 + $0x18] sm:$0xff]  }
  0x80   : > { %6174 = vmatprep.mubr.bf16.mxu0 %v3099_v15  ;;  %5979 = vmatpush3.bf16.msra.mxu1 %v6801_v0  ;;  %v3532_v18 = vrot.slane %v7314_v55, 2  ;;  %v3533_v20 = vrot.slane %v7317_v60, 2  ;;  %v6858_v0 = vld [vmem:[%s6978_s14 + $0x4] sm:$0xf]  ;;  %v6842_v3 = vld [vmem:[%s9013_s1 + $0x1f8] sm:$0xff]  }
  0x81   : > { %5980 = vmatprep.subr.bf16.mxu1 %v6805_v4  ;;  %v5260_v61 = vcombine.low %v1775_v63, %v6858_v0  ;;  %v3871_v0 = vshrl.u32 %v7314_v55, 16 }
  0x82   : > { %v3536_v37 = vsel %vm3068_vm2, %v3533_v20, %v3535_v30 }
  0x83   : > { %v1797_v59 = vrot.slane %v5260_v61, 1 }
  0x84   : > { %5981 = vmatpush3.bf16.msra.mxu1 %v6805_v4  ;;  %v1798_v4 = vrot.slane %v6859_v25, 1 }
  0x85   : > { %5982 = vmatprep.subr.bf16.mxu1 %v6810_v10 }
  0x86   : > { %5947 = vmatmul.mubr.bf16.gmra.mrb[8].mxu1 %v7073_v22  ;;  %v3534_v22 = vsel %vm3068_vm2, %v3532_v18, %v3533_v20  ;;  %v1799_v41 = vsel %vm1796_vm3, %v1797_v59, %v1798_v4  ;;  %v6861_v18 = vld [vmem:[%s6978_s14 + $0x18] sm:$0xff]   ;;  %v6843_v59 = vld [vmem:[%s9013_s1 + $0xe0] sm:$0xff]  }
  0x87   : > { %6175 = vmatmul.mubr.bf16.gmra.mrb[28].mxu0 %v3101_v57  ;;  %5950 = vmatprep.mubr.bf16.mxu1 %v7082_v31  ;;  %v7336_v31 = vld [vmem:[%s6978_s14 + $0x28] sm:$0xff]   ;;  %v7436_v57 = vld [vmem:[%s6978_s14 + $0x78] sm:$0xff]   ;;  %v1802_v20 = vrot.slane %v6861_v18, 1  ;;  %v6866_v18 = vld [vmem:[%s6978_s14 + $0x40] sm:$0xff]  }
  0x88   : > { %6178 = vmatprep.mubr.bf16.mxu0 %v3103_v12  ;;  %5983 = vmatpush3.bf16.msra.mxu1 %v6810_v10  ;;  %v3537_v7 = vrot.slane %v7336_v31, 2  ;;  %v7432_v10 = vld [vmem:[%s6978_s14 + $0x70] sm:$0xff]  }
  0x89   : > { %5984 = vmatprep.subr.bf16.mxu1 %v6814_v13  ;;  %v6860_v12 = vld [vmem:[%s6978_s14 + $0x10] sm:$0xff]   ;;  %v3555_v17 = vrot.slane %v7432_v10, 2 }
  0x8a   : > { %v3540_v28 = vsel %vm3068_vm2, %v3537_v7, %v3539_v62 }
  0x8c   : > { %5985 = vmatpush3.bf16.msra.mxu1 %v6814_v13  ;;  %v1800_v13 = vrot.slane %v6860_v12, 1 }
  0x8d   : > { %5986 = vmatprep.subr.bf16.mxu1 %v6818_v21 }
  0x8e   : > { %5951 = vmatmul.mubr.bf16.gmra.mrb[12].mxu1 %v7106_v54  ;;  %v3538_v54 = vsel %vm3068_vm2, %v3535_v30, %v3537_v7  ;;  %v1803_v30 = vsel %vm1796_vm3, %v1800_v13, %v1802_v20 }
  0x8f   : > { %6179 = vmatmul.mubr.bf16.gmra.mrb[32].mxu0 %v3105_v26  ;;  %5954 = vmatprep.mubr.bf16.mxu1 %v7115_v1  ;;  %v7356_v1 = vld [vmem:[%s6978_s14 + $0x38] sm:$0xff]   ;;  %v1801_v26 = vsel %vm1796_vm3, %v1798_v4, %v1800_v13 }
  0x90   : > { %6198 = vmatprep.mubr.bf16.mxu0 %v3534_v22  ;;  %5987 = vmatpush3.bf16.msra.mxu1 %v6818_v21  ;;  %v3541_v42 = vrot.slane %v7356_v1, 2  ;;  %v3557_v21 = vrot.slane %v7436_v57, 2  ;;  %v3556_v22 = vsel %vm3068_vm2, %v3553_v5, %v3555_v17 }
  0x91   : > { %5988 = vmatprep.subr.bf16.mxu1 %v6822_v29 }
  0x92   : > { %v3544_v49 = vsel %vm3068_vm2, %v3541_v42, %v3543_v46  ;;  %v3558_v7 = vsel %vm3068_vm2, %v3555_v17, %v3557_v21  ;;  %v6845_v17 = vld [vmem:[%s9013_s1 + $0xe8] sm:$0xff]  }
  0x94   : > { %5989 = vmatpush3.bf16.msra.mxu1 %v6822_v29  ;;  %v7447_v29 = vld [vmem:[%s6978_s14 + $0x80] sm:$0xff]  }
  0x95   : > { %6026 = vmatprep.subr.bf16.mxu1 %v7348_v36 }
  0x96   : > { %5955 = vmatmul.mubr.bf16.gmra.mrb[16].mxu1 %v7142_v35  ;;  %v7375_v35 = vld [vmem:[%s6978_s14 + $0x48] sm:$0xff]  }
  0x97   : > { %6199 = vmatmul.mubr.bf16.vlgmr.msra.gmra.mrb[0].mxu0 %v3536_v37  ;;  %5958 = vmatprep.mubr.bf16.mxu1 %v7149_v40  ;;  %v3542_v40 = vsel %vm3068_vm2, %v3539_v62, %v3541_v42  ;;  %v3545_v19 = vrot.slane %v7375_v35, 2  ;;  %v6833_v37 = vld [vmem:[%s9013_s1 + $0xc8] sm:$0xff]   ;;  %v3559_v42 = vrot.slane %v7447_v29, 2 }
  0x98   : > { %6202 = vmatprep.mubr.bf16.mxu0 %v3538_v54  ;;  %6235 = vmatpush3.bf16.msra.mxu0 %v7278_v48  ;;  %v6830_v48 = vld [vmem:[%s9013_s1 + $0x1e0] sm:$0xff]   ;;  %v7455_v54 = vld [vmem:[%s6978_s14 + $0x88] sm:$0xff]  }
  0x99   : > { %6236 = vmatprep.subr.bf16.mxu0 %v6817_v39  ;;  %v3548_v14 = vsel %vm3068_vm2, %v3545_v19, %v3547_v52 }
  0x9c   : > { %6237 = vmatpush3.bf16.msra.mxu0 %v6817_v39  ;;  %v6862_v39 = vld [vmem:[%s6978_s14 + $0x20] sm:$0xff]  }
  0x9d   : > { %6238 = vmatprep.subr.bf16.mxu0 %v6821_v43  ;;  %v1804_v62 = vrot.slane %v6862_v39, 1 }
  0x9e   : > { %5959 = vmatmul.mubr.bf16.gmra.mrb[20].mxu1 %v7158_v47  ;;  %v3546_v47 = vsel %vm3068_vm2, %v3543_v46, %v3545_v19 }
  0x9f   : > { %6203 = vmatmul.mubr.bf16.gmra.mrb[4].mxu0 %v3540_v28  ;;  %5962 = vmatprep.mubr.bf16.mxu1 %v7170_v58  ;;  %v7394_v58 = vld [vmem:[%s6978_s14 + $0x58] sm:$0xff]   ;;  %v1805_v46 = vsel %vm1796_vm3, %v1802_v20, %v1804_v62  ;;  %v1812_v20 = vrot.slane %v6866_v18, 1  ;;  %v6871_v18 = vld [vmem:[%s6978_s14 + $0x60] sm:$0xff]  }
  0xa0   : > { %6206 = vmatprep.mubr.bf16.mxu0 %v3542_v40  ;;  %6239 = vmatpush3.bf16.msra.mxu0 %v6821_v43  ;;  %v3549_v56 = vrot.slane %v7394_v58, 2  ;;  %v6863_v43 = vld [vmem:[%s6978_s14 + $0x28] sm:$0xff]   ;;  %v6837_v40 = vld [vmem:[%s9013_s1 + $0xd0] sm:$0xff]  }
  0xa1   : > { %6240 = vmatprep.subr.bf16.mxu0 %v6825_v45  ;;  %v1806_v28 = vrot.slane %v6863_v43, 1  ;;  %v6847_v43 = vld [vmem:[%s9013_s1 + $0xf0] sm:$0xff]  }
  0xa3   : > { %v1807_v19 = vsel %vm1796_vm3, %v1804_v62, %v1806_v28  ;;  %v3897_v62 = vshrl.u32 %v7336_v31, 16 }
  0xa4   : > { %6241 = vmatpush3.bf16.msra.mxu0 %v6825_v45  ;;  %v3561_v45 = vrot.slane %v7455_v54, 2 }
  0xa5   : > { %6242 = vmatprep.subr.bf16.mxu0 %v6830_v48 }
  0xa6   : > { %5963 = vmatmul.mubr.bf16.gmra.mrb[24].mxu1 %v7182_v8  ;;  %v7409_v8 = vld [vmem:[%s6978_s14 + $0x60] sm:$0xff]  }
  0xa7   : > { %6207 = vmatmul.mubr.bf16.gmra.mrb[8].mxu0 %v3544_v49  ;;  %5966 = vmatprep.mubr.bf16.mxu1 %v7199_v23  ;;  %v3550_v23 = vsel %vm3068_vm2, %v3547_v52, %v3549_v56  ;;  %v3551_v15 = vrot.slane %v7409_v8, 2  ;;  %v3562_v49 = vsel %vm3068_vm2, %v3559_v42, %v3561_v45  ;;  %v6864_v52 = vld [vmem:[%s6978_s14 + $0x30] sm:$0xff]  }
  0xa8   : > { %6210 = vmatprep.mubr.bf16.mxu0 %v3546_v47  ;;  %6243 = vmatpush3.bf16.msra.mxu0 %v6830_v48  ;;  %v7469_v48 = vld [vmem:[%s6978_s14 + $0x90] sm:$0xff]   ;;  %v7473_v47 = vld [vmem:[%s6978_s14 + $0x98] sm:$0xff]  }
  0xa9   : > { %6244 = vmatprep.subr.bf16.mxu0 %v6834_v51  ;;  %v3554_v11 = vsel %vm3068_vm2, %v3551_v15, %v3553_v5  ;;  %v3563_v63 = vrot.slane %v7469_v48, 2  ;;  %v3565_v61 = vrot.slane %v7473_v47, 2 }
  0xab   : > { %v3564_v4 = vsel %vm3068_vm2, %v3561_v45, %v3563_v63 }
  0xac   : > { %6245 = vmatpush3.bf16.msra.mxu0 %v6834_v51  ;;  %v6841_v51 = vld [vmem:[%s9013_s1 + $0xd8] sm:$0xff]  }
  0xad   : > { %6246 = vmatprep.subr.bf16.mxu0 %v6838_v33 }
  0xae   : > { %5967 = vmatmul.mubr.bf16.gmra.mrb[28].mxu1 %v7203_v32  ;;  %v7427_v32 = vld [vmem:[%s9013_s1 + $0x200] sm:$0xff]  }
  0xaf   : > { %6211 = vmatmul.mubr.bf16.gmra.mrb[12].mxu0 %v3548_v14  ;;  %5970 = vmatprep.mubr.bf16.mxu1 %v7221_v16  ;;  %v3552_v16 = vsel %vm3068_vm2, %v3549_v56, %v3551_v15  ;;  %v1808_v56 = vrot.slane %v6864_v52, 1  ;;  %v3882_v15 = vshll.u32 %v7317_v60, 16  ;;  %v6849_v52 = vld [vmem:[%s9013_s1 + $0xf8] sm:$0xff]  }
  0xb0   : > { %6214 = vmatprep.mubr.bf16.mxu0 %v3550_v23  ;;  %6247 = vmatpush3.bf16.msra.mxu0 %v6838_v33  ;;  %v6865_v33 = vld [vmem:[%s6978_s14 + $0x38] sm:$0xff]   ;;  %v3874_v23 = vshll.u32 %v7314_v55, 16  ;;  %v3566_v55 = vsel %vm3068_vm2, %v3563_v63, %v3565_v61 }
  0xb1   : > { %6248 = vmatprep.subr.bf16.mxu0 %v6842_v3  ;;  %v1810_v14 = vrot.slane %v6865_v33, 1  ;;  %v1809_v25 = vsel %vm1796_vm3, %v1806_v28, %v1808_v56  ;;  %v3884_v13 = vrot.slane %v3882_v15, 3  ;;  %v3915_v15 = vshrl.u32 %v7356_v1, 16 }
  0xb3   : > { %v1811_v5 = vsel %vm1796_vm3, %v1808_v56, %v1810_v14  ;;  %v1813_v28 = vsel %vm1796_vm3, %v1810_v14, %v1812_v20  ;;  %v6868_v56 = vld [vmem:[%s6978_s14 + $0x50] sm:$0xff]   ;;  %v6869_v14 = vld [vmem:[%s6978_s14 + $0x58] sm:$0xff]  }
  0xb4   : > { %6249 = vmatpush3.bf16.msra.mxu0 %v6842_v3  ;;  %v3879_v3 = vshrl.u32 %v7317_v60, 16  ;;  %v1816_v63 = vrot.slane %v6868_v56, 1  ;;  %v6850_v56 = vld [vmem:[%s9013_s1 + $0x218] sm:$0xff]  }
  0xb5   : > { %6286 = vmatprep.subr.bf16.mxu0 %v7427_v32 }
  0xb6   : > { %5971 = vmatmul.mubr.bf16.gmra.mrb[32].mxu1 %v7228_v53  ;;  %v3881_v12 = vrot.slane %v3879_v3, 2 }
  0xb7   : > { %6215 = vmatmul.mubr.bf16.gmra.mrb[16].mxu0 %v3552_v16  ;;  %5990 = vmatprep.mubr.bf16.mxu1 %v1799_v41  ;;  %v6840_v16 = vld [vmem:[%s6978_s14 + $0xa0] ss:$0 sps:$4 sm:$0x33]   ;;  %v3873_v41 = vrot.slane %v3871_v0, 2  ;;  %v1818_v0 = vrot.slane %v6869_v14, 1 }
  0xb8   : > { %6218 = vmatprep.mubr.bf16.mxu0 %v3554_v11  ;;  %v3876_v11 = vrot.slane %v3874_v23, 3  ;;  %v3885_v39 = vor.u32 %v3884_v13, %v3881_v12  ;;  %v3909_v23 = vshll.u32 %v7352_v38, 16  ;;  %v6846_v13 = vld [vmem:[%s9013_s1 + $0x208] sm:$0xff]  }
  0xbe   : > { %5991 = vmatmul.mubr.bf16.vlgmr.msra.gmra.mrb[0].mxu1 %v1801_v26  ;;  %v6867_v26 = vld [vmem:[%s6978_s14 + $0x48] sm:$0xff]  }
  0xbf   : > { %6219 = vmatmul.mubr.bf16.gmra.mrb[20].mxu0 %v3556_v22  ;;  %6027 = vmatpush3.bf16.msra.mxu1 %v7348_v36  ;;  %v3560_v36 = vsel %vm3068_vm2, %v3557_v21, %v3559_v42  ;;  %v3567_v21 = vrot.slane %v6840_v16, 2  ;;  %v1814_v22 = vrot.slane %v6867_v26, 1  ;;  %v3900_v42 = vshll.u32 %v7336_v31, 16 }
  0xc0   : > { %5994 = vmatprep.mubr.bf16.mxu1 %v1803_v30  ;;  %6222 = vmatprep.mubr.bf16.mxu0 %v3558_v7  ;;  %v3888_v30 = vshrl.u32 %v7332_v27, 16  ;;  %v3891_v7 = vshll.u32 %v7332_v27, 16 }
  0xc1   : > { %6028 = vmatprep.subr.bf16.mxu1 %v6833_v37  ;;  %v1815_v45 = vsel %vm1796_vm3, %v1812_v20, %v1814_v22  ;;  %v1820_v20 = vrot.slane %v6871_v18, 1 }
  0xc3   : > { %6029 = vmatpush3.bf16.msra.mxu1 %v6833_v37  ;;  %v3877_v37 = vor.u32 %v3876_v11, %v3873_v41  ;;  %v3911_v41 = vrot.slane %v3909_v23, 3  ;;  %v3917_v11 = vrot.slane %v3915_v15, 2  ;;  %v3945_v15 = vshll.u32 %v7390_v50, 16 }
  0xc4   : > { %6030 = vmatprep.subr.bf16.mxu1 %v6837_v40 }
  0xc6   : > { %5995 = vmatmul.mubr.bf16.gmra.mrb[4].mxu1 %v1805_v46  ;;  %v3890_v46 = vrot.slane %v3888_v30, 2  ;;  %v3924_v30 = vshrl.u32 %v7372_v44, 16 }
  0xc7   : > { %6223 = vmatmul.mubr.bf16.gmra.mrb[24].mxu0 %v3560_v36  ;;  %5998 = vmatprep.mubr.bf16.mxu1 %v1807_v19  ;;  %v3893_v36 = vrot.slane %v3891_v7, 3  ;;  %v3886_v19 = vsel %vm3869_vm4, %v3877_v37, %v3885_v39  ;;  %v3927_v7 = vshll.u32 %v7372_v44, 16 }
  0xc8   : > { %6226 = vmatprep.mubr.bf16.mxu0 %v3562_v49  ;;  %6031 = vmatpush3.bf16.msra.mxu1 %v6837_v40  ;;  %v3568_v40 = vsel %vm3068_vm2, %v3565_v61, %v3567_v21  ;;  %v3899_v49 = vrot.slane %v3897_v62, 2  ;;  %v3906_v61 = vshrl.u32 %v7352_v38, 16  ;;  %v6872_v21 = vld [vmem:[%s6978_s14 + $0x68] sm:$0xff]   ;;  %v3936_v62 = vshll.u32 %v7375_v35, 16 }
  0xc9   : > { %6032 = vmatprep.subr.bf16.mxu1 %v6841_v51  ;;  %v3894_v33 = vor.u32 %v3893_v36, %v3890_v46  ;;  %v1822_v26 = vrot.slane %v6872_v21, 1  ;;  %v3926_v46 = vrot.slane %v3924_v30, 2  ;;  %v3929_v36 = vrot.slane %v3927_v7, 3  ;;  %v6852_v21 = vld [vmem:[%s9013_s1 + $0x228] sm:$0xff]  }
  0xca   : > { %v3908_v16 = vrot.slane %v3906_v61, 2  ;;  %v6874_v61 = vld [vmem:[%s6978_s14 + $0x78] sm:$0xff]   ;;  %v1830_v7 = vrot.slane %v7228_v53, 1 }
  0xcb   : > { %v1826_v23 = vrot.slane %v6874_v61, 1  ;;  %v6876_v61 = vld [vmem:[%s6978_s14 + $0x10] sm:$0xff]  }
  0xcc   : > { %6033 = vmatpush3.bf16.msra.mxu1 %v6841_v51  ;;  %v3902_v51 = vrot.slane %v3900_v42, 3  ;;  %v6848_v42 = vld [vmem:[%s9013_s1 + $0x210] sm:$0xff]  }
  0xcd   : > { %6034 = vmatprep.subr.bf16.mxu1 %v6843_v59 }
  0xce   : > { %5999 = vmatmul.mubr.bf16.gmra.mrb[8].mxu1 %v1809_v25  ;;  %v3903_v3 = vor.u32 %v3902_v51, %v3899_v49  ;;  %v1817_v25 = vsel %vm1796_vm3, %v1814_v22, %v1816_v63  ;;  %v3912_v22 = vor.u32 %v3911_v41, %v3908_v16 }
  0xcf   : > { %6227 = vmatmul.mubr.bf16.gmra.mrb[28].mxu0 %v3564_v4  ;;  %6002 = vmatprep.mubr.bf16.mxu1 %v1811_v5  ;;  %v3895_v4 = vsel %vm3869_vm4, %v3885_v39, %v3894_v33  ;;  %v1819_v5 = vsel %vm1796_vm3, %v1816_v63, %v1818_v0  ;;  %v3933_v39 = vshrl.u32 %v7375_v35, 16 }
  0xd0   : > { %6230 = vmatprep.mubr.bf16.mxu0 %v3566_v55  ;;  %6035 = vmatpush3.bf16.msra.mxu1 %v6843_v59  ;;  %v3918_v59 = vshll.u32 %v7356_v1, 16  ;;  %v3904_v55 = vsel %vm3869_vm4, %v3894_v33, %v3903_v3  ;;  %v6873_v33 = vld [vmem:[%s6978_s14 + $0x70] sm:$0xff]  }
  0xd1   : > { %6036 = vmatprep.subr.bf16.mxu1 %v6845_v17  ;;  %v3935_v51 = vrot.slane %v3933_v39, 2  ;;  %v1824_v14 = vrot.slane %v6873_v33, 1  ;;  %v3963_v39 = vshll.u32 %v7409_v8, 16  ;;  %v1832_v33 = vrot.slane %v7250_v9, 1 }
  0xd2   : > { %v3920_v12 = vrot.slane %v3918_v59, 3 }
  0xd3   : > { %v1825_v16 = vsel %vm1796_vm3, %v1822_v26, %v1824_v14  ;;  %v1833_v9 = vsel %vm1796_vm3, %v1830_v7, %v1832_v33  ;;  %v4014_v33 = vshrl.u32 %v7469_v48, 16 }
  0xd4   : > { %6037 = vmatpush3.bf16.msra.mxu1 %v6845_v17  ;;  %v7529_v17 = vld [vmem:[%s9013_s1 + $0x100] sm:$0xff]   ;;  %v3921_v37 = vor.u32 %v3920_v12, %v3917_v11  ;;  %v3947_v12 = vrot.slane %v3945_v15, 3  ;;  %v3981_v15 = vshll.u32 %v7432_v10, 16 }
  0xd5   : > { %6038 = vmatprep.subr.bf16.mxu1 %v6847_v43 }
  0xd6   : > { %6003 = vmatmul.mubr.bf16.gmra.mrb[12].mxu1 %v1813_v28  ;;  %v4374_v28 = vrot.slane %v7473_v47, 3  ;;  %v3922_v49 = vsel %vm3869_vm4, %v3912_v22, %v3921_v37 }
  0xd7   : > { %6231 = vmatmul.mubr.bf16.gmra.mrb[32].mxu0 %v3568_v40  ;;  %6006 = vmatprep.mubr.bf16.mxu1 %v1815_v45  ;;  %v1823_v40 = vsel %vm1796_vm3, %v1820_v20, %v1822_v26  ;;  %v3913_v45 = vsel %vm3869_vm4, %v3903_v3, %v3912_v22  ;;  %v3942_v3 = vshrl.u32 %v7390_v50, 16  ;;  %v6875_v26 = vld [vmem:[%s6978_s14 + $0x80] sm:$0xff]  }
  0xd8   : > { %6250 = vmatprep.mubr.bf16.mxu0 %v3886_v19  ;;  %6039 = vmatpush3.bf16.msra.mxu1 %v6847_v43  ;;  %v7543_v43 = vld [vmem:[%s6978_s14 + $0xa0] ss:$0 sps:$4 sm:$0x77]   ;;  %v1828_v22 = vrot.slane %v6875_v26, 1  ;;  %v3999_v26 = vshll.u32 %v7447_v29, 16 }
  0xd9   : > { %6040 = vmatprep.subr.bf16.mxu1 %v6849_v52  ;;  %v4376_v19 = vrot.slane %v7543_v43, 3  ;;  %v3944_v11 = vrot.slane %v3942_v3, 2  ;;  %v3978_v3 = vshrl.u32 %v7432_v10, 16 }
  0xda   : > { %v1831_v53 = vsel %vm1796_vm3, %v1828_v22, %v1830_v7 }
  0xdb   : > { %v7557_v63 = vsel %vm4340_vm5, %v4374_v28, %v4376_v19  ;;  %v3948_v30 = vor.u32 %v3947_v12, %v3944_v11  ;;  %v3965_v19 = vrot.slane %v3963_v39, 3  ;;  %v4008_v39 = vshll.u32 %v7455_v54, 16 }
  0xdc   : > { %6041 = vmatpush3.bf16.msra.mxu1 %v6849_v52  ;;  %v3938_v52 = vrot.slane %v3936_v62, 3 }
  0xdd   : > { %6338 = vmatprep.subr.bf16.mxu1 %v7529_v17 }
  0xde   : > { %6007 = vmatmul.mubr.bf16.gmra.mrb[16].mxu1 %v1817_v25  ;;  %v3939_v59 = vor.u32 %v3938_v52, %v3935_v51  ;;  %v3951_v25 = vshrl.u32 %v7394_v58, 16 }
  0xdf   : > { %6251 = vmatmul.mubr.bf16.vlgmr.msra.gmra.mrb[0].mxu0 %v3895_v4  ;;  %6010 = vmatprep.mubr.bf16.mxu1 %v1819_v5  ;;  %v3954_v4 = vshll.u32 %v7394_v58, 16  ;;  %v6851_v5 = vld [vmem:[%s9013_s1 + $0x220] sm:$0xff]  }
  0xe0   : > { %6254 = vmatprep.mubr.bf16.mxu0 %v3904_v55  ;;  %6287 = vmatpush3.bf16.msra.mxu0 %v7427_v32  ;;  %v1821_v32 = vsel %vm1796_vm3, %v1818_v0, %v1820_v20  ;;  %v3930_v0 = vor.u32 %v3929_v36, %v3926_v46  ;;  %v1827_v55 = vsel %vm1796_vm3, %v1824_v14, %v1826_v23  ;;  %v3953_v18 = vrot.slane %v3951_v25, 2 }
  0xe1   : > { %6288 = vmatprep.subr.bf16.mxu0 %v6846_v13  ;;  %v3956_v20 = vrot.slane %v3954_v4, 3  ;;  %v3949_v46 = vsel %vm3869_vm4, %v3939_v59, %v3948_v30  ;;  %v2260_v14 = vrot.slane %v7010_v24, 1  ;;  %v3987_v25 = vshrl.u32 %v7436_v57, 16 }
  0xe2   : > { %v3931_v41 = vsel %vm3869_vm4, %v3921_v37, %v3930_v0  ;;  %v3960_v37 = vshrl.u32 %v7409_v8, 16  ;;  %v3990_v4 = vshll.u32 %v7436_v57, 16 }
  0xe3   : > { %v3957_v62 = vor.u32 %v3956_v20, %v3953_v18  ;;  %v3989_v11 = vrot.slane %v3987_v25, 2  ;;  %v4016_v25 = vrot.slane %v4014_v33, 2 }
  0xe4   : > { %6289 = vmatpush3.bf16.msra.mxu0 %v6846_v13  ;;  %v3940_v13 = vsel %vm3869_vm4, %v3930_v0, %v3939_v59  ;;  %v3962_v36 = vrot.slane %v3960_v37, 2  ;;  %v3992_v12 = vrot.slane %v3990_v4, 3  ;;  %v4005_v37 = vshrl.u32 %v7455_v54, 16 }
  0xe5   : > { %6290 = vmatprep.subr.bf16.mxu0 %v6848_v42 }
  0xe6   : > { %6011 = vmatmul.mubr.bf16.gmra.mrb[20].mxu1 %v1821_v32  ;;  %v3972_v32 = vshll.u32 %v7414_v2, 16  ;;  %v3966_v0 = vor.u32 %v3965_v19, %v3962_v36  ;;  %v3993_v7 = vor.u32 %v3992_v12, %v3989_v11  ;;  %v4010_v36 = vrot.slane %v4008_v39, 3  ;;  %v6879_v19 = vld [vmem:[%s6978_s14 + $0x28] sm:$0xff]   ;;  %v6884_v12 = vld [vmem:[%s6978_s14 + $0x40] sm:$0xff]  }
  0xe7   : > { %6255 = vmatmul.mubr.bf16.gmra.mrb[4].mxu0 %v3913_v45  ;;  %6014 = vmatprep.mubr.bf16.mxu1 %v1823_v40  ;;  %v6853_v40 = vld [vmem:[%s9013_s1 + $0x230] sm:$0xff]   ;;  %v1829_v45 = vsel %vm1796_vm3, %v1826_v23, %v1828_v22  ;;  %v2261_v23 = vrot.slane %v6876_v61, 1  ;;  %v6878_v22 = vld [vmem:[%s6978_s14 + $0x20] sm:$0xff]  }
  0xe8   : > { %6258 = vmatprep.mubr.bf16.mxu0 %v3922_v49  ;;  %6291 = vmatpush3.bf16.msra.mxu0 %v6848_v42  ;;  %v3969_v42 = vshrl.u32 %v7414_v2, 16  ;;  %v3958_v49 = vsel %vm3869_vm4, %v3948_v30, %v3957_v62  ;;  %v3974_v52 = vrot.slane %v3972_v32, 3  ;;  %v3967_v24 = vsel %vm3869_vm4, %v3957_v62, %v3966_v0 }
  0xe9   : > { %6292 = vmatprep.subr.bf16.mxu0 %v6850_v56  ;;  %v2265_v30 = vrot.slane %v6878_v22, 1  ;;  %v4319_v22 = vld [vmem:[%s6978_s14 + $0x10] sm:$0x8] }
  0xea   : > { %v3971_v51 = vrot.slane %v3969_v42, 2 }
  0xec   : > { %6293 = vmatpush3.bf16.msra.mxu0 %v6850_v56  ;;  %v6855_v56 = vld [vmem:[%s9013_s1 + $0x238] sm:$0xff]   ;;  %v3975_v59 = vor.u32 %v3974_v52, %v3971_v51  ;;  %v6880_v52 = vld [vmem:[%s6978_s14 + $0x30] sm:$0xff]  }
  0xed   : > { %6294 = vmatprep.subr.bf16.mxu0 %v6851_v5 }
  0xee   : > { %6015 = vmatmul.mubr.bf16.gmra.mrb[24].mxu1 %v1825_v16  ;;  %v3980_v16 = vrot.slane %v3978_v3, 2 }
  0xef   : > { %6259 = vmatmul.mubr.bf16.gmra.mrb[8].mxu0 %v3931_v41  ;;  %6018 = vmatprep.mubr.bf16.mxu1 %v1827_v55  ;;  %v3983_v41 = vrot.slane %v3981_v15, 3  ;;  %v3976_v55 = vsel %vm3869_vm4, %v3966_v0, %v3975_v59  ;;  %v6881_v0 = vld [vmem:[%s9013_s1 + $0x108] sm:$0xff]  }
  0xf0   : > { %6262 = vmatprep.mubr.bf16.mxu0 %v3940_v13  ;;  %6295 = vmatpush3.bf16.msra.mxu0 %v6851_v5  ;;  %v2262_v5 = vsel %vm1796_vm3, %v2260_v14, %v2261_v23  ;;  %v6877_v13 = vld [vmem:[%s6978_s14 + $0x18] sm:$0xff]   ;;  %v4017_v14 = vshll.u32 %v7469_v48, 16 }
  0xf1   : > { %6296 = vmatprep.subr.bf16.mxu0 %v6852_v21  ;;  %v2263_v18 = vrot.slane %v6877_v13, 1  ;;  %v3984_v20 = vor.u32 %v3983_v41, %v3980_v16  ;;  %v6883_v41 = vld [vmem:[%s6978_s14 + $0x38] sm:$0xff]   ;;  %v2273_v13 = vrot.slane %v6884_v12, 1 }
  0xf2   : > { %v4019_v4 = vrot.slane %v4017_v14, 3  ;;  %v6890_v14 = vld [vmem:[%s9013_s1 + $0x130] sm:$0xff]  }
  0xf3   : > { %v2264_v62 = vsel %vm1796_vm3, %v2261_v23, %v2263_v18  ;;  %v3985_v42 = vsel %vm3869_vm4, %v3975_v59, %v3984_v20  ;;  %v4023_v23 = vshrl.u32 %v7473_v47, 16 }
  0xf4   : > { %6297 = vmatpush3.bf16.msra.mxu0 %v6852_v21  ;;  %v3996_v21 = vshrl.u32 %v7447_v29, 16  ;;  %v4020_v11 = vor.u32 %v4019_v4, %v4016_v25 }
  0xf5   : > { %6298 = vmatprep.subr.bf16.mxu0 %v6853_v40 }
  0xf6   : > { %6019 = vmatmul.mubr.bf16.gmra.mrb[28].mxu1 %v1829_v45  ;;  %v3998_v32 = vrot.slane %v3996_v21, 2  ;;  %v2266_v45 = vsel %vm1796_vm3, %v2263_v18, %v2265_v30  ;;  %v4032_v18 = vshrl.u32 %v7543_v43, 16 }
  0xf7   : > { %6263 = vmatmul.mubr.bf16.gmra.mrb[12].mxu0 %v3949_v46  ;;  %6022 = vmatprep.mubr.bf16.mxu1 %v1831_v53  ;;  %v3994_v46 = vsel %vm3869_vm4, %v3984_v20, %v3993_v7  ;;  %v4007_v53 = vrot.slane %v4005_v37, 2  ;;  %v4035_v20 = vshll.u32 %v7543_v43, 16 }
  0xf8   : > { %6266 = vmatprep.mubr.bf16.mxu0 %v3958_v49  ;;  %6299 = vmatpush3.bf16.msra.mxu0 %v6853_v40  ;;  %v4001_v40 = vrot.slane %v3999_v26, 3  ;;  %v2267_v49 = vrot.slane %v6879_v19, 1  ;;  %v6885_v26 = vld [vmem:[%s9013_s1 + $0x118] sm:$0xff]   ;;  %v4034_v39 = vrot.slane %v4032_v18, 2 }
  0xf9   : > { %6300 = vmatprep.subr.bf16.mxu0 %v6855_v56  ;;  %v4011_v61 = vor.u32 %v4010_v36, %v4007_v53  ;;  %v7647_v53 = vld [vmem:[%s6978_s14 + $0x50] sm:$0xff]   ;;  %v7693_v18 = vld [vmem:[%s6978_s14 + $0x78] sm:$0xff]  }
  0xfa   : > { %v4002_v51 = vor.u32 %v4001_v40, %v3998_v32  ;;  %v2268_v3 = vsel %vm1796_vm3, %v2265_v30, %v2267_v49  ;;  %v6886_v32 = vld [vmem:[%s9013_s1 + $0x120] sm:$0xff]   ;;  %v6887_v40 = vld [vmem:[%s6978_s14 + $0x48] sm:$0xff]   ;;  %v2277_v36 = vrot.slane %v7647_v53, 1 }
  0xfc   : > { %6301 = vmatpush3.bf16.msra.mxu0 %v6855_v56  ;;  %v2269_v56 = vrot.slane %v6880_v52, 1  ;;  %v4003_v15 = vsel %vm3869_vm4, %v3993_v7, %v4002_v51  ;;  %v4021_v7 = vsel %vm3869_vm4, %v4011_v61, %v4020_v11 }
  0xfe   : > { %6023 = vmatmul.mubr.bf16.gmra.mrb[32].mxu1 %v1833_v9  ;;  %v2270_v59 = vsel %vm1796_vm3, %v2267_v49, %v2269_v56  ;;  %v6882_v9 = vld [vmem:[%s9013_s1 + $0x110] sm:$0xff]   ;;  %v6889_v49 = vld [vmem:[%s9013_s1 + $0x128] sm:$0xff]  }
  0xff   : > { %6267 = vmatmul.mubr.bf16.gmra.mrb[16].mxu0 %v3967_v24  ;;  %6042 = vmatprep.mubr.bf16.mxu1 %v2262_v5  ;;  %v4012_v24 = vsel %vm3869_vm4, %v4002_v51, %v4011_v61  ;;  %v4025_v5 = vrot.slane %v4023_v23, 2  ;;  %v4344_v61 = vrot.slane %v7332_v27, 3  ;;  %v7667_v23 = vld [vmem:[%s6978_s14 + $0x60] sm:$0xff]  }
 0x100   : > { %6270 = vmatprep.mubr.bf16.mxu0 %v3976_v55  ;;  %v2271_v55 = vrot.slane %v6883_v41, 1  ;;  %v4350_v41 = vrot.slane %v7356_v1, 3  ;;  %v4352_v1 = vrot.slane %v7372_v44, 3 }
 0x102   : > { %v2272_v30 = vsel %vm1796_vm3, %v2269_v56, %v2271_v55  ;;  %v2274_v37 = vsel %vm1796_vm3, %v2271_v55, %v2273_v13 }
 0x106   : > { %6043 = vmatmul.mubr.bf16.vlgmr.msra.gmra.mrb[0].mxu1 %v2264_v62  ;;  %v4037_v62 = vrot.slane %v4035_v20, 3  ;;  %v7698_v20 = vld [vmem:[%s6978_s14 + $0x80] sm:$0xff]  }
 0x107   : > { %6271 = vmatmul.mubr.bf16.gmra.mrb[20].mxu0 %v3985_v42  ;;  %6346 = vmatpush3.bf16.msra.mxu1 %v7529_v17  ;;  %v4026_v17 = vshll.u32 %v7473_v47, 16  ;;  %v5446_v42 = vcombine.low %v4319_v22, %v7306_v6  ;;  %v4342_v6 = vrot.slane %v7317_v60, 3  ;;  %v7662_v60 = vld [vmem:[%s6978_s14 + $0x58] sm:$0xff]  }
 0x108   : > { %6046 = vmatprep.mubr.bf16.mxu1 %v2266_v45  ;;  %6274 = vmatprep.mubr.bf16.mxu0 %v3994_v46  ;;  %v2275_v45 = vrot.slane %v6887_v40, 1  ;;  %v4038_v46 = vor.u32 %v4037_v62, %v4034_v39  ;;  %v7707_v39 = vld [vmem:[%s6978_s14 + $0x88] sm:$0xff]   ;;  %v4356_v62 = vrot.slane %v7390_v50, 3  ;;  %v4358_v40 = vrot.slane %v7394_v58, 3 }
 0x109   : > { %6339 = vmatprep.subr.bf16.mxu1 %v6881_v0  ;;  %v4028_v16 = vrot.slane %v4026_v17, 3  ;;  %v4341_v19 = vrot.slane %v5446_v42, 3  ;;  %v2281_v17 = vrot.slane %v7667_v23, 1  ;;  %v4345_v25 = vsel %vm4340_vm5, %v4342_v6, %v4344_v61 }
 0x10a   : > { %v2276_v51 = vsel %vm1796_vm3, %v2273_v13, %v2275_v45  ;;  %v2278_v56 = vsel %vm1796_vm3, %v2275_v45, %v2277_v36  ;;  %v2291_v44 = vrot.slane %v7707_v39, 1  ;;  %v2679_v42 = vshrl.u32 %v7647_v53, 16 }
 0x10b   : > { %6347 = vmatpush3.bf16.msra.mxu1 %v6881_v0  ;;  %v4029_v21 = vor.u32 %v4028_v16, %v4025_v5  ;;  %v4343_v33 = vsel %vm4340_vm5, %v4341_v19, %v4342_v6  ;;  %v2279_v0 = vrot.slane %v7662_v60, 1  ;;  %v7684_v5 = vld [vmem:[%s6978_s14 + $0x70] sm:$0xff]   ;;  %v4359_v50 = vsel %vm4340_vm5, %v4356_v62, %v4358_v40 }
 0x10c   : > { %6340 = vmatprep.subr.bf16.mxu1 %v6882_v9  ;;  %v2285_v16 = vrot.slane %v7684_v5, 1  ;;  %v2681_v6 = vrot.slane %v2679_v42, 1  ;;  %v4360_v58 = vrot.slane %v7409_v8, 3 }
 0x10d   : > { %v4030_v43 = vsel %vm3869_vm4, %v4020_v11, %v4029_v21  ;;  %v4039_v52 = vsel %vm3869_vm4, %v4029_v21, %v4038_v46  ;;  %v2282_v4 = vsel %vm1796_vm3, %v2279_v0, %v2281_v17  ;;  %v2289_v21 = vrot.slane %v7698_v20, 1  ;;  %v6857_v46 = vld [vmem:[%s6978_s14 + $0x98] ss:$0 sps:$4 sm:$0x11]  }
 0x10e   : > { %6047 = vmatmul.mubr.bf16.gmra.mrb[4].mxu1 %v2268_v3  ;;  %v4346_v3 = vrot.slane %v7336_v31, 3 }
 0x10f   : > { %6275 = vmatmul.mubr.bf16.gmra.mrb[24].mxu0 %v4003_v15  ;;  %6050 = vmatprep.mubr.bf16.mxu1 %v2270_v59  ;;  %v6893_v15 = vld [vmem:[%s9013_s1 + $0x138] sm:$0xff]   ;;  %v2280_v59 = vsel %vm1796_vm3, %v2277_v36, %v2279_v0  ;;  %v2292_v45 = vsel %vm1796_vm3, %v2289_v21, %v2291_v44  ;;  %v4362_v0 = vrot.slane %v7414_v2, 3 }
 0x110   : > { %6278 = vmatprep.mubr.bf16.mxu0 %v4012_v24  ;;  %6348 = vmatpush3.bf16.msra.mxu1 %v6882_v9  ;;  %v4347_v27 = vsel %vm4340_vm5, %v4344_v61, %v4346_v3  ;;  %v7679_v9 = vld [vmem:[%s6978_s14 + $0x68] sm:$0xff]   ;;  %v4348_v24 = vrot.slane %v7352_v38, 3  ;;  %v2287_v38 = vrot.slane %v7693_v18, 1 }
 0x111   : > { %6341 = vmatprep.subr.bf16.mxu1 %v6885_v26  ;;  %v2283_v31 = vrot.slane %v7679_v9, 1  ;;  %v4363_v8 = vsel %vm4340_vm5, %v4360_v58, %v4362_v0  ;;  %v2709_v2 = vshll.u32 %v7679_v9, 16 }
 0x112   : > { %v4349_v11 = vsel %vm4340_vm5, %v4346_v3, %v4348_v24  ;;  %v4351_v13 = vsel %vm4340_vm5, %v4348_v24, %v4350_v41  ;;  %v2288_v22 = vsel %vm1796_vm3, %v2285_v16, %v2287_v38  ;;  %v2715_v24 = vshrl.u32 %v7684_v5, 16 }
 0x113   : > { %v2284_v55 = vsel %vm1796_vm3, %v2281_v17, %v2283_v31  ;;  %v2286_v12 = vsel %vm1796_vm3, %v2283_v31, %v2285_v16  ;;  %v4366_v16 = vrot.slane %v7436_v57, 3  ;;  %v2727_v57 = vshll.u32 %v7693_v18, 16 }
 0x114   : > { %6349 = vmatpush3.bf16.msra.mxu1 %v6885_v26  ;;  %v4354_v26 = vrot.slane %v7375_v35, 3  ;;  %v7712_v35 = vld [vmem:[%s6978_s14 + $0x90] sm:$0xff]  }
 0x115   : > { %6342 = vmatprep.subr.bf16.mxu1 %v6886_v32 }
 0x116   : > { %6051 = vmatmul.mubr.bf16.gmra.mrb[8].mxu1 %v2272_v30  ;;  %v4353_v30 = vsel %vm4340_vm5, %v4350_v41, %v4352_v1  ;;  %v4357_v36 = vsel %vm4340_vm5, %v4354_v26, %v4356_v62  ;;  %v2729_v62 = vrot.slane %v2727_v57, 2 }
 0x117   : > { %6279 = vmatmul.mubr.bf16.gmra.mrb[28].mxu0 %v4021_v7  ;;  %6054 = vmatprep.mubr.bf16.mxu1 %v2274_v37  ;;  %v2290_v7 = vsel %vm1796_vm3, %v2287_v38, %v2289_v21  ;;  %v4355_v37 = vsel %vm4340_vm5, %v4352_v1, %v4354_v26  ;;  %v2717_v38 = vrot.slane %v2715_v24, 1  ;;  %v4368_v21 = vrot.slane %v7447_v29, 3 }
 0x118   : > { %6282 = vmatprep.mubr.bf16.mxu0 %v4030_v43  ;;  %6350 = vmatpush3.bf16.msra.mxu1 %v6886_v32  ;;  %v2293_v43 = vrot.slane %v7712_v35, 1  ;;  %v2682_v32 = vshll.u32 %v7647_v53, 16  ;;  %v2691_v53 = vshll.u32 %v7662_v60, 16 }
 0x119   : > { %6343 = vmatprep.subr.bf16.mxu1 %v6889_v49 }
 0x11a   : > { %v2294_v19 = vsel %vm1796_vm3, %v2291_v44, %v2293_v43  ;;  %v2693_v3 = vrot.slane %v2691_v53, 2 }
 0x11c   : > { %6351 = vmatpush3.bf16.msra.mxu1 %v6889_v49  ;;  %v2684_v49 = vrot.slane %v2682_v32, 2 }
 0x11d   : > { %6344 = vmatprep.subr.bf16.mxu1 %v6890_v14 }
 0x11e   : > { %6055 = vmatmul.mubr.bf16.gmra.mrb[12].mxu1 %v2276_v51  ;;  %v2295_v51 = vrot.slane %v6857_v46, 1 }
 0x11f   : > { %6283 = vmatmul.mubr.bf16.gmra.mrb[32].mxu0 %v4039_v52  ;;  %6058 = vmatprep.mubr.bf16.mxu1 %v2278_v56  ;;  %v2688_v52 = vshrl.u32 %v7662_v60, 16  ;;  %v2685_v56 = vor.u32 %v2684_v49, %v2681_v6 }
 0x120   : > { %6302 = vmatprep.mubr.bf16.mxu0 %v4343_v33  ;;  %6352 = vmatpush3.bf16.msra.mxu1 %v6890_v14  ;;  %v2697_v33 = vshrl.u32 %v7667_v23, 16  ;;  %v2700_v14 = vshll.u32 %v7667_v23, 16  ;;  %v2296_v61 = vsel %vm1796_vm3, %v2293_v43, %v2295_v51  ;;  %v2706_v23 = vshrl.u32 %v7679_v9, 16 }
 0x121   : > { %6345 = vmatprep.subr.bf16.mxu1 %v6893_v15  ;;  %v2690_v17 = vrot.slane %v2688_v52, 1  ;;  %v4369_v43 = vsel %vm4340_vm5, %v4366_v16, %v4368_v21 }
 0x122   : > { %v2699_v60 = vrot.slane %v2697_v33, 1 }
 0x124   : > { %6353 = vmatpush3.bf16.msra.mxu1 %v6893_v15  ;;  %v4361_v15 = vsel %vm4340_vm5, %v4358_v40, %v4360_v58 }
 0x126   : > { %6059 = vmatmul.mubr.bf16.gmra.mrb[16].mxu1 %v2280_v59  ;;  %v2686_v59 = vsel %vm2597_vm1, %v7139_v34, %v2685_v56  ;;  %v2718_v34 = vshll.u32 %v7684_v5, 16  ;;  %v2724_v5 = vshrl.u32 %v7693_v18, 16 }
 0x127   : > { %6303 = vmatmul.mubr.bf16.vlgmr.msra.gmra.mrb[0].mxu0 %v4345_v25  ;;  %6062 = vmatprep.mubr.bf16.mxu1 %v2282_v4  ;;  %v2702_v25 = vrot.slane %v2700_v14, 2  ;;  %v2694_v4 = vor.u32 %v2693_v3, %v2690_v17 }
 0x128   : > { %6306 = vmatprep.mubr.bf16.mxu0 %v4347_v27  ;;  %v4364_v27 = vrot.slane %v7432_v10, 3  ;;  %v2720_v9 = vrot.slane %v2718_v34, 2  ;;  %v2726_v44 = vrot.slane %v2724_v5, 1 }
 0x129   : > { %v2703_v31 = vor.u32 %v2702_v25, %v2699_v60  ;;  %v2695_v41 = vsel %vm2597_vm1, %v2685_v56, %v2694_v4  ;;  %v6900_v56 = vld [vmem:[%s6978_s14 + $0x98] ss:$0 sps:$4 sm:$0x33]   ;;  %s6643_s14 = smul.u32 144, %s9156_s16 }
 0x12a   : > { %v4367_v1 = vsel %vm4340_vm5, %v4364_v27, %v4366_v16  ;;  %v2721_v26 = vor.u32 %v2720_v9, %v2717_v38  ;;  %v2730_v29 = vor.u32 %v2729_v62, %v2726_v44  ;;  %v2763_v33 = vshll.u32 %v6900_v56, 16 }
 0x12b   : > { %s8378_s21 = scalar_lea.vmem %s9014_s2, %s6643_s14 }
 0x12c   : > { %v2731_v6 = vsel %vm2597_vm1, %v2721_v26, %v2730_v29  ;;  %v2765_v17 = vrot.slane %v2763_v33, 2 }
 0x12e   : > { %6063 = vmatmul.mubr.bf16.gmra.mrb[20].mxu1 %v2284_v55  ;;  %v2708_v55 = vrot.slane %v2706_v23, 1 }
 0x12f   : > { %6307 = vmatmul.mubr.bf16.gmra.mrb[4].mxu0 %v4349_v11  ;;  %6066 = vmatprep.mubr.bf16.mxu1 %v2286_v12  ;;  %v2711_v11 = vrot.slane %v2709_v2, 2  ;;  %v4365_v12 = vsel %vm4340_vm5, %v4362_v0, %v4364_v27 }
 0x130   : > { %6310 = vmatprep.mubr.bf16.mxu0 %v4351_v13  ;;  %v2704_v13 = vsel %vm2597_vm1, %v2694_v4, %v2703_v31 }
 0x131   : > { %v2712_v10 = vor.u32 %v2711_v11, %v2708_v55 }
 0x133   : > { %v2722_v42 = vsel %vm2597_vm1, %v2712_v10, %v2721_v26 }
 0x136   : > { %6067 = vmatmul.mubr.bf16.gmra.mrb[24].mxu1 %v2288_v22  ;;  %v2733_v22 = vshrl.u32 %v7698_v20, 16 }
 0x137   : > { %6311 = vmatmul.mubr.bf16.gmra.mrb[8].mxu0 %v4353_v30  ;;  %6070 = vmatprep.mubr.bf16.mxu1 %v2290_v7  ;;  %v2736_v30 = vshll.u32 %v7698_v20, 16  ;;  %v4370_v7 = vrot.slane %v7455_v54, 3  ;;  %v2742_v20 = vshrl.u32 %v7707_v39, 16  ;;  %v2745_v54 = vshll.u32 %v7707_v39, 16 }
 0x138   : > { %6314 = vmatprep.mubr.bf16.mxu0 %v4355_v37  ;;  %v2713_v37 = vsel %vm2597_vm1, %v2703_v31, %v2712_v10  ;;  %v2735_v32 = vrot.slane %v2733_v22, 1 }
 0x139   : > { %v2738_v18 = vrot.slane %v2736_v30, 2  ;;  %v4371_v40 = vsel %vm4340_vm5, %v4368_v21, %v4370_v7  ;;  %v2744_v49 = vrot.slane %v2742_v20, 1 }
 0x13b   : > { %v2739_v46 = vor.u32 %v2738_v18, %v2735_v32 }
 0x13d   : > { %v2740_v52 = vsel %vm2597_vm1, %v2730_v29, %v2739_v46 }
 0x13e   : > { %6071 = vmatmul.mubr.bf16.gmra.mrb[28].mxu1 %v2292_v45  ;;  %v4372_v45 = vrot.slane %v7469_v48, 3 }
 0x13f   : > { %6315 = vmatmul.mubr.bf16.gmra.mrb[12].mxu0 %v4357_v36  ;;  %6074 = vmatprep.mubr.bf16.mxu1 %v2294_v19  ;;  %v2751_v36 = vshrl.u32 %v7712_v35, 16  ;;  %v2754_v19 = vshll.u32 %v7712_v35, 16  ;;  %v2760_v35 = vshrl.u32 %v6900_v56, 16 }
 0x140   : > { %6318 = vmatprep.mubr.bf16.mxu0 %v4359_v50  ;;  %v2747_v50 = vrot.slane %v2745_v54, 2  ;;  %v4373_v51 = vsel %vm4340_vm5, %v4370_v7, %v4372_v45  ;;  %v4375_v48 = vsel %vm4340_vm5, %v4372_v45, %v4374_v28 }
 0x141   : > { %v2753_v53 = vrot.slane %v2751_v36, 1  ;;  %v2756_v58 = vrot.slane %v2754_v19, 2 }
 0x142   : > { %v2748_v39 = vor.u32 %v2747_v50, %v2744_v49 }
 0x143   : > { %v2757_v14 = vor.u32 %v2756_v58, %v2753_v53 }
 0x144   : > { %v2749_v0 = vsel %vm2597_vm1, %v2739_v46, %v2748_v39 }
 0x145   : > { %v2758_v3 = vsel %vm2597_vm1, %v2748_v39, %v2757_v14 }
 0x146   : > { %6075 = vmatmul.mubr.bf16.gmra.mrb[32].mxu1 %v2296_v61  ;;  %v2762_v61 = vrot.slane %v2760_v35, 1 }
 0x147   : > { %6319 = vmatmul.mubr.bf16.gmra.mrb[16].mxu0 %v4361_v15  ;;  %6110 = vmatprep.mubr.bf16.mxu1 %v2686_v59  ;;  %v220_v15 = vlaneseq }
 0x148   : > { %6322 = vmatprep.mubr.bf16.mxu0 %v4363_v8  ;;  %v2766_v47 = vor.u32 %v2765_v17, %v2762_v61 }
 0x149   : > { %v7770_v59 = vshrl.u32 %v220_v15, 7 }
 0x14a   : > { %v2767_v28 = vsel %vm2597_vm1, %v2757_v14, %v2766_v47 }
 0x14b   : > { %v223_v60 = vadd.s32 16, %v7770_v59  ;;  %v224_v8 = vadd.s32 24, %v7770_v59  ;;  %v257_v4 = vadd.s32 1, %v7770_v59  ;;  %v222_v23 = vadd.s32 8, %v7770_v59 }
 0x14c   : > { %v227_v2 = vadd.s32 48, %v7770_v59  ;;  %v226_v30 = vadd.s32 40, %v7770_v59  ;;  %v229_v20 = vadd.s32 64, %v7770_v59  ;;  %v232_v39 = vadd.s32 88, %v7770_v59 }
 0x14d   : > { %v259_v25 = vadd.s32 1, %v223_v60  ;;  %v260_v31 = vadd.s32 1, %v224_v8  ;;  %v7780_v24 = vmul.u32.u64.low 3817748708, %v257_v4  ;;  %v7781_v34 = vmul.u32.u64.high 3817748708, %v257_v4, %v7780_v24 }
 0x14e   : > { %6111 = vmatmul.mubr.bf16.vlgmr.msra.gmra.mrb[16].mxu1 %v2695_v41  ;;  %v258_v16 = vadd.s32 1, %v222_v23  ;;  %v225_v41 = vadd.s32 32, %v7770_v59  ;;  %v263_v55 = vadd.s32 1, %v227_v2  ;;  %v7805_v32 = vadd.s32 1, %v226_v30 }
 0x14f   : > { %6323 = vmatmul.mubr.bf16.gmra.mrb[20].mxu0 %v4365_v12  ;;  %6114 = vmatprep.mubr.bf16.mxu1 %v2704_v13  ;;  %v7784_v11 = vmul.u32.u64.low 3817748708, %v260_v31  ;;  %v7785_v12 = vmul.u32.u64.high 3817748708, %v260_v31, %v7784_v11  ;;  %v299_v21 = vshrl.u32 %v7781_v34, 4  ;;  %v7826_v53 = vadd.s32 1, %v229_v20 }
 0x150   : > { %6326 = vmatprep.mubr.bf16.mxu0 %v4367_v1  ;;  %v7787_v13 = vmul.u32.u64.low 3817748708, %v258_v16  ;;  %v7788_v38 = vmul.u32.u64.high 3817748708, %v258_v16, %v7787_v13  ;;  %v261_v9 = vadd.s32 1, %v225_v41  ;;  %v228_v1 = vadd.s32 56, %v7770_v59 }
 0x151   : > { %v7791_v10 = vmul.u32.u64.low 3817748708, %v263_v55  ;;  %v7792_v5 = vmul.u32.u64.high 3817748708, %v263_v55, %v7791_v10  ;;  %v332_v62 = vshrl.u32 %v7785_v12, 4  ;;  %v235_v47 = vadd.s32 112, %v7770_v59 }
 0x152   : > { %v7796_v26 = vmul.u32.u64.low 3817748708, %v261_v9  ;;  %v7797_v22 = vmul.u32.u64.high 3817748708, %v261_v9, %v7796_v26  ;;  %v7800_v7 = vadd.s32 1, %v228_v1  ;;  %v7839_v15 = vadd.s32 1, %v232_v39 }
 0x153   : > { %v365_v54 = vshrl.u32 %v7792_v5, 4  ;;  %v333_v46 = vmul.u32 18, %v332_v62  ;;  %v236_v10 = vadd.s32 120, %v7770_v59 }
 0x154   : > { %v343_v19 = vshrl.u32 %v7797_v22, 4 }
 0x155   : > { %v366_v58 = vmul.u32 18, %v365_v54 }
 0x156   : > { %6115 = vmatmul.mubr.bf16.gmra.mrb[20].mxu1 %v2713_v37  ;;  %v231_v37 = vadd.s32 80, %v7770_v59  ;;  %v344_v35 = vmul.u32 18, %v343_v19 }
 0x157   : > { %6327 = vmatmul.mubr.bf16.gmra.mrb[24].mxu0 %v4369_v43  ;;  %6118 = vmatprep.mubr.bf16.mxu1 %v2722_v42  ;;  %v300_v43 = vmul.u32 18, %v299_v21  ;;  %v310_v42 = vshrl.u32 %v7788_v38, 4  ;;  %v367_v17 = vsub.s32 %v263_v55, %v366_v58 }
 0x158   : > { %6330 = vmatprep.mubr.bf16.mxu0 %v4371_v40  ;;  %v7808_v18 = vmul.u32.u64.low 3817748708, %v7800_v7  ;;  %v7809_v40 = vmul.u32.u64.high 3817748708, %v7800_v7, %v7808_v18  ;;  %v7811_v29 = vadd.s32 1, %v231_v37 }
 0x159   : > { %v7815_v36 = vsub.s32 %v257_v4, %v300_v43  ;;  %v311_v50 = vmul.u32 18, %v310_v42  ;;  %v233_v4 = vadd.s32 96, %v7770_v59  ;;  %vm695_vm14 = vcmp.ne.s32.totalorder %v367_v17, 0 }
 0x15a   : > { %v376_v14 = vshrl.u32 %v7809_v40, 4  ;;  %vm731_vm0 = vcmp.lt.s32.totalorder %v367_v17, 0  ;;  %v803_v34 = vadd.s32 18, %v367_v17 }
 0x15b   : > { %vm689_vm8 = vcmp.ne.s32.totalorder %v7815_v36, 0  ;;  %v312_v33 = vsub.s32 %v258_v16, %v311_v50  ;;  %vm725_vm9 = vcmp.lt.s32.totalorder %v7815_v36, 0  ;;  %v7866_v12 = vadd.s32 1, %v233_v4 }
 0x15c   : > { %v377_v23 = vmul.u32 18, %v376_v14  ;;  %v7855_v16 = vmul.u32.u64.low 3817748708, %v7839_v15  ;;  %v7856_v41 = vmul.u32.u64.high 3817748708, %v7839_v15, %v7855_v16  ;;  %vm7862_vm1 = vmand %vm725_vm9, %vm689_vm8  ;;  %v237_v50 = vadd.s32 128, %v7770_v59 }
 0x15d   : > { %vm690_vm12 = vcmp.ne.s32.totalorder %v312_v33, 0  ;;  %vm726_vm13 = vcmp.lt.s32.totalorder %v312_v33, 0  ;;  %v7903_v62 = vmul.u32.u64.low 3817748708, %v7866_v12  ;;  %v7904_v43 = vmul.u32.u64.high 3817748708, %v7866_v12, %v7903_v62 }
 0x15e   : > { %6119 = vmatmul.mubr.bf16.gmra.mrb[24].mxu1 %v2731_v6  ;;  %v7819_v6 = vmul.u32.u64.low 3817748708, %v7805_v32  ;;  %v7820_v49 = vmul.u32.u64.high 3817748708, %v7805_v32, %v7819_v6  ;;  %v378_v38 = vsub.s32 %v7800_v7, %v377_v23  ;;  %vm762_vm5 = vmand %vm726_vm13, %vm690_vm12  ;;  %v234_v7 = vadd.s32 104, %v7770_v59 }
 0x15f   : > { %6331 = vmatmul.mubr.bf16.gmra.mrb[28].mxu0 %v4373_v51  ;;  %6122 = vmatprep.mubr.bf16.mxu1 %v2740_v52  ;;  %v7823_v51 = vmul.u32.u64.low 3817748708, %v7811_v29  ;;  %v7824_v52 = vmul.u32.u64.high 3817748708, %v7811_v29, %v7823_v51  ;;  %v431_v14 = vshrl.u32 %v7904_v43, 4  ;;  %v242_v62 = vadd.s32 168, %v7770_v59 }
 0x160   : > { %6334 = vmatprep.mubr.bf16.mxu0 %v4375_v48  ;;  %v334_v48 = vsub.s32 %v260_v31, %v333_v46  ;;  %v354_v8 = vshrl.u32 %v7820_v49, 4  ;;  %v7846_v31 = vadd.s32 1, %v235_v47  ;;  %vm696_vm8 = vcmp.ne.s32.totalorder %v378_v38, 0 }
 0x161   : > { %v409_v2 = vshrl.u32 %v7824_v52, 4  ;;  %vm732_vm9 = vcmp.lt.s32.totalorder %v378_v38, 0  ;;  %v804_v46 = vadd.s32 18, %v378_v38  ;;  %v7920_v19 = vadd.s32 1, %v234_v7 }
 0x162   : > { %vm692_vm10 = vcmp.ne.s32.totalorder %v334_v48, 0  ;;  %vm728_vm11 = vcmp.lt.s32.totalorder %v334_v48, 0  ;;  %v800_v60 = vadd.s32 18, %v334_v48  ;;  %v355_v11 = vmul.u32 18, %v354_v8  ;;  %vm768_vm12 = vmand %vm732_vm9, %vm696_vm8 }
 0x163   : > { %vm7870_vm4 = vmand %vm728_vm11, %vm692_vm10  ;;  %v7884_v21 = vmul.u32.u64.low 3817748708, %v7846_v31  ;;  %v7885_v26 = vmul.u32.u64.high 3817748708, %v7846_v31, %v7884_v21  ;;  %v239_v49 = vadd.s32 144, %v7770_v59  ;;  %v243_v47 = vadd.s32 176, %v7770_v59 }
 0x164   : > { %v7908_v42 = vsel %vm7870_vm4, %v800_v60, %v334_v48 }
 0x165   : > { %v453_v52 = vshrl.u32 %v7885_v26, 4  ;;  %v244_v26 = vadd.s32 184, %v7770_v59 }
 0x166   : > { %6123 = vmatmul.mubr.bf16.gmra.mrb[28].mxu1 %v2749_v0  ;;  %v7832_v0 = vmul.u32.u64.low 3817748708, %v7826_v53  ;;  %v7833_v61 = vmul.u32.u64.high 3817748708, %v7826_v53, %v7832_v0 }
 0x167   : > { %6335 = vmatmul.mubr.bf16.gmra.mrb[32].mxu0 %v7557_v63  ;;  %6126 = vmatprep.mubr.bf16.mxu1 %v2758_v3  ;;  %v7777_v63 = vmul.u32.u64.low 3817748708, %v259_v25  ;;  %v7778_v27 = vmul.u32.u64.high 3817748708, %v259_v25, %v7777_v63  ;;  %v230_v3 = vadd.s32 72, %v7770_v59  ;;  %v7941_v0 = vadd.s32 1, %v239_v49 }
 0x168   : > { %v798_v63 = vadd.s32 18, %v312_v33  ;;  %v387_v1 = vshrl.u32 %v7833_v61, 4  ;;  %v238_v61 = vadd.s32 136, %v7770_v59  ;;  %v454_v8 = vmul.u32 18, %v453_v52 }
 0x169   : > { %v321_v57 = vshrl.u32 %v7778_v27, 4  ;;  %v7844_v27 = vadd.s32 1, %v230_v3  ;;  %v7944_v3 = vadd.s32 1, %v237_v50 }
 0x16a   : > { %v7910_v18 = vsel %vm762_vm5, %v798_v63, %v312_v33  ;;  %v388_v20 = vmul.u32 18, %v387_v1  ;;  %v240_v33 = vadd.s32 152, %v7770_v59  ;;  %v7967_v55 = vadd.s32 1, %v238_v61 }
 0x16b   : > { %v322_v44 = vmul.u32 18, %v321_v57  ;;  %v7880_v5 = vmul.u32.u64.low 3817748708, %v7844_v27  ;;  %v7881_v57 = vmul.u32.u64.high 3817748708, %v7844_v27, %v7880_v5  ;;  %v7988_v21 = vsub.s32 %v7846_v31, %v454_v8 }
 0x16c   : > { %v7959_v63 = vadd.s32 1, %v240_v33 }
 0x16d   : > { %v323_v45 = vsub.s32 %v259_v25, %v322_v44  ;;  %v345_v25 = vsub.s32 %v261_v9, %v344_v35  ;;  %v410_v9 = vmul.u32 18, %v409_v2  ;;  %v356_v44 = vsub.s32 %v7805_v32, %v355_v11 }
 0x16e   : > { %6127 = vmatmul.mubr.bf16.gmra.mrb[32].mxu1 %v2767_v28  ;;  %v797_v28 = vadd.s32 18, %v7815_v36  ;;  %v398_v51 = vshrl.u32 %v7881_v57, 4  ;;  %vm739_vm9 = vcmp.lt.s32.totalorder %v7988_v21, 0 }
 0x16f   : > { %vm691_vm6 = vcmp.ne.s32.totalorder %v323_v45, 0  ;;  %vm727_vm7 = vcmp.lt.s32.totalorder %v323_v45, 0  ;;  %v799_v56 = vadd.s32 18, %v323_v45  ;;  %vm693_vm2 = vcmp.ne.s32.totalorder %v345_v25, 0 }
 0x170   : > { %vm7850_vm15 = vmand %vm727_vm7, %vm691_vm6  ;;  %vm729_vm3 = vcmp.lt.s32.totalorder %v345_v25, 0  ;;  %v801_v30 = vadd.s32 18, %v345_v25  ;;  %v7897_v37 = vsel %vm7862_vm1, %v797_v28, %v7815_v36  ;;  %v411_v40 = vsub.s32 %v7811_v29, %v410_v9 }
 0x171   : > { %v7889_v22 = vsel %vm7850_vm15, %v799_v56, %v323_v45  ;;  %vm767_vm6 = vmand %vm731_vm0, %vm695_vm14  ;;  %v7915_v45 = vadd.s32 1, %v236_v10  ;;  %v420_v36 = vshrl.u32 %v7856_v41, 4  ;;  %vm694_vm10 = vcmp.ne.s32.totalorder %v356_v44, 0 }
 0x172   : > { %vm765_vm7 = vmand %vm729_vm3, %vm693_vm2  ;;  %v7913_v54 = vsel %vm767_vm6, %v803_v34, %v367_v17  ;;  %vm730_vm11 = vcmp.lt.s32.totalorder %v356_v44, 0  ;;  %v802_v6 = vadd.s32 18, %v356_v44  ;;  %vm699_vm13 = vcmp.ne.s32.totalorder %v411_v40, 0 }
 0x173   : > { %v7917_v32 = vsel %vm765_vm7, %v801_v30, %v345_v25  ;;  %vm735_vm14 = vcmp.lt.s32.totalorder %v411_v40, 0  ;;  %v7924_v29 = vsub.s32 %v7826_v53, %v388_v20  ;;  %vm766_vm15 = vmand %vm730_vm11, %vm694_vm10  ;;  %v807_v39 = vadd.s32 18, %v411_v40 }
 0x174   : > { %v7930_v58 = vmul.u32.u64.low 3817748708, %v7915_v45  ;;  %v7931_v48 = vmul.u32.u64.high 3817748708, %v7915_v45, %v7930_v58  ;;  %v7934_v56 = vmul.u32.u64.low 3817748708, %v7920_v19  ;;  %v7935_v35 = vmul.u32.u64.high 3817748708, %v7920_v19, %v7934_v56  ;;  %vm771_vm0 = vmand %vm735_vm14, %vm699_vm13 }
 0x175   : > { %v7938_v53 = vsel %vm768_vm12, %v804_v46, %v378_v38  ;;  %v421_v17 = vmul.u32 18, %v420_v36  ;;  %v241_v28 = vadd.s32 160, %v7770_v59  ;;  %v7948_v60 = vsel %vm766_vm15, %v802_v6, %v356_v44 }
 0x176   : > { %vm697_vm1 = vcmp.ne.s32.totalorder %v7924_v29, 0  ;;  %v399_v25 = vmul.u32 18, %v398_v51  ;;  %v7953_v23 = vsel %vm771_vm0, %v807_v39, %v411_v40  ;;  %vm733_vm2 = vcmp.lt.s32.totalorder %v7924_v29, 0 }
 0x177   : > { %v7957_v2 = vadd.s32 18, %v7924_v29  ;;  %v432_v34 = vmul.u32 18, %v431_v14  ;;  %v7964_v16 = vmul.u32.u64.low 3817748708, %v7941_v0  ;;  %v7965_v41 = vmul.u32.u64.high 3817748708, %v7941_v0, %v7964_v16  ;;  %vm8034_vm8 = vmand %vm733_vm2, %vm697_vm1 }
 0x178   : > { %v7972_v13 = vmul.u32.u64.low 3817748708, %v7944_v3  ;;  %v7973_v38 = vmul.u32.u64.high 3817748708, %v7944_v3, %v7972_v13  ;;  %v7975_v9 = vadd.s32 1, %v243_v47  ;;  %v7977_v1 = vadd.s32 1, %v241_v28 }
 0x179   : > { %v7982_v5 = vsub.s32 %v7839_v15, %v421_v17  ;;  %v7985_v57 = vsub.s32 %v7844_v27, %v399_v25  ;;  %v464_v30 = vshrl.u32 %v7931_v48, 4  ;;  %v433_v43 = vsub.s32 %v7866_v12, %v432_v34 }
 0x17a   : > { %v7993_v7 = vmul.u32.u64.low 3817748708, %v7959_v63  ;;  %v7994_v44 = vmul.u32.u64.high 3817748708, %v7959_v63, %v7993_v7  ;;  %v442_v15 = vshrl.u32 %v7935_v35, 4  ;;  %v8013_v6 = vadd.s32 1, %v244_v26 }
 0x17b   : > { %v8000_v27 = vmul.u32.u64.low 3817748708, %v7967_v55  ;;  %v8001_v40 = vmul.u32.u64.high 3817748708, %v7967_v55, %v8000_v27  ;;  %v8004_v31 = vmul.u32.u64.low 3817748708, %v7975_v9  ;;  %v8005_v20 = vmul.u32.u64.high 3817748708, %v7975_v9, %v8004_v31 }
 0x17c   : > { %v8008_v46 = vmul.u32.u64.low 3817748708, %v7977_v1  ;;  %v8009_v36 = vmul.u32.u64.high 3817748708, %v7977_v1, %v8008_v46  ;;  %vm700_vm3 = vcmp.ne.s32.totalorder %v7982_v5, 0  ;;  %vm736_vm4 = vcmp.lt.s32.totalorder %v7982_v5, 0 }
 0x17d   : > { %v247_v12 = vadd.s32 208, %v7770_v59  ;;  %v808_v50 = vadd.s32 18, %v7982_v5  ;;  %vm698_vm5 = vcmp.ne.s32.totalorder %v7985_v57, 0  ;;  %vm734_vm6 = vcmp.lt.s32.totalorder %v7985_v57, 0  ;;  %vm8046_vm11 = vmand %vm736_vm4, %vm700_vm3 }
 0x17e   : > { %v8021_v51 = vadd.s32 1, %v242_v62  ;;  %v806_v58 = vadd.s32 18, %v7985_v57  ;;  %vm703_vm7 = vcmp.ne.s32.totalorder %v7988_v21, 0  ;;  %v465_v48 = vmul.u32 18, %v464_v30  ;;  %vm8060_vm13 = vmand %vm734_vm6, %vm698_vm5 }
 0x17f   : > { %v497_v39 = vshrl.u32 %v7965_v41, 4  ;;  %vm701_vm10 = vcmp.ne.s32.totalorder %v433_v43, 0  ;;  %v443_v33 = vmul.u32 18, %v442_v15  ;;  %v475_v14 = vshrl.u32 %v7973_v38, 4  ;;  %vm8074_vm14 = vmand %vm739_vm9, %vm703_vm7 }
 0x180   : > { %vm737_vm12 = vcmp.lt.s32.totalorder %v433_v43, 0  ;;  %v8051_v47 = vmul.u32.u64.low 3817748708, %v8013_v6  ;;  %v8052_v28 = vmul.u32.u64.high 3817748708, %v8013_v6, %v8051_v47  ;;  %v8054_v25 = vadd.s32 1, %v247_v12 }
 0x181   : > { %v811_v34 = vadd.s32 18, %v7988_v21  ;;  %v508_v16 = vshrl.u32 %v7994_v44, 4  ;;  %v8067_v41 = vmul.u32.u64.low 3817748708, %v8021_v51  ;;  %v8068_v13 = vmul.u32.u64.high 3817748708, %v8021_v51, %v8067_v41  ;;  %vm773_vm15 = vmand %vm737_vm12, %vm701_vm10 }
 0x182   : > { %v809_v26 = vadd.s32 18, %v433_v43  ;;  %v8079_v30 = vsub.s32 %v7915_v45, %v465_v48  ;;  %v498_v7 = vmul.u32 18, %v497_v39  ;;  %v486_v62 = vshrl.u32 %v8001_v40, 4 }
 0x183   : > { %v8086_v44 = vsel %vm8034_vm8, %v7957_v2, %v7924_v29  ;;  %v476_v15 = vmul.u32 18, %v475_v14  ;;  %v541_v27 = vshrl.u32 %v8005_v20, 4  ;;  %v519_v31 = vshrl.u32 %v8009_v36, 4 }
 0x184   : > { %v8092_v46 = vsub.s32 %v7920_v19, %v443_v33  ;;  %v8095_v45 = vmul.u32.u64.low 3817748708, %v8054_v25  ;;  %v8096_v12 = vmul.u32.u64.high 3817748708, %v8054_v25, %v8095_v45  ;;  %v245_v40 = vadd.s32 192, %v7770_v59 }
 0x185   : > { %v8104_v29 = vsel %vm8046_vm11, %v808_v50, %v7982_v5  ;;  %v8109_v2 = vsel %vm8060_vm13, %v806_v58, %v7985_v57  ;;  %v8114_v19 = vsel %vm8074_vm14, %v811_v34, %v7988_v21  ;;  %v509_v20 = vmul.u32 18, %v508_v16 }
 0x186   : > { %v8118_v39 = vsel %vm773_vm15, %v809_v26, %v433_v43  ;;  %vm704_vm0 = vcmp.ne.s32.totalorder %v8079_v30, 0  ;;  %v8122_v5 = vsub.s32 %v7941_v0, %v498_v7  ;;  %v487_v50 = vmul.u32 18, %v486_v62 }
 0x187   : > { %vm740_vm1 = vcmp.lt.s32.totalorder %v8079_v30, 0  ;;  %v8128_v57 = vsub.s32 %v7944_v3, %v476_v15  ;;  %v542_v21 = vmul.u32 18, %v541_v27  ;;  %v520_v58 = vmul.u32 18, %v519_v31 }
 0x188   : > { %v812_v43 = vadd.s32 18, %v8079_v30  ;;  %vm702_vm2 = vcmp.ne.s32.totalorder %v8092_v46, 0  ;;  %v552_v14 = vshrl.u32 %v8052_v28, 4  ;;  %v8135_v0 = vadd.s32 1, %v245_v40  ;;  %vm8163_vm12 = vmand %vm740_vm1, %vm704_vm0 }
 0x189   : > { %vm738_vm3 = vcmp.lt.s32.totalorder %v8092_v46, 0  ;;  %v510_v17 = vsub.s32 %v7959_v63, %v509_v20  ;;  %v530_v47 = vshrl.u32 %v8068_v13, 4  ;;  %v248_v3 = vadd.s32 216, %v7770_v59 }
 0x18a   : > { %vm871_vm4 = vcmp.ge.s32.totalorder %v7889_v22, 1  ;;  %vm907_vm5 = vcmp.le.s32.totalorder %v7889_v22, 16  ;;  %v810_v8 = vadd.s32 18, %v8092_v46  ;;  %vm707_vm6 = vcmp.ne.s32.totalorder %v8122_v5, 0  ;;  %vm8178_vm13 = vmand %vm738_vm3, %vm702_vm2 }
 0x18b   : > { %vm743_vm7 = vcmp.lt.s32.totalorder %v8122_v5, 0  ;;  %v8147_v28 = vsub.s32 %v7967_v55, %v487_v50  ;;  %vm705_vm10 = vcmp.ne.s32.totalorder %v8128_v57, 0  ;;  %vm741_vm11 = vcmp.lt.s32.totalorder %v8128_v57, 0 }
 0x18c   : > { %v8154_v63 = vsub.s32 %v7975_v9, %v542_v21  ;;  %v8157_v34 = vsub.s32 %v7977_v1, %v520_v58  ;;  %v553_v16 = vmul.u32 18, %v552_v14  ;;  %v585_v41 = vshrl.u32 %v8096_v12, 4  ;;  %vm8192_vm8 = vmand %vm743_vm7, %vm707_vm6 }
 0x18d   : > { %v8169_v13 = vmul.u32.u64.low 3817748708, %v8135_v0  ;;  %v8170_v38 = vmul.u32.u64.high 3817748708, %v8135_v0, %v8169_v13  ;;  %vm708_vm14 = vcmp.ne.s32.totalorder %v510_v17, 0  ;;  %vm744_vm15 = vcmp.lt.s32.totalorder %v510_v17, 0  ;;  %vm8208_vm6 = vmand %vm741_vm11, %vm705_vm10 }
 0x18e   : > { %v531_v26 = vmul.u32 18, %v530_v47  ;;  %v8182_v7 = vadd.s32 1, %v248_v3  ;;  %v815_v27 = vadd.s32 18, %v8122_v5  ;;  %vm706_vm2 = vcmp.ne.s32.totalorder %v8147_v28, 0  ;;  %vm8219_vm0 = vmand %vm744_vm15, %vm708_vm14 }
 0x18f   : > { %vm742_vm3 = vcmp.lt.s32.totalorder %v8147_v28, 0  ;;  %v246_v31 = vadd.s32 200, %v7770_v59  ;;  %v813_v40 = vadd.s32 18, %v8128_v57  ;;  %v816_v20 = vadd.s32 18, %v510_v17 }
 0x190   : > { %vm711_vm7 = vcmp.ne.s32.totalorder %v8154_v63, 0  ;;  %vm747_vm9 = vcmp.lt.s32.totalorder %v8154_v63, 0  ;;  %vm709_vm10 = vcmp.ne.s32.totalorder %v8157_v34, 0  ;;  %vm745_vm11 = vcmp.lt.s32.totalorder %v8157_v34, 0  ;;  %vm8232_vm1 = vmand %vm742_vm3, %vm706_vm2 }
 0x191   : > { %v8226_v58 = vsub.s32 %v8013_v6, %v553_v16  ;;  %v586_v14 = vmul.u32 18, %v585_v41  ;;  %v814_v3 = vadd.s32 18, %v8147_v28  ;;  %v8238_v13 = vsub.s32 %v8021_v51, %v531_v26  ;;  %vm8249_vm14 = vmand %vm747_vm9, %vm711_vm7 }
 0x192   : > { %v8247_v6 = vsel %vm8163_vm12, %v812_v43, %v8079_v30  ;;  %v819_v41 = vadd.s32 18, %v8154_v63  ;;  %v8260_v51 = vsel %vm8178_vm13, %v810_v8, %v8092_v46  ;;  %v8265_v30 = vsel %vm8192_vm8, %v815_v27, %v8122_v5  ;;  %vm8280_vm9 = vmand %vm745_vm11, %vm709_vm10 }
 0x193   : > { %v8270_v43 = vsel %vm8208_vm6, %v813_v40, %v8128_v57  ;;  %v8274_v55 = vsel %vm8219_vm0, %v816_v20, %v510_v17  ;;  %vm873_vm8 = vcmp.ge.s32.totalorder %v7917_v32, 1  ;;  %vm909_vm12 = vcmp.le.s32.totalorder %v7917_v32, 16  ;;  %vm8296_vm0 = vmand %vm871_vm4, %vm907_vm5 }
 0x194   : > { %vm712_vm13 = vcmp.ne.s32.totalorder %v8226_v58, 0  ;;  %vm748_vm15 = vcmp.lt.s32.totalorder %v8226_v58, 0  ;;  %v8289_v5 = vsub.s32 %v8054_v25, %v586_v14  ;;  %v563_v57 = vshrl.u32 %v8170_v38, 4 }
 0x195   : > { %vm875_vm2 = vcmp.ge.s32.totalorder %v7913_v54, 1  ;;  %vm911_vm3 = vcmp.le.s32.totalorder %v7913_v54, 16  ;;  %v8305_v8 = vsel %vm8232_vm1, %v814_v3, %v8147_v28  ;;  %vm710_vm6 = vcmp.ne.s32.totalorder %v8238_v13, 0 }
 0x196   : > { %vm746_vm7 = vcmp.lt.s32.totalorder %v8238_v13, 0  ;;  %v251_v25 = vadd.s32 240, %v7770_v59  ;;  %vm9053_vm4 = vcmp.le.s32.totalorder %v7897_v37, 16  ;;  %vm9054_vm5 = vcmp.ge.s32.totalorder %v7897_v37, 1 }
 0x197   : > { %vm8314_vm10 = vmand %vm9054_vm5, %vm9053_vm4  ;;  %vm910_vm1 = vcmp.le.s32.totalorder %v7948_v60, 16  ;;  %v8324_v28 = vsel %vm8249_vm14, %v819_v41, %v8154_v63  ;;  %v820_v63 = vadd.s32 18, %v8226_v58  ;;  %vm751_vm5 = vcmp.lt.s32.totalorder %v8289_v5, 0 }
 0x198   : > { %vm8340_vm4 = vmand %vm748_vm15, %vm712_vm13  ;;  %vm715_vm15 = vcmp.ne.s32.totalorder %v8289_v5, 0  ;;  %v564_v20 = vmul.u32 18, %v563_v57  ;;  %vm9061_vm11 = vcmp.le.s32.totalorder %v7910_v18, 16  ;;  %vm9062_vm14 = vcmp.ge.s32.totalorder %v7910_v18, 1 }
 0x199   : > { %vm8354_vm13 = vmand %vm746_vm7, %vm710_vm6  ;;  %v8370_v47 = vadd.s32 1, %v251_v25  ;;  %v252_v3 = vadd.s32 248, %v7770_v59  ;;  %vm9065_vm6 = vcmp.le.s32.totalorder %v7908_v42, 16  ;;  %vm9066_vm7 = vcmp.ge.s32.totalorder %v7908_v42, 1 }
 0x19a   : > { %v250_v41 = vadd.s32 232, %v7770_v59  ;;  %v8394_v57 = vsel %vm8340_vm4, %v820_v63, %v8226_v58  ;;  %vm877_vm4 = vcmp.ge.s32.totalorder %v8086_v44, 1 }
 0x1d9   : > { %v7951_v4 = vpop.f32.mrb[0].mxu1 }
 0x1da   : > { %v7961_v24 = vpop.f32.mrb[1].mxu1 }
 0x1db   : > { %v7969_v11 = vpop.f32.mrb[2].mxu1 }
 0x1dc   : > { %v7979_v10 = vpop.f32.mrb[3].mxu1 }
 0x1e1   : > { %v8016_v49 = vpop.f32.mrb[4].mxu1 }
 0x1e2   : > { %v8023_v52 = vpop.f32.mrb[5].mxu1 }
 0x1e3   : > { %v8028_v56 = vpop.f32.mrb[6].mxu1 }
 0x1e4   : > { %v8040_v61 = vpop.f32.mrb[7].mxu1 }
 0x1e9   : > { %v8099_v48 = vpop.f32.mrb[8].mxu1 }
 0x1ea   : > { %v8116_v36 = vpop.f32.mrb[9].mxu1 }
 0x1eb   : > { %v8124_v35 = vpop.f32.mrb[10].mxu1 }
 0x1ec   : > { %v8130_v33 = vpop.f32.mrb[11].mxu1 }
 0x1f1   : > { %v8172_v9 = vpop.f32.mrb[12].mxu1 }
 0x1f2   : > { %9033 = vst [vmem:[#allocation2_spill] sm:$0xff] %v8172_v9  ;;  %v8184_v62 = vpop.f32.mrb[13].mxu1  ;;  %v8255_v9 = vadd.s32 1, %v246_v31 }
 0x1f3   : > { %9036 = vst [vmem:[#allocation3_spill] sm:$0xff] %v8184_v62  ;;  %v8200_v45 = vpop.f32.mrb[14].mxu1  ;;  %v817_v62 = vadd.s32 18, %v8157_v34 }
 0x1f4   : > { %9039 = vst [vmem:[#allocation4_spill] sm:$0xff] %v8200_v45  ;;  %v8215_v50 = vpop.f32.mrb[15].mxu1  ;;  %v8332_v37 = vmul.u32.u64.low 3817748708, %v8255_v9  ;;  %v8333_v26 = vmul.u32.u64.high 3817748708, %v8255_v9, %v8332_v37 }
 0x1f5   : > { %9042 = vst [vmem:[#allocation5_spill] sm:$0xff] %v8215_v50  ;;  %v8241_v50 = vmul.u32.u64.low 3817748708, %v8182_v7  ;;  %v8242_v45 = vmul.u32.u64.high 3817748708, %v8182_v7, %v8241_v50  ;;  %v8329_v1 = vsel %vm8280_vm9, %v817_v62, %v8157_v34  ;;  %v818_v34 = vadd.s32 18, %v8238_v13  ;;  %vm8365_vm9 = vmand %vm9062_vm14, %vm9061_vm11 }
 0x1f6   : > { %v249_v62 = vadd.s32 224, %v7770_v59  ;;  %vm8384_vm11 = vmand %vm9066_vm7, %vm9065_vm6  ;;  %vm913_vm14 = vcmp.le.s32.totalorder %v8086_v44, 16  ;;  %vm880_vm7 = vcmp.ge.s32.totalorder %v8104_v29, 1 }
 0x1f7   : > { %v596_v14 = vshrl.u32 %v8242_v45, 4  ;;  %v823_v45 = vadd.s32 18, %v8289_v5  ;;  %v8399_v42 = vsel %vm8354_vm13, %v818_v34, %v8238_v13  ;;  %v8418_v13 = vsub.s32 %v8135_v0, %v564_v20  ;;  %vm8445_vm6 = vmand %vm875_vm2, %vm911_vm3 }
 0x1f8   : > { %v8409_v25 = vadd.s32 1, %v249_v62  ;;  %vm879_vm13 = vcmp.ge.s32.totalorder %v7953_v23, 1  ;;  %v574_v34 = vshrl.u32 %v8333_v26, 4  ;;  %v8434_v62 = vadd.s32 1, %v252_v3 }
 0x1f9   : > { %v597_v17 = vmul.u32 18, %v596_v14  ;;  %vm9074_vm2 = vcmp.le.s32.totalorder %v7938_v53, 16  ;;  %vm9075_vm3 = vcmp.ge.s32.totalorder %v7938_v53, 1 }
 0x1fa   : > { %v6304_v22 = vpop.f32.mrb[0].mxu0 }
 0x1fb   : > { %v6354_v15 = vadd.f32 %v6304_v22, %v7951_v4  ;;  %v4478_v27 = vpop.f32.mrb[1].mxu0  ;;  %v8483_v53 = vsub.s32 %v8182_v7, %v597_v17  ;;  %v9085_v7 = vld [vmem:[#allocation3_spill] sm:$0xff] }
 0x1fc   : > { %v6355_v12 = vadd.f32 %v4478_v27, %v7961_v24  ;;  %v6305_v40 = vpop.f32.mrb[2].mxu0 }
 0x1fd   : > { %v6356_v24 = vadd.f32 %v6305_v40, %v7969_v11  ;;  %v4481_v21 = vpop.f32.mrb[3].mxu0  ;;  %v4911_v58 = vsel %vm8296_vm0, %v6354_v15, 0.0  ;;  %vm878_vm0 = vcmp.ge.s32.totalorder %v8109_v2, 1 }
 0x1fe   : > { %v4909_v16 = vsel %vm8314_vm10, %v6355_v12, 0.0  ;;  %v6357_v11 = vadd.f32 %v4481_v21, %v7979_v10  ;;  %vm8405_vm10 = vmand %vm751_vm5, %vm715_vm15  ;;  %vm915_vm15 = vcmp.le.s32.totalorder %v7953_v23, 16 }
 0x1ff   : > { %v5537_v46 = vpack.c.bf16 %v6356_v24, %v6354_v15  ;;  %v4987_v37 = vmul.f32 %v4909_v16, %v4909_v16  ;;  %v4912_v15 = vsel %vm8384_vm11, %v6356_v24, 0.0  ;;  %v8431_v0 = vsel %vm8405_vm10, %v823_v45, %v8289_v5  ;;  %vm945_vm5 = vmand %vm873_vm8, %vm909_vm12 }
 0x200   : > { %v5532_v22 = vpack.c.bf16 %v6357_v11, %v6355_v12  ;;  %v4910_v38 = vsel %vm8365_vm9, %v6357_v11, 0.0  ;;  %vm914_vm9 = vcmp.le.s32.totalorder %v8109_v2, 16  ;;  %v4989_v12 = vmul.f32 %v4911_v58, %v4911_v58  ;;  %vm948_vm10 = vmand %vm9075_vm3, %vm9074_vm2 }
 0x201   : > { %5619 = vst [vmem:[%s8378_s21 + $0x8] sm:$0xff] %v5537_v46   ;;  %v4945_v27 = vadd.f32 %v4910_v38, %v4909_v16  ;;  %v4988_v31 = vmul.f32 %v4910_v38, %v4910_v38  ;;  %vm916_vm11 = vcmp.le.s32.totalorder %v8104_v29, 16  ;;  %v4990_v14 = vmul.f32 %v4912_v15, %v4912_v15  ;;  %vm8497_vm3 = vmand %vm877_vm4, %vm913_vm14 }
 0x202   : > { %5533 = vst [vmem:[%s8378_s21] sm:$0xff] %v5532_v22   ;;  %v6308_v63 = vpop.f32.mrb[4].mxu0  ;;  %v8456_v32 = vmul.u32.u64.low 3817748708, %v8370_v47  ;;  %v8457_v21 = vmul.u32.u64.high 3817748708, %v8370_v47, %v8456_v32  ;;  %vm9073_vm8 = vcmp.ge.s32.totalorder %v7948_v60, 1  ;;  %vm919_vm2 = vcmp.le.s32.totalorder %v8114_v19, 16  ;;  %vm950_vm4 = vmand %vm878_vm0, %vm914_vm9 }
 0x203   : > { %v4946_v40 = vadd.f32 %v4945_v27, %v4911_v58  ;;  %v5023_v4 = vadd.f32 %v4988_v31, %v4987_v37  ;;  %v6358_v20 = vadd.f32 %v6308_v63, %v8016_v49  ;;  %v4494_v24 = vpop.f32.mrb[5].mxu0  ;;  %v8453_v49 = vadd.s32 18, %v8418_v13  ;;  %vm946_vm12 = vmand %vm9073_vm8, %vm910_vm1 }
 0x204   : > { %v6359_v26 = vadd.f32 %v4494_v24, %v8023_v52  ;;  %v6309_v50 = vpop.f32.mrb[6].mxu0  ;;  %v8466_v45 = vmul.u32.u64.low 3817748708, %v8409_v25  ;;  %v8467_v46 = vmul.u32.u64.high 3817748708, %v8409_v25, %v8466_v45  ;;  %vm881_vm1 = vcmp.ge.s32.totalorder %v8118_v39, 1  ;;  %vm952_vm14 = vmand %vm880_vm7, %vm916_vm11 }
 0x205   : > { %v5024_v54 = vadd.f32 %v5023_v4, %v4989_v12  ;;  %v4947_v3 = vadd.f32 %v4946_v40, %v4912_v15  ;;  %v6360_v16 = vadd.f32 %v6309_v50, %v8028_v56  ;;  %v4497_v52 = vpop.f32.mrb[7].mxu0  ;;  %v4915_v56 = vsel %vm8445_vm6, %v6358_v20, 0.0 }
 0x206   : > { %v4913_v18 = vsel %vm945_vm5, %v6359_v26, 0.0  ;;  %v6361_v11 = vadd.f32 %v4497_v52, %v8040_v61  ;;  %vm917_vm5 = vcmp.le.s32.totalorder %v8118_v39, 16  ;;  %v8477_v61 = vadd.s32 1, %v250_v41 }
 0x207   : > { %v4948_v10 = vadd.f32 %v4947_v3, %v4913_v18  ;;  %v4991_v58 = vmul.f32 %v4913_v18, %v4913_v18  ;;  %v5025_v22 = vadd.f32 %v5024_v54, %v4990_v14  ;;  %v5547_v60 = vpack.c.bf16 %v6360_v16, %v6358_v20  ;;  %vm8549_vm0 = vmand %vm881_vm1, %vm917_vm5 }
 0x208   : > { %v5542_v38 = vpack.c.bf16 %v6361_v11, %v6359_v26  ;;  %v4914_v37 = vsel %vm946_vm12, %v6361_v11, 0.0  ;;  %vm883_vm8 = vcmp.ge.s32.totalorder %v8114_v19, 1  ;;  %v4916_v63 = vsel %vm948_vm10, %v6360_v16, 0.0  ;;  %vm8505_vm10 = vmand %vm879_vm13, %vm915_vm15 }
 0x209   : > { %v5026_v27 = vadd.f32 %v5025_v22, %v4991_v58  ;;  %5621 = vst [vmem:[%s8378_s21 + $0x18] sm:$0xff] %v5547_v60   ;;  %v4949_v31 = vadd.f32 %v4948_v10, %v4914_v37  ;;  %v4992_v15 = vmul.f32 %v4914_v37, %v4914_v37  ;;  %v575_v41 = vmul.u32 18, %v574_v34  ;;  %vm8559_vm11 = vmand %vm883_vm8, %vm919_vm2 }
 0x20a   : > { %5620 = vst [vmem:[%s8378_s21 + $0x10] sm:$0xff] %v5542_v38   ;;  %v6312_v12 = vpop.f32.mrb[8].mxu0  ;;  %v8489_v40 = vmul.u32.u64.low 3817748708, %v8434_v62  ;;  %v8490_v4 = vmul.u32.u64.high 3817748708, %v8434_v62, %v8489_v40  ;;  %v4993_v20 = vmul.f32 %v4915_v56, %v4915_v56  ;;  %vm884_vm6 = vcmp.ge.s32.totalorder %v8247_v6, 1 }
 0x20b   : > { %v4950_v24 = vadd.f32 %v4949_v31, %v4915_v56  ;;  %v5027_v5 = vadd.f32 %v5026_v27, %v4992_v15  ;;  %v6362_v26 = vadd.f32 %v6312_v12, %v8099_v48  ;;  %v4510_v17 = vpop.f32.mrb[9].mxu0  ;;  %vm920_vm12 = vcmp.le.s32.totalorder %v8247_v6, 16 }
 0x20c   : > { %v6363_v50 = vadd.f32 %v4510_v17, %v8116_v36  ;;  %v6313_v48 = vpop.f32.mrb[10].mxu0  ;;  %v8513_v44 = vmul.u32.u64.low 3817748708, %v8477_v61  ;;  %v8514_v32 = vmul.u32.u64.high 3817748708, %v8477_v61, %v8513_v44  ;;  %v255_v14 = vadd.s32 272, %v7770_v59 }
 0x20d   : > { %v4994_v54 = vmul.f32 %v4916_v63, %v4916_v63  ;;  %v5028_v3 = vadd.f32 %v5027_v5, %v4993_v20  ;;  %v4951_v23 = vadd.f32 %v4950_v24, %v4916_v63  ;;  %v6364_v16 = vadd.f32 %v6313_v48, %v8124_v35  ;;  %v4513_v36 = vpop.f32.mrb[11].mxu0  ;;  %v9080_v20 = vld [vmem:[#allocation2_spill] sm:$0xff] }
 0x20e   : > { %v4917_v52 = vsel %vm8497_vm3, %v6363_v50, 0.0  ;;  %v6365_v18 = vadd.f32 %v4513_v36, %v8130_v33  ;;  %v8526_v11 = vsub.s32 %v8255_v9, %v575_v41  ;;  %v629_v45 = vshrl.u32 %v8457_v21, 4  ;;  %v9091_v36 = vld [vmem:[#allocation5_spill] sm:$0xff] }
 0x20f   : > { %v4952_v10 = vadd.f32 %v4951_v23, %v4917_v52  ;;  %v4995_v35 = vmul.f32 %v4917_v52, %v4917_v52  ;;  %v5029_v58 = vadd.f32 %v5028_v3, %v4994_v54  ;;  %v5557_v2 = vpack.c.bf16 %v6364_v16, %v6362_v26  ;;  %v9086_v54 = vld [vmem:[#allocation4_spill] sm:$0xff] }
 0x210   : > { %v4919_v22 = vsel %vm8505_vm10, %v6362_v26, 0.0  ;;  %v5552_v60 = vpack.c.bf16 %v6365_v18, %v6363_v50  ;;  %v4918_v33 = vsel %vm950_vm4, %v6365_v18, 0.0  ;;  %v8535_v56 = vadd.s32 1, %v255_v14 }
 0x211   : > { %v5030_v9 = vadd.f32 %v5029_v58, %v4995_v35  ;;  %5623 = vst [vmem:[%s8378_s21 + $0x28] sm:$0xff] %v5557_v2   ;;  %v4953_v21 = vadd.f32 %v4952_v10, %v4918_v33  ;;  %v4996_v38 = vmul.f32 %v4918_v33, %v4918_v33  ;;  %v607_v37 = vshrl.u32 %v8467_v46, 4 }
 0x212   : > { %v4920_v27 = vsel %vm952_vm14, %v6364_v16, 0.0  ;;  %5622 = vst [vmem:[%s8378_s21 + $0x20] sm:$0xff] %v5552_v60   ;;  %v6316_v31 = vpop.f32.mrb[12].mxu0  ;;  %vm713_vm13 = vcmp.ne.s32.totalorder %v8418_v13, 0  ;;  %vm749_vm15 = vcmp.lt.s32.totalorder %v8418_v13, 0  ;;  %v630_v29 = vmul.u32 18, %v629_v45  ;;  %vm8590_vm14 = vmand %vm884_vm6, %vm920_vm12 }
 0x213   : > { %v253_v15 = vadd.s32 256, %v7770_v59  ;;  %v256_v63 = vadd.s32 280, %v7770_v59  ;;  %v4997_v12 = vmul.f32 %v4919_v22, %v4919_v22  ;;  %v4954_v41 = vadd.f32 %v4953_v21, %v4919_v22  ;;  %v4526_v5 = vpop.f32.mrb[13].mxu0 }
 0x214   : > { %v5031_v40 = vadd.f32 %v5030_v9, %v4996_v38  ;;  %v6366_v24 = vadd.f32 %v6316_v31, %v9080_v20  ;;  %vm716_vm9 = vcmp.ne.s32.totalorder %v8483_v53, 0  ;;  %vm752_vm7 = vcmp.lt.s32.totalorder %v8483_v53, 0  ;;  %v6317_v39 = vpop.f32.mrb[14].mxu0 }
 0x215   : > { %v6367_v17 = vadd.f32 %v4526_v5, %v9085_v7  ;;  %vm714_vm1 = vcmp.ne.s32.totalorder %v8526_v11, 0  ;;  %vm750_vm5 = vcmp.lt.s32.totalorder %v8526_v11, 0  ;;  %v640_v34 = vshrl.u32 %v8490_v4, 4  ;;  %v4529_v16 = vpop.f32.mrb[15].mxu0  ;;  %vm8638_vm12 = vmand %vm752_vm7, %vm716_vm9 }
 0x216   : > { %v8568_v50 = vmul.u32.u64.low 3817748708, %v8535_v56  ;;  %v8569_v48 = vmul.u32.u64.high 3817748708, %v8535_v56, %v8568_v50  ;;  %v4998_v44 = vmul.f32 %v4920_v27, %v4920_v27  ;;  %v5032_v14 = vadd.f32 %v5031_v40, %v4997_v12  ;;  %vm8654_vm9 = vmand %vm750_vm5, %vm714_vm1 }
 0x217   : > { %v4955_v19 = vadd.f32 %v4954_v41, %v4920_v27  ;;  %v6368_v3 = vadd.f32 %v6317_v39, %v9086_v54  ;;  %vm9087_vm8 = vcmp.le.s32.totalorder %v8260_v51, 16  ;;  %vm9088_vm2 = vcmp.ge.s32.totalorder %v8260_v51, 1 }
 0x218   : > { %vm8576_vm3 = vmand %vm9088_vm2, %vm9087_vm8  ;;  %v4921_v4 = vsel %vm8549_vm0, %v6367_v17, 0.0  ;;  %v6369_v52 = vadd.f32 %v4529_v16, %v9091_v36  ;;  %vm887_vm10 = vcmp.ge.s32.totalorder %v8265_v30, 1  ;;  %vm923_vm4 = vcmp.le.s32.totalorder %v8265_v30, 16 }
 0x219   : > { %v608_v18 = vmul.u32 18, %v607_v37  ;;  %v618_v45 = vshrl.u32 %v8514_v32, 4  ;;  %v4956_v10 = vadd.f32 %v4955_v19, %v4921_v4  ;;  %v4999_v51 = vmul.f32 %v4921_v4, %v4921_v4  ;;  %vm8685_vm7 = vmand %vm887_vm10, %vm923_vm4 }
 0x21a   : > { %v5033_v35 = vadd.f32 %v5032_v14, %v4998_v44  ;;  %v5567_v2 = vpack.c.bf16 %v6368_v3, %v6366_v24  ;;  %vm885_vm0 = vcmp.ge.s32.totalorder %v8270_v43, 1  ;;  %vm921_vm8 = vcmp.le.s32.totalorder %v8270_v43, 16  ;;  %v6320_v27 = vpop.f32.mrb[16].mxu0 }
 0x21b   : > { %v4923_v32 = vsel %vm8559_vm11, %v6366_v24, 0.0  ;;  %v5562_v22 = vpack.c.bf16 %v6369_v52, %v6367_v17  ;;  %v4922_v60 = vsel %vm8576_vm3, %v6369_v52, 0.0  ;;  %v8601_v33 = vsub.s32 %v8370_v47, %v630_v29  ;;  %v4542_v20 = vpop.f32.mrb[17].mxu0  ;;  %vm8626_vm11 = vmand %vm749_vm15, %vm713_vm13 }
 0x21c   : > { %v5034_v6 = vadd.f32 %v5033_v35, %v4999_v51  ;;  %5625 = vst [vmem:[%s8378_s21 + $0x38] sm:$0xff] %v5567_v2   ;;  %v4957_v9 = vadd.f32 %v4956_v10, %v4922_v60  ;;  %v5000_v21 = vmul.f32 %v4922_v60, %v4922_v60  ;;  %v254_v38 = vadd.s32 264, %v7770_v59  ;;  %v6321_v59 = vpop.f32.mrb[18].mxu0  ;;  %vm8705_vm10 = vmand %vm885_vm0, %vm921_vm8 }
 0x21d   : > { %v4924_v37 = vsel %vm8590_vm14, %v6368_v3, 0.0  ;;  %5624 = vst [vmem:[%s8378_s21 + $0x30] sm:$0xff] %v5562_v22   ;;  %v641_v31 = vmul.u32 18, %v640_v34  ;;  %v619_v12 = vmul.u32 18, %v618_v45  ;;  %v8610_v41 = vadd.s32 1, %v253_v15  ;;  %v4545_v7 = vpop.f32.mrb[19].mxu0 }
 0x21e   : > { %v5001_v47 = vmul.f32 %v4923_v32, %v4923_v32  ;;  %v4958_v29 = vadd.f32 %v4957_v9, %v4923_v32  ;;  %v5035_v40 = vadd.f32 %v5034_v6, %v5000_v21  ;;  %v8614_v24 = vadd.s32 1, %v256_v63 }
 0x21f   : > { %vm719_vm3 = vcmp.ne.s32.totalorder %v8601_v33, 0  ;;  %vm755_vm14 = vcmp.lt.s32.totalorder %v8601_v33, 0  ;;  %v8619_v46 = vsub.s32 %v8409_v25, %v608_v18  ;;  %v673_v15 = vshrl.u32 %v8569_v48, 4 }
 0x220   : > { %v5002_v5 = vmul.f32 %v4924_v37, %v4924_v37  ;;  %v5036_v26 = vadd.f32 %v5035_v40, %v5001_v47  ;;  %v4959_v17 = vadd.f32 %v4958_v29, %v4924_v37  ;;  %v8630_v39 = vadd.s32 1, %v254_v38  ;;  %vm8671_vm15 = vmand %vm755_vm14, %vm719_vm3 }
 0x221   : > { %vm891_vm2 = vcmp.ge.s32.totalorder %v8324_v28, 1  ;;  %vm927_vm6 = vcmp.le.s32.totalorder %v8324_v28, 16  ;;  %v824_v34 = vadd.s32 18, %v8483_v53  ;;  %v822_v50 = vadd.s32 18, %v8526_v11  ;;  %v6112_v36 = vpop.f32.mrb[16].mxu1 }
 0x222   : > { %v827_v48 = vadd.s32 18, %v8601_v33  ;;  %v8646_v44 = vsub.s32 %v8477_v61, %v619_v12  ;;  %v5037_v14 = vadd.f32 %v5036_v26, %v5002_v5  ;;  %v8659_v54 = vsub.s32 %v8434_v62, %v641_v31  ;;  %v6324_v51 = vpop.f32.mrb[20].mxu0  ;;  %v2932_v58 = vpop.f32.mrb[17].mxu1 }
 0x223   : > { %v8662_v3 = vmul.u32.u64.low 3817748708, %v8610_v41  ;;  %v8663_v61 = vmul.u32.u64.high 3817748708, %v8610_v41, %v8662_v3  ;;  %vm928_vm13 = vcmp.le.s32.totalorder %v8394_v57, 16  ;;  %vm717_vm1 = vcmp.ne.s32.totalorder %v8619_v46, 0  ;;  %v6113_v32 = vpop.f32.mrb[18].mxu1 }
 0x224   : > { %vm753_vm5 = vcmp.lt.s32.totalorder %v8619_v46, 0  ;;  %v8678_v62 = vmul.u32.u64.low 3817748708, %v8614_v24  ;;  %v8679_v16 = vmul.u32.u64.high 3817748708, %v8614_v24, %v8678_v62  ;;  %vm926_vm14 = vcmp.le.s32.totalorder %v8399_v42, 16 }
 0x225   : > { %v8695_v52 = vsel %vm8626_vm11, %v8453_v49, %v8418_v13  ;;  %v674_v18 = vmul.u32 18, %v673_v15  ;;  %v8698_v45 = vmul.u32.u64.low 3817748708, %v8630_v39  ;;  %v8699_v10 = vmul.u32.u64.high 3817748708, %v8630_v39, %v8698_v45  ;;  %v4558_v49 = vpop.f32.mrb[21].mxu0  ;;  %vm8731_vm0 = vmand %vm753_vm5, %vm717_vm1 }
 0x226   : > { %v6370_v30 = vadd.f32 %v6320_v27, %v6112_v36  ;;  %v825_v2 = vadd.s32 18, %v8619_v46  ;;  %vm718_vm4 = vcmp.ne.s32.totalorder %v8646_v44, 0  ;;  %vm754_vm11 = vcmp.lt.s32.totalorder %v8646_v44, 0  ;;  %v6325_v9 = vpop.f32.mrb[22].mxu0 }
 0x227   : > { %v6371_v13 = vadd.f32 %v4542_v20, %v2932_v58  ;;  %v8715_v22 = vsel %vm8638_vm12, %v824_v34, %v8483_v53  ;;  %v8720_v43 = vsel %vm8654_vm9, %v822_v50, %v8526_v11  ;;  %v8725_v60 = vsel %vm8671_vm15, %v827_v48, %v8601_v33  ;;  %v2935_v33 = vpop.f32.mrb[19].mxu1  ;;  %v4561_v27 = vpop.f32.mrb[23].mxu0  ;;  %vm8755_vm1 = vmand %vm754_vm11, %vm718_vm4 }
 0x228   : > { %v6372_v53 = vadd.f32 %v6321_v59, %v6113_v32  ;;  %vm9108_vm8 = vcmp.le.s32.totalorder %v8305_v8, 16  ;;  %vm9109_vm12 = vcmp.ge.s32.totalorder %v8305_v8, 1  ;;  %vm720_vm15 = vcmp.ne.s32.totalorder %v8659_v54, 0 }
 0x229   : > { %vm8739_vm9 = vmand %vm9109_vm12, %vm9108_vm8  ;;  %vm756_vm3 = vcmp.lt.s32.totalorder %v8659_v54, 0  ;;  %v826_v21 = vadd.s32 18, %v8646_v44  ;;  %v4925_v38 = vsel %vm8705_vm10, %v6371_v13, 0.0  ;;  %v6373_v37 = vadd.f32 %v4545_v7, %v2935_v33  ;;  %v6116_v34 = vpop.f32.mrb[20].mxu1 }
 0x22a   : > { %v8749_v31 = vadd.s32 18, %v8659_v54  ;;  %v8760_v12 = vsub.s32 %v8535_v56, %v674_v18  ;;  %v4960_v47 = vadd.f32 %v4959_v17, %v4925_v38  ;;  %v5003_v29 = vmul.f32 %v4925_v38, %v4925_v38  ;;  %v6328_v28 = vpop.f32.mrb[24].mxu0  ;;  %v2948_v23 = vpop.f32.mrb[21].mxu1 }
 0x22b   : > { %vm9114_vm5 = vcmp.le.s32.totalorder %v8274_v55, 16  ;;  %vm9115_vm10 = vcmp.ge.s32.totalorder %v8274_v55, 1  ;;  %v5577_v20 = vpack.c.bf16 %v6372_v53, %v6370_v30  ;;  %v8773_v59 = vsel %vm8731_vm0, %v825_v2, %v8619_v46 }
 0x22c   : > { %vm8766_vm8 = vmand %vm9115_vm10, %vm9114_vm5  ;;  %v4927_v56 = vsel %vm8685_vm7, %v6370_v30, 0.0  ;;  %v5572_v15 = vpack.c.bf16 %v6373_v37, %v6371_v13  ;;  %v4926_v5 = vsel %vm8739_vm9, %v6373_v37, 0.0  ;;  %vm893_vm4 = vcmp.ge.s32.totalorder %v8695_v52, 1 }
 0x22d   : > { %vm929_vm11 = vcmp.le.s32.totalorder %v8695_v52, 16  ;;  %v651_v55 = vshrl.u32 %v8663_v61, 4  ;;  %v5038_v26 = vadd.f32 %v5037_v14, %v5003_v29  ;;  %5627 = vst [vmem:[%s8378_s21 + $0x48] sm:$0xff] %v5577_v20   ;;  %v4961_v7 = vadd.f32 %v4960_v47, %v4926_v5  ;;  %vm8797_vm7 = vmand %vm891_vm2, %vm927_vm6 }
 0x22e   : > { %v5004_v17 = vmul.f32 %v4926_v5, %v4926_v5  ;;  %vm931_vm12 = vcmp.le.s32.totalorder %v8431_v0, 16  ;;  %v8788_v46 = vsel %vm8755_vm1, %v826_v21, %v8646_v44  ;;  %v4928_v63 = vsel %vm8766_vm8, %v6372_v53, 0.0  ;;  %5626 = vst [vmem:[%s8378_s21 + $0x40] sm:$0xff] %v5572_v15  }
 0x22f   : > { %vm723_vm1 = vcmp.ne.s32.totalorder %v8760_v12, 0  ;;  %v684_v50 = vshrl.u32 %v8679_v16, 4  ;;  %v662_v48 = vshrl.u32 %v8699_v10, 4  ;;  %v5005_v44 = vmul.f32 %v4927_v56, %v4927_v56  ;;  %v4574_v16 = vpop.f32.mrb[25].mxu0 }
 0x230   : > { %v4962_v14 = vadd.f32 %v4961_v7, %v4927_v56  ;;  %v5039_v19 = vadd.f32 %v5038_v26, %v5004_v17  ;;  %v6374_v3 = vadd.f32 %v6324_v51, %v6116_v34  ;;  %vm9120_vm6 = vcmp.le.s32.totalorder %v8329_v1, 16  ;;  %v6329_v35 = vpop.f32.mrb[26].mxu0 }
 0x231   : > { %vm9121_vm2 = vcmp.ge.s32.totalorder %v8329_v1, 1  ;;  %vm932_vm9 = vcmp.le.s32.totalorder %v8715_v22, 16  ;;  %v6375_v62 = vadd.f32 %v4558_v49, %v2948_v23  ;;  %vm9124_vm5 = vcmp.ge.s32.totalorder %v8394_v57, 1  ;;  %v6117_v1 = vpop.f32.mrb[22].mxu1  ;;  %v4577_v49 = vpop.f32.mrb[27].mxu0 }
 0x232   : > { %vm8810_vm10 = vmand %vm9121_vm2, %vm9120_vm6  ;;  %vm759_vm6 = vcmp.lt.s32.totalorder %v8760_v12, 0  ;;  %v831_v36 = vadd.s32 18, %v8760_v12  ;;  %v652_v18 = vmul.u32 18, %v651_v55  ;;  %v5006_v45 = vmul.f32 %v4928_v63, %v4928_v63  ;;  %v2951_v58 = vpop.f32.mrb[23].mxu1  ;;  %v6332_v7 = vpop.f32.mrb[28].mxu0 }
 0x233   : > { %vm8820_vm0 = vmand %vm9124_vm5, %vm928_vm13  ;;  %v5040_v10 = vadd.f32 %v5039_v19, %v5005_v44  ;;  %v4963_v30 = vadd.f32 %v4962_v14, %v4928_v63  ;;  %v6376_v51 = vadd.f32 %v6325_v9, %v6117_v1  ;;  %vm9127_vm2 = vcmp.ge.s32.totalorder %v8399_v42, 1  ;;  %v4590_v25 = vpop.f32.mrb[29].mxu0 }
 0x234   : > { %vm8830_vm8 = vmand %vm9127_vm2, %vm926_vm14  ;;  %v4929_v2 = vsel %vm8810_vm10, %v6375_v62, 0.0  ;;  %v6377_v13 = vadd.f32 %v4561_v27, %v2951_v58  ;;  %v685_v42 = vmul.u32 18, %v684_v50  ;;  %v663_v6 = vmul.u32 18, %v662_v48  ;;  %v6333_v14 = vpop.f32.mrb[30].mxu0 }
 0x235   : > { %vm8840_vm13 = vmand %vm756_vm3, %vm720_vm15  ;;  %v4964_v53 = vadd.f32 %v4963_v30, %v4929_v2  ;;  %v5007_v9 = vmul.f32 %v4929_v2, %v4929_v2  ;;  %v5041_v11 = vadd.f32 %v5040_v10, %v5006_v45  ;;  %v5587_v33 = vpack.c.bf16 %v6376_v51, %v6374_v3  ;;  %v4593_v61 = vpop.f32.mrb[31].mxu0 }
 0x236   : > { %vm897_vm14 = vcmp.ge.s32.totalorder %v8773_v59, 1  ;;  %vm933_vm5 = vcmp.le.s32.totalorder %v8773_v59, 16  ;;  %vm8850_vm10 = vmand %vm759_vm6, %vm723_vm1  ;;  %v4931_v38 = vsel %vm8797_vm7, %v6374_v3, 0.0  ;;  %v5582_v37 = vpack.c.bf16 %v6377_v13, %v6375_v62 }
 0x237   : > { %v4930_v27 = vsel %vm8830_vm8, %v6377_v13, 0.0  ;;  %v8859_v8 = vsub.s32 %v8610_v41, %v652_v18  ;;  %v5042_v47 = vadd.f32 %v5041_v11, %v5007_v9  ;;  %5629 = vst [vmem:[%s8378_s21 + $0x58] sm:$0xff] %v5587_v33   ;;  %vm899_vm3 = vcmp.ge.s32.totalorder %v8725_v60, 1  ;;  %v6120_v41 = vpop.f32.mrb[24].mxu1 }
 0x238   : > { %v4965_v29 = vadd.f32 %v4964_v53, %v4930_v27  ;;  %v5008_v40 = vmul.f32 %v4930_v27, %v4930_v27  ;;  %vm935_vm15 = vcmp.le.s32.totalorder %v8725_v60, 16  ;;  %v8868_v20 = vsel %vm8840_vm13, %v8749_v31, %v8659_v54  ;;  %5628 = vst [vmem:[%s8378_s21 + $0x50] sm:$0xff] %v5582_v37   ;;  %v2964_v63 = vpop.f32.mrb[25].mxu1 }
 0x239   : > { %v4932_v56 = vsel %vm8820_vm0, %v6376_v51, 0.0  ;;  %vm934_vm1 = vcmp.le.s32.totalorder %v8788_v46, 16  ;;  %v8878_v15 = vsel %vm8850_vm10, %v831_v36, %v8760_v12  ;;  %v8881_v5 = vsub.s32 %v8630_v39, %v663_v6  ;;  %vm8887_vm0 = vmand %vm893_vm4, %vm929_vm11  ;;  %v6121_v34 = vpop.f32.mrb[26].mxu1 }
 0x23a   : > { %v5009_v55 = vmul.f32 %v4931_v38, %v4931_v38  ;;  %v4966_v54 = vadd.f32 %v4965_v29, %v4931_v38  ;;  %v5043_v31 = vadd.f32 %v5042_v47, %v5008_v40  ;;  %v6378_v26 = vadd.f32 %v6328_v28, %v6120_v41  ;;  %v2967_v19 = vpop.f32.mrb[27].mxu1 }
 0x23b   : > { %vm9136_vm8 = vcmp.ge.s32.totalorder %v8431_v0, 1  ;;  %v6379_v12 = vadd.f32 %v4574_v16, %v2964_v63  ;;  %vm721_vm4 = vcmp.ne.s32.totalorder %v8859_v8, 0  ;;  %vm757_vm11 = vcmp.lt.s32.totalorder %v8859_v8, 0  ;;  %v6124_v51 = vpop.f32.mrb[28].mxu1 }
 0x23c   : > { %vm8895_vm6 = vmand %vm9136_vm8, %vm931_vm12  ;;  %v8904_v52 = vsub.s32 %v8614_v24, %v685_v42  ;;  %v5010_v50 = vmul.f32 %v4932_v56, %v4932_v56  ;;  %v5044_v0 = vadd.f32 %v5043_v31, %v5009_v55  ;;  %v4967_v48 = vadd.f32 %v4966_v54, %v4932_v56  ;;  %v6336_v42 = vpop.f32.mrb[32].mxu0  ;;  %v2980_v6 = vpop.f32.mrb[29].mxu1 }
 0x23d   : > { %v6380_v44 = vadd.f32 %v6329_v35, %v6121_v34  ;;  %vm9139_vm12 = vcmp.le.s32.totalorder %v8720_v43, 16  ;;  %vm9140_vm10 = vcmp.ge.s32.totalorder %v8720_v43, 1  ;;  %v4933_v3 = vsel %vm8887_vm0, %v6379_v12, 0.0  ;;  %vm793_vm0 = vmand %vm757_vm11, %vm721_vm4  ;;  %v4606_v11 = vpop.f32.mrb[33].mxu0  ;;  %v6125_v33 = vpop.f32.mrb[30].mxu1 }
 0x23e   : > { %vm966_vm8 = vmand %vm9140_vm10, %vm9139_vm12  ;;  %vm9141_vm2 = vcmp.ge.s32.totalorder %v8715_v22, 1  ;;  %v6381_v28 = vadd.f32 %v4577_v49, %v2967_v19  ;;  %v829_v23 = vadd.s32 18, %v8859_v8  ;;  %vm722_vm7 = vcmp.ne.s32.totalorder %v8881_v5, 0  ;;  %v6337_v47 = vpop.f32.mrb[34].mxu0  ;;  %v2983_v60 = vpop.f32.mrb[31].mxu1 }
 0x23f   : > { %vm8916_vm13 = vmand %vm9141_vm2, %vm932_vm9  ;;  %v4968_v43 = vadd.f32 %v4967_v48, %v4933_v3  ;;  %v5011_v62 = vmul.f32 %v4933_v3, %v4933_v3  ;;  %v5045_v16 = vadd.f32 %v5044_v0, %v5010_v50  ;;  %v5597_v4 = vpack.c.bf16 %v6380_v44, %v6378_v26  ;;  %v4609_v56 = vpop.f32.mrb[35].mxu0 }
 0x240   : > { %v4935_v22 = vsel %vm8895_vm6, %v6378_v26, 0.0  ;;  %v5592_v1 = vpack.c.bf16 %v6381_v28, %v6379_v12  ;;  %v4934_v36 = vsel %vm966_vm8, %v6381_v28, 0.0  ;;  %vm758_vm9 = vcmp.lt.s32.totalorder %v8881_v5, 0  ;;  %vm8938_vm6 = vmand %vm897_vm14, %vm933_vm5 }
 0x241   : > { %v5046_v18 = vadd.f32 %v5045_v16, %v5011_v62  ;;  %5631 = vst [vmem:[%s8378_s21 + $0x68] sm:$0xff] %v5597_v4   ;;  %v4969_v45 = vadd.f32 %v4968_v43, %v4934_v36  ;;  %v5012_v10 = vmul.f32 %v4934_v36, %v4934_v36  ;;  %vm724_vm2 = vcmp.ne.s32.totalorder %v8904_v52, 0  ;;  %vm8949_vm14 = vmand %vm758_vm9, %vm722_vm7  ;;  %v6128_v34 = vpop.f32.mrb[32].mxu1 }
 0x242   : > { %v4936_v30 = vsel %vm8916_vm13, %v6380_v44, 0.0  ;;  %5630 = vst [vmem:[%s8378_s21 + $0x60] sm:$0xff] %v5592_v1   ;;  %v865_v57 = vsel %vm793_vm0, %v829_v23, %v8859_v8  ;;  %vm760_vm4 = vcmp.lt.s32.totalorder %v8904_v52, 0  ;;  %v830_v58 = vadd.s32 18, %v8881_v5  ;;  %vm8957_vm5 = vmand %vm899_vm3, %vm935_vm15  ;;  %v2996_v44 = vpop.f32.mrb[33].mxu1 }
 0x243   : > { %v5013_v2 = vmul.f32 %v4935_v22, %v4935_v22  ;;  %v4970_v13 = vadd.f32 %v4969_v45, %v4935_v22  ;;  %v5047_v49 = vadd.f32 %v5046_v18, %v5012_v10  ;;  %v6382_v32 = vadd.f32 %v6332_v7, %v6124_v51  ;;  %vm796_vm12 = vmand %vm760_vm4, %vm724_vm2  ;;  %v6129_v19 = vpop.f32.mrb[34].mxu1 }
 0x244   : > { %v6383_v9 = vadd.f32 %v4590_v25, %v2980_v6  ;;  %vm903_vm13 = vcmp.ge.s32.totalorder %v8878_v15, 1  ;;  %vm939_vm11 = vcmp.le.s32.totalorder %v8878_v15, 16  ;;  %v832_v21 = vadd.s32 18, %v8904_v52  ;;  %v2999_v23 = vpop.f32.mrb[35].mxu1 }
 0x245   : > { %v5014_v38 = vmul.f32 %v4936_v30, %v4936_v30  ;;  %v5048_v37 = vadd.f32 %v5047_v49, %v5013_v2  ;;  %v4971_v27 = vadd.f32 %v4970_v13, %v4936_v30  ;;  %v6384_v8 = vadd.f32 %v6333_v14, %v6125_v33  ;;  %vm8992_vm4 = vmand %vm903_vm13, %vm939_vm11 }
 0x246   : > { %vm9150_vm3 = vcmp.ge.s32.totalorder %v8788_v46, 1  ;;  %v4937_v29 = vsel %vm8938_vm6, %v6383_v9, 0.0  ;;  %v6385_v40 = vadd.f32 %v4593_v61, %v2983_v60  ;;  %vm901_vm7 = vcmp.ge.s32.totalorder %v865_v57, 1 }
 0x247   : > { %vm970_vm15 = vmand %vm9150_vm3, %vm934_vm1  ;;  %v866_v41 = vsel %vm8949_vm14, %v830_v58, %v8881_v5  ;;  %v4972_v46 = vadd.f32 %v4971_v27, %v4937_v29  ;;  %v5015_v55 = vmul.f32 %v4937_v29, %v4937_v29  ;;  %v5049_v54 = vadd.f32 %v5048_v37, %v5014_v38 }
 0x248   : > { %vm9151_vm1 = vcmp.le.s32.totalorder %v8868_v20, 16  ;;  %vm9152_vm10 = vcmp.ge.s32.totalorder %v8868_v20, 1  ;;  %v5607_v31 = vpack.c.bf16 %v6384_v8, %v6382_v32  ;;  %v4939_v26 = vsel %vm8957_vm5, %v6382_v32, 0.0 }
 0x249   : > { %vm972_vm8 = vmand %vm9152_vm10, %vm9151_vm1  ;;  %v5602_v7 = vpack.c.bf16 %v6385_v40, %v6383_v9  ;;  %v4938_v17 = vsel %vm970_vm15, %v6385_v40, 0.0  ;;  %vm937_vm0 = vcmp.le.s32.totalorder %v865_v57, 16  ;;  %v5050_v63 = vadd.f32 %v5049_v54, %v5015_v55 }
 0x24a   : > { %5633 = vst [vmem:[%s8378_s21 + $0x78] sm:$0xff] %v5607_v31   ;;  %v4973_v39 = vadd.f32 %v4972_v46, %v4938_v17  ;;  %v5016_v5 = vmul.f32 %v4938_v17, %v4938_v17  ;;  %v868_v12 = vsel %vm796_vm12, %v832_v21, %v8904_v52  ;;  %v4940_v25 = vsel %vm972_vm8, %v6384_v8, 0.0  ;;  %vm973_vm6 = vmand %vm901_vm7, %vm937_vm0 }
 0x24b   : > { %5632 = vst [vmem:[%s8378_s21 + $0x70] sm:$0xff] %v5602_v7   ;;  %vm902_vm9 = vcmp.ge.s32.totalorder %v866_v41, 1  ;;  %vm938_vm2 = vcmp.le.s32.totalorder %v866_v41, 16  ;;  %v5017_v20 = vmul.f32 %v4939_v26, %v4939_v26  ;;  %v6386_v48 = vadd.f32 %v6336_v42, %v6128_v34 }
 0x24c   : > { %v4974_v50 = vadd.f32 %v4973_v39, %v4939_v26  ;;  %v5051_v0 = vadd.f32 %v5050_v63, %v5016_v5  ;;  %v6387_v52 = vadd.f32 %v4606_v11, %v2996_v44  ;;  %vm904_vm14 = vcmp.ge.s32.totalorder %v868_v12, 1  ;;  %vm974_vm3 = vmand %vm902_vm9, %vm938_vm2 }
 0x24d   : > { %vm940_vm5 = vcmp.le.s32.totalorder %v868_v12, 16  ;;  %v5018_v3 = vmul.f32 %v4940_v25, %v4940_v25  ;;  %v6388_v61 = vadd.f32 %v6337_v47, %v6129_v19  ;;  %v6389_v15 = vadd.f32 %v4609_v56, %v2999_v23 }
 0x24e   : > { %v5052_v24 = vadd.f32 %v5051_v0, %v5017_v20  ;;  %v4975_v28 = vadd.f32 %v4974_v50, %v4940_v25  ;;  %v4941_v43 = vsel %vm973_vm6, %v6387_v52, 0.0  ;;  %vm976_vm13 = vmand %vm904_vm14, %vm940_vm5  ;;  %v4943_v1 = vsel %vm8992_vm4, %v6386_v48, 0.0 }
 0x24f   : > { %v5019_v16 = vmul.f32 %v4941_v43, %v4941_v43  ;;  %v5617_v22 = vpack.c.bf16 %v6388_v61, %v6386_v48  ;;  %v5612_v36 = vpack.c.bf16 %v6389_v15, %v6387_v52  ;;  %v4942_v18 = vsel %vm974_vm3, %v6389_v15, 0.0 }
 0x250   : > { %v4976_v62 = vadd.f32 %v4975_v28, %v4941_v43  ;;  %v5053_v4 = vadd.f32 %v5052_v24, %v5018_v3  ;;  %v5020_v30 = vmul.f32 %v4942_v18, %v4942_v18  ;;  %v4944_v51 = vsel %vm976_vm13, %v6388_v61, 0.0 }
 0x251   : > { %5635 = vst [vmem:[%s8378_s21 + $0x88] sm:$0xff] %v5617_v22   ;;  %5634 = vst [vmem:[%s8378_s21 + $0x80] sm:$0xff] %v5612_v36   ;;  %v5021_v35 = vmul.f32 %v4943_v1, %v4943_v1  ;;  %v5022_v2 = vmul.f32 %v4944_v51, %v4944_v51 }
 0x252   : > { %v5054_v45 = vadd.f32 %v5053_v4, %v5019_v16  ;;  %v4977_v10 = vadd.f32 %v4976_v62, %v4942_v18 }
 0x254   : > { %v4978_v57 = vadd.f32 %v4977_v10, %v4943_v1  ;;  %v5055_v58 = vadd.f32 %v5054_v45, %v5020_v30 }
 0x256   : > { %v4979_v13 = vadd.f32 %v4978_v57, %v4944_v51  ;;  %v5056_v49 = vadd.f32 %v5055_v58, %v5021_v35 }
 0x258   : > { %v4980_v32 = vrot.slane %v4979_v13, 4  ;;  %v5057_v42 = vadd.f32 %v5056_v49, %v5022_v2 }
 0x25a   : > { %v4981_v6 = vadd.f32 %v4980_v32, %v4979_v13  ;;  %v5058_v59 = vrot.slane %v5057_v42, 4 }
 0x25c   : > { %v4982_v53 = vrot.slane %v4981_v6, 2  ;;  %v5059_v9 = vadd.f32 %v5058_v59, %v5057_v42 }
 0x25e   : > { %v4983_v11 = vadd.f32 %v4982_v53, %v4981_v6  ;;  %v5060_v33 = vrot.slane %v5059_v9, 2 }
 0x260   : > { %v4984_v21 = vrot.slane %v4983_v11, 1  ;;  %v5061_v38 = vadd.f32 %v5060_v33, %v5059_v9 }
 0x262   : > { %v4985_v37 = vadd.f32 %v4984_v21, %v4983_v11  ;;  %v5062_v27 = vrot.slane %v5061_v38, 1 }
 0x264   : > { %v5063_v8 = vadd.f32 %v5062_v27, %v5061_v38  ;;  %5065 = vst [vmem:[%s214_s25] sm:$0xff] %v4985_v37 }
 0x266   : > { %5066 = vst [vmem:[%s218_s28] sm:$0xff] %v5063_v8 }
 0x267 PF: > { %s15_s15 = sadd.s32 1, %s6907_s15  }
 0x268   : > { %p12_p4 = scmp.ge.s32.totalorder %s15_s15, 4  }
 0x26a   :  { %14 = sbr.rel (!%p12_p4) target bundleno = 1 (0x1), region = 90 }

</bundles_post_ra>
